<compile_context>
chip_gen: v6e
topology: v6e:2x2x1
jax: 0.10.0
libtpu: 0.0.40
codegen_flags: <defaults>
</compile_context>

<pallas_src>
import jax
import jax.numpy as jnp
from jax.experimental import pallas as pl
from jax.experimental.pallas import tpu as pltpu

EPS = 1e-5


# ---------------------------------------------------------------------------
# Fused ConvBlock kernel (one image per grid step)
# ---------------------------------------------------------------------------
def _make_convblock_kernel(H, W, cin, p2, p4, has_downsample, compute_dtype):
    HW = H * W

    def conv3x3(pad_scr, c, w_ref):
        """3x3 'same' conv as 9 shifted MXU matmuls with f32 accumulation."""
        acc = None
        for dy in range(3):
            for dx in range(3):
                tap = pad_scr[dy:dy + H, dx:dx + W, :c]      # (H, W, c) f32
                lhs = tap.reshape(HW, c).astype(compute_dtype)
                part = jnp.dot(lhs, w_ref[dy, dx],
                               preferred_element_type=jnp.float32)
                acc = part if acc is None else acc + part
        return acc                                           # (HW, c_out) f32

    def kernel(*refs):
        if has_downsample:
            (x_ref, w1_ref, w2_ref, w3_ref,
             s1_ref, b1_ref, s2_ref, b2_ref, s3_ref, b3_ref,
             wd_ref, sd_ref, bd_ref, out_ref, pad_scr) = refs
        else:
            (x_ref, w1_ref, w2_ref, w3_ref,
             s1_ref, b1_ref, s2_ref, b2_ref, s3_ref, b3_ref,
             out_ref, pad_scr) = refs

        x = x_ref[0].astype(jnp.float32)                     # (HW, cin)

        # Zero the padded scratch.  Each stage only rewrites the interior, so
        # the 1-pixel border stays zero (implements the conv's zero padding).
        pad_scr[...] = jnp.zeros(pad_scr.shape, pad_scr.dtype)

        # ---- stage 1: bn1 -> relu -> conv1 (cin -> p2) ----
        a1 = jnp.maximum(x * s1_ref[...] + b1_ref[...], 0.0)
        pad_scr[1:H + 1, 1:W + 1, :cin] = a1.reshape(H, W, cin)
        o1 = conv3x3(pad_scr, cin, w1_ref)                   # (HW, p2) f32

        # ---- stage 2: bn2 -> relu -> conv2 (p2 -> p4) ----
        a2 = jnp.maximum(o1 * s2_ref[...] + b2_ref[...], 0.0)
        pad_scr[1:H + 1, 1:W + 1, :p2] = a2.reshape(H, W, p2)
        o2 = conv3x3(pad_scr, p2, w2_ref)                    # (HW, p4) f32

        # ---- stage 3: bn3 -> relu -> conv3 (p4 -> p4) ----
        a3 = jnp.maximum(o2 * s3_ref[...] + b3_ref[...], 0.0)
        pad_scr[1:H + 1, 1:W + 1, :p4] = a3.reshape(H, W, p4)
        o3 = conv3x3(pad_scr, p4, w3_ref)                    # (HW, p4) f32

        # ---- residual ----
        if has_downsample:
            rd = jnp.maximum(x * sd_ref[...] + bd_ref[...], 0.0)
            res = jnp.dot(rd.astype(compute_dtype), wd_ref[...],
                          preferred_element_type=jnp.float32)
        else:
            res = x                                          # cin == cout

        # cat([out1, out2, out3], channel) + residual; single lane-dense store.
        y = jnp.concatenate([o1, o2, o3], axis=-1) + res     # (HW, cout) f32
        out_ref[0] = y.astype(out_ref.dtype)

    return kernel


# ---------------------------------------------------------------------------
# Parameter preparation (hoisted out of the per-call path)
# ---------------------------------------------------------------------------
def prepare_params(params, compute_dtype=jnp.bfloat16):
    """Fold BN stats and reorder conv weights once; reuse across forward calls."""
    def fold(g, b, m, v):
        s = g / jnp.sqrt(v + EPS)
        return (s[None, :].astype(jnp.float32),
                (b - m * s)[None, :].astype(jnp.float32))

    def w3x3(w):  # torch OIHW (co, ci, 3, 3) -> (kh, kw, ci, co)
        return jnp.transpose(w, (2, 3, 1, 0)).astype(compute_dtype)

    prep = {"w1": w3x3(params["w1"]),
            "w2": w3x3(params["w2"]),
            "w3": w3x3(params["w3"])}
    prep["s1"], prep["b1"] = fold(params["g1"], params["be1"], params["m1"], params["v1"])
    prep["s2"], prep["b2"] = fold(params["g2"], params["be2"], params["m2"], params["v2"])
    prep["s3"], prep["b3"] = fold(params["g3"], params["be3"], params["m3"], params["v3"])
    if "wd" in params:  # downsample: BN -> ReLU -> 1x1 conv
        cout, cin = params["wd"].shape[:2]
        prep["wd"] = jnp.transpose(params["wd"].reshape(cout, cin),
                                   (1, 0)).astype(compute_dtype)
        prep["sd"], prep["bd"] = fold(params["gd"], params["bed"],
                                      params["md"], params["vd"])
    return prep


# ---------------------------------------------------------------------------
# Forward pass
# ---------------------------------------------------------------------------
def conv_block_forward_nhwc(x_nhwc, prep):
    """x_nhwc: (N, H, W, in_planes).  prep: output of prepare_params()."""
    n, h, w, cin = x_nhwc.shape
    p2 = prep["w1"].shape[-1]
    p4 = prep["w2"].shape[-1]
    cout = p2 + 2 * p4
    has_ds = "wd" in prep
    if not has_ds:
        assert cin == cout, "identity residual requires in_planes == out_planes"
    hw = h * w
    cdt = prep["w1"].dtype
    cmax = max(cin, p2, p4)

    kernel = _make_convblock_kernel(h, w, cin, p2, p4, has_ds, cdt)

    x2d = x_nhwc.reshape(n, hw, cin)

    args = [x2d, prep["w1"], prep["w2"], prep["w3"],
            prep["s1"], prep["b1"], prep["s2"], prep["b2"],
            prep["s3"], prep["b3"]]
    in_specs = [
        pl.BlockSpec((1, hw, cin), lambda i: (i, 0, 0)),
        pl.BlockSpec((3, 3, cin, p2), lambda i: (0, 0, 0, 0)),
        pl.BlockSpec((3, 3, p2, p4), lambda i: (0, 0, 0, 0)),
        pl.BlockSpec((3, 3, p4, p4), lambda i: (0, 0, 0, 0)),
        pl.BlockSpec((1, cin), lambda i: (0, 0)),
        pl.BlockSpec((1, cin), lambda i: (0, 0)),
        pl.BlockSpec((1, p2), lambda i: (0, 0)),
        pl.BlockSpec((1, p2), lambda i: (0, 0)),
        pl.BlockSpec((1, p4), lambda i: (0, 0)),
        pl.BlockSpec((1, p4), lambda i: (0, 0)),
    ]
    if has_ds:
        args += [prep["wd"], prep["sd"], prep["bd"]]
        in_specs += [
            pl.BlockSpec((cin, cout), lambda i: (0, 0)),
            pl.BlockSpec((1, cin), lambda i: (0, 0)),
            pl.BlockSpec((1, cin), lambda i: (0, 0)),
        ]

    out2d = pl.pallas_call(
        kernel,
        out_shape=jax.ShapeDtypeStruct((n, hw, cout), x_nhwc.dtype),
        grid=(n,),
        in_specs=in_specs,
        out_specs=pl.BlockSpec((1, hw, cout), lambda i: (i, 0, 0)),
        scratch_shapes=[pltpu.VMEM((h + 2, w + 2, cmax), jnp.float32)],
        compiler_params=pltpu.CompilerParams(
            dimension_semantics=("parallel",),   # batch across TCs on v7x
            vmem_limit_bytes=64 * 1024 * 1024),  # <= physical on v5e/v6e/v7x
    )(*args)
    return out2d.reshape(n, h, w, cout)


def conv_block_forward(x_nchw, prep):
    """NCHW wrapper matching the PyTorch interface (layout plumbing only)."""
    x_nhwc = jnp.transpose(x_nchw, (0, 2, 3, 1))
    y = conv_block_forward_nhwc(x_nhwc, prep)
    return jnp.transpose(y, (0, 3, 1, 2))


# ---------------------------------------------------------------------------
# Pure-JAX reference (sanity check only)
# ---------------------------------------------------------------------------
def conv_block_reference(x, p):
    dn = ("NCHW", "OIHW", "NCHW")
    hi = jax.lax.Precision.HIGHEST

    def bn(y, g, b, m, v):
        g, b, m, v = (a[None, :, None, None] for a in (g, b, m, v))
        return (y - m) / jnp.sqrt(v + EPS) * g + b

    o1 = jax.lax.conv_general_dilated(
        jax.nn.relu(bn(x, p["g1"], p["be1"], p["m1"], p["v1"])), p["w1"],
        (1, 1), ((1, 1), (1, 1)), dimension_numbers=dn, precision=hi)
    o2 = jax.lax.conv_general_dilated(
        jax.nn.relu(bn(o1, p["g2"], p["be2"], p["m2"], p["v2"])), p["w2"],
        (1, 1), ((1, 1), (1, 1)), dimension_numbers=dn, precision=hi)
    o3 = jax.lax.conv_general_dilated(
        jax.nn.relu(bn(o2, p["g3"], p["be3"], p["m3"], p["v3"])), p["w3"],
        (1, 1), ((1, 1), (1, 1)), dimension_numbers=dn, precision=hi)
    out = jnp.concatenate([o1, o2, o3], axis=1)
    if "wd" in p:
        res = jax.lax.conv_general_dilated(
            jax.nn.relu(bn(x, p["gd"], p["bed"], p["md"], p["vd"])), p["wd"],
            (1, 1), "VALID", dimension_numbers=dn, precision=hi)
    else:
        res = x
    return out + res


# ---------------------------------------------------------------------------
if __name__ == "__main__":
    key = jax.random.PRNGKey(0)

    def nrm(k, shape, scale=0.1):
        return scale * jax.random.normal(k, shape, jnp.float32)

    def make_params(k, in_planes, out_planes):
        p2, p4 = out_planes // 2, out_planes // 4
        ks = jax.random.split(k, 20)
        p = {
            "w1": nrm(ks[0], (p2, in_planes, 3, 3)),
            "w2": nrm(ks[1], (p4, p2, 3, 3)),
            "w3": nrm(ks[2], (p4, p4, 3, 3)),
            "g1": 1.0 + nrm(ks[3], (in_planes,)), "be1": nrm(ks[4], (in_planes,)),
            "m1": nrm(ks[5], (in_planes,)), "v1": 0.5 + jnp.abs(nrm(ks[6], (in_planes,))),
            "g2": 1.0 + nrm(ks[7], (p2,)), "be2": nrm(ks[8], (p2,)),
            "m2": nrm(ks[9], (p2,)), "v2": 0.5 + jnp.abs(nrm(ks[10], (p2,))),
            "g3": 1.0 + nrm(ks[11], (p4,)), "be3": nrm(ks[12], (p4,)),
            "m3": nrm(ks[13], (p4,)), "v3": 0.5 + jnp.abs(nrm(ks[14], (p4,))),
        }
        if in_planes != out_planes:
            p["wd"] = nrm(ks[15], (out_planes, in_planes, 1, 1))
            p["gd"] = 1.0 + nrm(ks[16], (in_planes,))
            p["bed"] = nrm(ks[17], (in_planes,))
            p["md"] = nrm(ks[18], (in_planes,))
            p["vd"] = 0.5 + jnp.abs(nrm(ks[19], (in_planes,)))
        return p

    kx, kpa, kpb = jax.random.split(key, 3)
    N, H, W = 2, 16, 16

    # Case A: in_planes == out_planes (identity residual, no downsample)
    params_a = make_params(kpa, 32, 32)
    x_a = jax.random.normal(kx, (N, 32, H, W), jnp.float32)

    # Case B: in_planes != out_planes (downsample: BN -> ReLU -> 1x1 conv)
    params_b = make_params(kpb, 16, 32)
    x_b = jax.random.normal(jax.random.fold_in(kx, 1), (N, 16, H, W), jnp.float32)

    fwd = jax.jit(conv_block_forward)

    for name, x, params in (("identity", x_a, params_a),
                            ("downsample", x_b, params_b)):
        ref = jax.block_until_ready(conv_block_reference(x, params))

        # f32 compute path: tight check.
        prep32 = prepare_params(params, compute_dtype=jnp.float32)
        out32 = jax.block_until_ready(fwd(x, prep32))
        assert out32.shape == ref.shape
        err32 = float(jnp.max(jnp.abs(out32 - ref)))
        assert err32 < 2e-3, (name, "f32", err32)

        # bf16 matmul path (perf path on v6e/v7x, f32 accumulation): loose check.
        prep16 = prepare_params(params, compute_dtype=jnp.bfloat16)
        out16 = jax.block_until_ready(fwd(x, prep16))
        rel = float(jnp.sqrt(jnp.sum((out16 - ref) ** 2) / jnp.sum(ref ** 2)))
        assert rel < 3e-2, (name, "bf16", rel)

    print("KERNEL_OK")
</pallas_src>

<mosaic_0001>
module attributes {stable_mosaic.version = 11 : i64} {
  func.func @kernel(%arg0: i32, %arg1: memref<1x256x32xf32, #tpu.memory_space<vmem>>, %arg2: memref<3x3x32x16xf32, #tpu.memory_space<vmem>>, %arg3: memref<3x3x16x8xf32, #tpu.memory_space<vmem>>, %arg4: memref<3x3x8x8xf32, #tpu.memory_space<vmem>>, %arg5: memref<1x32xf32, #tpu.memory_space<vmem>>, %arg6: memref<1x32xf32, #tpu.memory_space<vmem>>, %arg7: memref<1x16xf32, #tpu.memory_space<vmem>>, %arg8: memref<1x16xf32, #tpu.memory_space<vmem>>, %arg9: memref<1x8xf32, #tpu.memory_space<vmem>>, %arg10: memref<1x8xf32, #tpu.memory_space<vmem>>, %arg11: memref<1x256x32xf32, #tpu.memory_space<vmem>>, %arg12: memref<18x18x32xf32, #tpu.memory_space<vmem>>) attributes {dimension_semantics = [#tpu.dimension_semantics<parallel>], iteration_bounds = array<i64: 2>, scalar_prefetch = 0 : i64, scratch_operands = 1 : i64, tpu.core_type = #tpu.core_type<tc>, window_params = [{transform_indices = @transform_0, window_bounds = array<i64: 1, 256, 32>}, {pipeline_mode = #tpu.pipeline_mode<synchronous>, transform_indices = @transform_1, window_bounds = array<i64: 3, 3, 32, 16>}, {pipeline_mode = #tpu.pipeline_mode<synchronous>, transform_indices = @transform_2, window_bounds = array<i64: 3, 3, 16, 8>}, {pipeline_mode = #tpu.pipeline_mode<synchronous>, transform_indices = @transform_3, window_bounds = array<i64: 3, 3, 8, 8>}, {pipeline_mode = #tpu.pipeline_mode<synchronous>, transform_indices = @transform_4, window_bounds = array<i64: 1, 32>}, {pipeline_mode = #tpu.pipeline_mode<synchronous>, transform_indices = @transform_5, window_bounds = array<i64: 1, 32>}, {pipeline_mode = #tpu.pipeline_mode<synchronous>, transform_indices = @transform_6, window_bounds = array<i64: 1, 16>}, {pipeline_mode = #tpu.pipeline_mode<synchronous>, transform_indices = @transform_7, window_bounds = array<i64: 1, 16>}, {pipeline_mode = #tpu.pipeline_mode<synchronous>, transform_indices = @transform_8, window_bounds = array<i64: 1, 8>}, {pipeline_mode = #tpu.pipeline_mode<synchronous>, transform_indices = @transform_9, window_bounds = array<i64: 1, 8>}, {transform_indices = @transform_10, window_bounds = array<i64: 1, 256, 32>}]} {
    %c0 = arith.constant 0 : index
    %c0_0 = arith.constant 0 : index
    %c0_1 = arith.constant 0 : index
    %0 = vector.load %arg1[%c0, %c0_0, %c0_1] : memref<1x256x32xf32, #tpu.memory_space<vmem>>, vector<1x256x32xf32>
    %1 = vector.shape_cast %0 : vector<1x256x32xf32> to vector<256x32xf32>
    %cst = arith.constant 0.000000e+00 : f32
    %2 = vector.broadcast %cst : f32 to vector<18x18x32xf32>
    %c0_2 = arith.constant 0 : index
    %c0_3 = arith.constant 0 : index
    %c0_4 = arith.constant 0 : index
    %3 = vector.load %arg12[%c0_2, %c0_3, %c0_4] : memref<18x18x32xf32, #tpu.memory_space<vmem>>, vector<18x18x32xf32>
    tpu.vector_store %arg12[%c0_2, %c0_3, %c0_4], %2 {strides = array<i32>} : memref<18x18x32xf32, #tpu.memory_space<vmem>>, vector<18x18x32xf32>,
    %c0_5 = arith.constant 0 : index
    %c0_6 = arith.constant 0 : index
    %4 = vector.load %arg5[%c0_5, %c0_6] : memref<1x32xf32, #tpu.memory_space<vmem>>, vector<1x32xf32>
    %5 = vector.broadcast %4 : vector<1x32xf32> to vector<256x32xf32>
    %6 = arith.mulf %1, %5 : vector<256x32xf32>
    %c0_7 = arith.constant 0 : index
    %c0_8 = arith.constant 0 : index
    %7 = vector.load %arg6[%c0_7, %c0_8] : memref<1x32xf32, #tpu.memory_space<vmem>>, vector<1x32xf32>
    %8 = vector.broadcast %7 : vector<1x32xf32> to vector<256x32xf32>
    %9 = arith.addf %6, %8 : vector<256x32xf32>
    %cst_9 = arith.constant 0.000000e+00 : f32
    %10 = vector.broadcast %cst_9 : f32 to vector<256x32xf32>
    %11 = arith.maximumf %9, %10 : vector<256x32xf32>
    %12 = vector.shape_cast %11 : vector<256x32xf32> to vector<16x16x32xf32>
    %c1 = arith.constant 1 : index
    %c1_10 = arith.constant 1 : index
    %c0_11 = arith.constant 0 : index
    %13 = vector.load %arg12[%c1, %c1_10, %c0_11] : memref<18x18x32xf32, #tpu.memory_space<vmem>>, vector<16x16x32xf32>
    tpu.vector_store %arg12[%c1, %c1_10, %c0_11], %12 {strides = array<i32>} : memref<18x18x32xf32, #tpu.memory_space<vmem>>, vector<16x16x32xf32>,
    %c0_12 = arith.constant 0 : index
    %c0_13 = arith.constant 0 : index
    %c0_14 = arith.constant 0 : index
    %14 = vector.load %arg12[%c0_12, %c0_13, %c0_14] : memref<18x18x32xf32, #tpu.memory_space<vmem>>, vector<16x16x32xf32>
    %15 = vector.shape_cast %14 : vector<16x16x32xf32> to vector<256x32xf32>
    %c0_15 = arith.constant 0 : index
    %c0_16 = arith.constant 0 : index
    %c0_17 = arith.constant 0 : index
    %c0_18 = arith.constant 0 : index
    %16 = vector.load %arg2[%c0_15, %c0_16, %c0_17, %c0_18] : memref<3x3x32x16xf32, #tpu.memory_space<vmem>>, vector<1x1x32x16xf32>
    %17 = vector.shape_cast %16 : vector<1x1x32x16xf32> to vector<32x16xf32>
    %cst_19 = arith.constant dense<0.000000e+00> : vector<256x16xf32>
    %18 = tpu.matmul %15, %17, %cst_19 {dimension_numbers = #tpu.dot_dimension_numbers<[1], [0], [0], [1], [0, 0, 1, 1], [], []>} : vector<256x32xf32>, vector<32x16xf32>, vector<256x16xf32> -> vector<256x16xf32>
    %c0_20 = arith.constant 0 : index
    %c1_21 = arith.constant 1 : index
    %c0_22 = arith.constant 0 : index
    %19 = vector.load %arg12[%c0_20, %c1_21, %c0_22] : memref<18x18x32xf32, #tpu.memory_space<vmem>>, vector<16x16x32xf32>
    %20 = vector.shape_cast %19 : vector<16x16x32xf32> to vector<256x32xf32>
    %c0_23 = arith.constant 0 : index
    %c1_24 = arith.constant 1 : index
    %c0_25 = arith.constant 0 : index
    %c0_26 = arith.constant 0 : index
    %21 = vector.load %arg2[%c0_23, %c1_24, %c0_25, %c0_26] : memref<3x3x32x16xf32, #tpu.memory_space<vmem>>, vector<1x1x32x16xf32>
    %22 = vector.shape_cast %21 : vector<1x1x32x16xf32> to vector<32x16xf32>
    %cst_27 = arith.constant dense<0.000000e+00> : vector<256x16xf32>
    %23 = tpu.matmul %20, %22, %cst_27 {dimension_numbers = #tpu.dot_dimension_numbers<[1], [0], [0], [1], [0, 0, 1, 1], [], []>} : vector<256x32xf32>, vector<32x16xf32>, vector<256x16xf32> -> vector<256x16xf32>
    %24 = arith.addf %18, %23 : vector<256x16xf32>
    %c0_28 = arith.constant 0 : index
    %c2 = arith.constant 2 : index
    %c0_29 = arith.constant 0 : index
    %25 = vector.load %arg12[%c0_28, %c2, %c0_29] : memref<18x18x32xf32, #tpu.memory_space<vmem>>, vector<16x16x32xf32>
    %26 = vector.shape_cast %25 : vector<16x16x32xf32> to vector<256x32xf32>
    %c0_30 = arith.constant 0 : index
    %c2_31 = arith.constant 2 : index
    %c0_32 = arith.constant 0 : index
    %c0_33 = arith.constant 0 : index
    %27 = vector.load %arg2[%c0_30, %c2_31, %c0_32, %c0_33] : memref<3x3x32x16xf32, #tpu.memory_space<vmem>>, vector<1x1x32x16xf32>
    %28 = vector.shape_cast %27 : vector<1x1x32x16xf32> to vector<32x16xf32>
    %cst_34 = arith.constant dense<0.000000e+00> : vector<256x16xf32>
    %29 = tpu.matmul %26, %28, %cst_34 {dimension_numbers = #tpu.dot_dimension_numbers<[1], [0], [0], [1], [0, 0, 1, 1], [], []>} : vector<256x32xf32>, vector<32x16xf32>, vector<256x16xf32> -> vector<256x16xf32>
    %30 = arith.addf %24, %29 : vector<256x16xf32>
    %c1_35 = arith.constant 1 : index
    %c0_36 = arith.constant 0 : index
    %c0_37 = arith.constant 0 : index
    %31 = vector.load %arg12[%c1_35, %c0_36, %c0_37] : memref<18x18x32xf32, #tpu.memory_space<vmem>>, vector<16x16x32xf32>
    %32 = vector.shape_cast %31 : vector<16x16x32xf32> to vector<256x32xf32>
    %c1_38 = arith.constant 1 : index
    %c0_39 = arith.constant 0 : index
    %c0_40 = arith.constant 0 : index
    %c0_41 = arith.constant 0 : index
    %33 = vector.load %arg2[%c1_38, %c0_39, %c0_40, %c0_41] : memref<3x3x32x16xf32, #tpu.memory_space<vmem>>, vector<1x1x32x16xf32>
    %34 = vector.shape_cast %33 : vector<1x1x32x16xf32> to vector<32x16xf32>
    %cst_42 = arith.constant dense<0.000000e+00> : vector<256x16xf32>
    %35 = tpu.matmul %32, %34, %cst_42 {dimension_numbers = #tpu.dot_dimension_numbers<[1], [0], [0], [1], [0, 0, 1, 1], [], []>} : vector<256x32xf32>, vector<32x16xf32>, vector<256x16xf32> -> vector<256x16xf32>
    %36 = arith.addf %30, %35 : vector<256x16xf32>
    %c1_43 = arith.constant 1 : index
    %c1_44 = arith.constant 1 : index
    %c0_45 = arith.constant 0 : index
    %37 = vector.load %arg12[%c1_43, %c1_44, %c0_45] : memref<18x18x32xf32, #tpu.memory_space<vmem>>, vector<16x16x32xf32>
    %38 = vector.shape_cast %37 : vector<16x16x32xf32> to vector<256x32xf32>
    %c1_46 = arith.constant 1 : index
    %c1_47 = arith.constant 1 : index
    %c0_48 = arith.constant 0 : index
    %c0_49 = arith.constant 0 : index
    %39 = vector.load %arg2[%c1_46, %c1_47, %c0_48, %c0_49] : memref<3x3x32x16xf32, #tpu.memory_space<vmem>>, vector<1x1x32x16xf32>
    %40 = vector.shape_cast %39 : vector<1x1x32x16xf32> to vector<32x16xf32>
    %cst_50 = arith.constant dense<0.000000e+00> : vector<256x16xf32>
    %41 = tpu.matmul %38, %40, %cst_50 {dimension_numbers = #tpu.dot_dimension_numbers<[1], [0], [0], [1], [0, 0, 1, 1], [], []>} : vector<256x32xf32>, vector<32x16xf32>, vector<256x16xf32> -> vector<256x16xf32>
    %42 = arith.addf %36, %41 : vector<256x16xf32>
    %c1_51 = arith.constant 1 : index
    %c2_52 = arith.constant 2 : index
    %c0_53 = arith.constant 0 : index
    %43 = vector.load %arg12[%c1_51, %c2_52, %c0_53] : memref<18x18x32xf32, #tpu.memory_space<vmem>>, vector<16x16x32xf32>
    %44 = vector.shape_cast %43 : vector<16x16x32xf32> to vector<256x32xf32>
    %c1_54 = arith.constant 1 : index
    %c2_55 = arith.constant 2 : index
    %c0_56 = arith.constant 0 : index
    %c0_57 = arith.constant 0 : index
    %45 = vector.load %arg2[%c1_54, %c2_55, %c0_56, %c0_57] : memref<3x3x32x16xf32, #tpu.memory_space<vmem>>, vector<1x1x32x16xf32>
    %46 = vector.shape_cast %45 : vector<1x1x32x16xf32> to vector<32x16xf32>
    %cst_58 = arith.constant dense<0.000000e+00> : vector<256x16xf32>
    %47 = tpu.matmul %44, %46, %cst_58 {dimension_numbers = #tpu.dot_dimension_numbers<[1], [0], [0], [1], [0, 0, 1, 1], [], []>} : vector<256x32xf32>, vector<32x16xf32>, vector<256x16xf32> -> vector<256x16xf32>
    %48 = arith.addf %42, %47 : vector<256x16xf32>
    %c2_59 = arith.constant 2 : index
    %c0_60 = arith.constant 0 : index
    %c0_61 = arith.constant 0 : index
    %49 = vector.load %arg12[%c2_59, %c0_60, %c0_61] : memref<18x18x32xf32, #tpu.memory_space<vmem>>, vector<16x16x32xf32>
    %50 = vector.shape_cast %49 : vector<16x16x32xf32> to vector<256x32xf32>
    %c2_62 = arith.constant 2 : index
    %c0_63 = arith.constant 0 : index
    %c0_64 = arith.constant 0 : index
    %c0_65 = arith.constant 0 : index
    %51 = vector.load %arg2[%c2_62, %c0_63, %c0_64, %c0_65] : memref<3x3x32x16xf32, #tpu.memory_space<vmem>>, vector<1x1x32x16xf32>
    %52 = vector.shape_cast %51 : vector<1x1x32x16xf32> to vector<32x16xf32>
    %cst_66 = arith.constant dense<0.000000e+00> : vector<256x16xf32>
    %53 = tpu.matmul %50, %52, %cst_66 {dimension_numbers = #tpu.dot_dimension_numbers<[1], [0], [0], [1], [0, 0, 1, 1], [], []>} : vector<256x32xf32>, vector<32x16xf32>, vector<256x16xf32> -> vector<256x16xf32>
    %54 = arith.addf %48, %53 : vector<256x16xf32>
    %c2_67 = arith.constant 2 : index
    %c1_68 = arith.constant 1 : index
    %c0_69 = arith.constant 0 : index
    %55 = vector.load %arg12[%c2_67, %c1_68, %c0_69] : memref<18x18x32xf32, #tpu.memory_space<vmem>>, vector<16x16x32xf32>
    %56 = vector.shape_cast %55 : vector<16x16x32xf32> to vector<256x32xf32>
    %c2_70 = arith.constant 2 : index
    %c1_71 = arith.constant 1 : index
    %c0_72 = arith.constant 0 : index
    %c0_73 = arith.constant 0 : index
    %57 = vector.load %arg2[%c2_70, %c1_71, %c0_72, %c0_73] : memref<3x3x32x16xf32, #tpu.memory_space<vmem>>, vector<1x1x32x16xf32>
    %58 = vector.shape_cast %57 : vector<1x1x32x16xf32> to vector<32x16xf32>
    %cst_74 = arith.constant dense<0.000000e+00> : vector<256x16xf32>
    %59 = tpu.matmul %56, %58, %cst_74 {dimension_numbers = #tpu.dot_dimension_numbers<[1], [0], [0], [1], [0, 0, 1, 1], [], []>} : vector<256x32xf32>, vector<32x16xf32>, vector<256x16xf32> -> vector<256x16xf32>
    %60 = arith.addf %54, %59 : vector<256x16xf32>
    %c2_75 = arith.constant 2 : index
    %c2_76 = arith.constant 2 : index
    %c0_77 = arith.constant 0 : index
    %61 = vector.load %arg12[%c2_75, %c2_76, %c0_77] : memref<18x18x32xf32, #tpu.memory_space<vmem>>, vector<16x16x32xf32>
    %62 = vector.shape_cast %61 : vector<16x16x32xf32> to vector<256x32xf32>
    %c2_78 = arith.constant 2 : index
    %c2_79 = arith.constant 2 : index
    %c0_80 = arith.constant 0 : index
    %c0_81 = arith.constant 0 : index
    %63 = vector.load %arg2[%c2_78, %c2_79, %c0_80, %c0_81] : memref<3x3x32x16xf32, #tpu.memory_space<vmem>>, vector<1x1x32x16xf32>
    %64 = vector.shape_cast %63 : vector<1x1x32x16xf32> to vector<32x16xf32>
    %cst_82 = arith.constant dense<0.000000e+00> : vector<256x16xf32>
    %65 = tpu.matmul %62, %64, %cst_82 {dimension_numbers = #tpu.dot_dimension_numbers<[1], [0], [0], [1], [0, 0, 1, 1], [], []>} : vector<256x32xf32>, vector<32x16xf32>, vector<256x16xf32> -> vector<256x16xf32>
    %66 = arith.addf %60, %65 : vector<256x16xf32>
    %c0_83 = arith.constant 0 : index
    %c0_84 = arith.constant 0 : index
    %67 = vector.load %arg7[%c0_83, %c0_84] : memref<1x16xf32, #tpu.memory_space<vmem>>, vector<1x16xf32>
    %68 = vector.broadcast %67 : vector<1x16xf32> to vector<256x16xf32>
    %69 = arith.mulf %66, %68 : vector<256x16xf32>
    %c0_85 = arith.constant 0 : index
    %c0_86 = arith.constant 0 : index
    %70 = vector.load %arg8[%c0_85, %c0_86] : memref<1x16xf32, #tpu.memory_space<vmem>>, vector<1x16xf32>
    %71 = vector.broadcast %70 : vector<1x16xf32> to vector<256x16xf32>
    %72 = arith.addf %69, %71 : vector<256x16xf32>
    %cst_87 = arith.constant 0.000000e+00 : f32
    %73 = vector.broadcast %cst_87 : f32 to vector<256x16xf32>
    %74 = arith.maximumf %72, %73 : vector<256x16xf32>
    %75 = vector.shape_cast %74 : vector<256x16xf32> to vector<16x16x16xf32>
    %c1_88 = arith.constant 1 : index
    %c1_89 = arith.constant 1 : index
    %c0_90 = arith.constant 0 : index
    %76 = vector.load %arg12[%c1_88, %c1_89, %c0_90] : memref<18x18x32xf32, #tpu.memory_space<vmem>>, vector<16x16x16xf32>
    tpu.vector_store %arg12[%c1_88, %c1_89, %c0_90], %75 {strides = array<i32>} : memref<18x18x32xf32, #tpu.memory_space<vmem>>, vector<16x16x16xf32>,
    %c0_91 = arith.constant 0 : index
    %c0_92 = arith.constant 0 : index
    %c0_93 = arith.constant 0 : index
    %77 = vector.load %arg12[%c0_91, %c0_92, %c0_93] : memref<18x18x32xf32, #tpu.memory_space<vmem>>, vector<16x16x16xf32>
    %78 = vector.shape_cast %77 : vector<16x16x16xf32> to vector<256x16xf32>
    %c0_94 = arith.constant 0 : index
    %c0_95 = arith.constant 0 : index
    %c0_96 = arith.constant 0 : index
    %c0_97 = arith.constant 0 : index
    %79 = vector.load %arg3[%c0_94, %c0_95, %c0_96, %c0_97] : memref<3x3x16x8xf32, #tpu.memory_space<vmem>>, vector<1x1x16x8xf32>
    %80 = vector.shape_cast %79 : vector<1x1x16x8xf32> to vector<16x8xf32>
    %cst_98 = arith.constant dense<0.000000e+00> : vector<256x8xf32>
    %81 = tpu.matmul %78, %80, %cst_98 {dimension_numbers = #tpu.dot_dimension_numbers<[1], [0], [0], [1], [0, 0, 1, 1], [], []>} : vector<256x16xf32>, vector<16x8xf32>, vector<256x8xf32> -> vector<256x8xf32>
    %c0_99 = arith.constant 0 : index
    %c1_100 = arith.constant 1 : index
    %c0_101 = arith.constant 0 : index
    %82 = vector.load %arg12[%c0_99, %c1_100, %c0_101] : memref<18x18x32xf32, #tpu.memory_space<vmem>>, vector<16x16x16xf32>
    %83 = vector.shape_cast %82 : vector<16x16x16xf32> to vector<256x16xf32>
    %c0_102 = arith.constant 0 : index
    %c1_103 = arith.constant 1 : index
    %c0_104 = arith.constant 0 : index
    %c0_105 = arith.constant 0 : index
    %84 = vector.load %arg3[%c0_102, %c1_103, %c0_104, %c0_105] : memref<3x3x16x8xf32, #tpu.memory_space<vmem>>, vector<1x1x16x8xf32>
    %85 = vector.shape_cast %84 : vector<1x1x16x8xf32> to vector<16x8xf32>
    %cst_106 = arith.constant dense<0.000000e+00> : vector<256x8xf32>
    %86 = tpu.matmul %83, %85, %cst_106 {dimension_numbers = #tpu.dot_dimension_numbers<[1], [0], [0], [1], [0, 0, 1, 1], [], []>} : vector<256x16xf32>, vector<16x8xf32>, vector<256x8xf32> -> vector<256x8xf32>
    %87 = arith.addf %81, %86 : vector<256x8xf32>
    %c0_107 = arith.constant 0 : index
    %c2_108 = arith.constant 2 : index
    %c0_109 = arith.constant 0 : index
    %88 = vector.load %arg12[%c0_107, %c2_108, %c0_109] : memref<18x18x32xf32, #tpu.memory_space<vmem>>, vector<16x16x16xf32>
    %89 = vector.shape_cast %88 : vector<16x16x16xf32> to vector<256x16xf32>
    %c0_110 = arith.constant 0 : index
    %c2_111 = arith.constant 2 : index
    %c0_112 = arith.constant 0 : index
    %c0_113 = arith.constant 0 : index
    %90 = vector.load %arg3[%c0_110, %c2_111, %c0_112, %c0_113] : memref<3x3x16x8xf32, #tpu.memory_space<vmem>>, vector<1x1x16x8xf32>
    %91 = vector.shape_cast %90 : vector<1x1x16x8xf32> to vector<16x8xf32>
    %cst_114 = arith.constant dense<0.000000e+00> : vector<256x8xf32>
    %92 = tpu.matmul %89, %91, %cst_114 {dimension_numbers = #tpu.dot_dimension_numbers<[1], [0], [0], [1], [0, 0, 1, 1], [], []>} : vector<256x16xf32>, vector<16x8xf32>, vector<256x8xf32> -> vector<256x8xf32>
    %93 = arith.addf %87, %92 : vector<256x8xf32>
    %c1_115 = arith.constant 1 : index
    %c0_116 = arith.constant 0 : index
    %c0_117 = arith.constant 0 : index
    %94 = vector.load %arg12[%c1_115, %c0_116, %c0_117] : memref<18x18x32xf32, #tpu.memory_space<vmem>>, vector<16x16x16xf32>
    %95 = vector.shape_cast %94 : vector<16x16x16xf32> to vector<256x16xf32>
    %c1_118 = arith.constant 1 : index
    %c0_119 = arith.constant 0 : index
    %c0_120 = arith.constant 0 : index
    %c0_121 = arith.constant 0 : index
    %96 = vector.load %arg3[%c1_118, %c0_119, %c0_120, %c0_121] : memref<3x3x16x8xf32, #tpu.memory_space<vmem>>, vector<1x1x16x8xf32>
    %97 = vector.shape_cast %96 : vector<1x1x16x8xf32> to vector<16x8xf32>
    %cst_122 = arith.constant dense<0.000000e+00> : vector<256x8xf32>
    %98 = tpu.matmul %95, %97, %cst_122 {dimension_numbers = #tpu.dot_dimension_numbers<[1], [0], [0], [1], [0, 0, 1, 1], [], []>} : vector<256x16xf32>, vector<16x8xf32>, vector<256x8xf32> -> vector<256x8xf32>
    %99 = arith.addf %93, %98 : vector<256x8xf32>
    %c1_123 = arith.constant 1 : index
    %c1_124 = arith.constant 1 : index
    %c0_125 = arith.constant 0 : index
    %100 = vector.load %arg12[%c1_123, %c1_124, %c0_125] : memref<18x18x32xf32, #tpu.memory_space<vmem>>, vector<16x16x16xf32>
    %101 = vector.shape_cast %100 : vector<16x16x16xf32> to vector<256x16xf32>
    %c1_126 = arith.constant 1 : index
    %c1_127 = arith.constant 1 : index
    %c0_128 = arith.constant 0 : index
    %c0_129 = arith.constant 0 : index
    %102 = vector.load %arg3[%c1_126, %c1_127, %c0_128, %c0_129] : memref<3x3x16x8xf32, #tpu.memory_space<vmem>>, vector<1x1x16x8xf32>
    %103 = vector.shape_cast %102 : vector<1x1x16x8xf32> to vector<16x8xf32>
    %cst_130 = arith.constant dense<0.000000e+00> : vector<256x8xf32>
    %104 = tpu.matmul %101, %103, %cst_130 {dimension_numbers = #tpu.dot_dimension_numbers<[1], [0], [0], [1], [0, 0, 1, 1], [], []>} : vector<256x16xf32>, vector<16x8xf32>, vector<256x8xf32> -> vector<256x8xf32>
    %105 = arith.addf %99, %104 : vector<256x8xf32>
    %c1_131 = arith.constant 1 : index
    %c2_132 = arith.constant 2 : index
    %c0_133 = arith.constant 0 : index
    %106 = vector.load %arg12[%c1_131, %c2_132, %c0_133] : memref<18x18x32xf32, #tpu.memory_space<vmem>>, vector<16x16x16xf32>
    %107 = vector.shape_cast %106 : vector<16x16x16xf32> to vector<256x16xf32>
    %c1_134 = arith.constant 1 : index
    %c2_135 = arith.constant 2 : index
    %c0_136 = arith.constant 0 : index
    %c0_137 = arith.constant 0 : index
    %108 = vector.load %arg3[%c1_134, %c2_135, %c0_136, %c0_137] : memref<3x3x16x8xf32, #tpu.memory_space<vmem>>, vector<1x1x16x8xf32>
    %109 = vector.shape_cast %108 : vector<1x1x16x8xf32> to vector<16x8xf32>
    %cst_138 = arith.constant dense<0.000000e+00> : vector<256x8xf32>
    %110 = tpu.matmul %107, %109, %cst_138 {dimension_numbers = #tpu.dot_dimension_numbers<[1], [0], [0], [1], [0, 0, 1, 1], [], []>} : vector<256x16xf32>, vector<16x8xf32>, vector<256x8xf32> -> vector<256x8xf32>
    %111 = arith.addf %105, %110 : vector<256x8xf32>
    %c2_139 = arith.constant 2 : index
    %c0_140 = arith.constant 0 : index
    %c0_141 = arith.constant 0 : index
    %112 = vector.load %arg12[%c2_139, %c0_140, %c0_141] : memref<18x18x32xf32, #tpu.memory_space<vmem>>, vector<16x16x16xf32>
    %113 = vector.shape_cast %112 : vector<16x16x16xf32> to vector<256x16xf32>
    %c2_142 = arith.constant 2 : index
    %c0_143 = arith.constant 0 : index
    %c0_144 = arith.constant 0 : index
    %c0_145 = arith.constant 0 : index
    %114 = vector.load %arg3[%c2_142, %c0_143, %c0_144, %c0_145] : memref<3x3x16x8xf32, #tpu.memory_space<vmem>>, vector<1x1x16x8xf32>
    %115 = vector.shape_cast %114 : vector<1x1x16x8xf32> to vector<16x8xf32>
    %cst_146 = arith.constant dense<0.000000e+00> : vector<256x8xf32>
    %116 = tpu.matmul %113, %115, %cst_146 {dimension_numbers = #tpu.dot_dimension_numbers<[1], [0], [0], [1], [0, 0, 1, 1], [], []>} : vector<256x16xf32>, vector<16x8xf32>, vector<256x8xf32> -> vector<256x8xf32>
    %117 = arith.addf %111, %116 : vector<256x8xf32>
    %c2_147 = arith.constant 2 : index
    %c1_148 = arith.constant 1 : index
    %c0_149 = arith.constant 0 : index
    %118 = vector.load %arg12[%c2_147, %c1_148, %c0_149] : memref<18x18x32xf32, #tpu.memory_space<vmem>>, vector<16x16x16xf32>
    %119 = vector.shape_cast %118 : vector<16x16x16xf32> to vector<256x16xf32>
    %c2_150 = arith.constant 2 : index
    %c1_151 = arith.constant 1 : index
    %c0_152 = arith.constant 0 : index
    %c0_153 = arith.constant 0 : index
    %120 = vector.load %arg3[%c2_150, %c1_151, %c0_152, %c0_153] : memref<3x3x16x8xf32, #tpu.memory_space<vmem>>, vector<1x1x16x8xf32>
    %121 = vector.shape_cast %120 : vector<1x1x16x8xf32> to vector<16x8xf32>
    %cst_154 = arith.constant dense<0.000000e+00> : vector<256x8xf32>
    %122 = tpu.matmul %119, %121, %cst_154 {dimension_numbers = #tpu.dot_dimension_numbers<[1], [0], [0], [1], [0, 0, 1, 1], [], []>} : vector<256x16xf32>, vector<16x8xf32>, vector<256x8xf32> -> vector<256x8xf32>
    %123 = arith.addf %117, %122 : vector<256x8xf32>
    %c2_155 = arith.constant 2 : index
    %c2_156 = arith.constant 2 : index
    %c0_157 = arith.constant 0 : index
    %124 = vector.load %arg12[%c2_155, %c2_156, %c0_157] : memref<18x18x32xf32, #tpu.memory_space<vmem>>, vector<16x16x16xf32>
    %125 = vector.shape_cast %124 : vector<16x16x16xf32> to vector<256x16xf32>
    %c2_158 = arith.constant 2 : index
    %c2_159 = arith.constant 2 : index
    %c0_160 = arith.constant 0 : index
    %c0_161 = arith.constant 0 : index
    %126 = vector.load %arg3[%c2_158, %c2_159, %c0_160, %c0_161] : memref<3x3x16x8xf32, #tpu.memory_space<vmem>>, vector<1x1x16x8xf32>
    %127 = vector.shape_cast %126 : vector<1x1x16x8xf32> to vector<16x8xf32>
    %cst_162 = arith.constant dense<0.000000e+00> : vector<256x8xf32>
    %128 = tpu.matmul %125, %127, %cst_162 {dimension_numbers = #tpu.dot_dimension_numbers<[1], [0], [0], [1], [0, 0, 1, 1], [], []>} : vector<256x16xf32>, vector<16x8xf32>, vector<256x8xf32> -> vector<256x8xf32>
    %129 = arith.addf %123, %128 : vector<256x8xf32>
    %c0_163 = arith.constant 0 : index
    %c0_164 = arith.constant 0 : index
    %130 = vector.load %arg9[%c0_163, %c0_164] : memref<1x8xf32, #tpu.memory_space<vmem>>, vector<1x8xf32>
    %131 = vector.broadcast %130 : vector<1x8xf32> to vector<256x8xf32>
    %132 = arith.mulf %129, %131 : vector<256x8xf32>
    %c0_165 = arith.constant 0 : index
    %c0_166 = arith.constant 0 : index
    %133 = vector.load %arg10[%c0_165, %c0_166] : memref<1x8xf32, #tpu.memory_space<vmem>>, vector<1x8xf32>
    %134 = vector.broadcast %133 : vector<1x8xf32> to vector<256x8xf32>
    %135 = arith.addf %132, %134 : vector<256x8xf32>
    %cst_167 = arith.constant 0.000000e+00 : f32
    %136 = vector.broadcast %cst_167 : f32 to vector<256x8xf32>
    %137 = arith.maximumf %135, %136 : vector<256x8xf32>
    %138 = vector.shape_cast %137 : vector<256x8xf32> to vector<16x16x8xf32>
    %c1_168 = arith.constant 1 : index
    %c1_169 = arith.constant 1 : index
    %c0_170 = arith.constant 0 : index
    %139 = vector.load %arg12[%c1_168, %c1_169, %c0_170] : memref<18x18x32xf32, #tpu.memory_space<vmem>>, vector<16x16x8xf32>
    tpu.vector_store %arg12[%c1_168, %c1_169, %c0_170], %138 {strides = array<i32>} : memref<18x18x32xf32, #tpu.memory_space<vmem>>, vector<16x16x8xf32>,
    %c0_171 = arith.constant 0 : index
    %c0_172 = arith.constant 0 : index
    %c0_173 = arith.constant 0 : index
    %140 = vector.load %arg12[%c0_171, %c0_172, %c0_173] : memref<18x18x32xf32, #tpu.memory_space<vmem>>, vector<16x16x8xf32>
    %141 = vector.shape_cast %140 : vector<16x16x8xf32> to vector<256x8xf32>
    %c0_174 = arith.constant 0 : index
    %c0_175 = arith.constant 0 : index
    %c0_176 = arith.constant 0 : index
    %c0_177 = arith.constant 0 : index
    %142 = vector.load %arg4[%c0_174, %c0_175, %c0_176, %c0_177] : memref<3x3x8x8xf32, #tpu.memory_space<vmem>>, vector<1x1x8x8xf32>
    %143 = vector.shape_cast %142 : vector<1x1x8x8xf32> to vector<8x8xf32>
    %cst_178 = arith.constant dense<0.000000e+00> : vector<256x8xf32>
    %144 = tpu.matmul %141, %143, %cst_178 {dimension_numbers = #tpu.dot_dimension_numbers<[1], [0], [0], [1], [0, 0, 1, 1], [], []>} : vector<256x8xf32>, vector<8x8xf32>, vector<256x8xf32> -> vector<256x8xf32>
    %c0_179 = arith.constant 0 : index
    %c1_180 = arith.constant 1 : index
    %c0_181 = arith.constant 0 : index
    %145 = vector.load %arg12[%c0_179, %c1_180, %c0_181] : memref<18x18x32xf32, #tpu.memory_space<vmem>>, vector<16x16x8xf32>
    %146 = vector.shape_cast %145 : vector<16x16x8xf32> to vector<256x8xf32>
    %c0_182 = arith.constant 0 : index
    %c1_183 = arith.constant 1 : index
    %c0_184 = arith.constant 0 : index
    %c0_185 = arith.constant 0 : index
    %147 = vector.load %arg4[%c0_182, %c1_183, %c0_184, %c0_185] : memref<3x3x8x8xf32, #tpu.memory_space<vmem>>, vector<1x1x8x8xf32>
    %148 = vector.shape_cast %147 : vector<1x1x8x8xf32> to vector<8x8xf32>
    %cst_186 = arith.constant dense<0.000000e+00> : vector<256x8xf32>
    %149 = tpu.matmul %146, %148, %cst_186 {dimension_numbers = #tpu.dot_dimension_numbers<[1], [0], [0], [1], [0, 0, 1, 1], [], []>} : vector<256x8xf32>, vector<8x8xf32>, vector<256x8xf32> -> vector<256x8xf32>
    %150 = arith.addf %144, %149 : vector<256x8xf32>
    %c0_187 = arith.constant 0 : index
    %c2_188 = arith.constant 2 : index
    %c0_189 = arith.constant 0 : index
    %151 = vector.load %arg12[%c0_187, %c2_188, %c0_189] : memref<18x18x32xf32, #tpu.memory_space<vmem>>, vector<16x16x8xf32>
    %152 = vector.shape_cast %151 : vector<16x16x8xf32> to vector<256x8xf32>
    %c0_190 = arith.constant 0 : index
    %c2_191 = arith.constant 2 : index
    %c0_192 = arith.constant 0 : index
    %c0_193 = arith.constant 0 : index
    %153 = vector.load %arg4[%c0_190, %c2_191, %c0_192, %c0_193] : memref<3x3x8x8xf32, #tpu.memory_space<vmem>>, vector<1x1x8x8xf32>
    %154 = vector.shape_cast %153 : vector<1x1x8x8xf32> to vector<8x8xf32>
    %cst_194 = arith.constant dense<0.000000e+00> : vector<256x8xf32>
    %155 = tpu.matmul %152, %154, %cst_194 {dimension_numbers = #tpu.dot_dimension_numbers<[1], [0], [0], [1], [0, 0, 1, 1], [], []>} : vector<256x8xf32>, vector<8x8xf32>, vector<256x8xf32> -> vector<256x8xf32>
    %156 = arith.addf %150, %155 : vector<256x8xf32>
    %c1_195 = arith.constant 1 : index
    %c0_196 = arith.constant 0 : index
    %c0_197 = arith.constant 0 : index
    %157 = vector.load %arg12[%c1_195, %c0_196, %c0_197] : memref<18x18x32xf32, #tpu.memory_space<vmem>>, vector<16x16x8xf32>
    %158 = vector.shape_cast %157 : vector<16x16x8xf32> to vector<256x8xf32>
    %c1_198 = arith.constant 1 : index
    %c0_199 = arith.constant 0 : index
    %c0_200 = arith.constant 0 : index
    %c0_201 = arith.constant 0 : index
    %159 = vector.load %arg4[%c1_198, %c0_199, %c0_200, %c0_201] : memref<3x3x8x8xf32, #tpu.memory_space<vmem>>, vector<1x1x8x8xf32>
    %160 = vector.shape_cast %159 : vector<1x1x8x8xf32> to vector<8x8xf32>
    %cst_202 = arith.constant dense<0.000000e+00> : vector<256x8xf32>
    %161 = tpu.matmul %158, %160, %cst_202 {dimension_numbers = #tpu.dot_dimension_numbers<[1], [0], [0], [1], [0, 0, 1, 1], [], []>} : vector<256x8xf32>, vector<8x8xf32>, vector<256x8xf32> -> vector<256x8xf32>
    %162 = arith.addf %156, %161 : vector<256x8xf32>
    %c1_203 = arith.constant 1 : index
    %c1_204 = arith.constant 1 : index
    %c0_205 = arith.constant 0 : index
    %163 = vector.load %arg12[%c1_203, %c1_204, %c0_205] : memref<18x18x32xf32, #tpu.memory_space<vmem>>, vector<16x16x8xf32>
    %164 = vector.shape_cast %163 : vector<16x16x8xf32> to vector<256x8xf32>
    %c1_206 = arith.constant 1 : index
    %c1_207 = arith.constant 1 : index
    %c0_208 = arith.constant 0 : index
    %c0_209 = arith.constant 0 : index
    %165 = vector.load %arg4[%c1_206, %c1_207, %c0_208, %c0_209] : memref<3x3x8x8xf32, #tpu.memory_space<vmem>>, vector<1x1x8x8xf32>
    %166 = vector.shape_cast %165 : vector<1x1x8x8xf32> to vector<8x8xf32>
    %cst_210 = arith.constant dense<0.000000e+00> : vector<256x8xf32>
    %167 = tpu.matmul %164, %166, %cst_210 {dimension_numbers = #tpu.dot_dimension_numbers<[1], [0], [0], [1], [0, 0, 1, 1], [], []>} : vector<256x8xf32>, vector<8x8xf32>, vector<256x8xf32> -> vector<256x8xf32>
    %168 = arith.addf %162, %167 : vector<256x8xf32>
    %c1_211 = arith.constant 1 : index
    %c2_212 = arith.constant 2 : index
    %c0_213 = arith.constant 0 : index
    %169 = vector.load %arg12[%c1_211, %c2_212, %c0_213] : memref<18x18x32xf32, #tpu.memory_space<vmem>>, vector<16x16x8xf32>
    %170 = vector.shape_cast %169 : vector<16x16x8xf32> to vector<256x8xf32>
    %c1_214 = arith.constant 1 : index
    %c2_215 = arith.constant 2 : index
    %c0_216 = arith.constant 0 : index
    %c0_217 = arith.constant 0 : index
    %171 = vector.load %arg4[%c1_214, %c2_215, %c0_216, %c0_217] : memref<3x3x8x8xf32, #tpu.memory_space<vmem>>, vector<1x1x8x8xf32>
    %172 = vector.shape_cast %171 : vector<1x1x8x8xf32> to vector<8x8xf32>
    %cst_218 = arith.constant dense<0.000000e+00> : vector<256x8xf32>
    %173 = tpu.matmul %170, %172, %cst_218 {dimension_numbers = #tpu.dot_dimension_numbers<[1], [0], [0], [1], [0, 0, 1, 1], [], []>} : vector<256x8xf32>, vector<8x8xf32>, vector<256x8xf32> -> vector<256x8xf32>
    %174 = arith.addf %168, %173 : vector<256x8xf32>
    %c2_219 = arith.constant 2 : index
    %c0_220 = arith.constant 0 : index
    %c0_221 = arith.constant 0 : index
    %175 = vector.load %arg12[%c2_219, %c0_220, %c0_221] : memref<18x18x32xf32, #tpu.memory_space<vmem>>, vector<16x16x8xf32>
    %176 = vector.shape_cast %175 : vector<16x16x8xf32> to vector<256x8xf32>
    %c2_222 = arith.constant 2 : index
    %c0_223 = arith.constant 0 : index
    %c0_224 = arith.constant 0 : index
    %c0_225 = arith.constant 0 : index
    %177 = vector.load %arg4[%c2_222, %c0_223, %c0_224, %c0_225] : memref<3x3x8x8xf32, #tpu.memory_space<vmem>>, vector<1x1x8x8xf32>
    %178 = vector.shape_cast %177 : vector<1x1x8x8xf32> to vector<8x8xf32>
    %cst_226 = arith.constant dense<0.000000e+00> : vector<256x8xf32>
    %179 = tpu.matmul %176, %178, %cst_226 {dimension_numbers = #tpu.dot_dimension_numbers<[1], [0], [0], [1], [0, 0, 1, 1], [], []>} : vector<256x8xf32>, vector<8x8xf32>, vector<256x8xf32> -> vector<256x8xf32>
    %180 = arith.addf %174, %179 : vector<256x8xf32>
    %c2_227 = arith.constant 2 : index
    %c1_228 = arith.constant 1 : index
    %c0_229 = arith.constant 0 : index
    %181 = vector.load %arg12[%c2_227, %c1_228, %c0_229] : memref<18x18x32xf32, #tpu.memory_space<vmem>>, vector<16x16x8xf32>
    %182 = vector.shape_cast %181 : vector<16x16x8xf32> to vector<256x8xf32>
    %c2_230 = arith.constant 2 : index
    %c1_231 = arith.constant 1 : index
    %c0_232 = arith.constant 0 : index
    %c0_233 = arith.constant 0 : index
    %183 = vector.load %arg4[%c2_230, %c1_231, %c0_232, %c0_233] : memref<3x3x8x8xf32, #tpu.memory_space<vmem>>, vector<1x1x8x8xf32>
    %184 = vector.shape_cast %183 : vector<1x1x8x8xf32> to vector<8x8xf32>
    %cst_234 = arith.constant dense<0.000000e+00> : vector<256x8xf32>
    %185 = tpu.matmul %182, %184, %cst_234 {dimension_numbers = #tpu.dot_dimension_numbers<[1], [0], [0], [1], [0, 0, 1, 1], [], []>} : vector<256x8xf32>, vector<8x8xf32>, vector<256x8xf32> -> vector<256x8xf32>
    %186 = arith.addf %180, %185 : vector<256x8xf32>
    %c2_235 = arith.constant 2 : index
    %c2_236 = arith.constant 2 : index
    %c0_237 = arith.constant 0 : index
    %187 = vector.load %arg12[%c2_235, %c2_236, %c0_237] : memref<18x18x32xf32, #tpu.memory_space<vmem>>, vector<16x16x8xf32>
    %188 = vector.shape_cast %187 : vector<16x16x8xf32> to vector<256x8xf32>
    %c2_238 = arith.constant 2 : index
    %c2_239 = arith.constant 2 : index
    %c0_240 = arith.constant 0 : index
    %c0_241 = arith.constant 0 : index
    %189 = vector.load %arg4[%c2_238, %c2_239, %c0_240, %c0_241] : memref<3x3x8x8xf32, #tpu.memory_space<vmem>>, vector<1x1x8x8xf32>
    %190 = vector.shape_cast %189 : vector<1x1x8x8xf32> to vector<8x8xf32>
    %cst_242 = arith.constant dense<0.000000e+00> : vector<256x8xf32>
    %191 = tpu.matmul %188, %190, %cst_242 {dimension_numbers = #tpu.dot_dimension_numbers<[1], [0], [0], [1], [0, 0, 1, 1], [], []>} : vector<256x8xf32>, vector<8x8xf32>, vector<256x8xf32> -> vector<256x8xf32>
    %192 = arith.addf %186, %191 : vector<256x8xf32>
    %193 = tpu.concatenate %66, %129, %192 in 1 : vector<256x16xf32>, vector<256x8xf32>, vector<256x8xf32> -> vector<256x32xf32>
    %194 = arith.addf %193, %1 : vector<256x32xf32>
    %c0_243 = arith.constant 0 : index
    %c0_244 = arith.constant 0 : index
    %c0_245 = arith.constant 0 : index
    %195 = vector.load %arg11[%c0_243, %c0_244, %c0_245] : memref<1x256x32xf32, #tpu.memory_space<vmem>>, vector<1x256x32xf32>
    %196 = vector.shape_cast %195 : vector<1x256x32xf32> to vector<256x32xf32>
    %197 = vector.shape_cast %194 : vector<256x32xf32> to vector<1x256x32xf32>
    tpu.vector_store %arg11[%c0_243, %c0_244, %c0_245], %197 {strides = array<i32>} : memref<1x256x32xf32, #tpu.memory_space<vmem>>, vector<1x256x32xf32>,
    return
  }
  func.func @transform_0(%arg0: i32) -> (i32, i32, i32) {
    %c0_i32 = arith.constant 0 : i32
    %c0_i32_0 = arith.constant 0 : i32
    %c0_i32_1 = arith.constant 0 : i32
    return %arg0, %c0_i32, %c0_i32_0 : i32, i32, i32
  }
  func.func @transform_1(%arg0: i32) -> (i32, i32, i32, i32) {
    %c0_i32 = arith.constant 0 : i32
    %c0_i32_0 = arith.constant 0 : i32
    %c0_i32_1 = arith.constant 0 : i32
    %c0_i32_2 = arith.constant 0 : i32
    %c0_i32_3 = arith.constant 0 : i32
    return %c0_i32, %c0_i32_0, %c0_i32_1, %c0_i32_2 : i32, i32, i32, i32
  }
  func.func @transform_2(%arg0: i32) -> (i32, i32, i32, i32) {
    %c0_i32 = arith.constant 0 : i32
    %c0_i32_0 = arith.constant 0 : i32
    %c0_i32_1 = arith.constant 0 : i32
    %c0_i32_2 = arith.constant 0 : i32
    %c0_i32_3 = arith.constant 0 : i32
    return %c0_i32, %c0_i32_0, %c0_i32_1, %c0_i32_2 : i32, i32, i32, i32
  }
  func.func @transform_3(%arg0: i32) -> (i32, i32, i32, i32) {
    %c0_i32 = arith.constant 0 : i32
    %c0_i32_0 = arith.constant 0 : i32
    %c0_i32_1 = arith.constant 0 : i32
    %c0_i32_2 = arith.constant 0 : i32
    %c0_i32_3 = arith.constant 0 : i32
    return %c0_i32, %c0_i32_0, %c0_i32_1, %c0_i32_2 : i32, i32, i32, i32
  }
  func.func @transform_4(%arg0: i32) -> (i32, i32) {
    %c0_i32 = arith.constant 0 : i32
    %c0_i32_0 = arith.constant 0 : i32
    %c0_i32_1 = arith.constant 0 : i32
    return %c0_i32, %c0_i32_0 : i32, i32
  }
  func.func @transform_5(%arg0: i32) -> (i32, i32) {
    %c0_i32 = arith.constant 0 : i32
    %c0_i32_0 = arith.constant 0 : i32
    %c0_i32_1 = arith.constant 0 : i32
    return %c0_i32, %c0_i32_0 : i32, i32
  }
  func.func @transform_6(%arg0: i32) -> (i32, i32) {
    %c0_i32 = arith.constant 0 : i32
    %c0_i32_0 = arith.constant 0 : i32
    %c0_i32_1 = arith.constant 0 : i32
    return %c0_i32, %c0_i32_0 : i32, i32
  }
  func.func @transform_7(%arg0: i32) -> (i32, i32) {
    %c0_i32 = arith.constant 0 : i32
    %c0_i32_0 = arith.constant 0 : i32
    %c0_i32_1 = arith.constant 0 : i32
    return %c0_i32, %c0_i32_0 : i32, i32
  }
  func.func @transform_8(%arg0: i32) -> (i32, i32) {
    %c0_i32 = arith.constant 0 : i32
    %c0_i32_0 = arith.constant 0 : i32
    %c0_i32_1 = arith.constant 0 : i32
    return %c0_i32, %c0_i32_0 : i32, i32
  }
  func.func @transform_9(%arg0: i32) -> (i32, i32) {
    %c0_i32 = arith.constant 0 : i32
    %c0_i32_0 = arith.constant 0 : i32
    %c0_i32_1 = arith.constant 0 : i32
    return %c0_i32, %c0_i32_0 : i32, i32
  }
  func.func @transform_10(%arg0: i32) -> (i32, i32, i32) {
    %c0_i32 = arith.constant 0 : i32
    %c0_i32_0 = arith.constant 0 : i32
    %c0_i32_1 = arith.constant 0 : i32
    return %arg0, %c0_i32, %c0_i32_0 : i32, i32, i32
  }
}

</mosaic_0001>

<bundles_post_ra>
// kernel: conv_block_forward.1
= control target key start
LH: loop header
LB: loop body
LE: loop exit
PB: predicated region body
PF: predicated region fallthrough
CT: control target
= control target key end

     0   :  { %15 = vsyncpa [#allocation4], 0  ;;  %s20297_s0 = inlined_call_operand.vmem [shape: f32[2,256,32], index: 0, kind: input, shape index: {}]   ;;  %s20298_s1 = inlined_call_operand.vmem [shape: f32[3,3,32,16], index: 1, kind: input, shape index: {}]   ;;  %s20299_s2 = inlined_call_operand.vmem [shape: f32[3,3,16,8], index: 2, kind: input, shape index: {}]   ;;  %s20300_s3 = inlined_call_operand.hbm [shape: f32[3,3,8,8], index: 3, kind: input, shape index: {}]   ;;  %s20301_s4 = inlined_call_operand.vmem [shape: f32[1,32], index: 4, kind: input, shape index: {}]   ;;  %s20302_s5 = inlined_call_operand.vmem [shape: f32[1,32], index: 5, kind: input, shape index: {}]   ;;  %s20303_s6 = inlined_call_operand.vmem [shape: f32[1,16], index: 6, kind: input, shape index: {}]   ;;  %s20304_s7 = inlined_call_operand.vmem [shape: f32[1,16], index: 7, kind: input, shape index: {}]   ;;  %s20305_s8 = inlined_call_operand.vmem [shape: f32[1,8], index: 8, kind: input, shape index: {}]   ;;  %s20306_s9 = inlined_call_operand.vmem [shape: f32[1,8], index: 9, kind: input, shape index: {}]   ;;  %s20307_s10 = inlined_call_operand.hbm [shape: f32[2,256,32], index: 10, kind: output, shape index: {}]  }
   0x1   :  { %16 = vsyncpa [#allocation5], 0 }
   0x2   :  { %18 = vsyncpa [#allocation5 + $0x1], 0  ;;  %s15192_s13 = smov 0   ;;  %s15194_s14 = smov 0  }
   0x3   :  { %s15196_s15 = smov 0   ;;  %s15198_s16 = smov 0  }
   0x4 LB: > { %s15213_s17 = sadd.s32 4294967295, %s15126_s16   ;;  %s11654_s18 = sadd.s32 4294967294, %s15126_s16   ;;  %s15126_s16 = sphi %s15198_s16, %s21064_s16   ;;  %s15122_s15 = sphi %s15196_s15, %s21063_s15   ;;  %s15118_s14 = sphi %s15194_s14, %s21062_s14   ;;  %s15114_s13 = sphi %s15192_s13, %s21061_s13  }
   0x5   : > { %s15217_s19 = sadd.s32 1, %s15126_s16   ;;  %s246_s20 = sadd.s32 1, %s15122_s15 }
   0x6   : > { %s243_s21 = ssub.s32 %s15126_s16, %s15217_s19  ;;  %p256_p0 = scmp.ne.s32.totalorder %s15122_s15, %s15118_s14 }
   0x7   : > { %p244_p1 = scmp.eq.s32.totalorder %s243_s21, 0  ;;  %p257_p2 = scmp.eq.s32.totalorder %s15213_s17, 1 }
   0x8   : > { %p262_p3 = scmp.ne.s32.totalorder %s15118_s14, %s15114_s13  ;;  %p263_p4 = scmp.eq.s32.totalorder %s11654_s18, 1 }
   0x9   : > { %s15228_s22 = scalar_select %p244_p1, %s15122_s15, %s246_s20  }
   0xa   : > { %p15230_p5 = por %p257_p2, %p256_p0  ;;  %p15234_p6 = por %p263_p4, %p262_p3 }
   0xb   : > { %p11655_p7 = scmp.ge.s32.totalorder %s15126_s16, 1  ;;  %p270_p8 = scmp.lt.s32.totalorder %s15126_s16, 3 }
   0xc   : > { %s20412_s24 = scalar_select %p15234_p6, 1, 0 }
   0xd   : > { %p14959_p9 = scmp.eq.s32.totalorder %s15213_s17, 0  ;;  %p15241_p10 = pnand %p11655_p7, %p270_p8 }
   0xe   : > { %s15128_s26 = smov [#allocation3]  }
   0xf   : > { %s288_s27 = sshll.u32 %s15128_s26, 4  ;;  %p14951_p11 = pneg %p15241_p10  ;;  %s289_s27 = int_to_ptr.vmem [resolvable:$true] %s288_s27 }
  0x10   : > { %s15047_s28 = scalar_lea.vmem %s289_s27, 1152  ;;  %p15055_p3 = scmp.lt.s32.totalorder %s289_s27, %s289_s27 }
  0x11   : > { %p14952_p12 = pnand %p14959_p9, %p14951_p11  ;;  %p15048_p0 = scmp.ne.s32.totalorder %s289_s27, %s15047_s28 }
  0x12   : > { %p15056_p4 = scmp.lt.s32.totalorder %s15047_s28, %s15047_s28 }
  0x13   : > { %p15038_p13 = pneg %p14952_p12 }
  0x14   : > { %p15057_p6 = por %p15056_p4, %p15055_p3 }
  0x15   : > { %p15050_p1 = pnand %p15048_p0, %p15038_p13 }
  0x17   : > { %p15051_p2 = pneg %p15050_p1 }
  0x19   : > { %p15058_p7 = pnand %p15057_p6, %p15051_p2 }
  0x1b   : > { %15061 = shalt.err (!%p15058_p7)
}
  0x1c   : > { %s15129_s29 = smov 128   ;;  %s15130_s30 = smov 8  }
  0x1d   : > { %14954 = dma.hbm_to_vmem [thread:$0]  (!%p14952_p12), %s20300_s3, 1152, %s289_s27, [#allocation4], %s15129_s29, %s15129_s29, %s15130_s30  }
  0x1e   : > { %330 = sbr.rel (%p15241_p10) target bundleno = 1624 (0x658), region = 60 }
  0x23   : > { %15105 = dma.done.wait (%p14959_p9), [#allocation4], 1152  }
  0x24   : > { %15107 = vsyncadd (%p14959_p9), [#allocation4], 4294966144  ;;  %vm405_vm0 = vcmask 261120   ;;  %p368_p8 = scmp.lt.s32.totalorder %s15213_s17, 1  ;;  %vm408_vm1 = vcmask 254976   ;;  %v15131_v0 = vmov 0.0  }
  0x25   : > { %406 = vst.msk [vmem:[#allocation2] sm:$0xff] %vm405_vm0, %v15131_v0  ;;  %407 = vst.msk [vmem:[#allocation2 + $0x8] sm:$0xff] %vm405_vm0, %v15131_v0  ;;  %v11668_v1 = vld [vmem:[%s20298_s1 + $0x38] sm:$0xff]  ;;  %v11667_v2 = vld [vmem:[%s20298_s1 + $0x30] sm:$0xff]  ;;  %vm4160_vm2 = vcmask 130048   ;;  %vm7730_vm3 = vcmask 64512  }
  0x26   : > { %410 = vst.msk [vmem:[#allocation2 + $0x18] sm:$0xff] %vm405_vm0, %v15131_v0  ;;  %411 = vst.msk [vmem:[#allocation2 + $0x20] sm:$0xff] %vm405_vm0, %v15131_v0  ;;  %s369_s18 = scalar_select %p368_p8, %s15213_s17, 1  ;;  %14937 = vmatprep.subr.mxu1 %v11668_v1  ;;  %13515 = vmatprep.subr.mxu0 %v11668_v1  ;;  %v11666_v4 = vld [vmem:[%s20298_s1 + $0x28] sm:$0xff]  ;;  %v15334_v5 = vld [vmem:[%s20301_s4] ss:$0 sm:$0xff] }
  0x27   : > { %413 = vst.msk [vmem:[#allocation2 + $0x30] sm:$0xff] %vm405_vm0, %v15131_v0  ;;  %414 = vst.msk [vmem:[#allocation2 + $0x38] sm:$0xff] %vm405_vm0, %v15131_v0  ;;  %14941 = vmatpush3.msra.mxu1 %v11668_v1  ;;  %13516 = vmatpush3.msra.mxu0 %v11668_v1  ;;  %v15339_v6 = vld [vmem:[%s20302_s5] ss:$0 sm:$0xff]  ;;  %v15359_v21 = vld [vmem:[%s20298_s1 + $0x18] sm:$0xff]  ;;  %s15132_s29 = smov 16  }
  0x28   : > { %416 = vst.msk [vmem:[#allocation2 + $0x48] sm:$0xff] %vm405_vm0, %v15131_v0  ;;  %417 = vst.msk [vmem:[#allocation2 + $0x50] sm:$0xff] %vm405_vm0, %v15131_v0  ;;  %s12586_s20 = sshll.u32 %s369_s18, 8  ;;  %14938 = vmatprep.subr.mxu1 %v11667_v2  ;;  %13517 = vmatprep.subr.mxu0 %v11667_v2  ;;  %v11665_v7 = vld [vmem:[%s20298_s1 + $0x20] sm:$0xff]  ;;  %v11736_v28 = vld [vmem:[%s20298_s1 + $0x58] sm:$0xff]  ;;  %s15133_s30 = smov 24  }
  0x29   : > { %419 = vst.msk [vmem:[#allocation2 + $0x60] sm:$0xff] %vm405_vm0, %v15131_v0  ;;  %420 = vst.msk [vmem:[#allocation2 + $0x68] sm:$0xff] %vm405_vm0, %v15131_v0  ;;  %s15319_s26 = scalar_lea.vmem %s20297_s0, %s12586_s20  ;;  %14942 = vmatpush3.msra.mxu1 %v11667_v2  ;;  %13518 = vmatpush3.msra.mxu0 %v11667_v2  ;;  %v11735_v43 = vld [vmem:[%s20298_s1 + $0x50] sm:$0xff]  ;;  %v11734_v56 = vld [vmem:[%s20298_s1 + $0x48] sm:$0xff]  ;;  %s365_s11 = sand.u32 1, %s15118_s14   ;;  %vm11469_vm4 = vcmask 195584  }
  0x2a   : > { %422 = vst.msk [vmem:[#allocation2 + $0x78] sm:$0xff] %vm405_vm0, %v15131_v0  ;;  %423 = vst.msk [vmem:[#allocation2 + $0x80] sm:$0xff] %vm405_vm0, %v15131_v0  ;;  %v387_v3 = vld [vmem:[%s15319_s26 + $0x70] sm:$0xff]  ;;  %v388_v9 = vld [vmem:[%s15319_s26 + $0x78] sm:$0xff]  ;;  %14939 = vmatprep.subr.mxu1 %v11666_v4  ;;  %13519 = vmatprep.subr.mxu0 %v11666_v4  ;;  %s11660_s12 = sshll.u32 %s365_s11, 8  ;;  %s12587_s20 = sshll.u32 %s15213_s17, 12 }
  0x2b   : > { %425 = vst.msk [vmem:[#allocation2 + $0x90] sm:$0xff] %vm405_vm0, %v15131_v0  ;;  %426 = vst.msk [vmem:[#allocation2 + $0x98] sm:$0xff] %vm405_vm0, %v15131_v0  ;;  %v482_v8 = vmul.f32 %v15334_v5, %v387_v3  ;;  %v483_v10 = vmul.f32 %v15334_v5, %v388_v9  ;;  %v373_v11 = vld [vmem:[%s15319_s26] sm:$0xff]  ;;  %v374_v13 = vld [vmem:[%s15319_s26 + $0x8] sm:$0xff]  ;;  %14943 = vmatpush3.msra.mxu1 %v11666_v4  ;;  %13520 = vmatpush3.msra.mxu0 %v11666_v4  ;;  %s20032_s18 = scalar_lea.vmem [#allocation6], %s11660_s12  ;;  %s20246_s28 = scalar_lea.hbm %s20307_s10, %s12587_s20 }
  0x2c   : > { %428 = vst.msk [vmem:[#allocation2 + $0xa8] sm:$0xff] %vm405_vm0, %v15131_v0  ;;  %429 = vst.msk [vmem:[#allocation2 + $0xb0] sm:$0xff] %vm405_vm0, %v15131_v0  ;;  %v389_v12 = vld [vmem:[%s15319_s26 + $0x80] sm:$0xff]  ;;  %v468_v15 = vmul.f32 %v15334_v5, %v373_v11  ;;  %v390_v17 = vld [vmem:[%s15319_s26 + $0x88] sm:$0xff]  ;;  %v469_v23 = vmul.f32 %v15334_v5, %v374_v13  ;;  %14940 = vmatprep.subr.mxu1 %v11665_v7  ;;  %13521 = vmatprep.subr.mxu0 %v11665_v7  ;;  %s11580_s21 = sshll.u32 %s20032_s18, 4  ;;  %s20257_s17 = scalar_lea.sflag [#allocation5], %s365_s11  ;;  %s20248_s21 = int_to_ptr.vmem [resolvable:$true] %s11580_s21 }
  0x2d   : > { %431 = vst.msk [vmem:[#allocation2 + $0xc0] sm:$0xff] %vm405_vm0, %v15131_v0  ;;  %432 = vst.msk [vmem:[#allocation2 + $0xc8] sm:$0xff] %vm405_vm0, %v15131_v0  ;;  %v521_v14 = vadd.f32 %v15339_v6, %v482_v8  ;;  %v484_v16 = vmul.f32 %v15334_v5, %v389_v12  ;;  %v375_v18 = vld [vmem:[%s15319_s26 + $0x10] sm:$0xff]  ;;  %v640_v20 = vld [vmem:[#allocation2 + $0x1] sm:$0xff]  ;;  %v522_v22 = vadd.f32 %v15339_v6, %v483_v10  ;;  %14944 = vmatpush3.msra.mxu1 %v11665_v7 }
  0x2e   : > { %434 = vst.msk [vmem:[#allocation2 + $0xd8] sm:$0xff] %vm405_vm0, %v15131_v0  ;;  %435 = vst.msk [vmem:[#allocation2 + $0xe0] sm:$0xff] %vm405_vm0, %v15131_v0  ;;  %v391_v19 = vld [vmem:[%s15319_s26 + $0x90] sm:$0xff]  ;;  %v485_v24 = vmul.f32 %v15334_v5, %v390_v17  ;;  %v376_v25 = vld [vmem:[%s15319_s26 + $0x18] sm:$0xff]  ;;  %v507_v29 = vadd.f32 %v15339_v6, %v468_v15  ;;  %v470_v31 = vmul.f32 %v15334_v5, %v375_v18  ;;  %13522 = vmatpush3.msra.mxu0 %v11665_v7 }
  0x2f   : > { %437 = vst.msk [vmem:[#allocation2 + $0xf0] sm:$0xff] %vm405_vm0, %v15131_v0  ;;  %438 = vst.msk [vmem:[#allocation2 + $0xf8] sm:$0xff] %vm405_vm0, %v15131_v0  ;;  %v553_v26 = vmax.f32 %v521_v14, 0.0  ;;  %v523_v30 = vadd.f32 %v15339_v6, %v484_v16  ;;  %v392_v32 = vld [vmem:[%s15319_s26 + $0x98] sm:$0xff]  ;;  %v554_v33 = vmax.f32 %v522_v22, 0.0  ;;  %v508_v34 = vadd.f32 %v15339_v6, %v469_v23  ;;  %v377_v37 = vld [vmem:[%s15319_s26 + $0x20] sm:$0xff]  ;;  %13523 = vmatprep.mubr.msk.f32.mxu0 %vm405_vm0, %v640_v20 }
  0x30   : > { %440 = vst.msk [vmem:[#allocation2 + $0x108] sm:$0xff] %vm405_vm0, %v15131_v0  ;;  %441 = vst.msk [vmem:[#allocation2 + $0x110] sm:$0xff] %vm405_vm0, %v15131_v0  ;;  %v524_v35 = vadd.f32 %v15339_v6, %v485_v24  ;;  %v486_v36 = vmul.f32 %v15334_v5, %v391_v19  ;;  %v393_v38 = vld [vmem:[%s15319_s26 + $0xa0] sm:$0xff]  ;;  %13571 = vmatprep.subr.mxu1 %v15359_v21  ;;  %v539_v39 = vmax.f32 %v507_v29, 0.0  ;;  %v378_v44 = vld [vmem:[%s15319_s26 + $0x28] sm:$0xff]  ;;  %13627 = vmatprep.subr.mxu0 %v11736_v28 }
  0x31   : > { %443 = vst.msk [vmem:[#allocation2 + $0x120] sm:$0xff] %vm405_vm0, %v15131_v0  ;;  %444 = vst.msk [vmem:[#allocation2 + $0x128] sm:$0xff] %vm405_vm0, %v15131_v0  ;;  %v555_v40 = vmax.f32 %v523_v30, 0.0  ;;  %v509_v41 = vadd.f32 %v15339_v6, %v470_v31  ;;  %v471_v42 = vmul.f32 %v15334_v5, %v376_v25  ;;  %v394_v45 = vld [vmem:[%s15319_s26 + $0xa8] sm:$0xff]  ;;  %v540_v46 = vmax.f32 %v508_v34, 0.0  ;;  %v379_v50 = vld [vmem:[%s15319_s26 + $0x30] sm:$0xff] }
  0x32   : > { %446 = vst.msk [vmem:[#allocation2 + $0x138] sm:$0xff] %vm405_vm0, %v15131_v0  ;;  %447 = vst.msk [vmem:[#allocation2 + $0x140] sm:$0xff] %vm405_vm0, %v15131_v0  ;;  %v556_v47 = vmax.f32 %v524_v35, 0.0  ;;  %v525_v48 = vadd.f32 %v15339_v6, %v486_v36  ;;  %v487_v49 = vmul.f32 %v15334_v5, %v392_v32  ;;  %v472_v53 = vmul.f32 %v15334_v5, %v377_v37  ;;  %v395_v55 = vld [vmem:[%s15319_s26 + $0xb0] sm:$0xff]  ;;  %v380_v61 = vld [vmem:[%s15319_s26 + $0x38] sm:$0xff] }
  0x33   : > { %449 = vst.msk [vmem:[#allocation2 + $0x150] sm:$0xff] %vm405_vm0, %v15131_v0  ;;  %450 = vst.msk [vmem:[#allocation2 + $0x158] sm:$0xff] %vm405_vm0, %v15131_v0  ;;  %v541_v51 = vmax.f32 %v509_v41, 0.0  ;;  %v510_v52 = vadd.f32 %v15339_v6, %v471_v42  ;;  %v488_v54 = vmul.f32 %v15334_v5, %v393_v38  ;;  %v473_v59 = vmul.f32 %v15334_v5, %v378_v44  ;;  %v396_v2 = vld [vmem:[%s15319_s26 + $0xb8] sm:$0xff]  ;;  %v11733_v3 = vld [vmem:[%s20298_s1 + $0x40] sm:$0xff] }
  0x34   : > { %452 = vst.msk [vmem:[#allocation2 + $0x168] sm:$0xff] %vm405_vm0, %v15131_v0  ;;  %453 = vst.msk [vmem:[#allocation2 + $0x170] sm:$0xff] %vm405_vm0, %v15131_v0  ;;  %v557_v57 = vmax.f32 %v525_v48, 0.0  ;;  %v526_v58 = vadd.f32 %v15339_v6, %v487_v49  ;;  %v489_v60 = vmul.f32 %v15334_v5, %v394_v45  ;;  %v511_v63 = vadd.f32 %v15339_v6, %v472_v53  ;;  %v381_v10 = vld [vmem:[%s15319_s26 + $0x40] sm:$0xff]  ;;  %v382_v16 = vld [vmem:[%s15319_s26 + $0x48] sm:$0xff] }
  0x35   : > { %455 = vst.msk [vmem:[#allocation2 + $0x180] sm:$0xff] %vm405_vm0, %v15131_v0  ;;  %456 = vst.msk [vmem:[#allocation2 + $0x188] sm:$0xff] %vm405_vm0, %v15131_v0  ;;  %v542_v62 = vmax.f32 %v510_v52, 0.0  ;;  %v474_v1 = vmul.f32 %v15334_v5, %v379_v50  ;;  %v512_v7 = vadd.f32 %v15339_v6, %v473_v59  ;;  %v490_v9 = vmul.f32 %v15334_v5, %v395_v55  ;;  %v397_v11 = vld [vmem:[%s15319_s26 + $0xc0] sm:$0xff]  ;;  %v398_v17 = vld [vmem:[%s15319_s26 + $0xc8] sm:$0xff] }
  0x36   : > { %458 = vst.msk [vmem:[#allocation2 + $0x198] sm:$0xff] %vm405_vm0, %v15131_v0  ;;  %459 = vst.msk [vmem:[#allocation2 + $0x1a0] sm:$0xff] %vm405_vm0, %v15131_v0  ;;  %v558_v4 = vmax.f32 %v526_v58, 0.0  ;;  %v528_v8 = vadd.f32 %v15339_v6, %v489_v60  ;;  %v543_v12 = vmax.f32 %v511_v63, 0.0  ;;  %v475_v15 = vmul.f32 %v15334_v5, %v380_v61  ;;  %v15431_v19 = vld [vmem:[%s20298_s1 + $0x10] sm:$0xff]  ;;  %v15450_v32 = vld [vmem:[%s20298_s1 + $0x98] sm:$0xff] }
  0x37   : > { %409 = vst.msk [vmem:[#allocation2 + $0x10] sm:$0x3] %vm408_vm1, %v15131_v0  ;;  %412 = vst.msk [vmem:[#allocation2 + $0x28] sm:$0x3] %vm408_vm1, %v15131_v0  ;;  %v513_v14 = vadd.f32 %v15339_v6, %v474_v1  ;;  %v544_v20 = vmax.f32 %v512_v7, 0.0  ;;  %v529_v23 = vadd.f32 %v15339_v6, %v490_v9  ;;  %v491_v24 = vmul.f32 %v15334_v5, %v396_v2  ;;  %v383_v25 = vld [vmem:[%s15319_s26 + $0x50] sm:$0xff] }
  0x38   : > { %415 = vst.msk [vmem:[#allocation2 + $0x40] sm:$0x3] %vm408_vm1, %v15131_v0  ;;  %418 = vst.msk [vmem:[#allocation2 + $0x58] sm:$0x3] %vm408_vm1, %v15131_v0  ;;  %v560_v22 = vmax.f32 %v528_v8, 0.0  ;;  %v476_v29 = vmul.f32 %v15334_v5, %v381_v10  ;;  %v492_v30 = vmul.f32 %v15334_v5, %v397_v11  ;;  %v399_v31 = vld [vmem:[%s15319_s26 + $0xd0] sm:$0xff]  ;;  %v477_v37 = vmul.f32 %v15334_v5, %v382_v16 }
  0x39   : > { %421 = vst.msk [vmem:[#allocation2 + $0x70] sm:$0x3] %vm408_vm1, %v15131_v0  ;;  %424 = vst.msk [vmem:[#allocation2 + $0x88] sm:$0x3] %vm408_vm1, %v15131_v0  ;;  %v561_v35 = vmax.f32 %v529_v23, 0.0  ;;  %v530_v36 = vadd.f32 %v15339_v6, %v491_v24  ;;  %v493_v38 = vmul.f32 %v15334_v5, %v398_v17  ;;  %v637_v42 = vld [vmem:[%s20298_s1 + $0x8] sm:$0xff]  ;;  %v478_v45 = vmul.f32 %v15334_v5, %v383_v25 }
  0x3a   : > { %427 = vst.msk [vmem:[#allocation2 + $0xa0] sm:$0x3] %vm408_vm1, %v15131_v0  ;;  %430 = vst.msk [vmem:[#allocation2 + $0xb8] sm:$0x3] %vm408_vm1, %v15131_v0  ;;  %v515_v44 = vadd.f32 %v15339_v6, %v476_v29  ;;  %v516_v49 = vadd.f32 %v15339_v6, %v477_v37  ;;  %v385_v52 = vld [vmem:[%s15319_s26 + $0x60] sm:$0xff]  ;;  %v386_v59 = vld [vmem:[%s15319_s26 + $0x68] sm:$0xff] }
  0x3b   : > { %433 = vst.msk [vmem:[#allocation2 + $0xd0] sm:$0x3] %vm408_vm1, %v15131_v0  ;;  %436 = vst.msk [vmem:[#allocation2 + $0xe8] sm:$0x3] %vm408_vm1, %v15131_v0  ;;  %v562_v48 = vmax.f32 %v530_v36, 0.0  ;;  %v532_v50 = vadd.f32 %v15339_v6, %v493_v38  ;;  %v401_v53 = vld [vmem:[%s15319_s26 + $0xe0] sm:$0xff]  ;;  %v480_v8 = vmul.f32 %v15334_v5, %v385_v52 }
  0x3c   : > { %439 = vst.msk [vmem:[#allocation2 + $0x100] sm:$0x3] %vm408_vm1, %v15131_v0  ;;  %442 = vst.msk [vmem:[#allocation2 + $0x118] sm:$0x3] %vm408_vm1, %v15131_v0  ;;  %v547_v55 = vmax.f32 %v515_v44, 0.0  ;;  %v402_v60 = vld [vmem:[%s15319_s26 + $0xe8] sm:$0xff]  ;;  %v496_v9 = vmul.f32 %v15334_v5, %v401_v53 }
  0x3d   : > { %445 = vst.msk [vmem:[#allocation2 + $0x130] sm:$0x3] %vm408_vm1, %v15131_v0  ;;  %448 = vst.msk [vmem:[#allocation2 + $0x148] sm:$0x3] %vm408_vm1, %v15131_v0  ;;  %v564_v63 = vmax.f32 %v532_v50, 0.0  ;;  %v1319_v52 = vld [vmem:[#allocation2 + $0x2] sm:$0xff] }
  0x3e   : > { %451 = vst.msk [vmem:[#allocation2 + $0x160] sm:$0x3] %vm408_vm1, %v15131_v0  ;;  %454 = vst.msk [vmem:[#allocation2 + $0x178] sm:$0x3] %vm408_vm1, %v15131_v0  ;;  %v641_v27 = vld [vmem:[#allocation2 + $0x9] sm:$0xff] }
  0x3f   : > { %457 = vst.msk [vmem:[#allocation2 + $0x190] sm:$0x3] %vm408_vm1, %v15131_v0  ;;  %460 = vst.msk [vmem:[#allocation2 + $0x1a8] sm:$0x3] %vm408_vm1, %v15131_v0  ;;  %13524 = vmatmul.mubr.msk.f32.vlgmr.msra.gmra.mxu0 %vm405_vm0, %v641_v27  ;;  %v527_v0 = vadd.f32 %v15339_v6, %v488_v54  ;;  %v545_v27 = vmax.f32 %v513_v14, 0.0  ;;  %v481_v14 = vmul.f32 %v15334_v5, %v386_v59  ;;  %v11807_v59 = vld [vmem:[%s20298_s1 + $0x90] sm:$0xff] }
  0x40   : > { %586 = vst.msk [vmem:[#allocation2 + $0xc1] sm:$0xff] %vm405_vm0, %v553_v26  ;;  %587 = vst.msk [vmem:[#allocation2 + $0xc9] sm:$0xff] %vm405_vm0, %v554_v33  ;;  %13628 = vmatpush3.msra.mxu0 %v11736_v28  ;;  %v514_v28 = vadd.f32 %v15339_v6, %v475_v15  ;;  %v497_v15 = vmul.f32 %v15334_v5, %v402_v60 }
  0x41   : > { %572 = vst.msk [vmem:[#allocation2 + $0x19] sm:$0xff] %vm405_vm0, %v539_v39  ;;  %588 = vst.msk [vmem:[#allocation2 + $0xd9] sm:$0xff] %vm405_vm0, %v555_v40  ;;  %13629 = vmatprep.subr.mxu0 %v11735_v43  ;;  %v559_v13 = vmax.f32 %v527_v0, 0.0  ;;  %v384_v39 = vld [vmem:[%s15319_s26 + $0x58] sm:$0xff]  ;;  %v520_v25 = vadd.f32 %v15339_v6, %v481_v14  ;;  %v11806_v14 = vld [vmem:[%s20298_s1 + $0x88] sm:$0xff] }
  0x42   : > { %573 = vst.msk [vmem:[#allocation2 + $0x21] sm:$0xff] %vm405_vm0, %v540_v46  ;;  %589 = vst.msk [vmem:[#allocation2 + $0xe1] sm:$0xff] %vm405_vm0, %v556_v47  ;;  %13630 = vmatpush3.msra.mxu0 %v11735_v43  ;;  %v546_v43 = vmax.f32 %v514_v28, 0.0  ;;  %v400_v46 = vld [vmem:[%s15319_s26 + $0xd8] sm:$0xff]  ;;  %v479_v58 = vmul.f32 %v15334_v5, %v384_v39 }
  0x43   : > { %574 = vst.msk [vmem:[#allocation2 + $0x31] sm:$0xff] %vm405_vm0, %v541_v51  ;;  %590 = vst.msk [vmem:[#allocation2 + $0xf1] sm:$0xff] %vm405_vm0, %v557_v57  ;;  %13631 = vmatprep.subr.mxu0 %v11734_v56  ;;  %v494_v51 = vmul.f32 %v15334_v5, %v399_v31  ;;  %v517_v57 = vadd.f32 %v15339_v6, %v478_v45  ;;  %v495_v1 = vmul.f32 %v15334_v5, %v400_v46 }
  0x44   : > { %575 = vst.msk [vmem:[#allocation2 + $0x39] sm:$0xff] %vm405_vm0, %v542_v62  ;;  %13632 = vmatpush3.msra.mxu0 %v11734_v56  ;;  %591 = vst.msk [vmem:[#allocation2 + $0xf9] sm:$0xff] %vm405_vm0, %v558_v4  ;;  %v548_v62 = vmax.f32 %v516_v49, 0.0  ;;  %v636_v4 = vld [vmem:[%s20298_s1] sm:$0xff]  ;;  %v518_v7 = vadd.f32 %v15339_v6, %v479_v58  ;;  %v605_v58 = vld [vmem:[#allocation2 + $0x8] sm:$0xff] }
  0x45   : > { %13633 = vmatprep.subr.mxu0 %v11733_v3  ;;  %576 = vst.msk [vmem:[#allocation2 + $0x49] sm:$0xff] %vm405_vm0, %v543_v12  ;;  %592 = vst.msk [vmem:[#allocation2 + $0x109] sm:$0xff] %vm405_vm0, %v559_v13  ;;  %v533_v0 = vadd.f32 %v15339_v6, %v494_v51  ;;  %v534_v13 = vadd.f32 %v15339_v6, %v495_v1 }
  0x46   : > { %13634 = vmatpush3.msra.mxu0 %v11733_v3  ;;  %577 = vst.msk [vmem:[#allocation2 + $0x51] sm:$0xff] %vm405_vm0, %v544_v20  ;;  %593 = vst.msk [vmem:[#allocation2 + $0x111] sm:$0xff] %vm405_vm0, %v560_v22  ;;  %v549_v3 = vmax.f32 %v517_v57, 0.0  ;;  %v550_v17 = vmax.f32 %v518_v7, 0.0  ;;  %v535_v20 = vadd.f32 %v15339_v6, %v496_v9  ;;  %v15543_v22 = vld [vmem:[%s20298_s1 + $0x78] sm:$0xff] }
  0x47   : > { %v15426_v18 = vld [vmem:[#allocation2 + $0xc1] sm:$0xff]  ;;  %v15439_v26 = vld [vmem:[#allocation2 + $0xc9] sm:$0xff]  ;;  %13739 = vmatprep.subr.mxu0 %v15450_v32  ;;  %578 = vst.msk [vmem:[#allocation2 + $0x61] sm:$0xff] %vm405_vm0, %v545_v27  ;;  %594 = vst.msk [vmem:[#allocation2 + $0x121] sm:$0xff] %vm405_vm0, %v561_v35  ;;  %v565_v12 = vmax.f32 %v533_v0, 0.0  ;;  %v566_v24 = vmax.f32 %v534_v13, 0.0  ;;  %v536_v27 = vadd.f32 %v15339_v6, %v497_v15 }
  0x48   : > { %13547 = vmatprep.mubr.msk.f32.mxu1 %vm405_vm0, %v15426_v18  ;;  %v15454_v33 = vld [vmem:[#allocation2 + $0x19] sm:$0xff]  ;;  %579 = vst.msk [vmem:[#allocation2 + $0x69] sm:$0xff] %vm405_vm0, %v546_v43  ;;  %595 = vst.msk [vmem:[#allocation2 + $0x129] sm:$0xff] %vm405_vm0, %v562_v48  ;;  %v552_v35 = vmax.f32 %v520_v25, 0.0 }
  0x49   : > { %13548 = vmatmul.mubr.msk.f32.vlgmr.msra.gmra.mxu1 %vm405_vm0, %v15439_v26  ;;  %v15456_v34 = vld [vmem:[#allocation2 + $0xd9] sm:$0xff]  ;;  %13526 = vmatprep.mubr.msk.f32.mxu0 %vm405_vm0, %v15454_v33  ;;  %v15468_v40 = vld [vmem:[#allocation2 + $0x21] sm:$0xff]  ;;  %580 = vst.msk [vmem:[#allocation2 + $0x79] sm:$0xff] %vm405_vm0, %v547_v55  ;;  %581 = vst.msk [vmem:[#allocation2 + $0x81] sm:$0xff] %vm405_vm0, %v548_v62  ;;  %v568_v36 = vmax.f32 %v536_v27, 0.0 }
  0x4a   : > { %13572 = vmatpush3.msra.mxu1 %v15359_v21  ;;  %v15470_v41 = vld [vmem:[#allocation2 + $0xe1] sm:$0xff]  ;;  %v531_v21 = vadd.f32 %v15339_v6, %v492_v30  ;;  %13550 = vmatprep.mubr.msk.f32.mxu1 %vm405_vm0, %v15456_v34  ;;  %v15484_v47 = vld [vmem:[#allocation2 + $0x31] sm:$0xff]  ;;  %597 = vst.msk [vmem:[#allocation2 + $0x141] sm:$0xff] %vm405_vm0, %v564_v63  ;;  %582 = vst.msk [vmem:[#allocation2 + $0x91] sm:$0xff] %vm405_vm0, %v549_v3  ;;  %v567_v30 = vmax.f32 %v535_v20, 0.0 }
  0x4b   : > { %13527 = vmatmul.mubr.msk.f32.gmra.mxu0 %vm405_vm0, %v15468_v40  ;;  %v15494_v54 = vld [vmem:[#allocation2 + $0xf1] sm:$0xff]  ;;  %13573 = vmatprep.subr.mxu1 %v15431_v19  ;;  %v15504_v61 = vld [vmem:[#allocation2 + $0x39] sm:$0xff]  ;;  %598 = vst.msk [vmem:[#allocation2 + $0x151] sm:$0xff] %vm405_vm0, %v565_v12  ;;  %583 = vst.msk [vmem:[#allocation2 + $0x99] sm:$0xff] %vm405_vm0, %v550_v17 }
  0x4c   : > { %13529 = vmatprep.mubr.msk.f32.mxu0 %vm405_vm0, %v15484_v47  ;;  %v563_v56 = vmax.f32 %v531_v21, 0.0  ;;  %v15511_v2 = vld [vmem:[#allocation2 + $0xf9] sm:$0xff]  ;;  %13574 = vmatpush3.msra.mxu1 %v15431_v19  ;;  %v15524_v10 = vld [vmem:[#allocation2 + $0x49] sm:$0xff]  ;;  %v519_v19 = vadd.f32 %v15339_v6, %v480_v8  ;;  %599 = vst.msk [vmem:[#allocation2 + $0x159] sm:$0xff] %vm405_vm0, %v566_v24  ;;  %600 = vst.msk [vmem:[#allocation2 + $0x169] sm:$0xff] %vm405_vm0, %v567_v30 }
  0x4d   : > { %13551 = vmatmul.mubr.msk.f32.gmra.mxu1 %vm405_vm0, %v15470_v41  ;;  %v15526_v11 = vld [vmem:[#allocation2 + $0x109] sm:$0xff]  ;;  %13575 = vmatprep.subr.mxu1 %v637_v42  ;;  %v15535_v16 = vld [vmem:[#allocation2 + $0x51] sm:$0xff]  ;;  %585 = vst.msk [vmem:[#allocation2 + $0xb1] sm:$0xff] %vm405_vm0, %v552_v35  ;;  %601 = vst.msk [vmem:[#allocation2 + $0x171] sm:$0xff] %vm405_vm0, %v568_v36 }
  0x4e   : > { %13553 = vmatprep.mubr.msk.f32.mxu1 %vm405_vm0, %v15494_v54  ;;  %596 = vst.msk [vmem:[#allocation2 + $0x139] sm:$0xff] %vm405_vm0, %v563_v56  ;;  %13576 = vmatpush3.msra.mxu1 %v637_v42  ;;  %v15547_v23 = vld [vmem:[#allocation2 + $0x61] sm:$0xff]  ;;  %v15554_v28 = vld [vmem:[#allocation2 + $0x111] sm:$0xff]  ;;  %v551_v29 = vmax.f32 %v519_v19, 0.0 }
  0x4f   : > { %13530 = vmatmul.mubr.msk.f32.gmra.mxu0 %vm405_vm0, %v15504_v61  ;;  %13577 = vmatprep.subr.mxu1 %v636_v4  ;;  %v15559_v31 = vld [vmem:[#allocation2 + $0x121] sm:$0xff]  ;;  %v15565_v37 = vld [vmem:[#allocation2 + $0x69] sm:$0xff]  ;;  %v15637_v60 = vld [vmem:[#allocation2 + $0x18] sm:$0xff] }
  0x50   : > { %13532 = vmatprep.mubr.msk.f32.mxu0 %vm405_vm0, %v15524_v10  ;;  %13578 = vmatpush3.msra.mxu1 %v636_v4  ;;  %584 = vst.msk [vmem:[#allocation2 + $0xa9] sm:$0xff] %vm405_vm0, %v551_v29  ;;  %v15571_v38 = vld [vmem:[#allocation2 + $0x79] sm:$0xff]  ;;  %v15577_v39 = vld [vmem:[#allocation2 + $0x129] sm:$0xff]  ;;  %v15585_v43 = vld [vmem:[#allocation2 + $0x81] sm:$0xff] }
  0x51   : > { %13554 = vmatmul.mubr.msk.f32.gmra.mxu1 %vm405_vm0, %v15511_v2  ;;  %13683 = vmatprep.subr.mxu1 %v15543_v22  ;;  %v15589_v44 = vld [vmem:[#allocation2 + $0x91] sm:$0xff]  ;;  %v15593_v21 = vld [vmem:[#allocation2 + $0x141] sm:$0xff] }
  0x52   : > { %13556 = vmatprep.mubr.msk.f32.mxu1 %vm405_vm0, %v15526_v11  ;;  %v15597_v45 = vld [vmem:[#allocation2 + $0x151] sm:$0xff]  ;;  %v15601_v46 = vld [vmem:[#allocation2 + $0x99] sm:$0xff]  ;;  %v15642_v62 = vld [vmem:[#allocation2 + $0x22] sm:$0xff] }
  0x53   : > { %13533 = vmatmul.mubr.msk.f32.gmra.mxu0 %vm405_vm0, %v15535_v16  ;;  %v15609_v49 = vld [vmem:[#allocation2 + $0x159] sm:$0xff]  ;;  %v15613_v50 = vld [vmem:[#allocation2 + $0x169] sm:$0xff]  ;;  %20416 = vst [vmem:[#allocation11_spill] sm:$0xff] %v15642_v62 }
  0x54   : > { %13535 = vmatprep.mubr.msk.f32.mxu0 %vm405_vm0, %v15547_v23  ;;  %v15617_v51 = vld [vmem:[#allocation2 + $0xb1] sm:$0xff]  ;;  %v604_v55 = vld [vmem:[#allocation2] sm:$0xff]  ;;  %v11770_v3 = vld [vmem:[%s20298_s1 + $0x68] sm:$0xff] }
  0x55   : > { %13557 = vmatmul.mubr.msk.f32.gmra.mxu1 %vm405_vm0, %v15554_v28  ;;  %v15581_v42 = vld [vmem:[#allocation2 + $0x139] sm:$0xff]  ;;  %v15623_v53 = vld [vmem:[#allocation2 + $0x171] sm:$0xff]  ;;  %v15685_v19 = vld [vmem:[#allocation2 + $0x48] sm:$0xff] }
  0x56   : > { %13559 = vmatprep.mubr.msk.f32.mxu1 %vm405_vm0, %v15559_v31  ;;  %20414 = vst [vmem:[#allocation9_spill] sm:$0xff] %v15623_v53  ;;  %v1320_v56 = vld [vmem:[#allocation2 + $0xa] sm:$0xff]  ;;  %v15630_v57 = vld [vmem:[#allocation2 + $0x1a] sm:$0xff]  ;;  %v15648_v0 = vld [vmem:[#allocation2 + $0x32] sm:$0xff] }
  0x57   : > { %13536 = vmatmul.mubr.msk.f32.gmra.mxu0 %vm405_vm0, %v15565_v37  ;;  %v15605_v48 = vld [vmem:[#allocation2 + $0xa9] sm:$0xff]  ;;  %20415 = vst [vmem:[#allocation10_spill] sm:$0xff] %v15630_v57  ;;  %20417 = vst [vmem:[#allocation12_spill] sm:$0xff] %v15648_v0  ;;  %v404_v7 = vld [vmem:[%s15319_s26 + $0xf8] sm:$0xff] }
  0x58   : > { %13538 = vmatprep.mubr.msk.f32.mxu0 %vm405_vm0, %v15571_v38  ;;  %v11771_v63 = vld [vmem:[%s20298_s1 + $0x70] sm:$0xff]  ;;  %v15666_v8 = vld [vmem:[#allocation2 + $0x3a] sm:$0xff]  ;;  %v499_v12 = vmul.f32 %v15334_v5, %v404_v7 }
  0x59   : > { %13560 = vmatmul.mubr.msk.f32.gmra.mxu1 %vm405_vm0, %v15577_v39  ;;  %v15655_v1 = vld [vmem:[#allocation2 + $0x30] sm:$0xff]  ;;  %20418 = vst [vmem:[#allocation13_spill] sm:$0xff] %v15666_v8  ;;  %v15679_v15 = vld [vmem:[#allocation2 + $0x38] sm:$0xff]  ;;  %v11769_v20 = vld [vmem:[%s20298_s1 + $0x60] sm:$0xff] }
  0x5a   : > { %13562 = vmatprep.mubr.msk.f32.mxu1 %vm405_vm0, %v15581_v42  ;;  %v403_v4 = vld [vmem:[%s15319_s26 + $0xf0] sm:$0xff]  ;;  %v11805_v27 = vld [vmem:[%s20298_s1 + $0x80] sm:$0xff]  ;;  %v15714_v35 = vld [vmem:[%s20298_s1 + $0xb8] sm:$0xff] }
  0x5b   : > { %13539 = vmatmul.mubr.msk.f32.gmra.mxu0 %vm405_vm0, %v15585_v43  ;;  %v498_v9 = vmul.f32 %v15334_v5, %v403_v4  ;;  %v15672_v13 = vld [vmem:[#allocation2 + $0x4a] sm:$0xff]  ;;  %v538_v5 = vadd.f32 %v15339_v6, %v499_v12  ;;  %v15709_v30 = vld [vmem:[#allocation2 + $0x60] sm:$0xff]  ;;  %v15765_v12 = vld [vmem:[#allocation2 + $0x98] sm:$0xff] }
  0x5c   : > { %13541 = vmatprep.mubr.msk.f32.mxu0 %vm405_vm0, %v15589_v44  ;;  %20419 = vst [vmem:[#allocation14_spill] sm:$0xff] %v15672_v13  ;;  %v15703_v29 = vld [vmem:[#allocation2 + $0x50] sm:$0xff]  ;;  %v15757_v7 = vld [vmem:[#allocation2 + $0x9a] sm:$0xff] }
  0x5d   : > { %13563 = vmatmul.mubr.msk.f32.gmra.mxu1 %vm405_vm0, %v15593_v21  ;;  %v537_v17 = vadd.f32 %v15339_v6, %v498_v9  ;;  %v570_v25 = vmax.f32 %v538_v5, 0.0  ;;  %v15696_v6 = vld [vmem:[#allocation2 + $0x62] sm:$0xff]  ;;  %v15718_v36 = vld [vmem:[#allocation2 + $0x6a] sm:$0xff]  ;;  %20426 = vst [vmem:[#allocation21_spill] sm:$0xff] %v15757_v7 }
  0x5e   : > { %13565 = vmatprep.mubr.msk.f32.mxu1 %vm405_vm0, %v15597_v45  ;;  %20421 = vst [vmem:[#allocation16_spill] sm:$0xff] %v15696_v6  ;;  %20422 = vst [vmem:[#allocation17_spill] sm:$0xff] %v15718_v36  ;;  %v15753_v4 = vld [vmem:[#allocation2 + $0x90] sm:$0xff]  ;;  %v15777_v5 = vld [vmem:[#allocation2 + $0xc2] sm:$0xff] }
  0x5f   : > { %13542 = vmatmul.mubr.msk.f32.gmra.mxu0 %vm405_vm0, %v15601_v46  ;;  %v569_v24 = vmax.f32 %v537_v17, 0.0  ;;  %603 = vst.msk [vmem:[#allocation2 + $0x189] sm:$0xff] %vm405_vm0, %v570_v25  ;;  %v15761_v9 = vld [vmem:[#allocation2 + $0xaa] sm:$0xff]  ;;  %v15773_v17 = vld [vmem:[#allocation2 + $0xb2] sm:$0xff]  ;;  %20429 = vst [vmem:[#allocation24_spill] sm:$0xff] %v15777_v5 }
  0x60   : > { %13544 = vmatprep.mubr.msk.f32.mxu0 %vm405_vm0, %v15605_v48  ;;  %20427 = vst [vmem:[#allocation22_spill] sm:$0xff] %v15761_v9  ;;  %20428 = vst [vmem:[#allocation23_spill] sm:$0xff] %v15773_v17  ;;  %v15789_v25 = vld [vmem:[#allocation2 + $0xca] sm:$0xff] }
  0x61   : > { %13566 = vmatmul.mubr.msk.f32.gmra.mxu1 %vm405_vm0, %v15609_v49  ;;  %602 = vst.msk [vmem:[#allocation2 + $0x181] sm:$0xff] %vm405_vm0, %v569_v24  ;;  %v15785_v24 = vld [vmem:[#allocation2 + $0xc0] sm:$0xff]  ;;  %20430 = vst [vmem:[#allocation25_spill] sm:$0xff] %v15789_v25 }
  0x62   : > { %13568 = vmatprep.mubr.msk.f32.mxu1 %vm405_vm0, %v15613_v50 }
  0x63   : > { %13545 = vmatmul.mubr.msk.f32.gmra.mxu0 %vm405_vm0, %v15617_v51 }
  0x64   : > { %13635 = vmatprep.mubr.msk.f32.mxu0 %vm405_vm0, %v1319_v52  ;;  %v15723_v52 = vld [vmem:[%s20298_s1 + $0xd8] sm:$0xff] }
  0x65   : > { %13569 = vmatmul.mubr.msk.f32.gmra.mxu1 %vm405_vm0, %v15623_v53  ;;  %v15907_v53 = vld [vmem:[#allocation2 + $0x170] sm:$0xff] }
  0x66   : > { %13579 = vmatprep.mubr.msk.f32.mxu1 %vm405_vm0, %v604_v55  ;;  %v15727_v55 = vld [vmem:[#allocation2 + $0x7a] sm:$0xff] }
  0x67   : > { %13636 = vmatmul.mubr.msk.f32.vlgmr.msra.gmra.mxu0 %vm405_vm0, %v1320_v56  ;;  %20423 = vst [vmem:[#allocation18_spill] sm:$0xff] %v15727_v55  ;;  %v15731_v56 = vld [vmem:[#allocation2 + $0x68] sm:$0xff] }
  0x68   : > { %13740 = vmatpush3.msra.mxu0 %v15450_v32  ;;  %13638 = vmatprep.mubr.msk.f32.mxu0 %vm405_vm0, %v15630_v57  ;;  %v15653_v32 = vld [vmem:[#allocation2 + $0x20] sm:$0xff]  ;;  %v15893_v57 = vld [vmem:[#allocation2 + $0x158] sm:$0xff] }
  0x69   : > { %13580 = vmatmul.mubr.msk.f32.vlgmr.msra.gmra.mxu1 %vm405_vm0, %v605_v58  ;;  %13741 = vmatprep.subr.mxu0 %v11807_v59  ;;  %v15736_v58 = vld [vmem:[#allocation2 + $0x78] sm:$0xff] }
  0x6a   : > { %13684 = vmatpush3.msra.mxu1 %v15543_v22  ;;  %13582 = vmatprep.mubr.msk.f32.mxu1 %vm405_vm0, %v15637_v60  ;;  %v15692_v22 = vld [vmem:[#allocation2 + $0x52] sm:$0xff] }
  0x6b   : > { %13639 = vmatmul.mubr.msk.f32.gmra.mxu0 %vm405_vm0, %v15642_v62  ;;  %13685 = vmatprep.subr.mxu1 %v11771_v63  ;;  %20420 = vst [vmem:[#allocation15_spill] sm:$0xff] %v15692_v22  ;;  %v15889_v62 = vld [vmem:[#allocation2 + $0x16a] sm:$0xff] }
  0x6c   : > { %13641 = vmatprep.mubr.msk.f32.mxu0 %vm405_vm0, %v15648_v0  ;;  %13686 = vmatpush3.msra.mxu1 %v11771_v63  ;;  %v15745_v63 = vld [vmem:[#allocation2 + $0x92] sm:$0xff]  ;;  %v15877_v0 = vld [vmem:[#allocation2 + $0x140] sm:$0xff]  ;;  %20442 = vst [vmem:[#allocation37_spill] sm:$0xff] %v15889_v62 }
  0x6d   : > { %13583 = vmatmul.mubr.msk.f32.gmra.mxu1 %vm405_vm0, %v15653_v32  ;;  %13742 = vmatpush3.msra.mxu0 %v11807_v59  ;;  %v15741_v59 = vld [vmem:[#allocation2 + $0x82] sm:$0xff]  ;;  %20425 = vst [vmem:[#allocation20_spill] sm:$0xff] %v15745_v63 }
  0x6e   : > { %13585 = vmatprep.mubr.msk.f32.mxu1 %vm405_vm0, %v15655_v1  ;;  %13687 = vmatprep.subr.mxu1 %v11770_v3  ;;  %20424 = vst [vmem:[#allocation19_spill] sm:$0xff] %v15741_v59 }
  0x6f   : > { %13642 = vmatmul.mubr.msk.f32.gmra.mxu0 %vm405_vm0, %v15666_v8  ;;  %13688 = vmatpush3.msra.mxu1 %v11770_v3  ;;  %v15749_v3 = vld [vmem:[#allocation2 + $0x80] sm:$0xff]  ;;  %v15873_v8 = vld [vmem:[#allocation2 + $0x152] sm:$0xff] }
  0x70   : > { %13644 = vmatprep.mubr.msk.f32.mxu0 %vm405_vm0, %v15672_v13  ;;  %13743 = vmatprep.subr.mxu0 %v11806_v14  ;;  %v15861_v13 = vld [vmem:[#allocation2 + $0x128] sm:$0xff]  ;;  %20441 = vst [vmem:[#allocation36_spill] sm:$0xff] %v15873_v8 }
  0x71   : > { %13586 = vmatmul.mubr.msk.f32.gmra.mxu1 %vm405_vm0, %v15679_v15  ;;  %13744 = vmatpush3.msra.mxu0 %v11806_v14  ;;  %v15769_v14 = vld [vmem:[#allocation2 + $0xa8] sm:$0xff] }
  0x72   : > { %13588 = vmatprep.mubr.msk.f32.mxu1 %vm405_vm0, %v15685_v19  ;;  %13689 = vmatprep.subr.mxu1 %v11769_v20 }
  0x73   : > { %13645 = vmatmul.mubr.msk.f32.gmra.mxu0 %vm405_vm0, %v15692_v22  ;;  %13690 = vmatpush3.msra.mxu1 %v11769_v20  ;;  %v15781_v20 = vld [vmem:[#allocation2 + $0xb0] sm:$0xff]  ;;  %v15857_v22 = vld [vmem:[#allocation2 + $0x13a] sm:$0xff] }
  0x74   : > { %13647 = vmatprep.mubr.msk.f32.mxu0 %vm405_vm0, %v15696_v6  ;;  %13745 = vmatprep.subr.mxu0 %v11805_v27  ;;  %v15845_v6 = vld [vmem:[#allocation2 + $0x110] sm:$0xff]  ;;  %20439 = vst [vmem:[#allocation34_spill] sm:$0xff] %v15857_v22 }
  0x75   : > { %13589 = vmatmul.mubr.msk.f32.gmra.mxu1 %vm405_vm0, %v15703_v29  ;;  %13746 = vmatpush3.msra.mxu0 %v11805_v27  ;;  %v15793_v27 = vld [vmem:[#allocation2 + $0xda] sm:$0xff] }
  0x76   : > { %13591 = vmatprep.mubr.msk.f32.mxu1 %vm405_vm0, %v15709_v30  ;;  %13795 = vmatprep.subr.mxu1 %v15714_v35  ;;  %20431 = vst [vmem:[#allocation26_spill] sm:$0xff] %v15793_v27 }
  0x77   : > { %13648 = vmatmul.mubr.msk.f32.gmra.mxu0 %vm405_vm0, %v15718_v36  ;;  %13851 = vmatprep.subr.mxu0 %v15723_v52  ;;  %v15841_v36 = vld [vmem:[#allocation2 + $0x122] sm:$0xff] }
  0x78   : > { %13650 = vmatprep.mubr.msk.f32.mxu0 %vm405_vm0, %v15727_v55  ;;  %v15829_v55 = vld [vmem:[#allocation2 + $0xf8] sm:$0xff]  ;;  %20437 = vst [vmem:[#allocation32_spill] sm:$0xff] %v15841_v36 }
  0x79   : > { %13592 = vmatmul.mubr.msk.f32.gmra.mxu1 %vm405_vm0, %v15731_v56 }
  0x7a   : > { %13594 = vmatprep.mubr.msk.f32.mxu1 %vm405_vm0, %v15736_v58 }
  0x7b   : > { %13651 = vmatmul.mubr.msk.f32.gmra.mxu0 %vm405_vm0, %v15741_v59  ;;  %v15825_v59 = vld [vmem:[#allocation2 + $0x10a] sm:$0xff] }
  0x7c   : > { %13653 = vmatprep.mubr.msk.f32.mxu0 %vm405_vm0, %v15745_v63  ;;  %v15813_v63 = vld [vmem:[#allocation2 + $0xe0] sm:$0xff]  ;;  %20435 = vst [vmem:[#allocation30_spill] sm:$0xff] %v15825_v59 }
  0x7d   : > { %13595 = vmatmul.mubr.msk.f32.gmra.mxu1 %vm405_vm0, %v15749_v3 }
  0x7e   : > { %13597 = vmatprep.mubr.msk.f32.mxu1 %vm405_vm0, %v15753_v4 }
  0x7f   : > { %13654 = vmatmul.mubr.msk.f32.gmra.mxu0 %vm405_vm0, %v15757_v7  ;;  %v15809_v7 = vld [vmem:[#allocation2 + $0xf2] sm:$0xff] }
  0x80   : > { %13656 = vmatprep.mubr.msk.f32.mxu0 %vm405_vm0, %v15761_v9  ;;  %v15797_v9 = vld [vmem:[#allocation2 + $0xc8] sm:$0xff]  ;;  %20433 = vst [vmem:[#allocation28_spill] sm:$0xff] %v15809_v7 }
  0x81   : > { %13598 = vmatmul.mubr.msk.f32.gmra.mxu1 %vm405_vm0, %v15765_v12 }
  0x82   : > { %13600 = vmatprep.mubr.msk.f32.mxu1 %vm405_vm0, %v15769_v14 }
  0x83   : > { %13657 = vmatmul.mubr.msk.f32.gmra.mxu0 %vm405_vm0, %v15773_v17  ;;  %v15801_v17 = vld [vmem:[#allocation2 + $0xd8] sm:$0xff] }
  0x84   : > { %13659 = vmatprep.mubr.msk.f32.mxu0 %vm405_vm0, %v15777_v5  ;;  %v15805_v5 = vld [vmem:[#allocation2 + $0xe2] sm:$0xff] }
  0x85   : > { %13601 = vmatmul.mubr.msk.f32.gmra.mxu1 %vm405_vm0, %v15781_v20  ;;  %20432 = vst [vmem:[#allocation27_spill] sm:$0xff] %v15805_v5 }
  0x86   : > { %13603 = vmatprep.mubr.msk.f32.mxu1 %vm405_vm0, %v15785_v24 }
  0x87   : > { %13660 = vmatmul.mubr.msk.f32.gmra.mxu0 %vm405_vm0, %v15789_v25  ;;  %v15817_v25 = vld [vmem:[#allocation2 + $0xf0] sm:$0xff] }
  0x88   : > { %13662 = vmatprep.mubr.msk.f32.mxu0 %vm405_vm0, %v15793_v27  ;;  %v15821_v27 = vld [vmem:[#allocation2 + $0xfa] sm:$0xff] }
  0x89   : > { %13604 = vmatmul.mubr.msk.f32.gmra.mxu1 %vm405_vm0, %v15797_v9  ;;  %20434 = vst [vmem:[#allocation29_spill] sm:$0xff] %v15821_v27 }
  0x8a   : > { %13606 = vmatprep.mubr.msk.f32.mxu1 %vm405_vm0, %v15801_v17 }
  0x8b   : > { %13663 = vmatmul.mubr.msk.f32.gmra.mxu0 %vm405_vm0, %v15805_v5  ;;  %v15833_v5 = vld [vmem:[#allocation2 + $0x108] sm:$0xff] }
  0x8c   : > { %13665 = vmatprep.mubr.msk.f32.mxu0 %vm405_vm0, %v15809_v7  ;;  %v15837_v7 = vld [vmem:[#allocation2 + $0x112] sm:$0xff] }
  0x8d   : > { %13607 = vmatmul.mubr.msk.f32.gmra.mxu1 %vm405_vm0, %v15813_v63  ;;  %20436 = vst [vmem:[#allocation31_spill] sm:$0xff] %v15837_v7 }
  0x8e   : > { %13609 = vmatprep.mubr.msk.f32.mxu1 %vm405_vm0, %v15817_v25 }
  0x8f   : > { %13666 = vmatmul.mubr.msk.f32.gmra.mxu0 %vm405_vm0, %v15821_v27  ;;  %v15849_v27 = vld [vmem:[#allocation2 + $0x120] sm:$0xff] }
  0x90   : > { %13668 = vmatprep.mubr.msk.f32.mxu0 %vm405_vm0, %v15825_v59  ;;  %v15853_v59 = vld [vmem:[#allocation2 + $0x12a] sm:$0xff] }
  0x91   : > { %13610 = vmatmul.mubr.msk.f32.gmra.mxu1 %vm405_vm0, %v15829_v55  ;;  %20438 = vst [vmem:[#allocation33_spill] sm:$0xff] %v15853_v59 }
  0x92   : > { %13612 = vmatprep.mubr.msk.f32.mxu1 %vm405_vm0, %v15833_v5 }
  0x93   : > { %13669 = vmatmul.mubr.msk.f32.gmra.mxu0 %vm405_vm0, %v15837_v7  ;;  %v15865_v7 = vld [vmem:[#allocation2 + $0x138] sm:$0xff] }
  0x94   : > { %13671 = vmatprep.mubr.msk.f32.mxu0 %vm405_vm0, %v15841_v36  ;;  %v15869_v36 = vld [vmem:[#allocation2 + $0x142] sm:$0xff] }
  0x95   : > { %13613 = vmatmul.mubr.msk.f32.gmra.mxu1 %vm405_vm0, %v15845_v6  ;;  %20440 = vst [vmem:[#allocation35_spill] sm:$0xff] %v15869_v36 }
  0x96   : > { %13615 = vmatprep.mubr.msk.f32.mxu1 %vm405_vm0, %v15849_v27 }
  0x97   : > { %13672 = vmatmul.mubr.msk.f32.gmra.mxu0 %vm405_vm0, %v15853_v59  ;;  %v15881_v59 = vld [vmem:[#allocation2 + $0x150] sm:$0xff] }
  0x98   : > { %13674 = vmatprep.mubr.msk.f32.mxu0 %vm405_vm0, %v15857_v22  ;;  %v15885_v22 = vld [vmem:[#allocation2 + $0x15a] sm:$0xff] }
  0x99   : > { %13616 = vmatmul.mubr.msk.f32.gmra.mxu1 %vm405_vm0, %v15861_v13 }
  0x9a   : > { %13618 = vmatprep.mubr.msk.f32.mxu1 %vm405_vm0, %v15865_v7 }
  0x9b   : > { %13675 = vmatmul.mubr.msk.f32.gmra.mxu0 %vm405_vm0, %v15869_v36  ;;  %v15897_v36 = vld [vmem:[#allocation2 + $0x168] sm:$0xff] }
  0x9c   : > { %13677 = vmatprep.mubr.msk.f32.mxu0 %vm405_vm0, %v15873_v8  ;;  %v15901_v8 = vld [vmem:[#allocation2 + $0x172] sm:$0xff] }
  0x9d   : > { %13619 = vmatmul.mubr.msk.f32.gmra.mxu1 %vm405_vm0, %v15877_v0 }
  0x9e   : > { %13621 = vmatprep.mubr.msk.f32.mxu1 %vm405_vm0, %v15881_v59 }
  0x9f   : > { %13678 = vmatmul.mubr.msk.f32.gmra.mxu0 %vm405_vm0, %v15885_v22 }
  0xa0   : > { %13680 = vmatprep.mubr.msk.f32.mxu0 %vm405_vm0, %v15889_v62  ;;  %v11879_v62 = vld [vmem:[%s20298_s1 + $0xd0] sm:$0xff] }
  0xa1   : > { %13622 = vmatmul.mubr.msk.f32.gmra.mxu1 %vm405_vm0, %v15893_v57 }
  0xa2   : > { %13624 = vmatprep.mubr.msk.f32.mxu1 %vm405_vm0, %v15897_v36 }
  0xa3   : > { %13681 = vmatmul.mubr.msk.f32.gmra.mxu0 %vm405_vm0, %v15901_v8 }
  0xa4   : > { %13747 = vmatprep.mubr.msk.f32.mxu0 %vm405_vm0, %v15454_v33  ;;  %v11843_v33 = vld [vmem:[%s20298_s1 + $0xb0] sm:$0xff] }
  0xa5   : > { %13625 = vmatmul.mubr.msk.f32.gmra.mxu1 %vm405_vm0, %v15907_v53 }
  0xa6   : > { %13691 = vmatprep.mubr.msk.f32.mxu1 %vm405_vm0, %v15637_v60  ;;  %v20455_v60 = vld [vmem:[#allocation21_spill] sm:$0xff] }
  0xa7   : > { %13748 = vmatmul.mubr.msk.f32.vlgmr.msra.gmra.mxu0 %vm405_vm0, %v15468_v40  ;;  %v11842_v40 = vld [vmem:[%s20298_s1 + $0xa8] sm:$0xff] }
  0xa8   : > { %13852 = vmatpush3.msra.mxu0 %v15723_v52  ;;  %13750 = vmatprep.mubr.msk.f32.mxu0 %vm405_vm0, %v15484_v47  ;;  %v11878_v47 = vld [vmem:[%s20298_s1 + $0xc8] sm:$0xff] }
  0xa9   : > { %13692 = vmatmul.mubr.msk.f32.vlgmr.msra.gmra.mxu1 %vm405_vm0, %v15653_v32  ;;  %13853 = vmatprep.subr.mxu0 %v11879_v62  ;;  %v20457_v32 = vld [vmem:[#allocation23_spill] sm:$0xff] }
  0xaa   : > { %13796 = vmatpush3.msra.mxu1 %v15714_v35  ;;  %13694 = vmatprep.mubr.msk.f32.mxu1 %vm405_vm0, %v15655_v1  ;;  %v20461_v52 = vld [vmem:[#allocation27_spill] sm:$0xff] }
  0xab   : > { %13751 = vmatmul.mubr.msk.f32.gmra.mxu0 %vm405_vm0, %v15504_v61  ;;  %13797 = vmatprep.subr.mxu1 %v11843_v33  ;;  %v11841_v61 = vld [vmem:[%s20298_s1 + $0xa0] sm:$0xff] }
  0xac   : > { %13753 = vmatprep.mubr.msk.f32.mxu0 %vm405_vm0, %v15524_v10  ;;  %13798 = vmatpush3.msra.mxu1 %v11843_v33  ;;  %v11877_v10 = vld [vmem:[%s20298_s1 + $0xc0] sm:$0xff] }
  0xad   : > { %13695 = vmatmul.mubr.msk.f32.gmra.mxu1 %vm405_vm0, %v15679_v15  ;;  %13854 = vmatpush3.msra.mxu0 %v11879_v62  ;;  %v20456_v62 = vld [vmem:[#allocation22_spill] sm:$0xff] }
  0xae   : > { %13697 = vmatprep.mubr.msk.f32.mxu1 %vm405_vm0, %v15685_v19  ;;  %13799 = vmatprep.subr.mxu1 %v11842_v40  ;;  %v20468_v33 = vld [vmem:[#allocation34_spill] sm:$0xff] }
  0xaf   : > { %13754 = vmatmul.mubr.msk.f32.gmra.mxu0 %vm405_vm0, %v15535_v16  ;;  %13800 = vmatpush3.msra.mxu1 %v11842_v40  ;;  %v15966_v16 = vld [vmem:[%s20298_s1 + $0xf8] sm:$0xff] }
  0xb0   : > { %13756 = vmatprep.mubr.msk.f32.mxu0 %vm405_vm0, %v15547_v23  ;;  %13855 = vmatprep.subr.mxu0 %v11878_v47  ;;  %v11952_v23 = vld [vmem:[%s20298_s1 + $0x118] sm:$0xff] }
  0xb1   : > { %13698 = vmatmul.mubr.msk.f32.gmra.mxu1 %vm405_vm0, %v15703_v29  ;;  %13856 = vmatpush3.msra.mxu0 %v11878_v47 }
  0xb2   : > { %13700 = vmatprep.mubr.msk.f32.mxu1 %vm405_vm0, %v15709_v30  ;;  %13801 = vmatprep.subr.mxu1 %v11841_v61 }
  0xb3   : > { %13757 = vmatmul.mubr.msk.f32.gmra.mxu0 %vm405_vm0, %v15565_v37  ;;  %13802 = vmatpush3.msra.mxu1 %v11841_v61  ;;  %v20446_v37 = vld [vmem:[#allocation12_spill] sm:$0xff] }
  0xb4   : > { %13759 = vmatprep.mubr.msk.f32.mxu0 %vm405_vm0, %v15571_v38  ;;  %13857 = vmatprep.subr.mxu0 %v11877_v10  ;;  %v11914_v38 = vld [vmem:[%s20298_s1 + $0xe8] sm:$0xff] }
  0xb5   : > { %13701 = vmatmul.mubr.msk.f32.gmra.mxu1 %vm405_vm0, %v15731_v56  ;;  %13858 = vmatpush3.msra.mxu0 %v11877_v10  ;;  %v20470_v10 = vld [vmem:[#allocation36_spill] sm:$0xff] }
  0xb6   : > { %13703 = vmatprep.mubr.msk.f32.mxu1 %vm405_vm0, %v15736_v58  ;;  %13907 = vmatprep.subr.mxu1 %v15966_v16 }
  0xb7   : > { %13760 = vmatmul.mubr.msk.f32.gmra.mxu0 %vm405_vm0, %v15585_v43  ;;  %13963 = vmatprep.subr.mxu0 %v11952_v23  ;;  %v20448_v43 = vld [vmem:[#allocation14_spill] sm:$0xff] }
  0xb8   : > { %13762 = vmatprep.mubr.msk.f32.mxu0 %vm405_vm0, %v15589_v44  ;;  %v11913_v44 = vld [vmem:[%s20298_s1 + $0xe0] sm:$0xff] }
  0xb9   : > { %13704 = vmatmul.mubr.msk.f32.gmra.mxu1 %vm405_vm0, %v15749_v3 }
  0xba   : > { %13706 = vmatprep.mubr.msk.f32.mxu1 %vm405_vm0, %v15753_v4 }
  0xbb   : > { %13763 = vmatmul.mubr.msk.f32.gmra.mxu0 %vm405_vm0, %v15601_v46  ;;  %v20450_v46 = vld [vmem:[#allocation16_spill] sm:$0xff] }
  0xbc   : > { %13765 = vmatprep.mubr.msk.f32.mxu0 %vm405_vm0, %v15605_v48  ;;  %v20451_v48 = vld [vmem:[#allocation17_spill] sm:$0xff] }
  0xbd   : > { %13707 = vmatmul.mubr.msk.f32.gmra.mxu1 %vm405_vm0, %v15765_v12 }
  0xbe   : > { %13709 = vmatprep.mubr.msk.f32.mxu1 %vm405_vm0, %v15769_v14 }
  0xbf   : > { %13766 = vmatmul.mubr.msk.f32.gmra.mxu0 %vm405_vm0, %v15617_v51  ;;  %v20454_v51 = vld [vmem:[#allocation20_spill] sm:$0xff] }
  0xc0   : > { %13768 = vmatprep.mubr.msk.f32.mxu0 %vm405_vm0, %v15426_v18  ;;  %v16056_v18 = vld [vmem:[#allocation2 + $0x181] sm:$0xff] }
  0xc1   : > { %13710 = vmatmul.mubr.msk.f32.gmra.mxu1 %vm405_vm0, %v15781_v20 }
  0xc2   : > { %13712 = vmatprep.mubr.msk.f32.mxu1 %vm405_vm0, %v15785_v24 }
  0xc3   : > { %13769 = vmatmul.mubr.msk.f32.gmra.mxu0 %vm405_vm0, %v15439_v26  ;;  %v20443_v26 = vld [vmem:[#allocation9_spill] sm:$0xff] }
  0xc4   : > { %13771 = vmatprep.mubr.msk.f32.mxu0 %vm405_vm0, %v15456_v34  ;;  %v16062_v34 = vld [vmem:[#allocation2 + $0x180] sm:$0xff] }
  0xc5   : > { %13713 = vmatmul.mubr.msk.f32.gmra.mxu1 %vm405_vm0, %v15797_v9 }
  0xc6   : > { %13715 = vmatprep.mubr.msk.f32.mxu1 %vm405_vm0, %v15801_v17 }
  0xc7   : > { %13772 = vmatmul.mubr.msk.f32.gmra.mxu0 %vm405_vm0, %v15470_v41  ;;  %v16066_v41 = vld [vmem:[#allocation2 + $0x189] sm:$0xff] }
  0xc8   : > { %13774 = vmatprep.mubr.msk.f32.mxu0 %vm405_vm0, %v15494_v54  ;;  %v16072_v54 = vld [vmem:[#allocation2 + $0x188] sm:$0xff] }
  0xc9   : > { %13716 = vmatmul.mubr.msk.f32.gmra.mxu1 %vm405_vm0, %v15813_v63 }
  0xca   : > { %13718 = vmatprep.mubr.msk.f32.mxu1 %vm405_vm0, %v15817_v25 }
  0xcb   : > { %13775 = vmatmul.mubr.msk.f32.gmra.mxu0 %vm405_vm0, %v15511_v2  ;;  %v20444_v2 = vld [vmem:[#allocation10_spill] sm:$0xff] }
  0xcc   : > { %13777 = vmatprep.mubr.msk.f32.mxu0 %vm405_vm0, %v15526_v11  ;;  %v11951_v11 = vld [vmem:[%s20298_s1 + $0x110] sm:$0xff] }
  0xcd   : > { %13719 = vmatmul.mubr.msk.f32.gmra.mxu1 %vm405_vm0, %v15829_v55 }
  0xce   : > { %13721 = vmatprep.mubr.msk.f32.mxu1 %vm405_vm0, %v15833_v5 }
  0xcf   : > { %13778 = vmatmul.mubr.msk.f32.gmra.mxu0 %vm405_vm0, %v15554_v28  ;;  %v11915_v28 = vld [vmem:[%s20298_s1 + $0xf0] sm:$0xff] }
  0xd0   : > { %13780 = vmatprep.mubr.msk.f32.mxu0 %vm405_vm0, %v15559_v31  ;;  %v20445_v31 = vld [vmem:[#allocation11_spill] sm:$0xff] }
  0xd1   : > { %13722 = vmatmul.mubr.msk.f32.gmra.mxu1 %vm405_vm0, %v15845_v6 }
  0xd2   : > { %13724 = vmatprep.mubr.msk.f32.mxu1 %vm405_vm0, %v15849_v27 }
  0xd3   : > { %13781 = vmatmul.mubr.msk.f32.gmra.mxu0 %vm405_vm0, %v15577_v39  ;;  %v20447_v39 = vld [vmem:[#allocation13_spill] sm:$0xff] }
  0xd4   : > { %13783 = vmatprep.mubr.msk.f32.mxu0 %vm405_vm0, %v15581_v42  ;;  %v11950_v42 = vld [vmem:[%s20298_s1 + $0x108] sm:$0xff] }
  0xd5   : > { %13725 = vmatmul.mubr.msk.f32.gmra.mxu1 %vm405_vm0, %v15861_v13 }
  0xd6   : > { %13727 = vmatprep.mubr.msk.f32.mxu1 %vm405_vm0, %v15865_v7 }
  0xd7   : > { %13784 = vmatmul.mubr.msk.f32.gmra.mxu0 %vm405_vm0, %v15593_v21  ;;  %v20449_v21 = vld [vmem:[#allocation15_spill] sm:$0xff] }
  0xd8   : > { %13786 = vmatprep.mubr.msk.f32.mxu0 %vm405_vm0, %v15597_v45  ;;  %v11949_v45 = vld [vmem:[%s20298_s1 + $0x100] sm:$0xff] }
  0xd9   : > { %13728 = vmatmul.mubr.msk.f32.gmra.mxu1 %vm405_vm0, %v15877_v0 }
  0xda   : > { %13730 = vmatprep.mubr.msk.f32.mxu1 %vm405_vm0, %v15881_v59 }
  0xdb   : > { %13787 = vmatmul.mubr.msk.f32.gmra.mxu0 %vm405_vm0, %v15609_v49  ;;  %v20452_v49 = vld [vmem:[#allocation18_spill] sm:$0xff] }
  0xdc   : > { %13789 = vmatprep.mubr.msk.f32.mxu0 %vm405_vm0, %v15613_v50  ;;  %v20453_v50 = vld [vmem:[#allocation19_spill] sm:$0xff] }
  0xdd   : > { %13731 = vmatmul.mubr.msk.f32.gmra.mxu1 %vm405_vm0, %v15893_v57 }
  0xde   : > { %13733 = vmatprep.mubr.msk.f32.mxu1 %vm405_vm0, %v15897_v36 }
  0xdf   : > { %13790 = vmatmul.mubr.msk.f32.gmra.mxu0 %vm405_vm0, %v20443_v26  ;;  %v2910_v26 = vld [vmem:[#allocation2 + $0x198] sm:$0xff] }
  0xe0   : > { %13792 = vmatprep.mubr.msk.f32.mxu0 %vm405_vm0, %v16056_v18 }
  0xe1   : > { %13734 = vmatmul.mubr.msk.f32.gmra.mxu1 %vm405_vm0, %v15907_v53 }
  0xe2   : > { %13736 = vmatprep.mubr.msk.f32.mxu1 %vm405_vm0, %v16062_v34 }
  0xe3   : > { %13793 = vmatmul.mubr.msk.f32.gmra.mxu0 %vm405_vm0, %v16066_v41 }
  0xe4   : > { %13859 = vmatprep.mubr.msk.f32.mxu0 %vm405_vm0, %v15655_v1  ;;  %v20458_v1 = vld [vmem:[#allocation24_spill] sm:$0xff] }
  0xe5   : > { %13737 = vmatmul.mubr.msk.f32.gmra.mxu1 %vm405_vm0, %v16072_v54 }
  0xe6   : > { %13803 = vmatprep.mubr.msk.f32.mxu1 %vm405_vm0, %v20444_v2  ;;  %v20471_v2 = vld [vmem:[#allocation37_spill] sm:$0xff] }
  0xe7   : > { %13860 = vmatmul.mubr.msk.f32.vlgmr.msra.gmra.mxu0 %vm405_vm0, %v15679_v15 }
  0xe8   : > { %13964 = vmatpush3.msra.mxu0 %v11952_v23  ;;  %13862 = vmatprep.mubr.msk.f32.mxu0 %vm405_vm0, %v15685_v19  ;;  %v20459_v19 = vld [vmem:[#allocation25_spill] sm:$0xff] }
  0xe9   : > { %13804 = vmatmul.mubr.msk.f32.vlgmr.msra.gmra.mxu1 %vm405_vm0, %v20445_v31  ;;  %13965 = vmatprep.subr.mxu0 %v11951_v11 }
  0xea   : > { %13908 = vmatpush3.msra.mxu1 %v15966_v16  ;;  %13806 = vmatprep.mubr.msk.f32.mxu1 %vm405_vm0, %v20446_v37 }
  0xeb   : > { %13863 = vmatmul.mubr.msk.f32.gmra.mxu0 %vm405_vm0, %v15703_v29  ;;  %13909 = vmatprep.subr.mxu1 %v11915_v28  ;;  %v20460_v29 = vld [vmem:[#allocation26_spill] sm:$0xff] }
  0xec   : > { %13865 = vmatprep.mubr.msk.f32.mxu0 %vm405_vm0, %v15709_v30  ;;  %13910 = vmatpush3.msra.mxu1 %v11915_v28 }
  0xed   : > { %13807 = vmatmul.mubr.msk.f32.gmra.mxu1 %vm405_vm0, %v20447_v39  ;;  %13966 = vmatpush3.msra.mxu0 %v11951_v11 }
  0xee   : > { %13809 = vmatprep.mubr.msk.f32.mxu1 %vm405_vm0, %v20448_v43  ;;  %13911 = vmatprep.subr.mxu1 %v11914_v38 }
  0xef   : > { %13866 = vmatmul.mubr.msk.f32.gmra.mxu0 %vm405_vm0, %v15731_v56  ;;  %13912 = vmatpush3.msra.mxu1 %v11914_v38  ;;  %v20462_v56 = vld [vmem:[#allocation28_spill] sm:$0xff] }
  0xf0   : > { %13868 = vmatprep.mubr.msk.f32.mxu0 %vm405_vm0, %v15736_v58  ;;  %13967 = vmatprep.subr.mxu0 %v11950_v42  ;;  %v16276_v38 = vld [vmem:[#allocation2 + $0x18a] sm:$0xff] }
  0xf1   : > { %13810 = vmatmul.mubr.msk.f32.gmra.mxu1 %vm405_vm0, %v20449_v21  ;;  %13968 = vmatpush3.msra.mxu0 %v11950_v42 }
  0xf2   : > { %13812 = vmatprep.mubr.msk.f32.mxu1 %vm405_vm0, %v20450_v46  ;;  %13913 = vmatprep.subr.mxu1 %v11913_v44 }
  0xf3   : > { %13869 = vmatmul.mubr.msk.f32.gmra.mxu0 %vm405_vm0, %v15749_v3  ;;  %13914 = vmatpush3.msra.mxu1 %v11913_v44  ;;  %v20463_v3 = vld [vmem:[#allocation29_spill] sm:$0xff] }
  0xf4   : > { %13871 = vmatprep.mubr.msk.f32.mxu0 %vm405_vm0, %v15753_v4  ;;  %13969 = vmatprep.subr.mxu0 %v11949_v45  ;;  %v3270_v44 = vld [vmem:[#allocation2 + $0x31] sm:$0xff] }
  0xf5   : > { %13813 = vmatmul.mubr.msk.f32.gmra.mxu1 %vm405_vm0, %v20451_v48  ;;  %13970 = vmatpush3.msra.mxu0 %v11949_v45 }
  0xf6   : > { %13815 = vmatprep.mubr.msk.f32.mxu1 %vm405_vm0, %v20452_v49 }
  0xf7   : > { %13872 = vmatmul.mubr.msk.f32.gmra.mxu0 %vm405_vm0, %v15765_v12 }
  0xf8   : > { %13874 = vmatprep.mubr.msk.f32.mxu0 %vm405_vm0, %v15769_v14 }
  0xf9   : > { %13816 = vmatmul.mubr.msk.f32.gmra.mxu1 %vm405_vm0, %v20453_v50 }
  0xfa   : > { %13818 = vmatprep.mubr.msk.f32.mxu1 %vm405_vm0, %v20454_v51 }
  0xfb   : > { %13875 = vmatmul.mubr.msk.f32.gmra.mxu0 %vm405_vm0, %v15781_v20  ;;  %v20466_v20 = vld [vmem:[#allocation32_spill] sm:$0xff] }
  0xfc   : > { %13877 = vmatprep.mubr.msk.f32.mxu0 %vm405_vm0, %v15785_v24 }
  0xfd   : > { %13819 = vmatmul.mubr.msk.f32.gmra.mxu1 %vm405_vm0, %v20455_v60 }
  0xfe   : > { %13821 = vmatprep.mubr.msk.f32.mxu1 %vm405_vm0, %v20456_v62 }
  0xff   : > { %13878 = vmatmul.mubr.msk.f32.gmra.mxu0 %vm405_vm0, %v15797_v9  ;;  %v16159_v15 = vpop.f32.mrf.mxu0  ;;  %v20464_v9 = vld [vmem:[#allocation30_spill] sm:$0xff] }
 0x100   : > { %13880 = vmatprep.mubr.msk.f32.mxu0 %vm405_vm0, %v15801_v17  ;;  %v20465_v17 = vld [vmem:[#allocation31_spill] sm:$0xff] }
 0x101   : > { %13822 = vmatmul.mubr.msk.f32.gmra.mxu1 %vm405_vm0, %v20457_v32  ;;  %v16169_v30 = vpop.f32.mrf.mxu0  ;;  %v3271_v32 = vld [vmem:[#allocation2 + $0x39] sm:$0xff] }
 0x102   : > { %13824 = vmatprep.mubr.msk.f32.mxu1 %vm405_vm0, %v20458_v1 }
 0x103   : > { %13881 = vmatmul.mubr.msk.f32.gmra.mxu0 %vm405_vm0, %v15813_v63 }
 0x104   : > { %13883 = vmatprep.mubr.msk.f32.mxu0 %vm405_vm0, %v15817_v25 }
 0x105   : > { %13825 = vmatmul.mubr.msk.f32.gmra.mxu1 %vm405_vm0, %v20459_v19 }
 0x106   : > { %13827 = vmatprep.mubr.msk.f32.mxu1 %vm405_vm0, %v20460_v29  ;;  %v3272_v29 = vld [vmem:[#allocation2 + $0x49] sm:$0xff] }
 0x107   : > { %13884 = vmatmul.mubr.msk.f32.gmra.mxu0 %vm405_vm0, %v15829_v55 }
 0x108   : > { %13886 = vmatprep.mubr.msk.f32.mxu0 %vm405_vm0, %v15833_v5 }
 0x109   : > { %v16173_v35 = vpop.f32.mrf.mxu1  ;;  %13828 = vmatmul.mubr.msk.f32.gmra.mxu1 %vm405_vm0, %v20461_v52 }
 0x10a   : > { %13830 = vmatprep.mubr.msk.f32.mxu1 %vm405_vm0, %v20462_v56 }
 0x10b   : > { %v16179_v58 = vpop.f32.mrf.mxu1  ;;  %v16181_v63 = vpop.f32.mrf.mxu0  ;;  %13887 = vmatmul.mubr.msk.f32.gmra.mxu0 %vm405_vm0, %v15845_v6 }
 0x10c   : > { %13889 = vmatprep.mubr.msk.f32.mxu0 %vm405_vm0, %v15849_v27 }
 0x10d   : > { %v16187_v55 = vpop.f32.mrf.mxu1  ;;  %13831 = vmatmul.mubr.msk.f32.gmra.mxu1 %vm405_vm0, %v20463_v3  ;;  %v16191_v4 = vpop.f32.mrf.mxu0  ;;  %v3273_v3 = vld [vmem:[#allocation2 + $0x51] sm:$0xff] }
 0x10e   : > { %13833 = vmatprep.mubr.msk.f32.mxu1 %vm405_vm0, %v20464_v9 }
 0x10f   : > { %v16195_v12 = vpop.f32.mrf.mxu1  ;;  %v16197_v14 = vpop.f32.mrf.mxu0  ;;  %13890 = vmatmul.mubr.msk.f32.gmra.mxu0 %vm405_vm0, %v15861_v13 }
 0x110   : > { %13892 = vmatprep.mubr.msk.f32.mxu0 %vm405_vm0, %v15865_v7  ;;  %v20467_v7 = vld [vmem:[#allocation33_spill] sm:$0xff] }
 0x111   : > { %v16203_v6 = vpop.f32.mrf.mxu1  ;;  %13834 = vmatmul.mubr.msk.f32.gmra.mxu1 %vm405_vm0, %v20465_v17  ;;  %v16207_v5 = vpop.f32.mrf.mxu0 }
 0x112   : > { %13836 = vmatprep.mubr.msk.f32.mxu1 %vm405_vm0, %v20466_v20  ;;  %v3274_v20 = vld [vmem:[#allocation2 + $0x61] sm:$0xff] }
 0x113   : > { %v16211_v24 = vpop.f32.mrf.mxu1  ;;  %v16213_v25 = vpop.f32.mrf.mxu0  ;;  %13893 = vmatmul.mubr.msk.f32.gmra.mxu0 %vm405_vm0, %v15877_v0 }
 0x114   : > { %13895 = vmatprep.mubr.msk.f32.mxu0 %vm405_vm0, %v15881_v59  ;;  %v20469_v59 = vld [vmem:[#allocation35_spill] sm:$0xff] }
 0x115   : > { %v16219_v13 = vpop.f32.mrf.mxu1  ;;  %13837 = vmatmul.mubr.msk.f32.gmra.mxu1 %vm405_vm0, %v20467_v7  ;;  %v16223_v27 = vpop.f32.mrf.mxu0 }
 0x116   : > { %13839 = vmatprep.mubr.msk.f32.mxu1 %vm405_vm0, %v20468_v33 }
 0x117   : > { %v16227_v40 = vpop.f32.mrf.mxu1  ;;  %v16229_v47 = vpop.f32.mrf.mxu0  ;;  %13896 = vmatmul.mubr.msk.f32.gmra.mxu0 %vm405_vm0, %v15893_v57 }
 0x118   : > { %13898 = vmatprep.mubr.msk.f32.mxu0 %vm405_vm0, %v15897_v36 }
 0x119   : > { %v16235_v0 = vpop.f32.mrf.mxu1  ;;  %13840 = vmatmul.mubr.msk.f32.gmra.mxu1 %vm405_vm0, %v20469_v59  ;;  %v16239_v61 = vpop.f32.mrf.mxu0 }
 0x11a   : > { %13842 = vmatprep.mubr.msk.f32.mxu1 %vm405_vm0, %v20470_v10  ;;  %v3275_v10 = vld [vmem:[#allocation2 + $0x69] sm:$0xff] }
 0x11b   : > { %v16243_v16 = vpop.f32.mrf.mxu1  ;;  %v16245_v23 = vpop.f32.mrf.mxu0  ;;  %13899 = vmatmul.mubr.msk.f32.gmra.mxu0 %vm405_vm0, %v15907_v53  ;;  %v16265_v53 = vld [vmem:[#allocation2 + $0x182] sm:$0xff] }
 0x11c   : > { %13901 = vmatprep.mubr.msk.f32.mxu0 %vm405_vm0, %v16062_v34  ;;  %v2911_v34 = vld [vmem:[#allocation2 + $0x1a0] sm:$0xff] }
 0x11d   : > { %v16251_v57 = vpop.f32.mrf.mxu1  ;;  %13843 = vmatmul.mubr.msk.f32.gmra.mxu1 %vm405_vm0, %v15885_v22  ;;  %v16255_v36 = vpop.f32.mrf.mxu0 }
 0x11e   : > { %13845 = vmatprep.mubr.msk.f32.mxu1 %vm405_vm0, %v20471_v2 }
 0x11f   : > { %v16259_v11 = vpop.f32.mrf.mxu1  ;;  %v16261_v28 = vpop.f32.mrf.mxu0  ;;  %13902 = vmatmul.mubr.msk.f32.gmra.mxu0 %vm405_vm0, %v16072_v54 }
 0x120   : > { %13904 = vmatprep.mubr.msk.f32.mxu0 %vm405_vm0, %v2910_v26 }
 0x121   : > { %v16268_v31 = vpop.f32.mrf.mxu1  ;;  %13846 = vmatmul.mubr.msk.f32.gmra.mxu1 %vm405_vm0, %v15901_v8  ;;  %v16272_v22 = vpop.f32.mrf.mxu0 }
 0x122   : > { %13848 = vmatprep.mubr.msk.f32.mxu1 %vm405_vm0, %v16265_v53 }
 0x123   : > { %v16278_v42 = vpop.f32.mrf.mxu1  ;;  %v16280_v54 = vpop.f32.mrf.mxu0  ;;  %13905 = vmatmul.mubr.msk.f32.gmra.mxu0 %vm405_vm0, %v2911_v34 }
 0x124   : > { %13971 = vmatprep.mubr.msk.f32.mxu0 %vm405_vm0, %v20446_v37 }
 0x125   : > { %v16285_v45 = vpop.f32.mrf.mxu1  ;;  %13849 = vmatmul.mubr.msk.f32.gmra.mxu1 %vm405_vm0, %v16276_v38  ;;  %v16289_v8 = vpop.f32.mrf.mxu0 }
 0x126   : > { %13915 = vmatprep.mubr.msk.f32.mxu1 %vm405_vm0, %v3270_v44 }
 0x127   : > { %v16292_v1 = vpop.f32.mrf.mxu1  ;;  %v13637_v19 = vpop.f32.mrf.mxu0  ;;  %13972 = vmatmul.mubr.msk.f32.vlgmr.msra.gmra.mxu0 %vm405_vm0, %v20447_v39 }
 0x128   : > { %13974 = vmatprep.mubr.msk.f32.mxu0 %vm405_vm0, %v20448_v43 }
 0x129   : > { %v13581_v37 = vpop.f32.mrf.mxu1  ;;  %13916 = vmatmul.mubr.msk.f32.vlgmr.msra.gmra.mxu1 %vm405_vm0, %v3271_v32  ;;  %v1518_v52 = vpop.f32.mrf.mxu0 }
 0x12a   : > { %v1166_v56 = vadd.f32 %v13581_v37, %v16159_v15  ;;  %13918 = vmatprep.mubr.msk.f32.mxu1 %vm405_vm0, %v3272_v29 }
 0x12b   : > { %v1160_v9 = vpop.f32.mrf.mxu1  ;;  %v13640_v17 = vpop.f32.mrf.mxu0  ;;  %13975 = vmatmul.mubr.msk.f32.gmra.mxu0 %vm405_vm0, %v20449_v21 }
 0x12c   : > { %v16303_v39 = vadd.f32 %v13637_v19, %v1166_v56  ;;  %v1161_v7 = vadd.f32 %v1160_v9, %v16169_v30  ;;  %13977 = vmatprep.mubr.msk.f32.mxu0 %vm405_vm0, %v20450_v46  ;;  %v3276_v30 = vld [vmem:[#allocation2 + $0x79] sm:$0xff]  ;;  %v3277_v19 = vld [vmem:[#allocation2 + $0x81] sm:$0xff] }
 0x12d   : > { %v13584_v43 = vpop.f32.mrf.mxu1  ;;  %13919 = vmatmul.mubr.msk.f32.gmra.mxu1 %vm405_vm0, %v3273_v3  ;;  %v1528_v15 = vpop.f32.mrf.mxu0  ;;  %v3279_v9 = vld [vmem:[#allocation2 + $0x99] sm:$0xff] }
 0x12e   : > { %v16309_v33 = vadd.f32 %v1518_v52, %v1161_v7  ;;  %v1176_v59 = vadd.f32 %v13584_v43, %v16181_v63  ;;  %13921 = vmatprep.mubr.msk.f32.mxu1 %vm405_vm0, %v3274_v20  ;;  %v3671_v7 = vld [vmem:[#allocation2 + $0xb2] sm:$0xff] }
 0x12f   : > { %v1170_v21 = vpop.f32.mrf.mxu1  ;;  %v13643_v26 = vpop.f32.mrf.mxu0  ;;  %13978 = vmatmul.mubr.msk.f32.gmra.mxu0 %vm405_vm0, %v20451_v48 }
 0x130   : > { %v16315_v2 = vadd.f32 %v13640_v17, %v1176_v59  ;;  %v1171_v46 = vadd.f32 %v1170_v21, %v16191_v4  ;;  %13980 = vmatprep.mubr.msk.f32.mxu0 %vm405_vm0, %v20452_v49  ;;  %v3278_v4 = vld [vmem:[#allocation2 + $0x91] sm:$0xff] }
 0x131   : > { %v13587_v34 = vpop.f32.mrf.mxu1  ;;  %13922 = vmatmul.mubr.msk.f32.gmra.mxu1 %vm405_vm0, %v3275_v10  ;;  %v1538_v63 = vpop.f32.mrf.mxu0 }
 0x132   : > { %v16321_v44 = vadd.f32 %v1528_v15, %v1171_v46  ;;  %v1186_v32 = vadd.f32 %v13587_v34, %v16197_v14  ;;  %13924 = vmatprep.mubr.msk.f32.mxu1 %vm405_vm0, %v3276_v30  ;;  %v3672_v15 = vld [vmem:[#allocation2 + $0xc2] sm:$0xff]  ;;  %v3673_v46 = vld [vmem:[#allocation2 + $0xca] sm:$0xff]  ;;  %v11988_v34 = vld [vmem:[%s20299_s2 + $0x18] sm:$0xff] }
 0x133   : > { %v1180_v48 = vpop.f32.mrf.mxu1  ;;  %v13646_v29 = vpop.f32.mrf.mxu0  ;;  %13981 = vmatmul.mubr.msk.f32.gmra.mxu0 %vm405_vm0, %v20453_v50  ;;  %14019 = vmatprep.subr.mxu1 %v11988_v34 }
 0x134   : > { %v16327_v37 = vadd.f32 %v13643_v26, %v1186_v32  ;;  %v1181_v49 = vadd.f32 %v1180_v48, %v16207_v5  ;;  %13983 = vmatprep.mubr.msk.f32.mxu0 %vm405_vm0, %v20454_v51  ;;  %v3280_v5 = vld [vmem:[#allocation2 + $0xa9] sm:$0xff]  ;;  %v3674_v32 = vld [vmem:[#allocation2 + $0xda] sm:$0xff]  ;;  %14020 = vmatpush3.msra.mxu1 %v11988_v34 }
 0x135   : > { %v13590_v52 = vpop.f32.mrf.mxu1  ;;  %13925 = vmatmul.mubr.msk.f32.gmra.mxu1 %vm405_vm0, %v3277_v19  ;;  %v1548_v14 = vpop.f32.mrf.mxu0 }
 0x136   : > { %v16333_v56 = vadd.f32 %v1538_v63, %v1181_v49  ;;  %v1196_v3 = vadd.f32 %v13590_v52, %v16213_v25  ;;  %13927 = vmatprep.mubr.msk.f32.mxu1 %vm405_vm0, %v3278_v4  ;;  %v3284_v49 = vld [vmem:[#allocation2 + $0xd9] sm:$0xff] }
 0x137   : > { %v1190_v50 = vpop.f32.mrf.mxu1  ;;  %v13649_v17 = vpop.f32.mrf.mxu0  ;;  %13984 = vmatmul.mubr.msk.f32.gmra.mxu0 %vm405_vm0, %v20455_v60  ;;  %v3281_v60 = vld [vmem:[#allocation2 + $0xb1] sm:$0xff] }
 0x138   : > { %v16339_v20 = vadd.f32 %v13646_v29, %v1196_v3  ;;  %v1191_v51 = vadd.f32 %v1190_v50, %v16223_v27  ;;  %13986 = vmatprep.mubr.msk.f32.mxu0 %vm405_vm0, %v20456_v62  ;;  %v3282_v27 = vld [vmem:[#allocation2 + $0xc1] sm:$0xff]  ;;  %v3676_v50 = vld [vmem:[#allocation2 + $0xf2] sm:$0xff] }
 0x139   : > { %v13593_v43 = vpop.f32.mrf.mxu1  ;;  %13928 = vmatmul.mubr.msk.f32.gmra.mxu1 %vm405_vm0, %v3279_v9  ;;  %v1558_v25 = vpop.f32.mrf.mxu0  ;;  %v3675_v3 = vld [vmem:[#allocation2 + $0xe2] sm:$0xff] }
 0x13a   : > { %v16345_v59 = vadd.f32 %v1548_v14, %v1191_v51  ;;  %v1206_v10 = vadd.f32 %v13593_v43, %v16229_v47  ;;  %13930 = vmatprep.mubr.msk.f32.mxu1 %vm405_vm0, %v3280_v5  ;;  %v3285_v51 = vld [vmem:[#allocation2 + $0xe1] sm:$0xff] }
 0x13b   : > { %v1200_v21 = vpop.f32.mrf.mxu1  ;;  %v13652_v26 = vpop.f32.mrf.mxu0  ;;  %13987 = vmatmul.mubr.msk.f32.gmra.mxu0 %vm405_vm0, %v3671_v7 }
 0x13c   : > { %v16350_v30 = vadd.f32 %v13649_v17, %v1206_v10  ;;  %v1201_v62 = vadd.f32 %v1200_v21, %v16239_v61  ;;  %13989 = vmatprep.mubr.msk.f32.mxu0 %vm405_vm0, %v3672_v15  ;;  %v3283_v61 = vld [vmem:[#allocation2 + $0xc9] sm:$0xff]  ;;  %v3677_v10 = vld [vmem:[#allocation2 + $0xfa] sm:$0xff] }
 0x13d   : > { %v13596_v47 = vpop.f32.mrf.mxu1  ;;  %13931 = vmatmul.mubr.msk.f32.gmra.mxu1 %vm405_vm0, %v3281_v60  ;;  %v1568_v63 = vpop.f32.mrf.mxu0 }
 0x13e   : > { %v16358_v19 = vadd.f32 %v1558_v25, %v1201_v62  ;;  %v1216_v48 = vadd.f32 %v13596_v47, %v16245_v23  ;;  %13933 = vmatprep.mubr.msk.f32.mxu1 %vm405_vm0, %v3282_v27  ;;  %v3287_v62 = vld [vmem:[#allocation2 + $0xf9] sm:$0xff] }
 0x13f   : > { %v1210_v29 = vpop.f32.mrf.mxu1  ;;  %v13655_v4 = vpop.f32.mrf.mxu0  ;;  %13990 = vmatmul.mubr.msk.f32.gmra.mxu0 %vm405_vm0, %v3673_v46 }
 0x140   : > { %v16363_v52 = vadd.f32 %v13652_v26, %v1216_v48  ;;  %v1211_v14 = vadd.f32 %v1210_v29, %v16255_v36  ;;  %13992 = vmatprep.mubr.msk.f32.mxu0 %vm405_vm0, %v3674_v32  ;;  %v3286_v36 = vld [vmem:[#allocation2 + $0xf1] sm:$0xff] }
 0x141   : > { %v13599_v9 = vpop.f32.mrf.mxu1  ;;  %13934 = vmatmul.mubr.msk.f32.gmra.mxu1 %vm405_vm0, %v3283_v61  ;;  %v1578_v23 = vpop.f32.mrf.mxu0  ;;  %v3679_v32 = vld [vmem:[#allocation2 + $0x112] sm:$0xff] }
 0x142   : > { %v16368_v17 = vadd.f32 %v1568_v63, %v1211_v14  ;;  %v1226_v5 = vadd.f32 %v13599_v9, %v16261_v28  ;;  %13936 = vmatprep.mubr.msk.f32.mxu1 %vm405_vm0, %v3284_v49  ;;  %v3678_v28 = vld [vmem:[#allocation2 + $0x10a] sm:$0xff] }
 0x143   : > { %v1220_v7 = vpop.f32.mrf.mxu1  ;;  %v13658_v43 = vpop.f32.mrf.mxu0  ;;  %13993 = vmatmul.mubr.msk.f32.gmra.mxu0 %vm405_vm0, %v3675_v3  ;;  %v3289_v49 = vld [vmem:[#allocation2 + $0x111] sm:$0xff] }
 0x144   : > { %v16373_v25 = vadd.f32 %v13655_v4, %v1226_v5  ;;  %v1221_v15 = vadd.f32 %v1220_v7, %v16272_v22  ;;  %13995 = vmatprep.mubr.msk.f32.mxu0 %vm405_vm0, %v3676_v50  ;;  %v3288_v22 = vld [vmem:[#allocation2 + $0x109] sm:$0xff] }
 0x145   : > { %v13602_v60 = vpop.f32.mrf.mxu1  ;;  %13937 = vmatmul.mubr.msk.f32.gmra.mxu1 %vm405_vm0, %v3285_v51  ;;  %v1588_v21 = vpop.f32.mrf.mxu0  ;;  %v3681_v50 = vld [vmem:[#allocation2 + $0x12a] sm:$0xff] }
 0x146   : > { %v16378_v26 = vadd.f32 %v1578_v23, %v1221_v15  ;;  %v1236_v27 = vadd.f32 %v13602_v60, %v16280_v54  ;;  %13939 = vmatprep.mubr.msk.f32.mxu1 %vm405_vm0, %v3286_v36  ;;  %v3680_v54 = vld [vmem:[#allocation2 + $0x122] sm:$0xff] }
 0x147   : > { %v1230_v46 = vpop.f32.mrf.mxu1  ;;  %v13661_v34 = vpop.f32.mrf.mxu0  ;;  %13996 = vmatmul.mubr.msk.f32.gmra.mxu0 %vm405_vm0, %v3677_v10  ;;  %v3291_v36 = vld [vmem:[#allocation2 + $0x129] sm:$0xff] }
 0x148   : > { %v16383_v47 = vadd.f32 %v13658_v43, %v1236_v27  ;;  %v1231_v63 = vadd.f32 %v1230_v46, %v16289_v8  ;;  %13998 = vmatprep.mubr.msk.f32.mxu0 %vm405_vm0, %v3678_v28  ;;  %v3290_v8 = vld [vmem:[#allocation2 + $0x121] sm:$0xff] }
 0x149   : > { %v13605_v48 = vpop.f32.mrf.mxu1  ;;  %13940 = vmatmul.mubr.msk.f32.gmra.mxu1 %vm405_vm0, %v3287_v62  ;;  %v1598_v61 = vpop.f32.mrf.mxu0  ;;  %v3293_v46 = vld [vmem:[#allocation2 + $0x141] sm:$0xff] }
 0x14a   : > { %v16388_v29 = vadd.f32 %v1588_v21, %v1231_v63  ;;  %v1246_v4 = vadd.f32 %v13605_v48, %v16173_v35  ;;  %13942 = vmatprep.mubr.msk.f32.mxu1 %vm405_vm0, %v3288_v22  ;;  %v3682_v35 = vld [vmem:[#allocation2 + $0x13a] sm:$0xff]  ;;  %v3683_v21 = vld [vmem:[#allocation2 + $0x142] sm:$0xff]  ;;  %v3294_v63 = vld [vmem:[#allocation2 + $0x151] sm:$0xff] }
 0x14b   : > { %v1240_v14 = vpop.f32.mrf.mxu1  ;;  %v13664_v3 = vpop.f32.mrf.mxu0  ;;  %13999 = vmatmul.mubr.msk.f32.gmra.mxu0 %vm405_vm0, %v3679_v32  ;;  %v3685_v48 = vld [vmem:[#allocation2 + $0x15a] sm:$0xff] }
 0x14c   : > { %20472 = vst [vmem:[#allocation9_spill] sm:$0xff] %v16388_v29  ;;  %v16393_v9 = vadd.f32 %v13661_v34, %v1246_v4  ;;  %v1241_v23 = vadd.f32 %v1240_v14, %v16179_v58  ;;  %14001 = vmatprep.mubr.msk.f32.mxu0 %vm405_vm0, %v3680_v54  ;;  %v3292_v58 = vld [vmem:[#allocation2 + $0x139] sm:$0xff] }
 0x14d   : > { %v13608_v5 = vpop.f32.mrf.mxu1  ;;  %13943 = vmatmul.mubr.msk.f32.gmra.mxu1 %vm405_vm0, %v3289_v49  ;;  %v16398_v51 = vpop.f32.mrf.mxu0  ;;  %v3295_v49 = vld [vmem:[#allocation2 + $0x159] sm:$0xff] }
 0x14e   : > { %v16400_v7 = vadd.f32 %v1598_v61, %v1241_v23  ;;  %v1256_v43 = vadd.f32 %v13608_v5, %v16187_v55  ;;  %13945 = vmatprep.mubr.msk.f32.mxu1 %vm405_vm0, %v3290_v8  ;;  %v3684_v55 = vld [vmem:[#allocation2 + $0x152] sm:$0xff]  ;;  %v3296_v8 = vld [vmem:[#allocation2 + $0x169] sm:$0xff] }
 0x14f   : > { %v16404_v15 = vpop.f32.mrf.mxu1  ;;  %v13667_v10 = vpop.f32.mrf.mxu0  ;;  %14002 = vmatmul.mubr.msk.f32.gmra.mxu0 %vm405_vm0, %v3681_v50  ;;  %v3687_v50 = vld [vmem:[#allocation2 + $0x172] sm:$0xff] }
 0x150   : > { %20473 = vst [vmem:[#allocation10_spill] sm:$0xff] %v16400_v7  ;;  %v16407_v60 = vadd.f32 %v13664_v3, %v1256_v43  ;;  %14004 = vmatprep.mubr.msk.f32.mxu0 %vm405_vm0, %v3682_v35  ;;  %v3297_v43 = vld [vmem:[#allocation2 + $0x171] sm:$0xff] }
 0x151   : > { %v13611_v28 = vpop.f32.mrf.mxu1  ;;  %13946 = vmatmul.mubr.msk.f32.gmra.mxu1 %vm405_vm0, %v3291_v36  ;;  %v16411_v27 = vpop.f32.mrf.mxu0 }
 0x152   : > { %v1266_v62 = vadd.f32 %v13611_v28, %v16203_v6  ;;  %13948 = vmatprep.mubr.msk.f32.mxu1 %vm405_vm0, %v3292_v58  ;;  %v3686_v6 = vld [vmem:[#allocation2 + $0x16a] sm:$0xff] }
 0x153   : > { %v16415_v34 = vpop.f32.mrf.mxu1  ;;  %v13670_v22 = vpop.f32.mrf.mxu0  ;;  %14005 = vmatmul.mubr.msk.f32.gmra.mxu0 %vm405_vm0, %v3683_v21  ;;  %v11987_v21 = vld [vmem:[%s20299_s2 + $0x10] sm:$0xff] }
 0x154   : > { %v16418_v32 = vadd.f32 %v13667_v10, %v1266_v62  ;;  %14007 = vmatprep.mubr.msk.f32.mxu0 %vm405_vm0, %v3684_v55  ;;  %v3690_v55 = vld [vmem:[#allocation2 + $0x19a] sm:$0xff]  ;;  %14021 = vmatprep.subr.mxu1 %v11987_v21 }
 0x155   : > { %v13614_v61 = vpop.f32.mrf.mxu1  ;;  %13949 = vmatmul.mubr.msk.f32.gmra.mxu1 %vm405_vm0, %v3293_v46  ;;  %v16422_v54 = vpop.f32.mrf.mxu0 }
 0x156   : > { %v1276_v4 = vadd.f32 %v13614_v61, %v16219_v13  ;;  %13951 = vmatprep.mubr.msk.f32.mxu1 %vm405_vm0, %v3294_v63  ;;  %14022 = vmatpush3.msra.mxu1 %v11987_v21 }
 0x157   : > { %v16426_v14 = vpop.f32.mrf.mxu1  ;;  %v13673_v3 = vpop.f32.mrf.mxu0  ;;  %14008 = vmatmul.mubr.msk.f32.gmra.mxu0 %vm405_vm0, %v3685_v48  ;;  %v3691_v48 = vld [vmem:[#allocation2 + $0x1a2] sm:$0xff] }
 0x158   : > { %v16429_v23 = vadd.f32 %v13670_v22, %v1276_v4  ;;  %14010 = vmatprep.mubr.msk.f32.mxu0 %vm405_vm0, %v3686_v6  ;;  %v3300_v22 = vld [vmem:[#allocation2 + $0x199] sm:$0xff]  ;;  %v3301_v6 = vld [vmem:[#allocation2 + $0x1a1] sm:$0xff] }
 0x159   : > { %v13617_v5 = vpop.f32.mrf.mxu1  ;;  %13952 = vmatmul.mubr.msk.f32.gmra.mxu1 %vm405_vm0, %v3295_v49  ;;  %v16433_v35 = vpop.f32.mrf.mxu0 }
 0x15a   : > { %v1286_v13 = vadd.f32 %v13617_v5, %v16235_v0  ;;  %13954 = vmatprep.mubr.msk.f32.mxu1 %vm405_vm0, %v3296_v8 }
 0x15b   : > { %v16437_v36 = vpop.f32.mrf.mxu1  ;;  %v13676_v10 = vpop.f32.mrf.mxu0  ;;  %14011 = vmatmul.mubr.msk.f32.gmra.mxu0 %vm405_vm0, %v3687_v50 }
 0x15c   : > { %v16440_v58 = vadd.f32 %v13673_v3, %v1286_v13  ;;  %14013 = vmatprep.mubr.msk.f32.mxu0 %vm405_vm0, %v16265_v53 }
 0x15d   : > { %v13620_v28 = vpop.f32.mrf.mxu1  ;;  %13955 = vmatmul.mubr.msk.f32.gmra.mxu1 %vm405_vm0, %v3297_v43  ;;  %v16448_v0 = vpop.f32.mrf.mxu0 }
 0x15e   : > { %v1296_v62 = vadd.f32 %v13620_v28, %v16251_v57  ;;  %13957 = vmatprep.mubr.msk.f32.mxu1 %vm405_vm0, %v16056_v18 }
 0x15f   : > { %v16453_v46 = vpop.f32.mrf.mxu1  ;;  %v13679_v53 = vpop.f32.mrf.mxu0  ;;  %14014 = vmatmul.mubr.msk.f32.gmra.mxu0 %vm405_vm0, %v16276_v38 }
 0x160   : > { %v16457_v63 = vadd.f32 %v13676_v10, %v1296_v62  ;;  %14016 = vmatprep.mubr.msk.f32.mxu0 %vm405_vm0, %v3690_v55 }
 0x161   : > { %v13623_v61 = vpop.f32.mrf.mxu1  ;;  %13958 = vmatmul.mubr.msk.f32.gmra.mxu1 %vm405_vm0, %v16066_v41  ;;  %v16462_v57 = vpop.f32.mrf.mxu0 }
 0x162   : > { %v1306_v18 = vadd.f32 %v13623_v61, %v16268_v31  ;;  %13960 = vmatprep.mubr.msk.f32.mxu1 %vm405_vm0, %v3300_v22 }
 0x163   : > { %v16466_v4 = vpop.f32.mrf.mxu1  ;;  %v13682_v38 = vpop.f32.mrf.mxu0  ;;  %14017 = vmatmul.mubr.msk.f32.gmra.mxu0 %vm405_vm0, %v3691_v48 }
 0x164   : > { %v16469_v49 = vadd.f32 %v13679_v53, %v1306_v18 }
 0x165   : > { %v13626_v3 = vpop.f32.mrf.mxu1  ;;  %13961 = vmatmul.mubr.msk.f32.gmra.mxu1 %vm405_vm0, %v3301_v6  ;;  %v16472_v8 = vpop.f32.mrf.mxu0 }
 0x166   : > { %20474 = vst [vmem:[#allocation11_spill] sm:$0xff] %v16472_v8  ;;  %v1316_v41 = vadd.f32 %v13626_v3, %v16285_v45 }
 0x167   : > { %v16475_v50 = vpop.f32.mrf.mxu1  ;;  %v13749_v31 = vpop.f32.mrf.mxu0 }
 0x168   : > { %v16477_v5 = vadd.f32 %v13682_v38, %v1316_v41 }
 0x169   : > { %v13693_v13 = vpop.f32.mrf.mxu1  ;;  %v16479_v43 = vpop.f32.mrf.mxu0 }
 0x16a   : > { %v2068_v10 = vadd.f32 %v13693_v13, %v16303_v39 }
 0x16b   : > { %v16482_v21 = vpop.f32.mrf.mxu1  ;;  %v13752_v28 = vpop.f32.mrf.mxu0 }
 0x16c   : > { %v16484_v55 = vadd.f32 %v13749_v31, %v2068_v10 }
 0x16d   : > { %v13696_v62 = vpop.f32.mrf.mxu1  ;;  %v16486_v53 = vpop.f32.mrf.mxu0 }
 0x16e   : > { %v2070_v45 = vadd.f32 %v13696_v62, %v16315_v2  ;;  %v4226_v2 = vld [vmem:[%s20299_s2 + $0x8] sm:$0xff] }
 0x16f   : > { %v16489_v22 = vpop.f32.mrf.mxu1  ;;  %v13755_v48 = vpop.f32.mrf.mxu0  ;;  %14071 = vmatprep.subr.mxu0 %v4226_v2 }
 0x170   : > { %v16491_v61 = vadd.f32 %v13752_v28, %v2070_v45  ;;  %14072 = vmatpush3.msra.mxu0 %v4226_v2 }
 0x171   : > { %v13699_v18 = vpop.f32.mrf.mxu1  ;;  %v16493_v6 = vpop.f32.mrf.mxu0 }
 0x172   : > { %v2072_v39 = vadd.f32 %v13699_v18, %v16327_v37  ;;  %v4225_v37 = vld [vmem:[%s20299_s2] sm:$0xff] }
 0x173   : > { %v16496_v38 = vpop.f32.mrf.mxu1  ;;  %v13758_v3 = vpop.f32.mrf.mxu0  ;;  %14073 = vmatprep.subr.mxu0 %v4225_v37  ;;  %v4193_v18 = vld [vmem:[#allocation2] sm:$0xff] }
 0x174   : > { %v16498_v41 = vadd.f32 %v13755_v48, %v2072_v39  ;;  %v4227_v48 = vld [vmem:[#allocation2 + $0x1] sm:$0xff]  ;;  %14074 = vmatpush3.msra.mxu0 %v4225_v37  ;;  %14075 = vmatprep.mubr.msk.f32.mxu0 %vm4160_vm2, %v4193_v18 }
 0x175   : > { %v13702_v31 = vpop.f32.mrf.mxu1  ;;  %v16500_v13 = vpop.f32.mrf.mxu0  ;;  %14023 = vmatprep.mubr.msk.f32.mxu1 %vm4160_vm2, %v4227_v48 }
 0x176   : > { %20475 = vst [vmem:[#allocation12_spill] sm:$0xff] %v16498_v41  ;;  %v2074_v10 = vadd.f32 %v13702_v31, %v16339_v20  ;;  %v4228_v20 = vld [vmem:[#allocation2 + $0x9] sm:$0xff] }
 0x177   : > { %v16506_v28 = vpop.f32.mrf.mxu1  ;;  %v13761_v62 = vpop.f32.mrf.mxu0  ;;  %v4194_v31 = vld [vmem:[#allocation2 + $0x8] sm:$0xff]  ;;  %14024 = vmatmul.mubr.msk.f32.vlgmr.msra.gmra.mxu1 %vm4160_vm2, %v4228_v20 }
 0x178   : > { %v16511_v45 = vadd.f32 %v13758_v3, %v2074_v10  ;;  %14076 = vmatmul.mubr.msk.f32.vlgmr.msra.gmra.mxu0 %vm4160_vm2, %v4194_v31 }
 0x179   : > { %v13705_v39 = vpop.f32.mrf.mxu1  ;;  %v16513_v8 = vpop.f32.mrf.mxu0 }
 0x17a   : > { %20476 = vst [vmem:[#allocation13_spill] sm:$0xff] %v16511_v45  ;;  %20477 = vst [vmem:[#allocation14_spill] sm:$0xff] %v16513_v8  ;;  %v2076_v2 = vadd.f32 %v13705_v39, %v16350_v30 }
 0x17b   : > { %v16519_v3 = vpop.f32.mrf.mxu1  ;;  %v13764_v10 = vpop.f32.mrf.mxu0 }
 0x17c   : > { %v16522_v7 = vadd.f32 %v13761_v62, %v2076_v2  ;;  %v12054_v2 = vld [vmem:[%s20299_s2 + $0x28] sm:$0xff] }
 0x17d   : > { %v13708_v45 = vpop.f32.mrf.mxu1  ;;  %v16524_v29 = vpop.f32.mrf.mxu0  ;;  %14123 = vmatprep.subr.mxu1 %v12054_v2 }
 0x17e   : > { %20478 = vst [vmem:[#allocation15_spill] sm:$0xff] %v16522_v7  ;;  %20479 = vst [vmem:[#allocation16_spill] sm:$0xff] %v16524_v29  ;;  %v2078_v37 = vadd.f32 %v13708_v45, %v16363_v52  ;;  %14124 = vmatpush3.msra.mxu1 %v12054_v2 }
 0x17f   : > { %v16527_v48 = vpop.f32.mrf.mxu1  ;;  %v13767_v8 = vpop.f32.mrf.mxu0 }
 0x180   : > { %v16529_v30 = vadd.f32 %v13764_v10, %v2078_v37 }
 0x181   : > { %v13711_v18 = vpop.f32.mrf.mxu1  ;;  %v16531_v39 = vpop.f32.mrf.mxu0 }
 0x182   : > { %20480 = vst [vmem:[#allocation17_spill] sm:$0xff] %v16529_v30  ;;  %20481 = vst [vmem:[#allocation18_spill] sm:$0xff] %v16531_v39  ;;  %v2080_v20 = vadd.f32 %v13711_v18, %v16373_v25 }
 0x183   : > { %v16534_v41 = vpop.f32.mrf.mxu1  ;;  %v13770_v31 = vpop.f32.mrf.mxu0 }
 0x184   : > { %v16536_v62 = vadd.f32 %v13767_v8, %v2080_v20 }
 0x185   : > { %v13714_v52 = vpop.f32.mrf.mxu1  ;;  %v16541_v45 = vpop.f32.mrf.mxu0 }
 0x186   : > { %20482 = vst [vmem:[#allocation19_spill] sm:$0xff] %v16536_v62  ;;  %20483 = vst [vmem:[#allocation20_spill] sm:$0xff] %v16541_v45  ;;  %v2082_v10 = vadd.f32 %v13714_v52, %v16383_v47 }
 0x187   : > { %v16544_v37 = vpop.f32.mrf.mxu1  ;;  %v13773_v30 = vpop.f32.mrf.mxu0 }
 0x188   : > { %v16546_v25 = vadd.f32 %v13770_v31, %v2082_v10 }
 0x189   : > { %v13717_v18 = vpop.f32.mrf.mxu1  ;;  %v16548_v7 = vpop.f32.mrf.mxu0 }
 0x18a   : > { %20484 = vst [vmem:[#allocation21_spill] sm:$0xff] %v16546_v25  ;;  %20485 = vst [vmem:[#allocation22_spill] sm:$0xff] %v16548_v7  ;;  %v2084_v8 = vadd.f32 %v13717_v18, %v16393_v9 }
 0x18b   : > { %v16551_v20 = vpop.f32.mrf.mxu1  ;;  %v13776_v62 = vpop.f32.mrf.mxu0 }
 0x18c   : > { %20486 = vst [vmem:[#allocation23_spill] sm:$0xff] %v16551_v20  ;;  %v16553_v39 = vadd.f32 %v13773_v30, %v2084_v8 }
 0x18d   : > { %v13720_v45 = vpop.f32.mrf.mxu1  ;;  %v16555_v29 = vpop.f32.mrf.mxu0 }
 0x18e   : > { %20487 = vst [vmem:[#allocation24_spill] sm:$0xff] %v16553_v39  ;;  %20488 = vst [vmem:[#allocation25_spill] sm:$0xff] %v16555_v29  ;;  %v2086_v47 = vadd.f32 %v13720_v45, %v16407_v60 }
 0x18f   : > { %v16558_v2 = vpop.f32.mrf.mxu1  ;;  %v13779_v52 = vpop.f32.mrf.mxu0 }
 0x190   : > { %20489 = vst [vmem:[#allocation26_spill] sm:$0xff] %v16558_v2  ;;  %v16560_v31 = vadd.f32 %v13776_v62, %v2086_v47 }
 0x191   : > { %v13723_v10 = vpop.f32.mrf.mxu1  ;;  %v16562_v25 = vpop.f32.mrf.mxu0 }
 0x192   : > { %20490 = vst [vmem:[#allocation27_spill] sm:$0xff] %v16560_v31  ;;  %20491 = vst [vmem:[#allocation28_spill] sm:$0xff] %v16562_v25  ;;  %v2088_v9 = vadd.f32 %v13723_v10, %v16418_v32 }
 0x193   : > { %v16565_v18 = vpop.f32.mrf.mxu1  ;;  %v13782_v7 = vpop.f32.mrf.mxu0 }
 0x194   : > { %20492 = vst [vmem:[#allocation29_spill] sm:$0xff] %v16565_v18  ;;  %v16567_v30 = vadd.f32 %v13779_v52, %v2088_v9  ;;  %v12087_v18 = vld [vmem:[%s20299_s2 + $0x30] sm:$0xff] }
 0x195   : > { %v13726_v8 = vpop.f32.mrf.mxu1  ;;  %v16569_v39 = vpop.f32.mrf.mxu0 }
 0x196   : > { %20493 = vst [vmem:[#allocation30_spill] sm:$0xff] %v16567_v30  ;;  %20494 = vst [vmem:[#allocation31_spill] sm:$0xff] %v16569_v39  ;;  %v2090_v60 = vadd.f32 %v13726_v8, %v16429_v23 }
 0x197   : > { %v16572_v45 = vpop.f32.mrf.mxu1  ;;  %v13785_v29 = vpop.f32.mrf.mxu0 }
 0x198   : > { %20495 = vst [vmem:[#allocation32_spill] sm:$0xff] %v16572_v45  ;;  %v16574_v62 = vadd.f32 %v13782_v7, %v2090_v60 }
 0x199   : > { %v13729_v47 = vpop.f32.mrf.mxu1  ;;  %v16576_v31 = vpop.f32.mrf.mxu0 }
 0x19a   : > { %20496 = vst [vmem:[#allocation33_spill] sm:$0xff] %v16574_v62  ;;  %20497 = vst [vmem:[#allocation34_spill] sm:$0xff] %v16576_v31  ;;  %v2092_v32 = vadd.f32 %v13729_v47, %v16440_v58 }
 0x19b   : > { %v16579_v10 = vpop.f32.mrf.mxu1  ;;  %v13788_v25 = vpop.f32.mrf.mxu0 }
 0x19c   : > { %20498 = vst [vmem:[#allocation35_spill] sm:$0xff] %v16579_v10  ;;  %v16581_v52 = vadd.f32 %v13785_v29, %v2092_v32 }
 0x19d   : > { %v13732_v9 = vpop.f32.mrf.mxu1  ;;  %v16583_v30 = vpop.f32.mrf.mxu0 }
 0x19e   : > { %20499 = vst [vmem:[#allocation36_spill] sm:$0xff] %v16581_v52  ;;  %20500 = vst [vmem:[#allocation37_spill] sm:$0xff] %v16583_v30  ;;  %v2094_v23 = vadd.f32 %v13732_v9, %v16457_v63  ;;  %v12053_v63 = vld [vmem:[%s20299_s2 + $0x20] sm:$0xff] }
 0x19f   : > { %v16586_v8 = vpop.f32.mrf.mxu1  ;;  %v13791_v39 = vpop.f32.mrf.mxu0  ;;  %14125 = vmatprep.subr.mxu1 %v12053_v63 }
 0x1a0   : > { %20501 = vst [vmem:[#allocation38_spill] sm:$0xff] %v16586_v8  ;;  %v16588_v7 = vadd.f32 %v13788_v25, %v2094_v23  ;;  %14126 = vmatpush3.msra.mxu1 %v12053_v63  ;;  %v12088_v8 = vld [vmem:[%s20299_s2 + $0x38] sm:$0xff] }
 0x1a1   : > { %v13735_v60 = vpop.f32.mrf.mxu1  ;;  %v16590_v62 = vpop.f32.mrf.mxu0  ;;  %14175 = vmatprep.subr.mxu0 %v12088_v8 }
 0x1a2   : > { %20502 = vst [vmem:[#allocation39_spill] sm:$0xff] %v16588_v7  ;;  %20503 = vst [vmem:[#allocation40_spill] sm:$0xff] %v16590_v62  ;;  %v2096_v58 = vadd.f32 %v13735_v60, %v16469_v49  ;;  %14176 = vmatpush3.msra.mxu0 %v12088_v8 }
 0x1a3   : > { %v16593_v47 = vpop.f32.mrf.mxu1  ;;  %v13794_v31 = vpop.f32.mrf.mxu0  ;;  %14177 = vmatprep.subr.mxu0 %v12087_v18 }
 0x1a4   : > { %20504 = vst [vmem:[#allocation41_spill] sm:$0xff] %v16593_v47  ;;  %v16595_v29 = vadd.f32 %v13791_v39, %v2096_v58  ;;  %14178 = vmatpush3.msra.mxu0 %v12087_v18 }
 0x1a5   : > { %v13738_v32 = vpop.f32.mrf.mxu1  ;;  %v16597_v52 = vpop.f32.mrf.mxu0 }
 0x1a6   : > { %20505 = vst [vmem:[#allocation42_spill] sm:$0xff] %v16595_v29  ;;  %20506 = vst [vmem:[#allocation43_spill] sm:$0xff] %v16597_v52  ;;  %v2098_v25 = vadd.f32 %v13738_v32, %v16477_v5 }
 0x1a7   : > { %v16603_v9 = vpop.f32.mrf.mxu1  ;;  %v16605_v23 = vpop.f32.mrf.mxu0 }
 0x1a8   : > { %20507 = vst [vmem:[#allocation44_spill] sm:$0xff] %v16603_v9  ;;  %v16607_v49 = vadd.f32 %v13794_v31, %v2098_v25 }
 0x1a9   : > { %v16609_v60 = vpop.f32.mrf.mxu1  ;;  %v16611_v39 = vpop.f32.mrf.mxu0 }
 0x1aa   : > { %20508 = vst [vmem:[#allocation45_spill] sm:$0xff] %v16607_v49 }
 0x1ab   : > { %v16613_v58 = vpop.f32.mrf.mxu1  ;;  %v16615_v52 = vpop.f32.mrf.mxu0 }
 0x1ad   : > { %v16617_v62 = vpop.f32.mrf.mxu1  ;;  %v16619_v29 = vpop.f32.mrf.mxu0 }
 0x1af   : > { %v16621_v5 = vpop.f32.mrf.mxu1  ;;  %v16623_v32 = vpop.f32.mrf.mxu0 }
 0x1b1   : > { %v16625_v7 = vpop.f32.mrf.mxu1  ;;  %v16627_v31 = vpop.f32.mrf.mxu0 }
 0x1b2   : > { %20509 = vst [vmem:[#allocation46_spill] sm:$0xff] %v16627_v31 }
 0x1b3   : > { %v16629_v63 = vpop.f32.mrf.mxu1  ;;  %v16631_v25 = vpop.f32.mrf.mxu0 }
 0x1b4   : > { %20510 = vst [vmem:[#allocation47_spill] sm:$0xff] %v16631_v25 }
 0x1b5   : > { %v16633_v49 = vpop.f32.mrf.mxu1  ;;  %v16635_v9 = vpop.f32.mrf.mxu0 }
 0x1b6   : > { %20511 = vst [vmem:[#allocation48_spill] sm:$0xff] %v16635_v9  ;;  %v12122_v9 = vld [vmem:[%s20299_s2 + $0x48] sm:$0xff] }
 0x1b7   : > { %v16637_v47 = vpop.f32.mrf.mxu1  ;;  %v16639_v30 = vpop.f32.mrf.mxu0  ;;  %14227 = vmatprep.subr.mxu1 %v12122_v9 }
 0x1b8   : > { %20512 = vst [vmem:[#allocation49_spill] sm:$0xff] %v16637_v47  ;;  %20513 = vst [vmem:[#allocation50_spill] sm:$0xff] %v16639_v30 }
 0x1b9   : > { %v16644_v10 = vpop.f32.mrf.mxu1  ;;  %v16646_v45 = vpop.f32.mrf.mxu0 }
 0x1ba   : > { %20514 = vst [vmem:[#allocation51_spill] sm:$0xff] %v16644_v10  ;;  %20515 = vst [vmem:[#allocation52_spill] sm:$0xff] %v16646_v45 }
 0x1bb   : > { %v16654_v2 = vpop.f32.mrf.mxu1  ;;  %v16656_v30 = vpop.f32.mrf.mxu0 }
 0x1bc   : > { %20516 = vst [vmem:[#allocation53_spill] sm:$0xff] %v16654_v2  ;;  %20517 = vst [vmem:[#allocation54_spill] sm:$0xff] %v16656_v30 }
 0x1bd   : > { %v16658_v20 = vpop.f32.mrf.mxu1  ;;  %v16660_v45 = vpop.f32.mrf.mxu0 }
 0x1be   : > { %20518 = vst [vmem:[#allocation55_spill] sm:$0xff] %v16658_v20  ;;  %20519 = vst [vmem:[#allocation56_spill] sm:$0xff] %v16660_v45 }
 0x1bf   : > { %v16662_v8 = vpop.f32.mrf.mxu1  ;;  %v16664_v10 = vpop.f32.mrf.mxu0 }
 0x1c0   : > { %20520 = vst [vmem:[#allocation57_spill] sm:$0xff] %v16662_v8  ;;  %20521 = vst [vmem:[#allocation58_spill] sm:$0xff] %v16664_v10 }
 0x1c1   : > { %v16666_v25 = vpop.f32.mrf.mxu1  ;;  %v16668_v47 = vpop.f32.mrf.mxu0 }
 0x1c2   : > { %20522 = vst [vmem:[#allocation59_spill] sm:$0xff] %v16666_v25  ;;  %20523 = vst [vmem:[#allocation60_spill] sm:$0xff] %v16668_v47 }
 0x1c3   : > { %v16670_v31 = vpop.f32.mrf.mxu1  ;;  %v16672_v2 = vpop.f32.mrf.mxu0 }
 0x1c4   : > { %20524 = vst [vmem:[#allocation61_spill] sm:$0xff] %v16670_v31  ;;  %20525 = vst [vmem:[#allocation62_spill] sm:$0xff] %v16672_v2 }
 0x1c5   : > { %v16674_v30 = vpop.f32.mrf.mxu1  ;;  %v16676_v9 = vpop.f32.mrf.mxu0 }
 0x1c6   : > { %20526 = vst [vmem:[#allocation63_spill] sm:$0xff] %v16674_v30  ;;  %20527 = vst [vmem:[#allocation64_spill] sm:$0xff] %v16676_v9 }
 0x1c7   : > { %v16678_v18 = vpop.f32.mrf.mxu1  ;;  %v16680_v20 = vpop.f32.mrf.mxu0 }
 0x1c8   : > { %20528 = vst [vmem:[#allocation65_spill] sm:$0xff] %v16678_v18  ;;  %20529 = vst [vmem:[#allocation66_spill] sm:$0xff] %v16680_v20 }
 0x1c9   : > { %v16682_v45 = vpop.f32.mrf.mxu1  ;;  %v16684_v8 = vpop.f32.mrf.mxu0 }
 0x1ca   : > { %20530 = vst [vmem:[#allocation67_spill] sm:$0xff] %v16682_v45  ;;  %20531 = vst [vmem:[#allocation68_spill] sm:$0xff] %v16684_v8 }
 0x1cb   : > { %v16686_v10 = vpop.f32.mrf.mxu1  ;;  %v16688_v25 = vpop.f32.mrf.mxu0 }
 0x1cc   : > { %20532 = vst [vmem:[#allocation69_spill] sm:$0xff] %v16686_v10  ;;  %20533 = vst [vmem:[#allocation70_spill] sm:$0xff] %v16688_v25 }
 0x1cd   : > { %v16690_v47 = vpop.f32.mrf.mxu1  ;;  %v16692_v31 = vpop.f32.mrf.mxu0 }
 0x1ce   : > { %20534 = vst [vmem:[#allocation71_spill] sm:$0xff] %v16690_v47  ;;  %20535 = vst [vmem:[#allocation72_spill] sm:$0xff] %v16692_v31 }
 0x1cf   : > { %v16694_v2 = vpop.f32.mrf.mxu1  ;;  %v16696_v30 = vpop.f32.mrf.mxu0 }
 0x1d0   : > { %20536 = vst [vmem:[#allocation73_spill] sm:$0xff] %v16694_v2  ;;  %20537 = vst [vmem:[#allocation74_spill] sm:$0xff] %v16696_v30 }
 0x1d1   : > { %v16698_v9 = vpop.f32.mrf.mxu1  ;;  %v16700_v18 = vpop.f32.mrf.mxu0 }
 0x1d2   : > { %20538 = vst [vmem:[#allocation75_spill] sm:$0xff] %v16698_v9  ;;  %20539 = vst [vmem:[#allocation76_spill] sm:$0xff] %v16700_v18 }
 0x1d3   : > { %v16702_v20 = vpop.f32.mrf.mxu1  ;;  %v16704_v45 = vpop.f32.mrf.mxu0 }
 0x1d4   : > { %20540 = vst [vmem:[#allocation77_spill] sm:$0xff] %v16702_v20  ;;  %20541 = vst [vmem:[#allocation78_spill] sm:$0xff] %v16704_v45 }
 0x1d5   : > { %v16706_v8 = vpop.f32.mrf.mxu1  ;;  %v16708_v10 = vpop.f32.mrf.mxu0 }
 0x1d6   : > { %20542 = vst [vmem:[#allocation79_spill] sm:$0xff] %v16706_v8  ;;  %20543 = vst [vmem:[#allocation80_spill] sm:$0xff] %v16708_v10  ;;  %v2067_v10 = vadd.f32 %v16482_v21, %v16309_v33  ;;  %v1261_v33 = vadd.f32 %v16415_v34, %v16211_v24  ;;  %v1271_v21 = vadd.f32 %v16426_v14, %v16227_v40 }
 0x1d7   : > { %v16710_v25 = vpop.f32.mrf.mxu1  ;;  %v16712_v47 = vpop.f32.mrf.mxu0  ;;  %v2071_v24 = vadd.f32 %v16496_v38, %v16333_v56 }
 0x1d8   : > { %20544 = vst [vmem:[#allocation81_spill] sm:$0xff] %v16712_v47 }
 0x1d9   : > { %v16714_v31 = vpop.f32.mrf.mxu1  ;;  %v16716_v2 = vpop.f32.mrf.mxu0 }
 0x1da   : > { %20545 = vst [vmem:[#allocation82_spill] sm:$0xff] %v16714_v31  ;;  %20546 = vst [vmem:[#allocation83_spill] sm:$0xff] %v16716_v2 }
 0x1db   : > { %v16718_v30 = vpop.f32.mrf.mxu1  ;;  %v16720_v9 = vpop.f32.mrf.mxu0 }
 0x1dc   : > { %20547 = vst [vmem:[#allocation84_spill] sm:$0xff] %v16718_v30  ;;  %20548 = vst [vmem:[#allocation85_spill] sm:$0xff] %v16720_v9  ;;  %v1251_v9 = vadd.f32 %v16404_v15, %v16195_v12  ;;  %v1291_v15 = vadd.f32 %v16453_v46, %v16259_v11  ;;  %v2850_v11 = vadd.f32 %v16617_v62, %v16491_v61 }
 0x1dd   : > { %v16722_v18 = vpop.f32.mrf.mxu1  ;;  %v16724_v20 = vpop.f32.mrf.mxu0  ;;  %v16774_v46 = vadd.f32 %v16411_v27, %v1261_v33 }
 0x1de   : > { %20549 = vst [vmem:[#allocation86_spill] sm:$0xff] %v16724_v20  ;;  %v2457_v20 = vadd.f32 %v16479_v43, %v2067_v10  ;;  %v1301_v43 = vadd.f32 %v16466_v4, %v16278_v42  ;;  %v16777_v42 = vadd.f32 %v16422_v54, %v1271_v21  ;;  %v2461_v54 = vadd.f32 %v16493_v6, %v2071_v24 }
 0x1df   : > { %v16726_v45 = vpop.f32.mrf.mxu1  ;;  %v16728_v8 = vpop.f32.mrf.mxu0 }
 0x1e0   : > { %20550 = vst [vmem:[#allocation87_spill] sm:$0xff] %v16726_v45  ;;  %20551 = vst [vmem:[#allocation88_spill] sm:$0xff] %v16728_v8  ;;  %v2069_v45 = vadd.f32 %v16489_v22, %v16321_v44  ;;  %v2848_v8 = vadd.f32 %v16609_v60, %v16484_v55  ;;  %v2847_v44 = vadd.f32 %v16613_v58, %v2457_v20  ;;  %v20559_v58 = vld [vmem:[#allocation9_spill] sm:$0xff] }
 0x1e1   : > { %v16732_v47 = vpop.f32.mrf.mxu1  ;;  %v16734_v31 = vpop.f32.mrf.mxu0  ;;  %v16790_v38 = vadd.f32 %v16462_v57, %v1301_v43  ;;  %v3241_v57 = vadd.f32 %v16615_v52, %v2850_v11  ;;  %v2851_v62 = vadd.f32 %v16629_v63, %v2461_v54  ;;  %v20560_v63 = vld [vmem:[#allocation13_spill] sm:$0xff]  ;;  %v20562_v43 = vld [vmem:[#allocation18_spill] sm:$0xff] }
 0x1e2   : > { %20552 = vst [vmem:[#allocation89_spill] sm:$0xff] %v16734_v31  ;;  %v2459_v14 = vadd.f32 %v16486_v53, %v2069_v45  ;;  %v16785_v53 = vadd.f32 %v16448_v0, %v1291_v15  ;;  %v3238_v22 = vadd.f32 %v16611_v39, %v2847_v44  ;;  %v16800_v0 = vld [vmem:[%s20303_s6] ss:$0 sm:$0xff] }
 0x1e3   : > { %v16736_v2 = vpop.f32.mrf.mxu1  ;;  %v16738_v30 = vpop.f32.mrf.mxu0 }
 0x1e4   : > { %20553 = vst [vmem:[#allocation90_spill] sm:$0xff] %v16738_v30  ;;  %v1281_v30 = vadd.f32 %v16437_v36, %v16243_v16  ;;  %v16767_v16 = vadd.f32 %v16398_v51, %v1251_v9  ;;  %v3239_v36 = vadd.f32 %v16605_v23, %v2848_v8  ;;  %v2073_v51 = vadd.f32 %v16506_v28, %v16345_v59 }
 0x1e5   : > { %v16753_v31 = vpop.f32.mrf.mxu1  ;;  %v16755_v12 = vpop.f32.mrf.mxu0  ;;  %v2849_v61 = vadd.f32 %v16621_v5, %v2459_v14  ;;  %v2077_v59 = vadd.f32 %v16527_v48, %v16368_v17  ;;  %v2079_v17 = vadd.f32 %v16534_v41, %v16378_v26  ;;  %v20557_v41 = vld [vmem:[#allocation14_spill] sm:$0xff]  ;;  %v2081_v5 = vadd.f32 %v16544_v37, %v20559_v58 }
 0x1e6   : > { %v16780_v56 = vadd.f32 %v16433_v35, %v1281_v30  ;;  %v2075_v35 = vadd.f32 %v16519_v3, %v16358_v19  ;;  %v16804_v30 = vadd.f32 %v16475_v50, %v16292_v1  ;;  %v2463_v19 = vadd.f32 %v16500_v13, %v2073_v51  ;;  %v20555_v3 = vld [vmem:[#allocation12_spill] sm:$0xff]  ;;  %v16818_v1 = vld [vmem:[%s20304_s7] ss:$0 sm:$0xff] }
 0x1e7   : > { %v16764_v34 = vpop.f32.mrf.mxu1  ;;  %v13973_v40 = vpop.f32.mrf.mxu0  ;;  %v2852_v48 = vadd.f32 %v16625_v7, %v20555_v3  ;;  %v3240_v52 = vadd.f32 %v16619_v29, %v2849_v61  ;;  %v20558_v7 = vld [vmem:[#allocation16_spill] sm:$0xff]  ;;  %v2854_v8 = vadd.f32 %v16633_v49, %v20560_v63  ;;  %v16837_v24 = vadd.f32 %v20562_v43, %v2079_v17  ;;  %v20563_v14 = vld [vmem:[#allocation46_spill] sm:$0xff] }
 0x1e8   : > { %v2465_v60 = vadd.f32 %v20557_v41, %v2075_v35  ;;  %v2467_v39 = vadd.f32 %v20558_v7, %v2077_v59  ;;  %v3242_v37 = vadd.f32 %v20563_v14, %v2851_v62  ;;  %v20567_v35 = vld [vmem:[#allocation47_spill] sm:$0xff]  ;;  %v20573_v41 = vld [vmem:[#allocation48_spill] sm:$0xff] }
 0x1e9   : > { %v13917_v4 = vpop.f32.mrf.mxu1  ;;  %v3859_v55 = vpop.f32.mrf.mxu0  ;;  %v3245_v59 = vadd.f32 %v20567_v35, %v2854_v8 }
 0x1ea   : > { %v3629_v27 = vadd.f32 %v13917_v4, %v3239_v36  ;;  %v20564_v36 = vld [vmem:[#allocation49_spill] sm:$0xff] }
 0x1eb   : > { %v3469_v28 = vpop.f32.mrf.mxu1  ;;  %v13976_v20 = vpop.f32.mrf.mxu0  ;;  %v2853_v11 = vadd.f32 %v20564_v36, %v2463_v19 }
 0x1ec   : > { %v16807_v6 = vadd.f32 %v13973_v40, %v3629_v27  ;;  %v3628_v45 = vadd.f32 %v3469_v28, %v3238_v22  ;;  %v3243_v40 = vadd.f32 %v16623_v32, %v2852_v48  ;;  %v20566_v27 = vld [vmem:[#allocation20_spill] sm:$0xff]  ;;  %v20568_v32 = vld [vmem:[#allocation15_spill] sm:$0xff] }
 0x1ed   : > { %v13920_v50 = vpop.f32.mrf.mxu1  ;;  %v3869_v10 = vpop.f32.mrf.mxu0  ;;  %v16848_v54 = vadd.f32 %v20566_v27, %v2081_v5  ;;  %v20569_v28 = vld [vmem:[#allocation51_spill] sm:$0xff]  ;;  %v3244_v7 = vadd.f32 %v20573_v41, %v2853_v11  ;;  %v20581_v27 = vld [vmem:[#allocation22_spill] sm:$0xff] }
 0x1ee   : > { %20554 = vst [vmem:[#allocation91_spill] sm:$0xff] %v16807_v6  ;;  %v4058_v13 = vmul.f32 %v16800_v0, %v16807_v6  ;;  %v16823_v23 = vadd.f32 %v3859_v55, %v3628_v45  ;;  %v3631_v26 = vadd.f32 %v13920_v50, %v3241_v57  ;;  %v20570_v50 = vld [vmem:[#allocation10_spill] sm:$0xff] }
 0x1ef   : > { %v3479_v9 = vpop.f32.mrf.mxu1  ;;  %v13979_v33 = vpop.f32.mrf.mxu0 }
 0x1f0   : > { %20556 = vst [vmem:[#allocation12_spill] sm:$0xff] %v16823_v23  ;;  %v4097_v29 = vadd.f32 %v16818_v1, %v4058_v13  ;;  %v4057_v21 = vmul.f32 %v16800_v0, %v16823_v23  ;;  %v16834_v15 = vadd.f32 %v13976_v20, %v3631_v26  ;;  %v3630_v44 = vadd.f32 %v3479_v9, %v3240_v52  ;;  %v20572_v13 = vld [vmem:[#allocation26_spill] sm:$0xff] }
 0x1f1   : > { %v13923_v49 = vpop.f32.mrf.mxu1  ;;  %v3879_v51 = vpop.f32.mrf.mxu0  ;;  %v2856_v20 = vadd.f32 %v20569_v28, %v20568_v32  ;;  %v2085_v26 = vadd.f32 %v20572_v13, %v16767_v16  ;;  %v20579_v16 = vld [vmem:[#allocation55_spill] sm:$0xff]  ;;  %v20583_v28 = vld [vmem:[#allocation57_spill] sm:$0xff] }
 0x1f2   : > { %20561 = vst [vmem:[#allocation14_spill] sm:$0xff] %v16834_v15  ;;  %v4129_v4 = vmax.f32 %v4097_v29, 0.0  ;;  %v4096_v55 = vadd.f32 %v16818_v1, %v4057_v21  ;;  %v4060_v22 = vmul.f32 %v16800_v0, %v16834_v15  ;;  %v16845_v61 = vadd.f32 %v3869_v10, %v3630_v44  ;;  %v20571_v10 = vld [vmem:[#allocation23_spill] sm:$0xff]  ;;  %v20576_v44 = vld [vmem:[#allocation50_spill] sm:$0xff] }
 0x1f3   : > { %v3633_v57 = vadd.f32 %v13923_v49, %v3243_v40  ;;  %v3489_v45 = vpop.f32.mrf.mxu1  ;;  %v13982_v19 = vpop.f32.mrf.mxu0  ;;  %v2083_v52 = vadd.f32 %v20571_v10, %v20570_v50  ;;  %v3247_v43 = vadd.f32 %v20576_v44, %v2856_v20  ;;  %v20577_v40 = vld [vmem:[#allocation53_spill] sm:$0xff]  ;;  %v2857_v20 = vadd.f32 %v20583_v28, %v2467_v39  ;;  %v20585_v50 = vld [vmem:[#allocation52_spill] sm:$0xff]  ;;  %v20587_v13 = vld [vmem:[#allocation19_spill] sm:$0xff] }
 0x1f4   : > { %20565 = vst [vmem:[#allocation16_spill] sm:$0xff] %v16845_v61  ;;  %v4128_v17 = vmax.f32 %v4096_v55, 0.0  ;;  %v4099_v3 = vadd.f32 %v16818_v1, %v4060_v22  ;;  %v4059_v48 = vmul.f32 %v16800_v0, %v16845_v61  ;;  %v3632_v62 = vadd.f32 %v3489_v45, %v3242_v37  ;;  %4162 = vst.msk [vmem:[#allocation2 + $0x21] sm:$0xff] %vm4160_vm2, %v4129_v4  ;;  %v20578_v37 = vld [vmem:[#allocation17_spill] sm:$0xff] }
 0x1f5   : > { %v16862_v58 = vadd.f32 %v13979_v33, %v3633_v57  ;;  %v13926_v5 = vpop.f32.mrf.mxu1  ;;  %v3889_v63 = vpop.f32.mrf.mxu0  ;;  %v2855_v14 = vadd.f32 %v20577_v40, %v2465_v60  ;;  %v2858_v36 = vadd.f32 %v20579_v16, %v20578_v37  ;;  %v16882_v60 = vld [vmem:[%s20299_s2 + $0x58] sm:$0xff]  ;;  %v16885_v35 = vadd.f32 %v20581_v27, %v2083_v52  ;;  %v20586_v52 = vld [vmem:[#allocation54_spill] sm:$0xff] }
 0x1f6   : > { %v4131_v8 = vmax.f32 %v4099_v3, 0.0  ;;  %v4098_v9 = vadd.f32 %v16818_v1, %v4059_v48  ;;  %v16865_v29 = vadd.f32 %v3879_v51, %v3632_v62  ;;  %v3635_v21 = vadd.f32 %v13926_v5, %v3245_v59  ;;  %4161 = vst.msk [vmem:[#allocation2 + $0x19] sm:$0xff] %vm4160_vm2, %v4128_v17  ;;  %v20582_v59 = vld [vmem:[#allocation25_spill] sm:$0xff]  ;;  %14279 = vmatprep.subr.mxu0 %v16882_v60 }
 0x1f7   : > { %20574 = vst [vmem:[#allocation9_spill] sm:$0xff] %v16862_v58  ;;  %v4062_v33 = vmul.f32 %v16800_v0, %v16862_v58  ;;  %v3499_v11 = vpop.f32.mrf.mxu1  ;;  %v13985_v49 = vpop.f32.mrf.mxu0  ;;  %v16888_v32 = vadd.f32 %v20582_v59, %v2085_v26  ;;  %v3246_v10 = vadd.f32 %v20585_v50, %v2855_v14  ;;  %v3249_v39 = vadd.f32 %v20586_v52, %v2858_v36  ;;  %v20588_v26 = vld [vmem:[#allocation59_spill] sm:$0xff]  ;;  %v20591_v14 = vld [vmem:[#allocation56_spill] sm:$0xff]  ;;  %v20592_v16 = vld [vmem:[#allocation61_spill] sm:$0xff] }
 0x1f8   : > { %20575 = vst [vmem:[#allocation13_spill] sm:$0xff] %v16865_v29  ;;  %v4130_v4 = vmax.f32 %v4098_v9, 0.0  ;;  %v4061_v51 = vmul.f32 %v16800_v0, %v16865_v29  ;;  %v16876_v55 = vadd.f32 %v13982_v19, %v3635_v21  ;;  %v3634_v22 = vadd.f32 %v3499_v11, %v3244_v7  ;;  %4164 = vst.msk [vmem:[#allocation2 + $0x39] sm:$0xff] %vm4160_vm2, %v4131_v8 }
 0x1f9   : > { %v4101_v57 = vadd.f32 %v16818_v1, %v4062_v33  ;;  %v13929_v45 = vpop.f32.mrf.mxu1  ;;  %v3899_v19 = vpop.f32.mrf.mxu0  ;;  %v2860_v41 = vadd.f32 %v20588_v26, %v20587_v13  ;;  %v3248_v37 = vadd.f32 %v20591_v14, %v2857_v20  ;;  %v2859_v36 = vadd.f32 %v20592_v16, %v16837_v24  ;;  %v20593_v20 = vld [vmem:[#allocation58_spill] sm:$0xff] }
 0x1fa   : > { %20580 = vst [vmem:[#allocation18_spill] sm:$0xff] %v16876_v55  ;;  %v4100_v17 = vadd.f32 %v16818_v1, %v4061_v51  ;;  %v4064_v3 = vmul.f32 %v16800_v0, %v16876_v55  ;;  %v16896_v48 = vadd.f32 %v3889_v63, %v3634_v22  ;;  %4163 = vst.msk [vmem:[#allocation2 + $0x31] sm:$0xff] %vm4160_vm2, %v4130_v4 }
 0x1fb   : > { %v3637_v62 = vadd.f32 %v13929_v45, %v3247_v43  ;;  %v4133_v7 = vmax.f32 %v4101_v57, 0.0  ;;  %v3509_v5 = vpop.f32.mrf.mxu1  ;;  %v13988_v8 = vpop.f32.mrf.mxu0  ;;  %v20590_v43 = vld [vmem:[#allocation29_spill] sm:$0xff]  ;;  %v16930_v28 = vld [vmem:[#allocation2 + $0x21] sm:$0xff]  ;;  %v3251_v57 = vadd.f32 %v20593_v20, %v2860_v41  ;;  %v20598_v41 = vld [vmem:[#allocation32_spill] sm:$0xff] }
 0x1fc   : > { %20584 = vst [vmem:[#allocation46_spill] sm:$0xff] %v16896_v48  ;;  %v4132_v9 = vmax.f32 %v4100_v17, 0.0  ;;  %v4103_v21 = vadd.f32 %v16818_v1, %v4064_v3  ;;  %v4063_v63 = vmul.f32 %v16800_v0, %v16896_v48  ;;  %v16910_v40 = vadd.f32 %v20590_v43, %v16774_v46  ;;  %v20594_v45 = vld [vmem:[#allocation21_spill] sm:$0xff]  ;;  %v20595_v17 = vld [vmem:[#allocation63_spill] sm:$0xff] }
 0x1fd   : > { %v16906_v44 = vadd.f32 %v13985_v49, %v3637_v62  ;;  %4166 = vst.msk [vmem:[#allocation2 + $0x51] sm:$0xff] %vm4160_vm2, %v4133_v7  ;;  %v3636_v33 = vadd.f32 %v3509_v5, %v3246_v10  ;;  %v13932_v11 = vpop.f32.mrf.mxu1  ;;  %v16916_v4 = vld [vmem:[#allocation2 + $0x19] sm:$0xff]  ;;  %v3909_v22 = vpop.f32.mrf.mxu0  ;;  %v2862_v3 = vadd.f32 %v20595_v17, %v20594_v45  ;;  %v20599_v7 = vld [vmem:[#allocation60_spill] sm:$0xff] }
 0x1fe   : > { %v16918_v51 = vld [vmem:[#allocation2 + $0x18] sm:$0xff]  ;;  %v16920_v49 = vld [vmem:[#allocation2 + $0x20] sm:$0xff]  ;;  %v4135_v27 = vmax.f32 %v4103_v21, 0.0  ;;  %v4102_v46 = vadd.f32 %v16818_v1, %v4063_v63  ;;  %4165 = vst.msk [vmem:[#allocation2 + $0x49] sm:$0xff] %vm4160_vm2, %v4132_v9  ;;  %v3639_v24 = vadd.f32 %v13932_v11, %v3249_v39  ;;  %14026 = vmatprep.mubr.msk.f32.mxu1 %vm4160_vm2, %v16916_v4  ;;  %v3250_v5 = vadd.f32 %v20599_v7, %v2859_v36 }
 0x1ff   : > { %20589 = vst [vmem:[#allocation49_spill] sm:$0xff] %v16906_v44  ;;  %v4066_v59 = vmul.f32 %v16800_v0, %v16906_v44  ;;  %14078 = vmatprep.mubr.msk.f32.mxu0 %vm4160_vm2, %v16918_v51  ;;  %v16935_v62 = vadd.f32 %v3899_v19, %v3636_v33  ;;  %v3519_v50 = vpop.f32.mrf.mxu1  ;;  %14027 = vmatmul.mubr.msk.f32.gmra.mxu1 %vm4160_vm2, %v16930_v28  ;;  %v13991_v10 = vpop.f32.mrf.mxu0  ;;  %v20600_v9 = vld [vmem:[#allocation65_spill] sm:$0xff] }
 0x200   : > { %14079 = vmatmul.mubr.msk.f32.gmra.mxu0 %vm4160_vm2, %v16920_v49  ;;  %v4134_v52 = vmax.f32 %v4102_v46, 0.0  ;;  %4168 = vst.msk [vmem:[#allocation2 + $0x69] sm:$0xff] %vm4160_vm2, %v4135_v27  ;;  %v16943_v13 = vadd.f32 %v13988_v8, %v3639_v24  ;;  %v3638_v26 = vadd.f32 %v3519_v50, %v3248_v37  ;;  %v2089_v19 = vadd.f32 %v20598_v41, %v16777_v42  ;;  %v16967_v11 = vld [vmem:[#allocation2 + $0x39] sm:$0xff]  ;;  %v20604_v24 = vld [vmem:[#allocation67_spill] sm:$0xff] }
 0x201   : > { %20596 = vst [vmem:[#allocation20_spill] sm:$0xff] %v16935_v62  ;;  %v4105_v39 = vadd.f32 %v16818_v1, %v4066_v59  ;;  %v2861_v21 = vadd.f32 %v20600_v9, %v16848_v54  ;;  %v4065_v63 = vmul.f32 %v16800_v0, %v16935_v62  ;;  %v13935_v43 = vpop.f32.mrf.mxu1  ;;  %v16952_v14 = vld [vmem:[#allocation2 + $0x31] sm:$0xff]  ;;  %v3919_v33 = vpop.f32.mrf.mxu0  ;;  %v20602_v27 = vld [vmem:[#allocation62_spill] sm:$0xff]  ;;  %v20608_v9 = vld [vmem:[#allocation27_spill] sm:$0xff] }
 0x202   : > { %20597 = vst [vmem:[#allocation47_spill] sm:$0xff] %v16943_v13  ;;  %v16954_v16 = vld [vmem:[#allocation2 + $0x30] sm:$0xff]  ;;  %v16956_v8 = vld [vmem:[#allocation2 + $0x38] sm:$0xff]  ;;  %4167 = vst.msk [vmem:[#allocation2 + $0x61] sm:$0xff] %vm4160_vm2, %v4134_v52  ;;  %v4068_v42 = vmul.f32 %v16800_v0, %v16943_v13  ;;  %v16961_v36 = vadd.f32 %v3909_v22, %v3638_v26  ;;  %v3641_v54 = vadd.f32 %v13935_v43, %v3251_v57  ;;  %14029 = vmatprep.mubr.msk.f32.mxu1 %vm4160_vm2, %v16952_v14 }
 0x203   : > { %v4137_v37 = vmax.f32 %v4105_v39, 0.0  ;;  %14081 = vmatprep.mubr.msk.f32.mxu0 %vm4160_vm2, %v16954_v16  ;;  %v3253_v46 = vadd.f32 %v20602_v27, %v2862_v3  ;;  %v20603_v59 = vld [vmem:[#allocation24_spill] sm:$0xff]  ;;  %v4104_v45 = vadd.f32 %v16818_v1, %v4065_v63  ;;  %v3529_v17 = vpop.f32.mrf.mxu1  ;;  %14030 = vmatmul.mubr.msk.f32.gmra.mxu1 %vm4160_vm2, %v16967_v11  ;;  %v13994_v22 = vpop.f32.mrf.mxu0  ;;  %v20607_v41 = vld [vmem:[#allocation69_spill] sm:$0xff]  ;;  %v20609_v63 = vld [vmem:[#allocation71_spill] sm:$0xff] }
 0x204   : > { %20601 = vst [vmem:[#allocation15_spill] sm:$0xff] %v16961_v36  ;;  %v2864_v20 = vadd.f32 %v20604_v24, %v20603_v59  ;;  %14082 = vmatmul.mubr.msk.f32.gmra.mxu0 %vm4160_vm2, %v16956_v8  ;;  %v4107_v57 = vadd.f32 %v16818_v1, %v4068_v42  ;;  %v4067_v3 = vmul.f32 %v16800_v0, %v16961_v36  ;;  %v20606_v39 = vld [vmem:[#allocation64_spill] sm:$0xff] }
 0x205   : > { %4170 = vst.msk [vmem:[#allocation2 + $0x81] sm:$0xff] %vm4160_vm2, %v4137_v37  ;;  %v16981_v50 = vadd.f32 %v13991_v10, %v3641_v54  ;;  %v3640_v52 = vadd.f32 %v3529_v17, %v3250_v5  ;;  %v3252_v26 = vadd.f32 %v20606_v39, %v2861_v21  ;;  %v2863_v7 = vadd.f32 %v20607_v41, %v16885_v35  ;;  %v13938_v59 = vpop.f32.mrf.mxu1  ;;  %v16988_v24 = vld [vmem:[#allocation2 + $0x49] sm:$0xff]  ;;  %v3929_v42 = vpop.f32.mrf.mxu0  ;;  %v17003_v35 = vld [vmem:[#allocation2 + $0x51] sm:$0xff]  ;;  %v20612_v39 = vld [vmem:[#allocation66_spill] sm:$0xff] }
 0x206   : > { %v2866_v43 = vadd.f32 %v20609_v63, %v20608_v9  ;;  %v4136_v27 = vmax.f32 %v4104_v45, 0.0  ;;  %v16990_v37 = vld [vmem:[#allocation2 + $0x48] sm:$0xff]  ;;  %v16992_v13 = vld [vmem:[#allocation2 + $0x50] sm:$0xff]  ;;  %v4139_v10 = vmax.f32 %v4107_v57, 0.0  ;;  %v4106_v5 = vadd.f32 %v16818_v1, %v4067_v3  ;;  %14032 = vmatprep.mubr.msk.f32.mxu1 %vm4160_vm2, %v16988_v24 }
 0x207   : > { %20605 = vst [vmem:[#allocation51_spill] sm:$0xff] %v16981_v50  ;;  %v4070_v21 = vmul.f32 %v16800_v0, %v16981_v50  ;;  %v16997_v54 = vadd.f32 %v3919_v33, %v3640_v52  ;;  %14084 = vmatprep.mubr.msk.f32.mxu0 %vm4160_vm2, %v16990_v37  ;;  %v20611_v45 = vld [vmem:[#allocation28_spill] sm:$0xff]  ;;  %v3255_v57 = vadd.f32 %v20612_v39, %v2864_v20  ;;  %v3539_v41 = vpop.f32.mrf.mxu1  ;;  %v13997_v33 = vpop.f32.mrf.mxu0  ;;  %v20613_v63 = vld [vmem:[#allocation31_spill] sm:$0xff] }
 0x208   : > { %v2477_v17 = vadd.f32 %v20611_v45, %v16910_v40  ;;  %4169 = vst.msk [vmem:[#allocation2 + $0x79] sm:$0xff] %vm4160_vm2, %v4136_v27  ;;  %v3643_v3 = vadd.f32 %v13938_v59, %v3253_v46  ;;  %14033 = vmatmul.mubr.msk.f32.gmra.mxu1 %vm4160_vm2, %v17003_v35  ;;  %14085 = vmatmul.mubr.msk.f32.gmra.mxu0 %vm4160_vm2, %v16992_v13  ;;  %4172 = vst.msk [vmem:[#allocation2 + $0x99] sm:$0xff] %vm4160_vm2, %v4139_v10  ;;  %v4138_v52 = vmax.f32 %v4106_v5, 0.0  ;;  %v20614_v46 = vld [vmem:[#allocation68_spill] sm:$0xff]  ;;  %v20615_v45 = vld [vmem:[#allocation70_spill] sm:$0xff] }
 0x209   : > { %20610 = vst [vmem:[#allocation10_spill] sm:$0xff] %v16997_v54  ;;  %v4109_v9 = vadd.f32 %v16818_v1, %v4070_v21  ;;  %v4069_v40 = vmul.f32 %v16800_v0, %v16997_v54  ;;  %v3642_v20 = vadd.f32 %v3539_v41, %v3252_v26  ;;  %v2479_v27 = vadd.f32 %v20613_v63, %v2089_v19  ;;  %v13941_v36 = vpop.f32.mrf.mxu1  ;;  %v17022_v62 = vld [vmem:[#allocation2 + $0x61] sm:$0xff]  ;;  %v3939_v10 = vpop.f32.mrf.mxu0 }
 0x20a   : > { %v3254_v59 = vadd.f32 %v20614_v46, %v2863_v7  ;;  %v3257_v39 = vadd.f32 %v20615_v45, %v2866_v43  ;;  %v17020_v50 = vadd.f32 %v13994_v22, %v3643_v3  ;;  %v17024_v44 = vld [vmem:[#allocation2 + $0x60] sm:$0xff]  ;;  %v17026_v5 = vld [vmem:[#allocation2 + $0x68] sm:$0xff]  ;;  %4171 = vst.msk [vmem:[#allocation2 + $0x91] sm:$0xff] %vm4160_vm2, %v4138_v52  ;;  %v3645_v7 = vadd.f32 %v13941_v36, %v3255_v57  ;;  %v20618_v43 = vld [vmem:[#allocation73_spill] sm:$0xff] }
 0x20b   : > { %v4141_v21 = vmax.f32 %v4109_v9, 0.0  ;;  %v4108_v26 = vadd.f32 %v16818_v1, %v4069_v40  ;;  %v17030_v19 = vadd.f32 %v3929_v42, %v3642_v20  ;;  %14035 = vmatprep.mubr.msk.f32.mxu1 %vm4160_vm2, %v17022_v62  ;;  %14087 = vmatprep.mubr.msk.f32.mxu0 %vm4160_vm2, %v17024_v44  ;;  %v17036_v22 = vld [vmem:[#allocation2 + $0x69] sm:$0xff]  ;;  %v2865_v3 = vadd.f32 %v20618_v43, %v16888_v32  ;;  %v20619_v41 = vld [vmem:[#allocation30_spill] sm:$0xff]  ;;  %v3549_v42 = vpop.f32.mrf.mxu1  ;;  %v14000_v36 = vpop.f32.mrf.mxu0 }
 0x20c   : > { %20616 = vst [vmem:[#allocation23_spill] sm:$0xff] %v17020_v50  ;;  %v20620_v63 = vld [vmem:[#allocation75_spill] sm:$0xff]  ;;  %v4072_v9 = vmul.f32 %v16800_v0, %v17020_v50  ;;  %14036 = vmatmul.mubr.msk.f32.gmra.mxu1 %vm4160_vm2, %v17036_v22  ;;  %14088 = vmatmul.mubr.msk.f32.gmra.mxu0 %vm4160_vm2, %v17026_v5  ;;  %v17051_v40 = vadd.f32 %v13997_v33, %v3645_v7  ;;  %v20623_v43 = vld [vmem:[#allocation38_spill] sm:$0xff] }
 0x20d   : > { %20617 = vst [vmem:[#allocation26_spill] sm:$0xff] %v17030_v19  ;;  %v2868_v52 = vadd.f32 %v20620_v63, %v20619_v41  ;;  %4174 = vst.msk [vmem:[#allocation2 + $0xb1] sm:$0xff] %vm4160_vm2, %v4141_v21  ;;  %v4140_v57 = vmax.f32 %v4108_v26, 0.0  ;;  %v4071_v32 = vmul.f32 %v16800_v0, %v17030_v19  ;;  %v3644_v20 = vadd.f32 %v3549_v42, %v3254_v59  ;;  %v20622_v46 = vld [vmem:[#allocation35_spill] sm:$0xff]  ;;  %v20624_v63 = vld [vmem:[#allocation77_spill] sm:$0xff]  ;;  %v13944_v48 = vpop.f32.mrf.mxu1  ;;  %v3949_v55 = vpop.f32.mrf.mxu0 }
 0x20e   : > { %20621 = vst [vmem:[#allocation48_spill] sm:$0xff] %v17051_v40  ;;  %v2091_v45 = vadd.f32 %v20622_v46, %v16780_v56  ;;  %v2093_v41 = vadd.f32 %v20623_v43, %v16785_v53  ;;  %v2867_v50 = vadd.f32 %v20624_v63, %v2477_v17  ;;  %v4111_v54 = vadd.f32 %v16818_v1, %v4072_v9  ;;  %v20626_v17 = vld [vmem:[#allocation72_spill] sm:$0xff]  ;;  %v20627_v42 = vld [vmem:[#allocation74_spill] sm:$0xff]  ;;  %v20628_v43 = vld [vmem:[#allocation33_spill] sm:$0xff] }
 0x20f   : > { %4173 = vst.msk [vmem:[#allocation2 + $0xa9] sm:$0xff] %vm4160_vm2, %v4140_v57  ;;  %v4110_v21 = vadd.f32 %v16818_v1, %v4071_v32  ;;  %v4074_v33 = vmul.f32 %v16800_v0, %v17051_v40  ;;  %v17063_v59 = vadd.f32 %v3939_v10, %v3644_v20  ;;  %v3647_v26 = vadd.f32 %v13944_v48, %v3257_v39  ;;  %v17065_v56 = vld [vmem:[#allocation2 + $0x79] sm:$0xff]  ;;  %v20629_v57 = vld [vmem:[#allocation79_spill] sm:$0xff]  ;;  %v3559_v48 = vpop.f32.mrf.mxu1  ;;  %v14003_v10 = vpop.f32.mrf.mxu0 }
 0x210   : > { %v17067_v7 = vld [vmem:[#allocation2 + $0x78] sm:$0xff]  ;;  %v17069_v53 = vld [vmem:[#allocation2 + $0x80] sm:$0xff]  ;;  %v3256_v9 = vadd.f32 %v20626_v17, %v2865_v3  ;;  %v3259_v46 = vadd.f32 %v20627_v42, %v2868_v52  ;;  %v2870_v63 = vadd.f32 %v20629_v57, %v20628_v43  ;;  %v4143_v32 = vmax.f32 %v4111_v54, 0.0  ;;  %14038 = vmatprep.mubr.msk.f32.mxu1 %vm4160_vm2, %v17065_v56  ;;  %v20631_v54 = vld [vmem:[#allocation11_spill] sm:$0xff] }
 0x211   : > { %20625 = vst [vmem:[#allocation50_spill] sm:$0xff] %v17063_v59  ;;  %14090 = vmatprep.mubr.msk.f32.mxu0 %vm4160_vm2, %v17067_v7  ;;  %v17079_v39 = vld [vmem:[#allocation2 + $0x81] sm:$0xff]  ;;  %v4142_v20 = vmax.f32 %v4110_v21, 0.0  ;;  %v4113_v40 = vadd.f32 %v16818_v1, %v4074_v33  ;;  %v4073_v3 = vmul.f32 %v16800_v0, %v17063_v59  ;;  %v17084_v52 = vadd.f32 %v14000_v36, %v3647_v26  ;;  %v20632_v42 = vld [vmem:[#allocation76_spill] sm:$0xff]  ;;  %v13947_v57 = vpop.f32.mrf.mxu1  ;;  %v3959_v26 = vpop.f32.mrf.mxu0  ;;  %v17099_v19 = vld [vmem:[#allocation2 + $0x98] sm:$0xff] }
 0x212   : > { %14039 = vmatmul.mubr.msk.f32.gmra.mxu1 %vm4160_vm2, %v17079_v39  ;;  %14091 = vmatmul.mubr.msk.f32.gmra.mxu0 %vm4160_vm2, %v17069_v53  ;;  %v1707_v17 = vadd.f32 %v20631_v54, %v16804_v30  ;;  %v3258_v43 = vadd.f32 %v20632_v42, %v2867_v50  ;;  %v2869_v21 = vadd.f32 %v16710_v25, %v2479_v27  ;;  %v17095_v59 = vld [vmem:[#allocation2 + $0x91] sm:$0xff]  ;;  %v20633_v27 = vld [vmem:[#allocation34_spill] sm:$0xff] }
 0x213   : > { %20630 = vst [vmem:[#allocation53_spill] sm:$0xff] %v17084_v52  ;;  %4176 = vst.msk [vmem:[#allocation2 + $0xc9] sm:$0xff] %vm4160_vm2, %v4143_v32  ;;  %v3646_v33 = vadd.f32 %v3559_v48, %v3256_v9  ;;  %v17097_v36 = vld [vmem:[#allocation2 + $0x90] sm:$0xff]  ;;  %v4145_v29 = vmax.f32 %v4113_v40, 0.0  ;;  %v4112_v30 = vadd.f32 %v16818_v1, %v4073_v3  ;;  %v4076_v50 = vmul.f32 %v16800_v0, %v17084_v52  ;;  %v20634_v32 = vld [vmem:[#allocation37_spill] sm:$0xff]  ;;  %v3569_v40 = vpop.f32.mrf.mxu1  ;;  %v14006_v58 = vpop.f32.mrf.mxu0 }
 0x214   : > { %4175 = vst.msk [vmem:[#allocation2 + $0xc1] sm:$0xff] %vm4160_vm2, %v4142_v20  ;;  %v3649_v25 = vadd.f32 %v13947_v57, %v3259_v46  ;;  %14041 = vmatprep.mubr.msk.f32.mxu1 %vm4160_vm2, %v17095_v59  ;;  %14093 = vmatprep.mubr.msk.f32.mxu0 %vm4160_vm2, %v17097_v36  ;;  %v2481_v9 = vadd.f32 %v20633_v27, %v2091_v45  ;;  %v20635_v54 = vld [vmem:[#allocation78_spill] sm:$0xff]  ;;  %v20641_v27 = vld [vmem:[#allocation84_spill] sm:$0xff] }
 0x215   : > { %v2483_v48 = vadd.f32 %v20634_v32, %v2093_v41  ;;  %v3261_v42 = vadd.f32 %v20635_v54, %v2870_v63  ;;  %v17112_v20 = vadd.f32 %v3949_v55, %v3646_v33  ;;  %v17114_v3 = vld [vmem:[#allocation2 + $0x99] sm:$0xff]  ;;  %4178 = vst.msk [vmem:[#allocation2 + $0xe1] sm:$0xff] %vm4160_vm2, %v4145_v29  ;;  %v4144_v46 = vmax.f32 %v4112_v30, 0.0  ;;  %v20638_v55 = vld [vmem:[#allocation80_spill] sm:$0xff]  ;;  %v13950_v30 = vpop.f32.mrf.mxu1 }
 0x216   : > { %v4115_v57 = vadd.f32 %v16818_v1, %v4076_v50  ;;  %v17118_v52 = vadd.f32 %v14003_v10, %v3649_v25  ;;  %v3648_v61 = vadd.f32 %v3569_v40, %v3258_v43  ;;  %14042 = vmatmul.mubr.msk.f32.gmra.mxu1 %vm4160_vm2, %v17114_v3  ;;  %14094 = vmatmul.mubr.msk.f32.gmra.mxu0 %vm4160_vm2, %v17099_v19  ;;  %v20639_v41 = vld [vmem:[#allocation36_spill] sm:$0xff]  ;;  %v20640_v63 = vld [vmem:[#allocation82_spill] sm:$0xff]  ;;  %v17132_v43 = vld [vmem:[#allocation2 + $0xa8] sm:$0xff]  ;;  %v3969_v50 = vpop.f32.mrf.mxu0 }
 0x217   : > { %20636 = vst [vmem:[#allocation17_spill] sm:$0xff] %v17112_v20  ;;  %v3260_v45 = vadd.f32 %v20638_v55, %v2869_v21  ;;  %v2872_v33 = vadd.f32 %v20640_v63, %v20639_v41  ;;  %v2871_v32 = vadd.f32 %v20641_v27, %v2481_v9  ;;  %v4075_v29 = vmul.f32 %v16800_v0, %v17112_v20  ;;  %v17130_v10 = vld [vmem:[#allocation2 + $0xa9] sm:$0xff]  ;;  %v20644_v55 = vld [vmem:[#allocation41_spill] sm:$0xff] }
 0x218   : > { %20637 = vst [vmem:[#allocation55_spill] sm:$0xff] %v17118_v52  ;;  %4177 = vst.msk [vmem:[#allocation2 + $0xd9] sm:$0xff] %vm4160_vm2, %v4144_v46  ;;  %v4147_v25 = vmax.f32 %v4115_v57, 0.0  ;;  %v4078_v21 = vmul.f32 %v16800_v0, %v17118_v52  ;;  %v17137_v54 = vadd.f32 %v3959_v26, %v3648_v61  ;;  %v3651_v40 = vadd.f32 %v13950_v30, %v3261_v42  ;;  %v17143_v9 = vld [vmem:[#allocation2 + $0xb0] sm:$0xff]  ;;  %v20646_v57 = vld [vmem:[#allocation39_spill] sm:$0xff]  ;;  %v3579_v26 = vpop.f32.mrf.mxu1  ;;  %v14009_v30 = vpop.f32.mrf.mxu0 }
 0x219   : > { %14044 = vmatprep.mubr.msk.f32.mxu1 %vm4160_vm2, %v17130_v10  ;;  %14096 = vmatprep.mubr.msk.f32.mxu0 %vm4160_vm2, %v17132_v43  ;;  %20643 = vst [vmem:[#allocation25_spill] sm:$0xff] %v17143_v9  ;;  %v2095_v41 = vadd.f32 %v20644_v55, %v16790_v38  ;;  %v20645_v63 = vld [vmem:[#allocation44_spill] sm:$0xff]  ;;  %v2874_v27 = vadd.f32 %v16722_v18, %v20646_v57  ;;  %v20648_v18 = vld [vmem:[#allocation81_spill] sm:$0xff] }
 0x21a   : > { %20642 = vst [vmem:[#allocation22_spill] sm:$0xff] %v17137_v54  ;;  %v2097_v46 = vadd.f32 %v20645_v63, %v1707_v17  ;;  %v4114_v61 = vadd.f32 %v16818_v1, %v4075_v29  ;;  %v17151_v42 = vld [vmem:[#allocation2 + $0xb1] sm:$0xff]  ;;  %4180 = vst.msk [vmem:[#allocation2 + $0xf9] sm:$0xff] %vm4160_vm2, %v4147_v25  ;;  %v4117_v52 = vadd.f32 %v16818_v1, %v4078_v21  ;;  %v20649_v29 = vld [vmem:[#allocation83_spill] sm:$0xff]  ;;  %14097 = vmatmul.mubr.msk.f32.gmra.mxu0 %vm4160_vm2, %v17143_v9  ;;  %v13953_v25 = vpop.f32.mrf.mxu1 }
 0x21b   : > { %v4077_v20 = vmul.f32 %v16800_v0, %v17137_v54  ;;  %v17157_v15 = vadd.f32 %v14006_v58, %v3651_v40  ;;  %v3650_v38 = vadd.f32 %v3579_v26, %v3260_v45  ;;  %14045 = vmatmul.mubr.msk.f32.gmra.mxu1 %vm4160_vm2, %v17151_v42  ;;  %v3263_v17 = vadd.f32 %v20648_v18, %v2872_v33  ;;  %v20650_v63 = vld [vmem:[#allocation87_spill] sm:$0xff]  ;;  %v17168_v54 = vld [vmem:[#allocation2 + $0xc0] sm:$0xff]  ;;  %v3979_v58 = vpop.f32.mrf.mxu0 }
 0x21c   : > { %v3262_v55 = vadd.f32 %v20649_v29, %v2871_v32  ;;  %v2873_v57 = vadd.f32 %v20650_v63, %v2483_v48  ;;  %v4146_v23 = vmax.f32 %v4114_v61, 0.0  ;;  %v17166_v21 = vld [vmem:[#allocation2 + $0xc1] sm:$0xff]  ;;  %20652 = vst [vmem:[#allocation54_spill] sm:$0xff] %v17168_v54  ;;  %v4149_v45 = vmax.f32 %v4117_v52, 0.0  ;;  %14099 = vmatprep.mubr.msk.f32.mxu0 %vm4160_vm2, %v17168_v54  ;;  %v20655_v32 = vld [vmem:[#allocation85_spill] sm:$0xff]  ;;  %v3589_v29 = vpop.f32.mrf.mxu1  ;;  %v17185_v63 = vld [vmem:[#allocation2 + $0xc9] sm:$0xff] }
 0x21d   : > { %20647 = vst [vmem:[#allocation57_spill] sm:$0xff] %v17157_v15  ;;  %20651 = vst [vmem:[#allocation52_spill] sm:$0xff] %v17166_v21  ;;  %v4116_v40 = vadd.f32 %v16818_v1, %v4077_v20  ;;  %v4080_v33 = vmul.f32 %v16800_v0, %v17157_v15  ;;  %v17173_v26 = vadd.f32 %v3969_v50, %v3650_v38  ;;  %14047 = vmatprep.mubr.msk.f32.mxu1 %vm4160_vm2, %v17166_v21  ;;  %v17179_v48 = vld [vmem:[#allocation2 + $0xc8] sm:$0xff]  ;;  %v20656_v18 = vld [vmem:[#allocation42_spill] sm:$0xff]  ;;  %v14012_v50 = vpop.f32.mrf.mxu0 }
 0x21e   : > { %20654 = vst [vmem:[#allocation59_spill] sm:$0xff] %v17179_v48  ;;  %v3265_v61 = vadd.f32 %v20655_v32, %v2874_v27  ;;  %v2876_v52 = vadd.f32 %v16732_v47, %v20656_v18  ;;  %4179 = vst.msk [vmem:[#allocation2 + $0xf1] sm:$0xff] %vm4160_vm2, %v4146_v23  ;;  %v3653_v20 = vadd.f32 %v13953_v25, %v3263_v17  ;;  %v20657_v47 = vld [vmem:[#allocation40_spill] sm:$0xff]  ;;  %v20658_v23 = vld [vmem:[#allocation43_spill] sm:$0xff]  ;;  %14100 = vmatmul.mubr.msk.f32.gmra.mxu0 %vm4160_vm2, %v17179_v48 }
 0x21f   : > { %20653 = vst [vmem:[#allocation19_spill] sm:$0xff] %v17173_v26  ;;  %4182 = vst.msk [vmem:[#allocation2 + $0x111] sm:$0xff] %vm4160_vm2, %v4149_v45  ;;  %v4148_v38 = vmax.f32 %v4116_v40, 0.0  ;;  %v4119_v15 = vadd.f32 %v16818_v1, %v4080_v33  ;;  %v4079_v6 = vmul.f32 %v16800_v0, %v17173_v26  ;;  %v3652_v21 = vadd.f32 %v3589_v29, %v3262_v55  ;;  %v20659_v25 = vld [vmem:[#allocation86_spill] sm:$0xff]  ;;  %v13956_v45 = vpop.f32.mrf.mxu1  ;;  %v17202_v33 = vld [vmem:[#allocation2 + $0xd8] sm:$0xff]  ;;  %v3989_v55 = vpop.f32.mrf.mxu0 }
 0x220   : > { %14048 = vmatmul.mubr.msk.f32.gmra.mxu1 %vm4160_vm2, %v17185_v63  ;;  %v2485_v27 = vadd.f32 %v20657_v47, %v2095_v41  ;;  %v2487_v17 = vadd.f32 %v20658_v23, %v2097_v46  ;;  %v3264_v32 = vadd.f32 %v20659_v25, %v2873_v57  ;;  %v17196_v18 = vadd.f32 %v14009_v30, %v3653_v20  ;;  %v17200_v40 = vld [vmem:[#allocation2 + $0xd9] sm:$0xff]  ;;  %v20664_v57 = vld [vmem:[#allocation88_spill] sm:$0xff] }
 0x221   : > { %20661 = vst [vmem:[#allocation56_spill] sm:$0xff] %v17202_v33  ;;  %4181 = vst.msk [vmem:[#allocation2 + $0x109] sm:$0xff] %vm4160_vm2, %v4148_v38  ;;  %v4151_v29 = vmax.f32 %v4119_v15, 0.0  ;;  %v4118_v41 = vadd.f32 %v16818_v1, %v4079_v6  ;;  %v17206_v47 = vadd.f32 %v3979_v58, %v3652_v21  ;;  %v3655_v46 = vadd.f32 %v13956_v45, %v3265_v61  ;;  %v17212_v30 = vld [vmem:[#allocation2 + $0xe0] sm:$0xff]  ;;  %v20665_v25 = vld [vmem:[#allocation45_spill] sm:$0xff]  ;;  %v3599_v21 = vpop.f32.mrf.mxu1  ;;  %v14015_v61 = vpop.f32.mrf.mxu0 }
 0x222   : > { %20660 = vst [vmem:[#allocation29_spill] sm:$0xff] %v17196_v18  ;;  %14050 = vmatprep.mubr.msk.f32.mxu1 %vm4160_vm2, %v17200_v40  ;;  %14102 = vmatprep.mubr.msk.f32.mxu0 %vm4160_vm2, %v17202_v33  ;;  %20663 = vst [vmem:[#allocation58_spill] sm:$0xff] %v17212_v30  ;;  %v3267_v20 = vadd.f32 %v20664_v57, %v2876_v52  ;;  %v2875_v23 = vadd.f32 %v16736_v2, %v2485_v27  ;;  %v17220_v58 = vld [vmem:[#allocation2 + $0xe1] sm:$0xff] }
 0x223   : > { %20662 = vst [vmem:[#allocation61_spill] sm:$0xff] %v17206_v47  ;;  %v2878_v15 = vadd.f32 %v16753_v31, %v20665_v25  ;;  %v4082_v6 = vmul.f32 %v16800_v0, %v17196_v18  ;;  %4184 = vst.msk [vmem:[#allocation2 + $0x129] sm:$0xff] %vm4160_vm2, %v4151_v29  ;;  %v4150_v38 = vmax.f32 %v4118_v41, 0.0  ;;  %v4081_v45 = vmul.f32 %v16800_v0, %v17206_v47  ;;  %v13959_v27 = vpop.f32.mrf.mxu1  ;;  %v3999_v57 = vpop.f32.mrf.mxu0  ;;  %v20670_v25 = vld [vmem:[#allocation89_spill] sm:$0xff] }
 0x224   : > { %v17225_v26 = vadd.f32 %v14012_v50, %v3655_v46  ;;  %v3654_v52 = vadd.f32 %v3599_v21, %v3264_v32  ;;  %14051 = vmatmul.mubr.msk.f32.gmra.mxu1 %vm4160_vm2, %v17220_v58  ;;  %v2877_v2 = vadd.f32 %v16764_v34, %v2487_v17  ;;  %14103 = vmatmul.mubr.msk.f32.gmra.mxu0 %vm4160_vm2, %v17212_v30  ;;  %v20671_v21 = vld [vmem:[#allocation90_spill] sm:$0xff] }
 0x225   : > { %v4121_v31 = vadd.f32 %v16818_v1, %v4082_v6  ;;  %4183 = vst.msk [vmem:[#allocation2 + $0x121] sm:$0xff] %vm4160_vm2, %v4150_v38  ;;  %v4120_v29 = vadd.f32 %v16818_v1, %v4081_v45  ;;  %v3657_v41 = vadd.f32 %v13959_v27, %v3267_v20  ;;  %v17239_v46 = vld [vmem:[#allocation2 + $0xf1] sm:$0xff]  ;;  %v3266_v6 = vadd.f32 %v20670_v25, %v2875_v23  ;;  %v17251_v38 = vld [vmem:[#allocation2 + $0xf9] sm:$0xff]  ;;  %v14018_v20 = vpop.f32.mrf.mxu0 }
 0x226   : > { %20666 = vst [vmem:[#allocation21_spill] sm:$0xff] %v17225_v26  ;;  %v4084_v50 = vmul.f32 %v16800_v0, %v17225_v26  ;;  %v17237_v32 = vadd.f32 %v3989_v55, %v3654_v52  ;;  %v17241_v34 = vld [vmem:[#allocation2 + $0xf0] sm:$0xff]  ;;  %v17243_v17 = vld [vmem:[#allocation2 + $0xf8] sm:$0xff]  ;;  %v3269_v47 = vadd.f32 %v20671_v21, %v2878_v15  ;;  %14053 = vmatprep.mubr.msk.f32.mxu1 %vm4160_vm2, %v17239_v46  ;;  %v3609_v55 = vpop.f32.mrf.mxu1 }
 0x227   : > { %20668 = vst [vmem:[#allocation32_spill] sm:$0xff] %v17241_v34  ;;  %20669 = vst [vmem:[#allocation60_spill] sm:$0xff] %v17243_v17  ;;  %v4153_v18 = vmax.f32 %v4121_v31, 0.0  ;;  %14105 = vmatprep.mubr.msk.f32.mxu0 %vm4160_vm2, %v17241_v34  ;;  %v4152_v45 = vmax.f32 %v4120_v29, 0.0  ;;  %v17256_v23 = vadd.f32 %v14015_v61, %v3657_v41  ;;  %v3268_v15 = vadd.f32 %v16755_v12, %v2877_v2 }
 0x228   : > { %20667 = vst [vmem:[#allocation63_spill] sm:$0xff] %v17237_v32  ;;  %v4123_v52 = vadd.f32 %v16818_v1, %v4084_v50  ;;  %v4083_v27 = vmul.f32 %v16800_v0, %v17237_v32  ;;  %14054 = vmatmul.mubr.msk.f32.gmra.mxu1 %vm4160_vm2, %v17251_v38  ;;  %v3656_v31 = vadd.f32 %v3609_v55, %v3266_v6  ;;  %v13962_v25 = vpop.f32.mrf.mxu1  ;;  %v17264_v29 = vld [vmem:[#allocation2 + $0x109] sm:$0xff]  ;;  %v17280_v55 = vld [vmem:[#allocation2 + $0x111] sm:$0xff] }
 0x229   : > { %20672 = vst [vmem:[#allocation65_spill] sm:$0xff] %v17256_v23  ;;  %4186 = vst.msk [vmem:[#allocation2 + $0x141] sm:$0xff] %vm4160_vm2, %v4153_v18  ;;  %14106 = vmatmul.mubr.msk.f32.gmra.mxu0 %vm4160_vm2, %v17243_v17  ;;  %v17266_v50 = vld [vmem:[#allocation2 + $0x108] sm:$0xff]  ;;  %v4086_v21 = vmul.f32 %v16800_v0, %v17256_v23  ;;  %v3659_v12 = vadd.f32 %v13962_v25, %v3269_v47  ;;  %14056 = vmatprep.mubr.msk.f32.mxu1 %vm4160_vm2, %v17264_v29  ;;  %v17276_v18 = vld [vmem:[#allocation2 + $0x110] sm:$0xff] }
 0x22a   : > { %20673 = vst [vmem:[#allocation62_spill] sm:$0xff] %v17266_v50  ;;  %4185 = vst.msk [vmem:[#allocation2 + $0x139] sm:$0xff] %vm4160_vm2, %v4152_v45  ;;  %v4155_v61 = vmax.f32 %v4123_v52, 0.0  ;;  %v4122_v41 = vadd.f32 %v16818_v1, %v4083_v27  ;;  %14108 = vmatprep.mubr.msk.f32.mxu0 %vm4160_vm2, %v17266_v50  ;;  %v17278_v2 = vadd.f32 %v3999_v57, %v3656_v31  ;;  %v3619_v6 = vpop.f32.mrf.mxu1  ;;  %v4009_v45 = vpop.f32.mrf.mxu0 }
 0x22b   : > { %20674 = vst [vmem:[#allocation24_spill] sm:$0xff] %v17276_v18  ;;  %v4125_v27 = vadd.f32 %v16818_v1, %v4086_v21  ;;  %v3658_v47 = vadd.f32 %v3619_v6, %v3268_v15  ;;  %v17284_v25 = vadd.f32 %v14018_v20, %v3659_v12  ;;  %v17308_v12 = vld [vmem:[#allocation2 + $0x129] sm:$0xff] }
 0x22c   : > { %20675 = vst [vmem:[#allocation67_spill] sm:$0xff] %v17278_v2  ;;  %4188 = vst.msk [vmem:[#allocation2 + $0x159] sm:$0xff] %vm4160_vm2, %v4155_v61  ;;  %v4154_v52 = vmax.f32 %v4122_v41, 0.0  ;;  %14057 = vmatmul.mubr.msk.f32.gmra.mxu1 %vm4160_vm2, %v17280_v55  ;;  %v4085_v23 = vmul.f32 %v16800_v0, %v17278_v2  ;;  %v17292_v57 = vld [vmem:[#allocation2 + $0x121] sm:$0xff]  ;;  %v4905_v2 = vld [vmem:[#allocation2 + $0xa] sm:$0xff] }
 0x22d   : > { %20676 = vst [vmem:[#allocation64_spill] sm:$0xff] %v17284_v25  ;;  %14109 = vmatmul.mubr.msk.f32.gmra.mxu0 %vm4160_vm2, %v17276_v18  ;;  %v17294_v31 = vld [vmem:[#allocation2 + $0x120] sm:$0xff]  ;;  %v4157_v61 = vmax.f32 %v4125_v27, 0.0  ;;  %v4088_v20 = vmul.f32 %v16800_v0, %v17284_v25  ;;  %v17299_v15 = vadd.f32 %v4009_v45, %v3658_v47  ;;  %14059 = vmatprep.mubr.msk.f32.mxu1 %vm4160_vm2, %v17292_v57  ;;  %v17305_v41 = vld [vmem:[#allocation2 + $0x128] sm:$0xff] }
 0x22e   : > { %20677 = vst [vmem:[#allocation69_spill] sm:$0xff] %v17294_v31  ;;  %4187 = vst.msk [vmem:[#allocation2 + $0x151] sm:$0xff] %vm4160_vm2, %v4154_v52  ;;  %14111 = vmatprep.mubr.msk.f32.mxu0 %vm4160_vm2, %v17294_v31  ;;  %v4124_v21 = vadd.f32 %v16818_v1, %v4085_v23 }
 0x22f   : > { %20678 = vst [vmem:[#allocation27_spill] sm:$0xff] %v17299_v15  ;;  %20679 = vst [vmem:[#allocation71_spill] sm:$0xff] %v17305_v41  ;;  %v4127_v6 = vadd.f32 %v16818_v1, %v4088_v20  ;;  %v4087_v45 = vmul.f32 %v16800_v0, %v17299_v15 }
 0x230   : > { %4190 = vst.msk [vmem:[#allocation2 + $0x171] sm:$0xff] %vm4160_vm2, %v4157_v61  ;;  %14060 = vmatmul.mubr.msk.f32.gmra.mxu1 %vm4160_vm2, %v17308_v12  ;;  %v4156_v52 = vmax.f32 %v4124_v21, 0.0  ;;  %v17330_v61 = vld [vmem:[#allocation2 + $0x141] sm:$0xff] }
 0x231   : > { %14112 = vmatmul.mubr.msk.f32.gmra.mxu0 %vm4160_vm2, %v17305_v41  ;;  %v17318_v27 = vld [vmem:[#allocation2 + $0x139] sm:$0xff]  ;;  %v4159_v23 = vmax.f32 %v4127_v6, 0.0  ;;  %v4126_v25 = vadd.f32 %v16818_v1, %v4087_v45  ;;  %v4904_v45 = vld [vmem:[#allocation2 + $0x2] sm:$0xff] }
 0x232   : > { %v17320_v47 = vld [vmem:[#allocation2 + $0x138] sm:$0xff]  ;;  %14062 = vmatprep.mubr.msk.f32.mxu1 %vm4160_vm2, %v17318_v27  ;;  %v17327_v0 = vld [vmem:[#allocation2 + $0x140] sm:$0xff]  ;;  %4189 = vst.msk [vmem:[#allocation2 + $0x169] sm:$0xff] %vm4160_vm2, %v4156_v52 }
 0x233   : > { %20680 = vst [vmem:[#allocation28_spill] sm:$0xff] %v17320_v47  ;;  %14114 = vmatprep.mubr.msk.f32.mxu0 %vm4160_vm2, %v17320_v47  ;;  %20681 = vst [vmem:[#allocation66_spill] sm:$0xff] %v17327_v0  ;;  %v4158_v20 = vmax.f32 %v4126_v25, 0.0  ;;  %v17348_v25 = vld [vmem:[#allocation2 + $0x159] sm:$0xff] }
 0x234   : > { %4192 = vst.msk [vmem:[#allocation2 + $0x189] sm:$0xff] %vm4160_vm2, %v4159_v23  ;;  %14063 = vmatmul.mubr.msk.f32.gmra.mxu1 %vm4160_vm2, %v17330_v61  ;;  %20684 = vst [vmem:[#allocation70_spill] sm:$0xff] %v17348_v25 }
 0x235   : > { %14115 = vmatmul.mubr.msk.f32.gmra.mxu0 %vm4160_vm2, %v17327_v0  ;;  %v17337_v1 = vld [vmem:[#allocation2 + $0x151] sm:$0xff]  ;;  %4191 = vst.msk [vmem:[#allocation2 + $0x181] sm:$0xff] %vm4160_vm2, %v4158_v20 }
 0x236   : > { %v17339_v21 = vld [vmem:[#allocation2 + $0x150] sm:$0xff]  ;;  %14065 = vmatprep.mubr.msk.f32.mxu1 %vm4160_vm2, %v17337_v1  ;;  %v17346_v6 = vld [vmem:[#allocation2 + $0x158] sm:$0xff] }
 0x237   : > { %20682 = vst [vmem:[#allocation31_spill] sm:$0xff] %v17339_v21  ;;  %14117 = vmatprep.mubr.msk.f32.mxu0 %vm4160_vm2, %v17339_v21  ;;  %20683 = vst [vmem:[#allocation68_spill] sm:$0xff] %v17346_v6  ;;  %v17364_v15 = vld [vmem:[#allocation2 + $0x171] sm:$0xff]  ;;  %v14025_v32 = vpop.f32.mrf.mxu1 }
 0x238   : > { %14066 = vmatmul.mubr.msk.f32.gmra.mxu1 %vm4160_vm2, %v17348_v25  ;;  %20687 = vst [vmem:[#allocation75_spill] sm:$0xff] %v17364_v15  ;;  %v14077_v26 = vpop.f32.mrf.mxu0 }
 0x239   : > { %14118 = vmatmul.mubr.msk.f32.gmra.mxu0 %vm4160_vm2, %v17346_v6  ;;  %v17354_v52 = vld [vmem:[#allocation2 + $0x169] sm:$0xff]  ;;  %v17377_v25 = vadd.f32 %v14077_v26, %v14025_v32 }
 0x23a   : > { %20685 = vst [vmem:[#allocation73_spill] sm:$0xff] %v17354_v52  ;;  %v17356_v23 = vld [vmem:[#allocation2 + $0x168] sm:$0xff]  ;;  %v17358_v20 = vld [vmem:[#allocation2 + $0x170] sm:$0xff]  ;;  %14068 = vmatprep.mubr.msk.f32.mxu1 %vm4160_vm2, %v17354_v52  ;;  %v12121_v52 = vld [vmem:[%s20299_s2 + $0x40] sm:$0xff] }
 0x23b   : > { %20686 = vst [vmem:[#allocation30_spill] sm:$0xff] %v17356_v23  ;;  %14120 = vmatprep.mubr.msk.f32.mxu0 %vm4160_vm2, %v17356_v23  ;;  %20688 = vst [vmem:[#allocation35_spill] sm:$0xff] %v17377_v25  ;;  %v17393_v26 = vld [vmem:[#allocation2 + $0x22] sm:$0xff]  ;;  %v17490_v25 = vld [vmem:[#allocation2 + $0xca] sm:$0xff] }
 0x23c   : > { %14069 = vmatmul.mubr.msk.f32.gmra.mxu1 %vm4160_vm2, %v17364_v15  ;;  %v17384_v15 = vld [vmem:[#allocation2 + $0x1a] sm:$0xff]  ;;  %v17403_v32 = vld [vmem:[%s20299_s2 + $0x68] sm:$0xff] }
 0x23d   : > { %14121 = vmatmul.mubr.msk.f32.gmra.mxu0 %vm4160_vm2, %v17358_v20  ;;  %14127 = vmatprep.mubr.msk.f32.mxu1 %vm4160_vm2, %v4904_v45  ;;  %v15002_v45 = vld [vmem:[%s20299_s2 + $0x48] sm:$0xff] }
 0x23e   : > { %14179 = vmatprep.mubr.msk.f32.mxu0 %vm4160_vm2, %v16918_v51  ;;  %v12155_v51 = vld [vmem:[%s20299_s2 + $0x50] sm:$0xff] }
 0x240   : > { %14128 = vmatmul.mubr.msk.f32.vlgmr.msra.gmra.mxu1 %vm4160_vm2, %v4905_v2  ;;  %v17434_v2 = vld [vmem:[#allocation2 + $0x62] sm:$0xff] }
 0x241   : > { %14180 = vmatmul.mubr.msk.f32.vlgmr.msra.gmra.mxu0 %vm4160_vm2, %v16920_v49  ;;  %14228 = vmatpush3.msra.mxu1 %v15002_v45  ;;  %v17398_v49 = vld [vmem:[#allocation2 + $0x32] sm:$0xff] }
 0x242   : > { %14130 = vmatprep.mubr.msk.f32.mxu1 %vm4160_vm2, %v17384_v15  ;;  %14182 = vmatprep.mubr.msk.f32.mxu0 %vm4160_vm2, %v16954_v16  ;;  %v17416_v16 = vld [vmem:[#allocation2 + $0x3a] sm:$0xff]  ;;  %v17478_v45 = vld [vmem:[#allocation2 + $0xb2] sm:$0xff] }
 0x243   : > { %14229 = vmatprep.subr.mxu1 %v12121_v52  ;;  %14280 = vmatpush3.msra.mxu0 %v16882_v60  ;;  %v17412_v60 = vld [vmem:[%s20299_s2 + $0x78] sm:$0xff] }
 0x244   : > { %14131 = vmatmul.mubr.msk.f32.gmra.mxu1 %vm4160_vm2, %v17393_v26  ;;  %14281 = vmatprep.subr.mxu0 %v12155_v51 }
 0x245   : > { %14183 = vmatmul.mubr.msk.f32.gmra.mxu0 %vm4160_vm2, %v16956_v8  ;;  %14133 = vmatprep.mubr.msk.f32.mxu1 %vm4160_vm2, %v17398_v49  ;;  %v17421_v8 = vld [vmem:[#allocation2 + $0x4a] sm:$0xff] }
 0x246   : > { %14185 = vmatprep.mubr.msk.f32.mxu0 %vm4160_vm2, %v16990_v37  ;;  %14230 = vmatpush3.msra.mxu1 %v12121_v52  ;;  %v17430_v37 = vld [vmem:[#allocation2 + $0x52] sm:$0xff]  ;;  %v17470_v52 = vld [vmem:[#allocation2 + $0xaa] sm:$0xff] }
 0x247   : > { %14282 = vmatpush3.msra.mxu0 %v12155_v51  ;;  %14331 = vmatprep.subr.mxu1 %v17403_v32  ;;  %v17482_v51 = vld [vmem:[#allocation2 + $0xc2] sm:$0xff] }
 0x248   : > { %14134 = vmatmul.mubr.msk.f32.gmra.mxu1 %vm4160_vm2, %v17416_v16  ;;  %14383 = vmatprep.subr.mxu0 %v17412_v60 }
 0x249   : > { %14186 = vmatmul.mubr.msk.f32.gmra.mxu0 %vm4160_vm2, %v16992_v13  ;;  %14136 = vmatprep.mubr.msk.f32.mxu1 %vm4160_vm2, %v17421_v8  ;;  %v17442_v13 = vld [vmem:[#allocation2 + $0x6a] sm:$0xff] }
 0x24a   : > { %14188 = vmatprep.mubr.msk.f32.mxu0 %vm4160_vm2, %v17024_v44  ;;  %v17446_v44 = vld [vmem:[#allocation2 + $0x7a] sm:$0xff] }
 0x24c   : > { %14137 = vmatmul.mubr.msk.f32.gmra.mxu1 %vm4160_vm2, %v17430_v37 }
 0x24d   : > { %14189 = vmatmul.mubr.msk.f32.gmra.mxu0 %vm4160_vm2, %v17026_v5  ;;  %14139 = vmatprep.mubr.msk.f32.mxu1 %vm4160_vm2, %v17434_v2  ;;  %v17454_v5 = vld [vmem:[#allocation2 + $0x82] sm:$0xff] }
 0x24e   : > { %14191 = vmatprep.mubr.msk.f32.mxu0 %vm4160_vm2, %v17067_v7  ;;  %v17458_v7 = vld [vmem:[#allocation2 + $0x92] sm:$0xff] }
 0x250   : > { %14140 = vmatmul.mubr.msk.f32.gmra.mxu1 %vm4160_vm2, %v17442_v13 }
 0x251   : > { %14192 = vmatmul.mubr.msk.f32.gmra.mxu0 %vm4160_vm2, %v17069_v53  ;;  %14142 = vmatprep.mubr.msk.f32.mxu1 %vm4160_vm2, %v17446_v44  ;;  %v17466_v53 = vld [vmem:[#allocation2 + $0x9a] sm:$0xff] }
 0x252   : > { %14194 = vmatprep.mubr.msk.f32.mxu0 %vm4160_vm2, %v17097_v36 }
 0x254   : > { %14143 = vmatmul.mubr.msk.f32.gmra.mxu1 %vm4160_vm2, %v17454_v5 }
 0x255   : > { %14195 = vmatmul.mubr.msk.f32.gmra.mxu0 %vm4160_vm2, %v17099_v19  ;;  %14145 = vmatprep.mubr.msk.f32.mxu1 %vm4160_vm2, %v17458_v7 }
 0x256   : > { %14197 = vmatprep.mubr.msk.f32.mxu0 %vm4160_vm2, %v17132_v43 }
 0x258   : > { %14146 = vmatmul.mubr.msk.f32.gmra.mxu1 %vm4160_vm2, %v17466_v53 }
 0x259   : > { %14198 = vmatmul.mubr.msk.f32.gmra.mxu0 %vm4160_vm2, %v17143_v9  ;;  %14148 = vmatprep.mubr.msk.f32.mxu1 %vm4160_vm2, %v17470_v52  ;;  %v17576_v9 = vld [vmem:[#allocation2 + $0x172] sm:$0xff] }
 0x25a   : > { %14200 = vmatprep.mubr.msk.f32.mxu0 %vm4160_vm2, %v17168_v54  ;;  %v17494_v54 = vld [vmem:[#allocation2 + $0xda] sm:$0xff] }
 0x25c   : > { %14149 = vmatmul.mubr.msk.f32.gmra.mxu1 %vm4160_vm2, %v17478_v45 }
 0x25d   : > { %14201 = vmatmul.mubr.msk.f32.gmra.mxu0 %vm4160_vm2, %v17179_v48  ;;  %14151 = vmatprep.mubr.msk.f32.mxu1 %vm4160_vm2, %v17482_v51  ;;  %v17502_v48 = vld [vmem:[#allocation2 + $0xe2] sm:$0xff] }
 0x25e   : > { %14203 = vmatprep.mubr.msk.f32.mxu0 %vm4160_vm2, %v17202_v33  ;;  %v17506_v33 = vld [vmem:[#allocation2 + $0xf2] sm:$0xff] }
 0x260   : > { %14152 = vmatmul.mubr.msk.f32.gmra.mxu1 %vm4160_vm2, %v17490_v25 }
 0x261   : > { %14204 = vmatmul.mubr.msk.f32.gmra.mxu0 %vm4160_vm2, %v17212_v30  ;;  %14154 = vmatprep.mubr.msk.f32.mxu1 %vm4160_vm2, %v17494_v54  ;;  %v17514_v30 = vld [vmem:[#allocation2 + $0xfa] sm:$0xff] }
 0x262   : > { %14206 = vmatprep.mubr.msk.f32.mxu0 %vm4160_vm2, %v17241_v34  ;;  %v17518_v34 = vld [vmem:[#allocation2 + $0x10a] sm:$0xff] }
 0x264   : > { %14155 = vmatmul.mubr.msk.f32.gmra.mxu1 %vm4160_vm2, %v17502_v48 }
 0x265   : > { %14207 = vmatmul.mubr.msk.f32.gmra.mxu0 %vm4160_vm2, %v17243_v17  ;;  %14157 = vmatprep.mubr.msk.f32.mxu1 %vm4160_vm2, %v17506_v33  ;;  %v17526_v17 = vld [vmem:[#allocation2 + $0x112] sm:$0xff] }
 0x266   : > { %14209 = vmatprep.mubr.msk.f32.mxu0 %vm4160_vm2, %v17266_v50  ;;  %v17530_v50 = vld [vmem:[#allocation2 + $0x122] sm:$0xff] }
 0x268   : > { %14158 = vmatmul.mubr.msk.f32.gmra.mxu1 %vm4160_vm2, %v17514_v30 }
 0x269   : > { %14210 = vmatmul.mubr.msk.f32.gmra.mxu0 %vm4160_vm2, %v17276_v18  ;;  %14160 = vmatprep.mubr.msk.f32.mxu1 %vm4160_vm2, %v17518_v34  ;;  %v17538_v18 = vld [vmem:[#allocation2 + $0x12a] sm:$0xff] }
 0x26a   : > { %14212 = vmatprep.mubr.msk.f32.mxu0 %vm4160_vm2, %v17294_v31  ;;  %v17542_v31 = vld [vmem:[#allocation2 + $0x13a] sm:$0xff] }
 0x26c   : > { %14161 = vmatmul.mubr.msk.f32.gmra.mxu1 %vm4160_vm2, %v17526_v17 }
 0x26d   : > { %14213 = vmatmul.mubr.msk.f32.gmra.mxu0 %vm4160_vm2, %v17305_v41  ;;  %14163 = vmatprep.mubr.msk.f32.mxu1 %vm4160_vm2, %v17530_v50  ;;  %v17550_v41 = vld [vmem:[#allocation2 + $0x142] sm:$0xff] }
 0x26e   : > { %14215 = vmatprep.mubr.msk.f32.mxu0 %vm4160_vm2, %v17320_v47  ;;  %v17554_v47 = vld [vmem:[#allocation2 + $0x152] sm:$0xff] }
 0x270   : > { %14164 = vmatmul.mubr.msk.f32.gmra.mxu1 %vm4160_vm2, %v17538_v18 }
 0x271   : > { %14216 = vmatmul.mubr.msk.f32.gmra.mxu0 %vm4160_vm2, %v17327_v0  ;;  %14166 = vmatprep.mubr.msk.f32.mxu1 %vm4160_vm2, %v17542_v31  ;;  %v17562_v0 = vld [vmem:[#allocation2 + $0x15a] sm:$0xff] }
 0x272   : > { %14218 = vmatprep.mubr.msk.f32.mxu0 %vm4160_vm2, %v17339_v21  ;;  %v17566_v21 = vld [vmem:[#allocation2 + $0x16a] sm:$0xff] }
 0x274   : > { %14167 = vmatmul.mubr.msk.f32.gmra.mxu1 %vm4160_vm2, %v17550_v41 }
 0x275   : > { %14219 = vmatmul.mubr.msk.f32.gmra.mxu0 %vm4160_vm2, %v17346_v6  ;;  %14169 = vmatprep.mubr.msk.f32.mxu1 %vm4160_vm2, %v17554_v47  ;;  %v17572_v6 = vld [vmem:[#allocation2 + $0x180] sm:$0xff] }
 0x276   : > { %14221 = vmatprep.mubr.msk.f32.mxu0 %vm4160_vm2, %v17356_v23  ;;  %20689 = vst [vmem:[#allocation38_spill] sm:$0xff] %v17572_v6  ;;  %v17580_v23 = vld [vmem:[#allocation2 + $0x188] sm:$0xff] }
 0x277   : > { %20690 = vst [vmem:[#allocation77_spill] sm:$0xff] %v17580_v23 }
 0x278   : > { %14170 = vmatmul.mubr.msk.f32.gmra.mxu1 %vm4160_vm2, %v17562_v0 }
 0x279   : > { %14222 = vmatmul.mubr.msk.f32.gmra.mxu0 %vm4160_vm2, %v17358_v20  ;;  %14172 = vmatprep.mubr.msk.f32.mxu1 %vm4160_vm2, %v17566_v21 }
 0x27a   : > { %14224 = vmatprep.mubr.msk.f32.mxu0 %vm4160_vm2, %v17572_v6  ;;  %v12189_v6 = vld [vmem:[%s20299_s2 + $0x60] sm:$0xff] }
 0x27c   : > { %14173 = vmatmul.mubr.msk.f32.gmra.mxu1 %vm4160_vm2, %v17576_v9 }
 0x27d   : > { %14225 = vmatmul.mubr.msk.f32.gmra.mxu0 %vm4160_vm2, %v17580_v23  ;;  %14231 = vmatprep.mubr.msk.f32.mxu1 %vm4160_vm2, %v16916_v4  ;;  %v12223_v23 = vld [vmem:[%s20299_s2 + $0x70] sm:$0xff]  ;;  %v17609_v4 = vld [vmem:[%s20299_s2 + $0x88] sm:$0xff] }
 0x27e   : > { %14283 = vmatprep.mubr.msk.f32.mxu0 %vm4160_vm2, %v17384_v15 }
 0x280   : > { %14232 = vmatmul.mubr.msk.f32.vlgmr.msra.gmra.mxu1 %vm4160_vm2, %v16930_v28  ;;  %v20691_v28 = vld [vmem:[#allocation52_spill] sm:$0xff] }
 0x281   : > { %14284 = vmatmul.mubr.msk.f32.vlgmr.msra.gmra.mxu0 %vm4160_vm2, %v17393_v26  ;;  %14332 = vmatpush3.msra.mxu1 %v17403_v32  ;;  %v6461_v32 = vld [vmem:[#allocation2 + $0x68] sm:$0xff] }
 0x282   : > { %14234 = vmatprep.mubr.msk.f32.mxu1 %vm4160_vm2, %v16952_v14  ;;  %14286 = vmatprep.mubr.msk.f32.mxu0 %vm4160_vm2, %v17398_v49  ;;  %v20693_v14 = vld [vmem:[#allocation73_spill] sm:$0xff] }
 0x283   : > { %14333 = vmatprep.subr.mxu1 %v12189_v6  ;;  %14384 = vmatpush3.msra.mxu0 %v17412_v60 }
 0x284   : > { %14235 = vmatmul.mubr.msk.f32.gmra.mxu1 %vm4160_vm2, %v16967_v11  ;;  %14385 = vmatprep.subr.mxu0 %v12223_v23  ;;  %v20694_v11 = vld [vmem:[#allocation75_spill] sm:$0xff] }
 0x285   : > { %14287 = vmatmul.mubr.msk.f32.gmra.mxu0 %vm4160_vm2, %v17416_v16  ;;  %14237 = vmatprep.mubr.msk.f32.mxu1 %vm4160_vm2, %v16988_v24  ;;  %v17716_v24 = vld [vmem:[#allocation2 + $0x181] sm:$0xff] }
 0x286   : > { %14289 = vmatprep.mubr.msk.f32.mxu0 %vm4160_vm2, %v17421_v8  ;;  %14334 = vmatpush3.msra.mxu1 %v12189_v6 }
 0x287   : > { %14386 = vmatpush3.msra.mxu0 %v12223_v23  ;;  %14435 = vmatprep.subr.mxu1 %v17609_v4 }
 0x288   : > { %14238 = vmatmul.mubr.msk.f32.gmra.mxu1 %vm4160_vm2, %v17003_v35  ;;  %v17722_v35 = vld [vmem:[#allocation2 + $0x182] sm:$0xff] }
 0x289   : > { %14290 = vmatmul.mubr.msk.f32.gmra.mxu0 %vm4160_vm2, %v17430_v37  ;;  %14240 = vmatprep.mubr.msk.f32.mxu1 %vm4160_vm2, %v17022_v62  ;;  %v20692_v62 = vld [vmem:[#allocation70_spill] sm:$0xff] }
 0x28a   : > { %14292 = vmatprep.mubr.msk.f32.mxu0 %vm4160_vm2, %v17434_v2 }
 0x28c   : > { %14241 = vmatmul.mubr.msk.f32.gmra.mxu1 %vm4160_vm2, %v17036_v22  ;;  %v17726_v22 = vld [vmem:[#allocation2 + $0x189] sm:$0xff] }
 0x28d   : > { %14293 = vmatmul.mubr.msk.f32.gmra.mxu0 %vm4160_vm2, %v17442_v13  ;;  %14243 = vmatprep.mubr.msk.f32.mxu1 %vm4160_vm2, %v17065_v56  ;;  %v6456_v56 = vld [vmem:[#allocation2 + $0x30] sm:$0xff] }
 0x28e   : > { %14295 = vmatprep.mubr.msk.f32.mxu0 %vm4160_vm2, %v17446_v44 }
 0x290   : > { %14244 = vmatmul.mubr.msk.f32.gmra.mxu1 %vm4160_vm2, %v17079_v39  ;;  %v6844_v39 = vld [vmem:[#allocation2 + $0x31] sm:$0xff] }
 0x291   : > { %14296 = vmatmul.mubr.msk.f32.gmra.mxu0 %vm4160_vm2, %v17454_v5  ;;  %14246 = vmatprep.mubr.msk.f32.mxu1 %vm4160_vm2, %v17095_v59  ;;  %v17730_v59 = vld [vmem:[#allocation2 + $0x18a] sm:$0xff] }
 0x292   : > { %14298 = vmatprep.mubr.msk.f32.mxu0 %vm4160_vm2, %v17458_v7 }
 0x294   : > { %14247 = vmatmul.mubr.msk.f32.gmra.mxu1 %vm4160_vm2, %v17114_v3  ;;  %v6457_v3 = vld [vmem:[#allocation2 + $0x38] sm:$0xff] }
 0x295   : > { %14299 = vmatmul.mubr.msk.f32.gmra.mxu0 %vm4160_vm2, %v17466_v53  ;;  %14249 = vmatprep.mubr.msk.f32.mxu1 %vm4160_vm2, %v17130_v10 }
 0x296   : > { %14301 = vmatprep.mubr.msk.f32.mxu0 %vm4160_vm2, %v17470_v52 }
 0x298   : > { %14250 = vmatmul.mubr.msk.f32.gmra.mxu1 %vm4160_vm2, %v17151_v42 }
 0x299   : > { %14302 = vmatmul.mubr.msk.f32.gmra.mxu0 %vm4160_vm2, %v17478_v45  ;;  %14252 = vmatprep.mubr.msk.f32.mxu1 %vm4160_vm2, %v20691_v28  ;;  %v6849_v45 = vld [vmem:[#allocation2 + $0x69] sm:$0xff] }
 0x29a   : > { %14304 = vmatprep.mubr.msk.f32.mxu0 %vm4160_vm2, %v17482_v51 }
 0x29c   : > { %14253 = vmatmul.mubr.msk.f32.gmra.mxu1 %vm4160_vm2, %v17185_v63 }
 0x29d   : > { %14305 = vmatmul.mubr.msk.f32.gmra.mxu0 %vm4160_vm2, %v17490_v25  ;;  %14255 = vmatprep.mubr.msk.f32.mxu1 %vm4160_vm2, %v17200_v40 }
 0x29e   : > { %14307 = vmatprep.mubr.msk.f32.mxu0 %vm4160_vm2, %v17494_v54 }
 0x2a0   : > { %14256 = vmatmul.mubr.msk.f32.gmra.mxu1 %vm4160_vm2, %v17220_v58 }
 0x2a1   : > { %14308 = vmatmul.mubr.msk.f32.gmra.mxu0 %vm4160_vm2, %v17502_v48  ;;  %14258 = vmatprep.mubr.msk.f32.mxu1 %vm4160_vm2, %v17239_v46  ;;  %v12257_v48 = vld [vmem:[%s20299_s2 + $0x80] sm:$0xff] }
 0x2a2   : > { %14310 = vmatprep.mubr.msk.f32.mxu0 %vm4160_vm2, %v17506_v33  ;;  %v17740_v33 = vpop.f32.mrf.mxu1 }
 0x2a4   : > { %14259 = vmatmul.mubr.msk.f32.gmra.mxu1 %vm4160_vm2, %v17251_v38 }
 0x2a5   : > { %14311 = vmatmul.mubr.msk.f32.gmra.mxu0 %vm4160_vm2, %v17514_v30  ;;  %14261 = vmatprep.mubr.msk.f32.mxu1 %vm4160_vm2, %v17264_v29  ;;  %v17742_v30 = vpop.f32.mrf.mxu0 }
 0x2a6   : > { %14313 = vmatprep.mubr.msk.f32.mxu0 %vm4160_vm2, %v17518_v34  ;;  %v6458_v34 = vld [vmem:[#allocation2 + $0x48] sm:$0xff] }
 0x2a8   : > { %14262 = vmatmul.mubr.msk.f32.gmra.mxu1 %vm4160_vm2, %v17280_v55 }
 0x2a9   : > { %14314 = vmatmul.mubr.msk.f32.gmra.mxu0 %vm4160_vm2, %v17526_v17  ;;  %14264 = vmatprep.mubr.msk.f32.mxu1 %vm4160_vm2, %v17292_v57  ;;  %v6846_v17 = vld [vmem:[#allocation2 + $0x49] sm:$0xff] }
 0x2aa   : > { %14316 = vmatprep.mubr.msk.f32.mxu0 %vm4160_vm2, %v17530_v50 }
 0x2ac   : > { %14265 = vmatmul.mubr.msk.f32.gmra.mxu1 %vm4160_vm2, %v17308_v12 }
 0x2ad   : > { %14317 = vmatmul.mubr.msk.f32.gmra.mxu0 %vm4160_vm2, %v17538_v18  ;;  %14267 = vmatprep.mubr.msk.f32.mxu1 %vm4160_vm2, %v17318_v27 }
 0x2ae   : > { %14319 = vmatprep.mubr.msk.f32.mxu0 %vm4160_vm2, %v17542_v31  ;;  %v6459_v31 = vld [vmem:[#allocation2 + $0x50] sm:$0xff] }
 0x2b0   : > { %14268 = vmatmul.mubr.msk.f32.gmra.mxu1 %vm4160_vm2, %v17330_v61 }
 0x2b1   : > { %14320 = vmatmul.mubr.msk.f32.gmra.mxu0 %vm4160_vm2, %v17550_v41  ;;  %14270 = vmatprep.mubr.msk.f32.mxu1 %vm4160_vm2, %v17337_v1  ;;  %v6847_v41 = vld [vmem:[#allocation2 + $0x51] sm:$0xff] }
 0x2b2   : > { %14322 = vmatprep.mubr.msk.f32.mxu0 %vm4160_vm2, %v17554_v47  ;;  %v6460_v47 = vld [vmem:[#allocation2 + $0x60] sm:$0xff] }
 0x2b4   : > { %14271 = vmatmul.mubr.msk.f32.gmra.mxu1 %vm4160_vm2, %v20692_v62 }
 0x2b5   : > { %14323 = vmatmul.mubr.msk.f32.gmra.mxu0 %vm4160_vm2, %v17562_v0  ;;  %14273 = vmatprep.mubr.msk.f32.mxu1 %vm4160_vm2, %v20693_v14  ;;  %v6848_v0 = vld [vmem:[#allocation2 + $0x61] sm:$0xff] }
 0x2b6   : > { %14325 = vmatprep.mubr.msk.f32.mxu0 %vm4160_vm2, %v17566_v21 }
 0x2b8   : > { %14274 = vmatmul.mubr.msk.f32.gmra.mxu1 %vm4160_vm2, %v20694_v11 }
 0x2b9   : > { %14326 = vmatmul.mubr.msk.f32.gmra.mxu0 %vm4160_vm2, %v17576_v9  ;;  %14276 = vmatprep.mubr.msk.f32.mxu1 %vm4160_vm2, %v17716_v24  ;;  %v6845_v9 = vld [vmem:[#allocation2 + $0x39] sm:$0xff] }
 0x2ba   : > { %14328 = vmatprep.mubr.msk.f32.mxu0 %vm4160_vm2, %v17722_v35 }
 0x2bc   : > { %14277 = vmatmul.mubr.msk.f32.gmra.mxu1 %vm4160_vm2, %v17726_v22 }
 0x2bd   : > { %14329 = vmatmul.mubr.msk.f32.gmra.mxu0 %vm4160_vm2, %v17730_v59  ;;  %14335 = vmatprep.mubr.msk.f32.mxu1 %vm4160_vm2, %v6456_v56  ;;  %v6850_v56 = vld [vmem:[#allocation2 + $0x79] sm:$0xff] }
 0x2be   : > { %14387 = vmatprep.mubr.msk.f32.mxu0 %vm4160_vm2, %v6844_v39 }
 0x2bf   : > { %v14028_v50 = vpop.f32.mrf.mxu1 }
 0x2c0   : > { %14336 = vmatmul.mubr.msk.f32.vlgmr.msra.gmra.mxu1 %vm4160_vm2, %v6457_v3  ;;  %v14080_v18 = vpop.f32.mrf.mxu0 }
 0x2c1   : > { %14388 = vmatmul.mubr.msk.f32.vlgmr.msra.gmra.mxu0 %vm4160_vm2, %v6845_v9  ;;  %14436 = vmatpush3.msra.mxu1 %v17609_v4  ;;  %v17748_v15 = vadd.f32 %v14080_v18, %v14028_v50  ;;  %v4434_v21 = vpop.f32.mrf.mxu1  ;;  %v6462_v4 = vld [vmem:[#allocation2 + $0x78] sm:$0xff]  ;;  %v6851_v18 = vld [vmem:[#allocation2 + $0x81] sm:$0xff] }
 0x2c2   : > { %14338 = vmatprep.mubr.msk.f32.mxu1 %vm4160_vm2, %v6458_v34  ;;  %14390 = vmatprep.mubr.msk.f32.mxu0 %vm4160_vm2, %v6846_v17  ;;  %v4755_v6 = vpop.f32.mrf.mxu0  ;;  %v6463_v17 = vld [vmem:[#allocation2 + $0x80] sm:$0xff] }
 0x2c3   : > { %14437 = vmatprep.subr.mxu1 %v12257_v48  ;;  %v17754_v25 = vadd.f32 %v4755_v6, %v4434_v21  ;;  %v14031_v23 = vpop.f32.mrf.mxu1 }
 0x2c4   : > { %14339 = vmatmul.mubr.msk.f32.gmra.mxu1 %vm4160_vm2, %v6459_v31  ;;  %v14083_v26 = vpop.f32.mrf.mxu0  ;;  %v6852_v31 = vld [vmem:[#allocation2 + $0x91] sm:$0xff] }
 0x2c5   : > { %14391 = vmatmul.mubr.msk.f32.gmra.mxu0 %vm4160_vm2, %v6847_v41  ;;  %14341 = vmatprep.mubr.msk.f32.mxu1 %vm4160_vm2, %v6460_v47  ;;  %v17756_v60 = vadd.f32 %v14083_v26, %v14031_v23  ;;  %v4444_v39 = vpop.f32.mrf.mxu1  ;;  %v6853_v26 = vld [vmem:[#allocation2 + $0x99] sm:$0xff] }
 0x2c6   : > { %14393 = vmatprep.mubr.msk.f32.mxu0 %vm4160_vm2, %v6848_v0  ;;  %14438 = vmatpush3.msra.mxu1 %v12257_v48  ;;  %v4765_v3 = vpop.f32.mrf.mxu0 }
 0x2c7   : > { %v17762_v9 = vadd.f32 %v4765_v3, %v4444_v39  ;;  %v20695_v39 = vld [vmem:[#allocation25_spill] sm:$0xff] }
 0x2c8   : > { %14342 = vmatmul.mubr.msk.f32.gmra.mxu1 %vm4160_vm2, %v6461_v32  ;;  %v14034_v48 = vpop.f32.mrf.mxu1  ;;  %v14086_v34 = vpop.f32.mrf.mxu0 }
 0x2c9   : > { %14394 = vmatmul.mubr.msk.f32.gmra.mxu0 %vm4160_vm2, %v6849_v45  ;;  %14344 = vmatprep.mubr.msk.f32.mxu1 %vm4160_vm2, %v6462_v4  ;;  %v17764_v50 = vadd.f32 %v14086_v34, %v14034_v48 }
 0x2ca   : > { %14396 = vmatprep.mubr.msk.f32.mxu0 %vm4160_vm2, %v6850_v56  ;;  %v4454_v41 = vpop.f32.mrf.mxu1  ;;  %v4775_v47 = vpop.f32.mrf.mxu0 }
 0x2cb   : > { %v17771_v0 = vadd.f32 %v4775_v47, %v4454_v41 }
 0x2cc   : > { %14345 = vmatmul.mubr.msk.f32.gmra.mxu1 %vm4160_vm2, %v6463_v17  ;;  %v14037_v21 = vpop.f32.mrf.mxu1  ;;  %v14089_v6 = vpop.f32.mrf.mxu0 }
 0x2cd   : > { %14397 = vmatmul.mubr.msk.f32.gmra.mxu0 %vm4160_vm2, %v6851_v18  ;;  %14347 = vmatprep.mubr.msk.f32.mxu1 %vm4160_vm2, %v17097_v36  ;;  %v17773_v23 = vadd.f32 %v14089_v6, %v14037_v21  ;;  %v20697_v18 = vld [vmem:[#allocation59_spill] sm:$0xff]  ;;  %v20699_v6 = vld [vmem:[#allocation58_spill] sm:$0xff] }
 0x2ce   : > { %14399 = vmatprep.mubr.msk.f32.mxu0 %vm4160_vm2, %v6852_v31  ;;  %v4464_v36 = vpop.f32.mrf.mxu1  ;;  %v4785_v32 = vpop.f32.mrf.mxu0 }
 0x2cf   : > { %v17782_v45 = vadd.f32 %v4785_v32, %v4464_v36  ;;  %v20700_v36 = vld [vmem:[#allocation32_spill] sm:$0xff] }
 0x2d0   : > { %14348 = vmatmul.mubr.msk.f32.gmra.mxu1 %vm4160_vm2, %v17099_v19  ;;  %v20696_v19 = vld [vmem:[#allocation54_spill] sm:$0xff] }
 0x2d1   : > { %14400 = vmatmul.mubr.msk.f32.gmra.mxu0 %vm4160_vm2, %v6853_v26  ;;  %14350 = vmatprep.mubr.msk.f32.mxu1 %vm4160_vm2, %v17132_v43 }
 0x2d2   : > { %14402 = vmatprep.mubr.msk.f32.mxu0 %vm4160_vm2, %v17130_v10  ;;  %v14040_v4 = vpop.f32.mrf.mxu1  ;;  %v14092_v56 = vpop.f32.mrf.mxu0 }
 0x2d3   : > { %v17786_v3 = vadd.f32 %v14092_v56, %v14040_v4 }
 0x2d4   : > { %14351 = vmatmul.mubr.msk.f32.gmra.mxu1 %vm4160_vm2, %v20695_v39  ;;  %v4474_v43 = vpop.f32.mrf.mxu1  ;;  %v4795_v10 = vpop.f32.mrf.mxu0  ;;  %v20701_v39 = vld [vmem:[#allocation60_spill] sm:$0xff] }
 0x2d5   : > { %14403 = vmatmul.mubr.msk.f32.gmra.mxu0 %vm4160_vm2, %v17151_v42  ;;  %14353 = vmatprep.mubr.msk.f32.mxu1 %vm4160_vm2, %v20696_v19  ;;  %v17794_v48 = vadd.f32 %v4795_v10, %v4474_v43  ;;  %v20698_v42 = vld [vmem:[#allocation56_spill] sm:$0xff] }
 0x2d6   : > { %14405 = vmatprep.mubr.msk.f32.mxu0 %vm4160_vm2, %v20691_v28  ;;  %v14043_v34 = vpop.f32.mrf.mxu1  ;;  %v14095_v17 = vpop.f32.mrf.mxu0 }
 0x2d7   : > { %v17798_v31 = vadd.f32 %v14095_v17, %v14043_v34  ;;  %v20703_v17 = vld [vmem:[#allocation24_spill] sm:$0xff] }
 0x2d8   : > { %14354 = vmatmul.mubr.msk.f32.gmra.mxu1 %vm4160_vm2, %v20697_v18  ;;  %v4484_v28 = vpop.f32.mrf.mxu1  ;;  %v4805_v41 = vpop.f32.mrf.mxu0 }
 0x2d9   : > { %14406 = vmatmul.mubr.msk.f32.gmra.mxu0 %vm4160_vm2, %v17185_v63  ;;  %14356 = vmatprep.mubr.msk.f32.mxu1 %vm4160_vm2, %v20698_v42  ;;  %v17806_v47 = vadd.f32 %v4805_v41, %v4484_v28 }
 0x2da   : > { %14408 = vmatprep.mubr.msk.f32.mxu0 %vm4160_vm2, %v17200_v40  ;;  %v14098_v26 = vpop.f32.mrf.mxu0 }
 0x2db   : > { %v14046_v21 = vpop.f32.mrf.mxu1 }
 0x2dc   : > { %14357 = vmatmul.mubr.msk.f32.gmra.mxu1 %vm4160_vm2, %v20699_v6  ;;  %v17814_v63 = vadd.f32 %v14098_v26, %v14046_v21  ;;  %v4815_v32 = vpop.f32.mrf.mxu0  ;;  %v20705_v21 = vld [vmem:[#allocation71_spill] sm:$0xff] }
 0x2dd   : > { %14409 = vmatmul.mubr.msk.f32.gmra.mxu0 %vm4160_vm2, %v17220_v58  ;;  %14359 = vmatprep.mubr.msk.f32.mxu1 %vm4160_vm2, %v20700_v36  ;;  %v4494_v40 = vpop.f32.mrf.mxu1  ;;  %v20702_v58 = vld [vmem:[#allocation62_spill] sm:$0xff] }
 0x2de   : > { %14411 = vmatprep.mubr.msk.f32.mxu0 %vm4160_vm2, %v17239_v46  ;;  %v17818_v4 = vadd.f32 %v4815_v32, %v4494_v40  ;;  %v14101_v19 = vpop.f32.mrf.mxu0  ;;  %v20707_v32 = vld [vmem:[#allocation66_spill] sm:$0xff] }
 0x2e0   : > { %v14049_v56 = vpop.f32.mrf.mxu1  ;;  %14360 = vmatmul.mubr.msk.f32.gmra.mxu1 %vm4160_vm2, %v20701_v39  ;;  %v17832_v10 = vpop.f32.mrf.mxu0 }
 0x2e1   : > { %14412 = vmatmul.mubr.msk.f32.gmra.mxu0 %vm4160_vm2, %v17251_v38  ;;  %14362 = vmatprep.mubr.msk.f32.mxu1 %vm4160_vm2, %v20702_v58  ;;  %v17826_v43 = vadd.f32 %v14101_v19, %v14049_v56  ;;  %v20704_v38 = vld [vmem:[#allocation69_spill] sm:$0xff] }
 0x2e2   : > { %14414 = vmatprep.mubr.msk.f32.mxu0 %vm4160_vm2, %v17264_v29  ;;  %v17830_v46 = vpop.f32.mrf.mxu1 }
 0x2e4   : > { %v14052_v34 = vpop.f32.mrf.mxu1  ;;  %14363 = vmatmul.mubr.msk.f32.gmra.mxu1 %vm4160_vm2, %v20703_v17  ;;  %v14104_v18 = vpop.f32.mrf.mxu0 }
 0x2e5   : > { %14415 = vmatmul.mubr.msk.f32.gmra.mxu0 %vm4160_vm2, %v17280_v55  ;;  %14365 = vmatprep.mubr.msk.f32.mxu1 %vm4160_vm2, %v20704_v38  ;;  %v17840_v42 = vadd.f32 %v14104_v18, %v14052_v34  ;;  %v20706_v55 = vld [vmem:[#allocation28_spill] sm:$0xff] }
 0x2e6   : > { %14417 = vmatprep.mubr.msk.f32.mxu0 %vm4160_vm2, %v17292_v57  ;;  %v17844_v29 = vpop.f32.mrf.mxu1  ;;  %v17846_v28 = vpop.f32.mrf.mxu0  ;;  %v20709_v34 = vld [vmem:[#allocation68_spill] sm:$0xff] }
 0x2e8   : > { %v14055_v41 = vpop.f32.mrf.mxu1  ;;  %14366 = vmatmul.mubr.msk.f32.gmra.mxu1 %vm4160_vm2, %v20705_v21 }
 0x2e9   : > { %v14107_v6 = vpop.f32.mrf.mxu0  ;;  %14418 = vmatmul.mubr.msk.f32.gmra.mxu0 %vm4160_vm2, %v17308_v12  ;;  %14368 = vmatprep.mubr.msk.f32.mxu1 %vm4160_vm2, %v20706_v55  ;;  %v20708_v12 = vld [vmem:[#allocation31_spill] sm:$0xff]  ;;  %v6486_v55 = vld [vmem:[#allocation2 + $0x198] sm:$0xff] }
 0x2ea   : > { %v17854_v26 = vadd.f32 %v14107_v6, %v14055_v41  ;;  %14420 = vmatprep.mubr.msk.f32.mxu0 %vm4160_vm2, %v17318_v27  ;;  %v17858_v57 = vpop.f32.mrf.mxu1 }
 0x2eb   : > { %v17860_v36 = vpop.f32.mrf.mxu0 }
 0x2ec   : > { %v14058_v40 = vpop.f32.mrf.mxu1  ;;  %14369 = vmatmul.mubr.msk.f32.gmra.mxu1 %vm4160_vm2, %v20707_v32  ;;  %v6874_v32 = vld [vmem:[#allocation2 + $0x199] sm:$0xff] }
 0x2ed   : > { %v14110_v56 = vpop.f32.mrf.mxu0  ;;  %14421 = vmatmul.mubr.msk.f32.gmra.mxu0 %vm4160_vm2, %v17330_v61  ;;  %14371 = vmatprep.mubr.msk.f32.mxu1 %vm4160_vm2, %v20708_v12  ;;  %v20710_v61 = vld [vmem:[#allocation30_spill] sm:$0xff] }
 0x2ee   : > { %v17868_v39 = vadd.f32 %v14110_v56, %v14058_v40  ;;  %14423 = vmatprep.mubr.msk.f32.mxu0 %vm4160_vm2, %v17337_v1  ;;  %v17872_v27 = vpop.f32.mrf.mxu1 }
 0x2ef   : > { %v17874_v19 = vpop.f32.mrf.mxu0 }
 0x2f0   : > { %v14061_v58 = vpop.f32.mrf.mxu1  ;;  %14372 = vmatmul.mubr.msk.f32.gmra.mxu1 %vm4160_vm2, %v20709_v34  ;;  %v6875_v34 = vld [vmem:[#allocation2 + $0x1a1] sm:$0xff] }
 0x2f1   : > { %v14113_v17 = vpop.f32.mrf.mxu0  ;;  %14424 = vmatmul.mubr.msk.f32.gmra.mxu0 %vm4160_vm2, %v20692_v62  ;;  %14374 = vmatprep.mubr.msk.f32.mxu1 %vm4160_vm2, %v20710_v61  ;;  %v20711_v62 = vld [vmem:[#allocation38_spill] sm:$0xff] }
 0x2f2   : > { %v17882_v18 = vadd.f32 %v14113_v17, %v14061_v58  ;;  %14426 = vmatprep.mubr.msk.f32.mxu0 %vm4160_vm2, %v20693_v14  ;;  %v17886_v1 = vpop.f32.mrf.mxu1 }
 0x2f3   : > { %v17888_v38 = vpop.f32.mrf.mxu0 }
 0x2f4   : > { %v14064_v41 = vpop.f32.mrf.mxu1  ;;  %14375 = vmatmul.mubr.msk.f32.gmra.mxu1 %vm4160_vm2, %v17358_v20  ;;  %v20712_v20 = vld [vmem:[#allocation77_spill] sm:$0xff] }
 0x2f5   : > { %v14116_v21 = vpop.f32.mrf.mxu0  ;;  %14427 = vmatmul.mubr.msk.f32.gmra.mxu0 %vm4160_vm2, %v20694_v11  ;;  %14377 = vmatprep.mubr.msk.f32.mxu1 %vm4160_vm2, %v20711_v62  ;;  %v6487_v11 = vld [vmem:[#allocation2 + $0x1a0] sm:$0xff] }
 0x2f6   : > { %v17896_v6 = vadd.f32 %v14116_v21, %v14064_v41  ;;  %14429 = vmatprep.mubr.msk.f32.mxu0 %vm4160_vm2, %v17716_v24  ;;  %v17900_v14 = vpop.f32.mrf.mxu1 }
 0x2f7   : > { %v17902_v40 = vpop.f32.mrf.mxu0 }
 0x2f8   : > { %v14067_v56 = vpop.f32.mrf.mxu1  ;;  %14378 = vmatmul.mubr.msk.f32.gmra.mxu1 %vm4160_vm2, %v20712_v20 }
 0x2f9   : > { %v14119_v12 = vpop.f32.mrf.mxu0  ;;  %14430 = vmatmul.mubr.msk.f32.gmra.mxu0 %vm4160_vm2, %v17726_v22  ;;  %14380 = vmatprep.mubr.msk.f32.mxu1 %vm4160_vm2, %v6486_v55 }
 0x2fa   : > { %v17909_v58 = vadd.f32 %v14119_v12, %v14067_v56  ;;  %v17911_v24 = vpop.f32.mrf.mxu1  ;;  %14432 = vmatprep.mubr.msk.f32.mxu0 %vm4160_vm2, %v6874_v32  ;;  %v20713_v32 = vld [vmem:[#allocation35_spill] sm:$0xff] }
 0x2fb   : > { %v17914_v17 = vpop.f32.mrf.mxu0 }
 0x2fc   : > { %v14070_v61 = vpop.f32.mrf.mxu1  ;;  %14381 = vmatmul.mubr.msk.f32.gmra.mxu1 %vm4160_vm2, %v6487_v11 }
 0x2fd   : > { %v14122_v41 = vpop.f32.mrf.mxu0  ;;  %14439 = vmatprep.mubr.msk.f32.mxu1 %vm4160_vm2, %v17398_v49  ;;  %14433 = vmatmul.mubr.msk.f32.gmra.mxu0 %vm4160_vm2, %v6875_v34 }
 0x2fe   : > { %v17920_v22 = vadd.f32 %v14122_v41, %v14070_v61  ;;  %v17922_v21 = vpop.f32.mrf.mxu1 }
 0x2ff   : > { %v17924_v62 = vpop.f32.mrf.mxu0 }
 0x300   : > { %v14129_v55 = vpop.f32.mrf.mxu1  ;;  %14440 = vmatmul.mubr.msk.f32.vlgmr.msra.gmra.mxu1 %vm4160_vm2, %v17416_v16 }
 0x301   : > { %v5261_v56 = vadd.f32 %v14129_v55, %v20713_v32  ;;  %v14181_v20 = vpop.f32.mrf.mxu0  ;;  %14442 = vmatprep.mubr.msk.f32.mxu1 %vm4160_vm2, %v17421_v8 }
 0x302   : > { %v17931_v12 = vpop.f32.mrf.mxu1 }
 0x303   : > { %v17933_v49 = vadd.f32 %v14181_v20, %v5261_v56  ;;  %v17935_v11 = vpop.f32.mrf.mxu0 }
 0x304   : > { %v14132_v34 = vpop.f32.mrf.mxu1  ;;  %14443 = vmatmul.mubr.msk.f32.gmra.mxu1 %vm4160_vm2, %v17430_v37 }
 0x305   : > { %v5263_v61 = vadd.f32 %v14132_v34, %v17748_v15  ;;  %v14184_v41 = vpop.f32.mrf.mxu0  ;;  %14445 = vmatprep.mubr.msk.f32.mxu1 %vm4160_vm2, %v17434_v2 }
 0x306   : > { %v5111_v16 = vpop.f32.mrf.mxu1 }
 0x307   : > { %v17942_v55 = vadd.f32 %v14184_v41, %v5263_v61  ;;  %v17945_v8 = vadd.f32 %v5111_v16, %v17754_v25  ;;  %v17947_v32 = vpop.f32.mrf.mxu0 }
 0x308   : > { %v14135_v56 = vpop.f32.mrf.mxu1  ;;  %14446 = vmatmul.mubr.msk.f32.gmra.mxu1 %vm4160_vm2, %v17442_v13 }
 0x309   : > { %v5265_v37 = vadd.f32 %v14135_v56, %v17756_v60  ;;  %v14187_v20 = vpop.f32.mrf.mxu0  ;;  %14448 = vmatprep.mubr.msk.f32.mxu1 %vm4160_vm2, %v17446_v44 }
 0x30a   : > { %v5121_v15 = vpop.f32.mrf.mxu1 }
 0x30b   : > { %v17954_v2 = vadd.f32 %v14187_v20, %v5265_v37  ;;  %v17957_v34 = vadd.f32 %v5121_v15, %v17762_v9  ;;  %v17959_v25 = vpop.f32.mrf.mxu0 }
 0x30c   : > { %v14138_v61 = vpop.f32.mrf.mxu1  ;;  %14449 = vmatmul.mubr.msk.f32.gmra.mxu1 %vm4160_vm2, %v17454_v5 }
 0x30d   : > { %v5267_v13 = vadd.f32 %v14138_v61, %v17764_v50  ;;  %v14190_v41 = vpop.f32.mrf.mxu0  ;;  %14451 = vmatprep.mubr.msk.f32.mxu1 %vm4160_vm2, %v17458_v7  ;;  %v7829_v50 = vld [vmem:[#allocation3 + $0x8] sm:$0xff] }
 0x30e   : > { %v5131_v60 = vpop.f32.mrf.mxu1  ;;  %14487 = vmatprep.subr.mxu0 %v7829_v50  ;;  %v7243_v61 = vld [vmem:[#allocation2 + $0xb2] sm:$0xff] }
 0x30f   : > { %v17966_v44 = vadd.f32 %v14190_v41, %v5267_v13  ;;  %v17969_v16 = vadd.f32 %v5131_v60, %v17771_v0  ;;  %v17971_v9 = vpop.f32.mrf.mxu0  ;;  %14488 = vmatpush3.msra.mxu0 %v7829_v50 }
 0x310   : > { %v14141_v56 = vpop.f32.mrf.mxu1  ;;  %14452 = vmatmul.mubr.msk.f32.gmra.mxu1 %vm4160_vm2, %v17466_v53 }
 0x311   : > { %v5269_v5 = vadd.f32 %v14141_v56, %v17773_v23  ;;  %v14193_v37 = vpop.f32.mrf.mxu0  ;;  %14454 = vmatprep.mubr.msk.f32.mxu1 %vm4160_vm2, %v17470_v52  ;;  %v7245_v56 = vld [vmem:[#allocation2 + $0xca] sm:$0xff] }
 0x312   : > { %v5141_v7 = vpop.f32.mrf.mxu1 }
 0x313   : > { %v17978_v20 = vadd.f32 %v14193_v37, %v5269_v5  ;;  %v17981_v0 = vadd.f32 %v5141_v7, %v17782_v45  ;;  %v17983_v15 = vpop.f32.mrf.mxu0 }
 0x314   : > { %v14144_v13 = vpop.f32.mrf.mxu1  ;;  %14455 = vmatmul.mubr.msk.f32.gmra.mxu1 %vm4160_vm2, %v7243_v61  ;;  %v7247_v61 = vld [vmem:[#allocation2 + $0xe2] sm:$0xff] }
 0x315   : > { %v5271_v53 = vadd.f32 %v14144_v13, %v17786_v3  ;;  %v14196_v23 = vpop.f32.mrf.mxu0  ;;  %14457 = vmatprep.mubr.msk.f32.mxu1 %vm4160_vm2, %v17482_v51 }
 0x316   : > { %v5151_v52 = vpop.f32.mrf.mxu1 }
 0x317   : > { %v17989_v41 = vadd.f32 %v14196_v23, %v5271_v53  ;;  %v17992_v60 = vadd.f32 %v5151_v52, %v17794_v48  ;;  %v17994_v45 = vpop.f32.mrf.mxu0  ;;  %v7248_v53 = vld [vmem:[#allocation2 + $0xf2] sm:$0xff] }
 0x318   : > { %v14147_v5 = vpop.f32.mrf.mxu1  ;;  %14458 = vmatmul.mubr.msk.f32.gmra.mxu1 %vm4160_vm2, %v7245_v56 }
 0x319   : > { %v5273_v37 = vadd.f32 %v14147_v5, %v17798_v31  ;;  %v14199_v50 = vpop.f32.mrf.mxu0  ;;  %14460 = vmatprep.mubr.msk.f32.mxu1 %vm4160_vm2, %v17494_v54  ;;  %v7249_v5 = vld [vmem:[#allocation2 + $0xfa] sm:$0xff] }
 0x31a   : > { %v5161_v3 = vpop.f32.mrf.mxu1 }
 0x31b   : > { %v18000_v51 = vadd.f32 %v14199_v50, %v5273_v37  ;;  %v18003_v7 = vadd.f32 %v5161_v3, %v17806_v47  ;;  %v18005_v48 = vpop.f32.mrf.mxu0  ;;  %v7250_v50 = vld [vmem:[#allocation2 + $0x10a] sm:$0xff]  ;;  %v4826_v3 = vadd.f32 %v17832_v10, %v17830_v46 }
 0x31c   : > { %v14150_v13 = vpop.f32.mrf.mxu1  ;;  %14461 = vmatmul.mubr.msk.f32.gmra.mxu1 %vm4160_vm2, %v7247_v61 }
 0x31d   : > { %v5275_v23 = vadd.f32 %v14150_v13, %v17814_v63  ;;  %v14202_v31 = vpop.f32.mrf.mxu0  ;;  %14463 = vmatprep.mubr.msk.f32.mxu1 %vm4160_vm2, %v7248_v53 }
 0x31e   : > { %v5171_v52 = vpop.f32.mrf.mxu1 }
 0x31f   : > { %v18010_v54 = vadd.f32 %v14202_v31, %v5275_v23  ;;  %v18013_v56 = vadd.f32 %v5171_v52, %v17818_v4  ;;  %v18015_v47 = vpop.f32.mrf.mxu0  ;;  %v7251_v31 = vld [vmem:[#allocation2 + $0x112] sm:$0xff] }
 0x320   : > { %20715 = vst [vmem:[#allocation74_spill] sm:$0xff] %v18015_v47  ;;  %v14153_v37 = vpop.f32.mrf.mxu1  ;;  %14464 = vmatmul.mubr.msk.f32.gmra.mxu1 %vm4160_vm2, %v7249_v5  ;;  %v7252_v5 = vld [vmem:[#allocation2 + $0x122] sm:$0xff] }
 0x321   : > { %20714 = vst [vmem:[#allocation72_spill] sm:$0xff] %v18013_v56  ;;  %v5277_v63 = vadd.f32 %v14153_v37, %v17826_v43  ;;  %v14205_v61 = vpop.f32.mrf.mxu0  ;;  %14466 = vmatprep.mubr.msk.f32.mxu1 %vm4160_vm2, %v7250_v50  ;;  %v7253_v50 = vld [vmem:[#allocation2 + $0x12a] sm:$0xff] }
 0x322   : > { %v5181_v13 = vpop.f32.mrf.mxu1 }
 0x323   : > { %v18022_v53 = vadd.f32 %v14205_v61, %v5277_v63  ;;  %v18024_v4 = vadd.f32 %v5181_v13, %v4826_v3  ;;  %v18026_v23 = vpop.f32.mrf.mxu0  ;;  %v7254_v63 = vld [vmem:[#allocation2 + $0x13a] sm:$0xff] }
 0x324   : > { %20717 = vst [vmem:[#allocation79_spill] sm:$0xff] %v18026_v23  ;;  %v14156_v52 = vpop.f32.mrf.mxu1  ;;  %14467 = vmatmul.mubr.msk.f32.gmra.mxu1 %vm4160_vm2, %v7251_v31 }
 0x325   : > { %20716 = vst [vmem:[#allocation33_spill] sm:$0xff] %v18024_v4  ;;  %v5279_v47 = vadd.f32 %v14156_v52, %v17840_v42  ;;  %v14208_v46 = vpop.f32.mrf.mxu0  ;;  %14469 = vmatprep.mubr.msk.f32.mxu1 %vm4160_vm2, %v7252_v5 }
 0x326   : > { %v18031_v43 = vpop.f32.mrf.mxu1 }
 0x327   : > { %v18033_v10 = vadd.f32 %v14208_v46, %v5279_v47  ;;  %v18035_v37 = vpop.f32.mrf.mxu0  ;;  %v7255_v47 = vld [vmem:[#allocation2 + $0x142] sm:$0xff]  ;;  %v7256_v46 = vld [vmem:[#allocation2 + $0x152] sm:$0xff] }
 0x328   : > { %20718 = vst [vmem:[#allocation11_spill] sm:$0xff] %v18035_v37  ;;  %v14159_v3 = vpop.f32.mrf.mxu1  ;;  %14470 = vmatmul.mubr.msk.f32.gmra.mxu1 %vm4160_vm2, %v7253_v50 }
 0x329   : > { %v5281_v61 = vadd.f32 %v14159_v3, %v17854_v26  ;;  %v14211_v13 = vpop.f32.mrf.mxu0  ;;  %14472 = vmatprep.mubr.msk.f32.mxu1 %vm4160_vm2, %v7254_v63 }
 0x32a   : > { %v18040_v42 = vpop.f32.mrf.mxu1 }
 0x32b   : > { %v18042_v31 = vadd.f32 %v14211_v13, %v5281_v61  ;;  %v18044_v52 = vpop.f32.mrf.mxu0  ;;  %v7257_v61 = vld [vmem:[#allocation2 + $0x15a] sm:$0xff] }
 0x32c   : > { %20719 = vst [vmem:[#allocation76_spill] sm:$0xff] %v18044_v52  ;;  %v14162_v5 = vpop.f32.mrf.mxu1  ;;  %14473 = vmatmul.mubr.msk.f32.gmra.mxu1 %vm4160_vm2, %v7255_v47  ;;  %v7258_v52 = vld [vmem:[#allocation2 + $0x16a] sm:$0xff] }
 0x32d   : > { %v5283_v37 = vadd.f32 %v14162_v5, %v17868_v39  ;;  %v14214_v50 = vpop.f32.mrf.mxu0  ;;  %14475 = vmatprep.mubr.msk.f32.mxu1 %vm4160_vm2, %v7256_v46 }
 0x32e   : > { %v18049_v26 = vpop.f32.mrf.mxu1 }
 0x32f   : > { %20720 = vst [vmem:[#allocation34_spill] sm:$0xff] %v18049_v26  ;;  %v18051_v3 = vadd.f32 %v14214_v50, %v5283_v37  ;;  %v18053_v63 = vpop.f32.mrf.mxu0  ;;  %v7259_v37 = vld [vmem:[#allocation2 + $0x172] sm:$0xff] }
 0x330   : > { %20721 = vst [vmem:[#allocation37_spill] sm:$0xff] %v18053_v63  ;;  %v14165_v13 = vpop.f32.mrf.mxu1  ;;  %14476 = vmatmul.mubr.msk.f32.gmra.mxu1 %vm4160_vm2, %v7257_v61  ;;  %v7262_v61 = vld [vmem:[#allocation2 + $0x19a] sm:$0xff]  ;;  %v7795_v26 = vld [vmem:[#allocation3] sm:$0xff] }
 0x331   : > { %v5285_v23 = vadd.f32 %v14165_v13, %v17882_v18  ;;  %v14217_v47 = vpop.f32.mrf.mxu0  ;;  %14478 = vmatprep.mubr.msk.f32.mxu1 %vm4160_vm2, %v7258_v52  ;;  %14537 = vmatprep.subr.mxu1 %v7795_v26 }
 0x332   : > { %v18058_v39 = vpop.f32.mrf.mxu1  ;;  %14538 = vmatpush3.msra.mxu1 %v7795_v26 }
 0x333   : > { %20722 = vst [vmem:[#allocation78_spill] sm:$0xff] %v18058_v39  ;;  %v18060_v5 = vadd.f32 %v14217_v47, %v5285_v23  ;;  %v18062_v46 = vpop.f32.mrf.mxu0 }
 0x334   : > { %20723 = vst [vmem:[#allocation80_spill] sm:$0xff] %v18062_v46  ;;  %v14168_v50 = vpop.f32.mrf.mxu1  ;;  %14479 = vmatmul.mubr.msk.f32.gmra.mxu1 %vm4160_vm2, %v7259_v37 }
 0x335   : > { %v5287_v63 = vadd.f32 %v14168_v50, %v17896_v6  ;;  %v14220_v4 = vpop.f32.mrf.mxu0  ;;  %14481 = vmatprep.mubr.msk.f32.mxu1 %vm4160_vm2, %v17722_v35  ;;  %v7263_v6 = vld [vmem:[#allocation2 + $0x1a2] sm:$0xff] }
 0x336   : > { %v18068_v18 = vpop.f32.mrf.mxu1 }
 0x337   : > { %20724 = vst [vmem:[#allocation36_spill] sm:$0xff] %v18068_v18  ;;  %v18070_v52 = vadd.f32 %v14220_v4, %v5287_v63  ;;  %v18072_v13 = vpop.f32.mrf.mxu0 }
 0x338   : > { %20725 = vst [vmem:[#allocation82_spill] sm:$0xff] %v18072_v13  ;;  %v14171_v23 = vpop.f32.mrf.mxu1  ;;  %14482 = vmatmul.mubr.msk.f32.gmra.mxu1 %vm4160_vm2, %v17730_v59 }
 0x339   : > { %v5289_v47 = vadd.f32 %v14171_v23, %v17909_v58  ;;  %v14223_v37 = vpop.f32.mrf.mxu0  ;;  %14484 = vmatprep.mubr.msk.f32.mxu1 %vm4160_vm2, %v7262_v61 }
 0x33a   : > { %v18078_v50 = vpop.f32.mrf.mxu1 }
 0x33b   : > { %20726 = vst [vmem:[#allocation84_spill] sm:$0xff] %v18078_v50  ;;  %v18080_v35 = vadd.f32 %v14223_v37, %v5289_v47  ;;  %v18082_v46 = vpop.f32.mrf.mxu0 }
 0x33c   : > { %20727 = vst [vmem:[#allocation41_spill] sm:$0xff] %v18082_v46  ;;  %v14174_v4 = vpop.f32.mrf.mxu1  ;;  %14485 = vmatmul.mubr.msk.f32.gmra.mxu1 %vm4160_vm2, %v7263_v6 }
 0x33d   : > { %v5291_v63 = vadd.f32 %v14174_v4, %v17920_v22  ;;  %v14226_v13 = vpop.f32.mrf.mxu0 }
 0x33e   : > { %v18086_v18 = vpop.f32.mrf.mxu1 }
 0x33f   : > { %20728 = vst [vmem:[#allocation44_spill] sm:$0xff] %v18086_v18  ;;  %v18088_v59 = vadd.f32 %v14226_v13, %v5291_v63  ;;  %v18090_v58 = vpop.f32.mrf.mxu0 }
 0x340   : > { %20729 = vst [vmem:[#allocation39_spill] sm:$0xff] %v18090_v58  ;;  %v14233_v61 = vpop.f32.mrf.mxu1 }
 0x341   : > { %v18093_v23 = vadd.f32 %v14233_v61, %v17933_v49  ;;  %v18095_v47 = vpop.f32.mrf.mxu0 }
 0x342   : > { %v18097_v37 = vpop.f32.mrf.mxu1 }
 0x343   : > { %v18099_v46 = vpop.f32.mrf.mxu0 }
 0x344   : > { %v14236_v6 = vpop.f32.mrf.mxu1 }
 0x345   : > { %v18102_v22 = vadd.f32 %v14236_v6, %v17942_v55  ;;  %v18104_v4 = vpop.f32.mrf.mxu0 }
 0x346   : > { %v18106_v13 = vpop.f32.mrf.mxu1 }
 0x347   : > { %v18108_v63 = vpop.f32.mrf.mxu0 }
 0x348   : > { %20730 = vst [vmem:[#allocation81_spill] sm:$0xff] %v18108_v63  ;;  %v14239_v58 = vpop.f32.mrf.mxu1  ;;  %v7796_v63 = vld [vmem:[#allocation2 + $0x1] sm:$0xff] }
 0x349   : > { %v18111_v49 = vadd.f32 %v14239_v58, %v17954_v2  ;;  %v18113_v61 = vpop.f32.mrf.mxu0  ;;  %v7763_v2 = vld [vmem:[#allocation2] sm:$0xff]  ;;  %14489 = vmatprep.mubr.msk.f32.mxu0 %vm7730_vm3, %v7796_v63 }
 0x34a   : > { %20732 = vst [vmem:[#allocation87_spill] sm:$0xff] %v18113_v61  ;;  %v18115_v18 = vpop.f32.mrf.mxu1  ;;  %v7797_v61 = vld [vmem:[#allocation2 + $0x9] sm:$0xff]  ;;  %14539 = vmatprep.mubr.msk.f32.mxu1 %vm7730_vm3, %v7763_v2 }
 0x34b   : > { %20731 = vst [vmem:[#allocation83_spill] sm:$0xff] %v18111_v49  ;;  %v18117_v50 = vpop.f32.mrf.mxu0  ;;  %14490 = vmatmul.mubr.msk.f32.vlgmr.msra.gmra.mxu0 %vm7730_vm3, %v7797_v61 }
 0x34c   : > { %20733 = vst [vmem:[#allocation85_spill] sm:$0xff] %v18117_v50  ;;  %v14242_v39 = vpop.f32.mrf.mxu1  ;;  %v7764_v50 = vld [vmem:[#allocation2 + $0x8] sm:$0xff] }
 0x34d   : > { %v18120_v55 = vadd.f32 %v14242_v39, %v17966_v44  ;;  %v18122_v6 = vpop.f32.mrf.mxu0  ;;  %14540 = vmatmul.mubr.msk.f32.vlgmr.msra.gmra.mxu1 %vm7730_vm3, %v7764_v50 }
 0x34e   : > { %20735 = vst [vmem:[#allocation40_spill] sm:$0xff] %v18122_v6  ;;  %v18124_v56 = vpop.f32.mrf.mxu1 }
 0x34f   : > { %20734 = vst [vmem:[#allocation42_spill] sm:$0xff] %v18120_v55  ;;  %v18126_v58 = vpop.f32.mrf.mxu0 }
 0x350   : > { %20736 = vst [vmem:[#allocation43_spill] sm:$0xff] %v18126_v58  ;;  %v14245_v49 = vpop.f32.mrf.mxu1 }
 0x351   : > { %v18132_v44 = vadd.f32 %v14245_v49, %v17978_v20  ;;  %v18134_v39 = vpop.f32.mrf.mxu0  ;;  %v8505_v20 = vld [vmem:[#allocation3 + $0x10] sm:$0xff] }
 0x352   : > { %20738 = vst [vmem:[#allocation88_spill] sm:$0xff] %v18134_v39  ;;  %v18137_v6 = vpop.f32.mrf.mxu1  ;;  %14587 = vmatprep.subr.mxu0 %v8505_v20 }
 0x353   : > { %20737 = vst [vmem:[#allocation86_spill] sm:$0xff] %v18132_v44  ;;  %v18139_v58 = vpop.f32.mrf.mxu0  ;;  %14588 = vmatpush3.msra.mxu0 %v8505_v20 }
 0x354   : > { %20739 = vst [vmem:[#allocation45_spill] sm:$0xff] %v18139_v58  ;;  %v14248_v63 = vpop.f32.mrf.mxu1 }
 0x355   : > { %v18142_v26 = vadd.f32 %v14248_v63, %v17989_v41  ;;  %v18144_v55 = vpop.f32.mrf.mxu0 }
 0x356   : > { %20741 = vst [vmem:[#allocation90_spill] sm:$0xff] %v18144_v55  ;;  %v18146_v2 = vpop.f32.mrf.mxu1 }
 0x357   : > { %20740 = vst [vmem:[#allocation89_spill] sm:$0xff] %v18142_v26  ;;  %20742 = vst [vmem:[#allocation52_spill] sm:$0xff] %v18146_v2  ;;  %v18148_v61 = vpop.f32.mrf.mxu0 }
 0x358   : > { %20743 = vst [vmem:[#allocation70_spill] sm:$0xff] %v18148_v61  ;;  %v14251_v49 = vpop.f32.mrf.mxu1 }
 0x359   : > { %v18151_v39 = vadd.f32 %v14251_v49, %v18000_v51  ;;  %v18153_v50 = vpop.f32.mrf.mxu0 }
 0x35a   : > { %20745 = vst [vmem:[#allocation75_spill] sm:$0xff] %v18153_v50  ;;  %v18155_v58 = vpop.f32.mrf.mxu1 }
 0x35b   : > { %20744 = vst [vmem:[#allocation73_spill] sm:$0xff] %v18151_v39  ;;  %20746 = vst [vmem:[#allocation25_spill] sm:$0xff] %v18155_v58  ;;  %v18157_v44 = vpop.f32.mrf.mxu0 }
 0x35c   : > { %20747 = vst [vmem:[#allocation54_spill] sm:$0xff] %v18157_v44  ;;  %v14254_v41 = vpop.f32.mrf.mxu1 }
 0x35d   : > { %v18160_v63 = vadd.f32 %v14254_v41, %v18010_v54  ;;  %v18162_v55 = vpop.f32.mrf.mxu0 }
 0x35e   : > { %20749 = vst [vmem:[#allocation56_spill] sm:$0xff] %v18162_v55  ;;  %v18164_v61 = vpop.f32.mrf.mxu1 }
 0x35f   : > { %20748 = vst [vmem:[#allocation59_spill] sm:$0xff] %v18160_v63  ;;  %20750 = vst [vmem:[#allocation58_spill] sm:$0xff] %v18164_v61  ;;  %v18166_v26 = vpop.f32.mrf.mxu0 }
 0x360   : > { %20751 = vst [vmem:[#allocation32_spill] sm:$0xff] %v18166_v26  ;;  %v14257_v2 = vpop.f32.mrf.mxu1 }
 0x361   : > { %v18169_v51 = vadd.f32 %v14257_v2, %v18022_v53  ;;  %v18171_v49 = vpop.f32.mrf.mxu0 }
 0x362   : > { %20753 = vst [vmem:[#allocation62_spill] sm:$0xff] %v18171_v49  ;;  %v18173_v20 = vpop.f32.mrf.mxu1 }
 0x363   : > { %20752 = vst [vmem:[#allocation60_spill] sm:$0xff] %v18169_v51  ;;  %20754 = vst [vmem:[#allocation24_spill] sm:$0xff] %v18173_v20  ;;  %v18175_v50 = vpop.f32.mrf.mxu0 }
 0x364   : > { %20755 = vst [vmem:[#allocation69_spill] sm:$0xff] %v18175_v50  ;;  %v14260_v44 = vpop.f32.mrf.mxu1 }
 0x365   : > { %v18178_v54 = vadd.f32 %v14260_v44, %v18033_v10  ;;  %v18180_v41 = vpop.f32.mrf.mxu0 }
 0x366   : > { %20757 = vst [vmem:[#allocation28_spill] sm:$0xff] %v18180_v41  ;;  %v18182_v55 = vpop.f32.mrf.mxu1 }
 0x367   : > { %20756 = vst [vmem:[#allocation71_spill] sm:$0xff] %v18178_v54  ;;  %20758 = vst [vmem:[#allocation66_spill] sm:$0xff] %v18182_v55  ;;  %v18184_v63 = vpop.f32.mrf.mxu0 }
 0x368   : > { %20759 = vst [vmem:[#allocation31_spill] sm:$0xff] %v18184_v63  ;;  %v14263_v26 = vpop.f32.mrf.mxu1 }
 0x369   : > { %v18187_v53 = vadd.f32 %v14263_v26, %v18042_v31  ;;  %v18189_v2 = vpop.f32.mrf.mxu0 }
 0x36a   : > { %20761 = vst [vmem:[#allocation30_spill] sm:$0xff] %v18189_v2  ;;  %v18191_v49 = vpop.f32.mrf.mxu1 }
 0x36b   : > { %20760 = vst [vmem:[#allocation68_spill] sm:$0xff] %v18187_v53  ;;  %20762 = vst [vmem:[#allocation38_spill] sm:$0xff] %v18191_v49  ;;  %v18193_v51 = vpop.f32.mrf.mxu0 }
 0x36c   : > { %20763 = vst [vmem:[#allocation77_spill] sm:$0xff] %v18193_v51  ;;  %v14266_v50 = vpop.f32.mrf.mxu1 }
 0x36d   : > { %v18196_v10 = vadd.f32 %v14266_v50, %v18051_v3  ;;  %v18198_v44 = vpop.f32.mrf.mxu0 }
 0x36e   : > { %20765 = vst [vmem:[#allocation92_spill] sm:$0xff] %v18198_v44  ;;  %v18200_v41 = vpop.f32.mrf.mxu1 }
 0x36f   : > { %20764 = vst [vmem:[#allocation35_spill] sm:$0xff] %v18196_v10  ;;  %20766 = vst [vmem:[#allocation93_spill] sm:$0xff] %v18200_v41  ;;  %v18202_v54 = vpop.f32.mrf.mxu0 }
 0x370   : > { %20767 = vst [vmem:[#allocation94_spill] sm:$0xff] %v18202_v54  ;;  %v14269_v63 = vpop.f32.mrf.mxu1 }
 0x371   : > { %v18205_v31 = vadd.f32 %v14269_v63, %v18060_v5  ;;  %v18207_v26 = vpop.f32.mrf.mxu0 }
 0x372   : > { %20769 = vst [vmem:[#allocation96_spill] sm:$0xff] %v18207_v26  ;;  %v18209_v2 = vpop.f32.mrf.mxu1 }
 0x373   : > { %20768 = vst [vmem:[#allocation95_spill] sm:$0xff] %v18205_v31  ;;  %20770 = vst [vmem:[#allocation97_spill] sm:$0xff] %v18209_v2  ;;  %v18211_v53 = vpop.f32.mrf.mxu0 }
 0x374   : > { %20771 = vst [vmem:[#allocation98_spill] sm:$0xff] %v18211_v53  ;;  %v14272_v51 = vpop.f32.mrf.mxu1 }
 0x375   : > { %v18214_v3 = vadd.f32 %v14272_v51, %v18070_v52  ;;  %v18216_v50 = vpop.f32.mrf.mxu0 }
 0x376   : > { %20773 = vst [vmem:[#allocation100_spill] sm:$0xff] %v18216_v50  ;;  %v18218_v44 = vpop.f32.mrf.mxu1 }
 0x377   : > { %20772 = vst [vmem:[#allocation99_spill] sm:$0xff] %v18214_v3  ;;  %20774 = vst [vmem:[#allocation101_spill] sm:$0xff] %v18218_v44  ;;  %v18220_v10 = vpop.f32.mrf.mxu0  ;;  %v9279_v44 = vld [vmem:[#allocation3 + $0x20] sm:$0xff] }
 0x378   : > { %20775 = vst [vmem:[#allocation102_spill] sm:$0xff] %v18220_v10  ;;  %v14275_v54 = vpop.f32.mrf.mxu1  ;;  %14687 = vmatprep.subr.mxu0 %v9279_v44 }
 0x379   : > { %v18223_v5 = vadd.f32 %v14275_v54, %v18080_v35  ;;  %v18225_v63 = vpop.f32.mrf.mxu0 }
 0x37a   : > { %20777 = vst [vmem:[#allocation104_spill] sm:$0xff] %v18225_v63  ;;  %v18227_v26 = vpop.f32.mrf.mxu1 }
 0x37b   : > { %20776 = vst [vmem:[#allocation103_spill] sm:$0xff] %v18223_v5  ;;  %20778 = vst [vmem:[#allocation105_spill] sm:$0xff] %v18227_v26  ;;  %v18229_v31 = vpop.f32.mrf.mxu0 }
 0x37c   : > { %20779 = vst [vmem:[#allocation106_spill] sm:$0xff] %v18229_v31  ;;  %v14278_v53 = vpop.f32.mrf.mxu1 }
 0x37d   : > { %v18232_v52 = vadd.f32 %v14278_v53, %v18088_v59  ;;  %v18234_v51 = vpop.f32.mrf.mxu0 }
 0x37e   : > { %20781 = vst [vmem:[#allocation108_spill] sm:$0xff] %v18234_v51  ;;  %v18236_v50 = vpop.f32.mrf.mxu1 }
 0x37f   : > { %20780 = vst [vmem:[#allocation107_spill] sm:$0xff] %v18232_v52  ;;  %20782 = vst [vmem:[#allocation109_spill] sm:$0xff] %v18236_v50  ;;  %v18238_v3 = vpop.f32.mrf.mxu0  ;;  %v8892_v50 = vld [vmem:[#allocation3 + $0x18] sm:$0xff] }
 0x380   : > { %20783 = vst [vmem:[#allocation110_spill] sm:$0xff] %v18238_v3  ;;  %v18240_v10 = vpop.f32.mrf.mxu1  ;;  %14637 = vmatprep.subr.mxu1 %v8892_v50 }
 0x381   : > { %v18242_v35 = vpop.f32.mrf.mxu0  ;;  %14638 = vmatpush3.msra.mxu1 %v8892_v50 }
 0x382   : > { %v18244_v54 = vpop.f32.mrf.mxu1 }
 0x383   : > { %v18246_v63 = vpop.f32.mrf.mxu0 }
 0x384   : > { %v18248_v5 = vpop.f32.mrf.mxu1 }
 0x385   : > { %v18252_v59 = vpop.f32.mrf.mxu0 }
 0x386   : > { %v18250_v31 = vpop.f32.mrf.mxu1 }
 0x387   : > { %v18258_v52 = vpop.f32.mrf.mxu0 }
 0x388   : > { %v18254_v53 = vpop.f32.mrf.mxu1 }
 0x389   : > { %v18264_v2 = vpop.f32.mrf.mxu0 }
 0x38a   : > { %v18256_v51 = vpop.f32.mrf.mxu1 }
 0x38b   : > { %v18270_v55 = vpop.f32.mrf.mxu0 }
 0x38c   : > { %v18260_v3 = vpop.f32.mrf.mxu1  ;;  %20788 = vst [vmem:[#allocation115_spill] sm:$0xff] %v18270_v55 }
 0x38d   : > { %20784 = vst [vmem:[#allocation111_spill] sm:$0xff] %v18260_v3  ;;  %v18276_v39 = vpop.f32.mrf.mxu0 }
 0x38e   : > { %v18262_v26 = vpop.f32.mrf.mxu1  ;;  %20791 = vst [vmem:[#allocation118_spill] sm:$0xff] %v18276_v39 }
 0x38f   : > { %20785 = vst [vmem:[#allocation112_spill] sm:$0xff] %v18262_v26  ;;  %v18282_v3 = vpop.f32.mrf.mxu0 }
 0x390   : > { %v18266_v41 = vpop.f32.mrf.mxu1  ;;  %20794 = vst [vmem:[#allocation121_spill] sm:$0xff] %v18282_v3 }
 0x391   : > { %20786 = vst [vmem:[#allocation113_spill] sm:$0xff] %v18266_v41  ;;  %v18288_v41 = vpop.f32.mrf.mxu0 }
 0x392   : > { %v18268_v49 = vpop.f32.mrf.mxu1  ;;  %20797 = vst [vmem:[#allocation124_spill] sm:$0xff] %v18288_v41 }
 0x393   : > { %20787 = vst [vmem:[#allocation114_spill] sm:$0xff] %v18268_v49 }
 0x394   : > { %v18272_v20 = vpop.f32.mrf.mxu1 }
 0x395   : > { %20789 = vst [vmem:[#allocation116_spill] sm:$0xff] %v18272_v20  ;;  %v18294_v20 = vpop.f32.mrf.mxu0 }
 0x396   : > { %v18274_v61 = vpop.f32.mrf.mxu1  ;;  %20800 = vst [vmem:[#allocation127_spill] sm:$0xff] %v18294_v20 }
 0x397   : > { %20790 = vst [vmem:[#allocation117_spill] sm:$0xff] %v18274_v61 }
 0x398   : > { %v18278_v58 = vpop.f32.mrf.mxu1 }
 0x399   : > { %20792 = vst [vmem:[#allocation119_spill] sm:$0xff] %v18278_v58  ;;  %v18300_v58 = vpop.f32.mrf.mxu0 }
 0x39a   : > { %v18280_v26 = vpop.f32.mrf.mxu1  ;;  %20803 = vst [vmem:[#allocation130_spill] sm:$0xff] %v18300_v58 }
 0x39b   : > { %20793 = vst [vmem:[#allocation120_spill] sm:$0xff] %v18280_v26 }
 0x39c   : > { %v18284_v50 = vpop.f32.mrf.mxu1 }
 0x39d   : > { %20795 = vst [vmem:[#allocation122_spill] sm:$0xff] %v18284_v50  ;;  %v18306_v50 = vpop.f32.mrf.mxu0 }
 0x39e   : > { %v18286_v44 = vpop.f32.mrf.mxu1  ;;  %20806 = vst [vmem:[#allocation133_spill] sm:$0xff] %v18306_v50 }
 0x39f   : > { %20796 = vst [vmem:[#allocation123_spill] sm:$0xff] %v18286_v44 }
 0x3a0   : > { %v18290_v49 = vpop.f32.mrf.mxu1 }
 0x3a1   : > { %20798 = vst [vmem:[#allocation125_spill] sm:$0xff] %v18290_v49  ;;  %v18314_v49 = vpop.f32.mrf.mxu0 }
 0x3a2   : > { %v18292_v55 = vpop.f32.mrf.mxu1 }
 0x3a3   : > { %20799 = vst [vmem:[#allocation126_spill] sm:$0xff] %v18292_v55  ;;  %v4746_v55 = vadd.f32 %v17742_v30, %v17740_v33  ;;  %v4836_v30 = vadd.f32 %v17846_v28, %v17844_v29  ;;  %v4886_v29 = vadd.f32 %v17914_v17, %v17911_v24  ;;  %v18371_v17 = vadd.f32 %v17994_v45, %v17992_v60 }
 0x3a4   : > { %v18296_v61 = vpop.f32.mrf.mxu1 }
 0x3a5   : > { %20801 = vst [vmem:[#allocation128_spill] sm:$0xff] %v18296_v61 }
 0x3a6   : > { %v18298_v39 = vpop.f32.mrf.mxu1 }
 0x3a7   : > { %20802 = vst [vmem:[#allocation129_spill] sm:$0xff] %v18298_v39  ;;  %v5260_v39 = vadd.f32 %v17931_v12, %v4746_v55  ;;  %v4846_v12 = vadd.f32 %v17860_v36, %v17858_v57  ;;  %v5650_v55 = vadd.f32 %v17947_v32, %v17945_v8  ;;  %v18353_v57 = vadd.f32 %v17924_v62, %v17922_v21 }
 0x3a8   : > { %v18302_v26 = vpop.f32.mrf.mxu1  ;;  %v6427_v62 = vadd.f32 %v18104_v4, %v18102_v22  ;;  %v20815_v4 = vld [vmem:[#allocation79_spill] sm:$0xff] }
 0x3a9   : > { %20804 = vst [vmem:[#allocation131_spill] sm:$0xff] %v18302_v26  ;;  %v18321_v26 = vpop.f32.mrf.mxu0  ;;  %v5648_v50 = vadd.f32 %v17935_v11, %v5260_v39  ;;  %v6425_v11 = vadd.f32 %v18095_v47, %v18093_v23  ;;  %v4856_v39 = vadd.f32 %v17874_v19, %v17872_v27  ;;  %v6038_v8 = vadd.f32 %v18106_v13, %v5650_v55 }
 0x3aa   : > { %v18304_v3 = vpop.f32.mrf.mxu1  ;;  %v5280_v21 = vadd.f32 %v18040_v42, %v4846_v12  ;;  %v6815_v22 = vadd.f32 %v18248_v5, %v6427_v62  ;;  %v20819_v12 = vld [vmem:[#allocation87_spill] sm:$0xff]  ;;  %v20820_v5 = vld [vmem:[#allocation76_spill] sm:$0xff] }
 0x3ab   : > { %20805 = vst [vmem:[#allocation132_spill] sm:$0xff] %v18304_v3  ;;  %v18329_v20 = vpop.f32.mrf.mxu0  ;;  %v6813_v27 = vadd.f32 %v18240_v10, %v6425_v11 }
 0x3ac   : > { %v18308_v44 = vpop.f32.mrf.mxu1 }
 0x3ad   : > { %20807 = vst [vmem:[#allocation134_spill] sm:$0xff] %v18308_v44  ;;  %v18358_v19 = vpop.f32.mrf.mxu0  ;;  %v7201_v47 = vadd.f32 %v18242_v35, %v6813_v27  ;;  %v18408_v35 = vld [vmem:[%s20305_s8] ss:$0 sm:$0xff]  ;;  %v20821_v27 = vld [vmem:[#allocation37_spill] sm:$0xff] }
 0x3ae   : > { %v18310_v41 = vpop.f32.mrf.mxu1 }
 0x3af   : > { %20808 = vst [vmem:[#allocation135_spill] sm:$0xff] %v18310_v41  ;;  %v6036_v41 = vadd.f32 %v18097_v37, %v5648_v50  ;;  %v4866_v37 = vadd.f32 %v17888_v38, %v17886_v1  ;;  %v4876_v50 = vadd.f32 %v17902_v40, %v17900_v14  ;;  %v5652_v1 = vadd.f32 %v17959_v25, %v17957_v34  ;;  %v20809_v25 = vld [vmem:[#allocation72_spill] sm:$0xff] }
 0x3b0   : > { %v18316_v61 = vpop.f32.mrf.mxu1  ;;  %v5654_v38 = vadd.f32 %v17971_v9, %v17969_v16  ;;  %v5656_v14 = vadd.f32 %v17983_v15, %v17981_v0  ;;  %v5278_v40 = vadd.f32 %v18031_v43, %v4836_v30  ;;  %v18379_v34 = vadd.f32 %v18005_v48, %v18003_v7  ;;  %v20810_v16 = vld [vmem:[#allocation74_spill] sm:$0xff]  ;;  %v18393_v7 = vpop.f32.mrf.mxu0  ;;  %v20814_v48 = vld [vmem:[#allocation33_spill] sm:$0xff]  ;;  %v20818_v30 = vld [vmem:[#allocation83_spill] sm:$0xff] }
 0x3b1   : > { %v6424_v36 = vadd.f32 %v18099_v46, %v6036_v41  ;;  %v18383_v9 = vadd.f32 %v20810_v16, %v20809_v25  ;;  %v20811_v0 = vld [vmem:[#allocation34_spill] sm:$0xff]  ;;  %v6040_v60 = vadd.f32 %v18115_v18, %v5652_v1  ;;  %v20813_v46 = vld [vmem:[#allocation81_spill] sm:$0xff]  ;;  %v18397_v13 = vadd.f32 %v20815_v4, %v20814_v48  ;;  %v20816_v41 = vld [vmem:[#allocation11_spill] sm:$0xff] }
 0x3b2   : > { %v18319_v58 = vpop.f32.mrf.mxu1  ;;  %v5282_v15 = vadd.f32 %v20811_v0, %v4856_v39  ;;  %v20812_v43 = vld [vmem:[#allocation78_spill] sm:$0xff]  ;;  %v6426_v23 = vadd.f32 %v20813_v46, %v6038_v8  ;;  %v18400_v10 = vadd.f32 %v20816_v41, %v5278_v40  ;;  %v20817_v18 = vld [vmem:[#allocation36_spill] sm:$0xff]  ;;  %v6429_v55 = vadd.f32 %v20819_v12, %v20818_v30 }
 0x3b3   : > { %v6812_v32 = vadd.f32 %v18244_v54, %v6424_v36  ;;  %v5284_v42 = vadd.f32 %v20812_v43, %v4866_v37  ;;  %v5286_v54 = vadd.f32 %v20817_v18, %v4876_v50  ;;  %v18411_v39 = vadd.f32 %v20820_v5, %v5280_v21  ;;  %v20822_v50 = vld [vmem:[#allocation85_spill] sm:$0xff]  ;;  %v18424_v16 = vld [vmem:[%s20306_s9] ss:$0 sm:$0xff]  ;;  %v20823_v0 = vld [vmem:[#allocation80_spill] sm:$0xff] }
 0x3b4   : > { %v18323_v3 = vpop.f32.mrf.mxu1  ;;  %v6814_v36 = vadd.f32 %v18250_v31, %v6426_v23  ;;  %v18416_v1 = vadd.f32 %v20821_v27, %v5282_v15  ;;  %v6428_v40 = vadd.f32 %v20822_v50, %v6040_v60  ;;  %v6042_v62 = vadd.f32 %v18124_v56, %v5654_v38  ;;  %v20824_v56 = vld [vmem:[#allocation82_spill] sm:$0xff]  ;;  %v20825_v38 = vld [vmem:[#allocation84_spill] sm:$0xff]  ;;  %v20828_v18 = vld [vmem:[#allocation43_spill] sm:$0xff] }
 0x3b5   : > { %v7200_v37 = vadd.f32 %v18246_v63, %v6812_v32  ;;  %v6817_v25 = vadd.f32 %v18254_v53, %v6429_v55  ;;  %v18427_v63 = vadd.f32 %v20823_v0, %v5284_v42  ;;  %v7203_v31 = vadd.f32 %v18252_v59, %v6815_v22  ;;  %v18430_v32 = vpop.f32.mrf.mxu0  ;;  %v20826_v46 = vld [vmem:[#allocation42_spill] sm:$0xff]  ;;  %v20827_v23 = vld [vmem:[#allocation40_spill] sm:$0xff]  ;;  %v20833_v50 = vld [vmem:[#allocation115_spill] sm:$0xff] }
 0x3b6   : > { %v18326_v44 = vpop.f32.mrf.mxu1  ;;  %v18435_v53 = vadd.f32 %v20824_v56, %v5286_v54  ;;  %v5288_v43 = vadd.f32 %v20825_v38, %v4886_v29  ;;  %v6816_v42 = vadd.f32 %v18256_v51, %v6428_v40  ;;  %v7202_v59 = vadd.f32 %v18258_v52, %v6814_v36  ;;  %v20829_v29 = vld [vmem:[#allocation111_spill] sm:$0xff] }
 0x3b7   : > { %v6430_v30 = vadd.f32 %v20828_v18, %v6042_v62  ;;  %v6044_v54 = vadd.f32 %v18137_v6, %v5656_v14  ;;  %v7205_v12 = vadd.f32 %v18264_v2, %v6817_v25  ;;  %v18448_v5 = vpop.f32.mrf.mxu0  ;;  %v20831_v6 = vld [vmem:[#allocation86_spill] sm:$0xff]  ;;  %v20832_v2 = vld [vmem:[#allocation88_spill] sm:$0xff] }
 0x3b8   : > { %v18331_v33 = vpop.f32.mrf.mxu1  ;;  %v6433_v14 = vadd.f32 %v20832_v2, %v20831_v6  ;;  %v7204_v40 = vadd.f32 %v20833_v50, %v6816_v42  ;;  %v20834_v62 = vld [vmem:[#allocation112_spill] sm:$0xff] }
 0x3b9   : > { %v6818_v25 = vadd.f32 %v20834_v62, %v6430_v30  ;;  %v20845_v62 = vld [vmem:[#allocation25_spill] sm:$0xff] }
 0x3ba   : > { %v18349_v28 = vpop.f32.mrf.mxu1 }
 0x3bc   : > { %v18367_v24 = vpop.f32.mrf.mxu1 }
 0x3be   : > { %v18387_v45 = vpop.f32.mrf.mxu1 }
 0x3c0   : > { %v14441_v11 = vpop.f32.mrf.mxu1 }
 0x3c1   : > { %v7589_v8 = vadd.f32 %v14441_v11, %v7201_v47  ;;  %v6431_v47 = vadd.f32 %v20827_v23, %v20826_v46  ;;  %v20837_v23 = vld [vmem:[#allocation118_spill] sm:$0xff] }
 0x3c2   : > { %v7429_v21 = vpop.f32.mrf.mxu1 }
 0x3c3   : > { %v7628_v15 = vmul.f32 %v18408_v35, %v7589_v8  ;;  %v7588_v60 = vadd.f32 %v7429_v21, %v7200_v37  ;;  %11215 = vrot.lane.b32.xlu0 %v7589_v8, %s15132_s29  ;;  %v6819_v55 = vadd.f32 %v20829_v29, %v6431_v47  ;;  %v20830_v8 = vld [vmem:[#allocation41_spill] sm:$0xff]  ;;  %v20841_v29 = vld [vmem:[#allocation90_spill] sm:$0xff] }
 0x3c4   : > { %v14444_v48 = vpop.f32.mrf.mxu1  ;;  %v18455_v27 = vadd.f32 %v20830_v8, %v5288_v43  ;;  %v20836_v43 = vld [vmem:[#allocation52_spill] sm:$0xff] }
 0x3c5   : > { %v7667_v22 = vadd.f32 %v18424_v16, %v7628_v15  ;;  %v7627_v4 = vmul.f32 %v18408_v35, %v7588_v60  ;;  %v7591_v41 = vadd.f32 %v14444_v48, %v7203_v31  ;;  %v6046_v46 = vadd.f32 %v20836_v43, %v18371_v17  ;;  %v20838_v48 = vld [vmem:[#allocation113_spill] sm:$0xff] }
 0x3c6   : > { %v7439_v11 = vpop.f32.mrf.mxu1  ;;  %v7207_v47 = vadd.f32 %v20837_v23, %v6819_v55  ;;  %v6821_v42 = vadd.f32 %v20838_v48, %v6433_v14 }
 0x3c7   : > { %v7699_v51 = vmax.f32 %v7667_v22, 0.0  ;;  %v7666_v37 = vadd.f32 %v18424_v16, %v7627_v4  ;;  %v7630_v52 = vmul.f32 %v18408_v35, %v7591_v41  ;;  %v7590_v36 = vadd.f32 %v7439_v11, %v7202_v59  ;;  %11213 = vrot.lane.b32.xlu0 %v7588_v60, %s15132_s29  ;;  %11219 = vrot.lane.b32.xlu1 %v7591_v41, %s15132_s29  ;;  %v20835_v60 = vld [vmem:[#allocation45_spill] sm:$0xff]  ;;  %v18469_v22 = vpop.f32.mrf.mxu0 }
 0x3c8   : > { %v14447_v21 = vpop.f32.mrf.mxu1  ;;  %v6432_v38 = vadd.f32 %v20835_v60, %v6044_v54  ;;  %v20839_v54 = vld [vmem:[#allocation44_spill] sm:$0xff]  ;;  %v20842_v11 = vld [vmem:[#allocation121_spill] sm:$0xff] }
 0x3c9   : > { %v7698_v0 = vmax.f32 %v7666_v37, 0.0  ;;  %v7669_v31 = vadd.f32 %v18424_v16, %v7630_v52  ;;  %v7629_v15 = vmul.f32 %v18408_v35, %v7590_v36  ;;  %v7593_v56 = vadd.f32 %v14447_v21, %v7205_v12  ;;  %7732 = vst.msk [vmem:[#allocation2 + $0x21] sm:$0xff] %vm7730_vm3, %v7699_v51  ;;  %v20840_v12 = vld [vmem:[#allocation89_spill] sm:$0xff]  ;;  %v20843_v37 = vld [vmem:[#allocation114_spill] sm:$0xff]  ;;  %v20846_v21 = vld [vmem:[#allocation124_spill] sm:$0xff] }
 0x3ca   : > { %v7449_v59 = vpop.f32.mrf.mxu1  ;;  %v5290_v17 = vadd.f32 %v20839_v54, %v18353_v57  ;;  %v6435_v55 = vadd.f32 %v20841_v29, %v20840_v12  ;;  %v7206_v51 = vadd.f32 %v20842_v11, %v6818_v25  ;;  %v6820_v52 = vadd.f32 %v20843_v37, %v6432_v38  ;;  %v20844_v57 = vld [vmem:[#allocation70_spill] sm:$0xff]  ;;  %v18493_v38 = vpop.f32.mrf.mxu0 }
 0x3cb   : > { %v7701_v4 = vmax.f32 %v7669_v31, 0.0  ;;  %v7668_v41 = vadd.f32 %v18424_v16, %v7629_v15  ;;  %v7632_v18 = vmul.f32 %v18408_v35, %v7593_v56  ;;  %v7592_v30 = vadd.f32 %v7449_v59, %v7204_v40  ;;  %11217 = vrot.lane.b32.xlu1 %v7590_v36, %s15132_s29  ;;  %7731 = vst.msk [vmem:[#allocation2 + $0x19] sm:$0xff] %vm7730_vm3, %v7698_v0  ;;  %v18485_v36 = vld [vmem:[#allocation3 + $0x28] sm:$0xff]  ;;  %v20847_v31 = vld [vmem:[#allocation116_spill] sm:$0xff]  ;;  %v20850_v59 = vld [vmem:[#allocation75_spill] sm:$0xff] }
 0x3cc   : > { %v14450_v8 = vpop.f32.mrf.mxu1  ;;  %v6434_v40 = vadd.f32 %v20844_v57, %v6046_v46  ;;  %v6048_v25 = vadd.f32 %v20845_v62, %v18379_v34  ;;  %v7209_v0 = vadd.f32 %v20846_v21, %v6821_v42  ;;  %v6823_v15 = vadd.f32 %v20847_v31, %v6435_v55  ;;  %14737 = vmatprep.subr.mxu1 %v18485_v36  ;;  %v20848_v34 = vld [vmem:[#allocation39_spill] sm:$0xff]  ;;  %v20849_v42 = vld [vmem:[#allocation73_spill] sm:$0xff]  ;;  %v20854_v37 = vld [vmem:[#allocation58_spill] sm:$0xff]  ;;  %v18521_v31 = vpop.f32.mrf.mxu0 }
 0x3cd   : > { %v7700_v6 = vmax.f32 %v7668_v41, 0.0  ;;  %v7671_v2 = vadd.f32 %v18424_v16, %v7632_v18  ;;  %v7631_v14 = vmul.f32 %v18408_v35, %v7592_v30  ;;  %v7595_v50 = vadd.f32 %v14450_v8, %v7207_v47  ;;  %7734 = vst.msk [vmem:[#allocation2 + $0x39] sm:$0xff] %vm7730_vm3, %v7701_v4  ;;  %11221 = vrot.lane.b32.xlu0 %v7592_v30, %s15132_s29  ;;  %v20851_v41 = vld [vmem:[#allocation127_spill] sm:$0xff]  ;;  %v20852_v30 = vld [vmem:[#allocation117_spill] sm:$0xff] }
 0x3ce   : > { %v7459_v60 = vpop.f32.mrf.mxu1  ;;  %v18500_v48 = vadd.f32 %v20848_v34, %v5290_v17  ;;  %v6437_v4 = vadd.f32 %v20850_v59, %v20849_v42  ;;  %v7208_v18 = vadd.f32 %v20851_v41, %v6820_v52  ;;  %v6822_v54 = vadd.f32 %v20852_v30, %v6434_v40  ;;  %v20860_v42 = vld [vmem:[#allocation120_spill] sm:$0xff] }
 0x3cf   : > { %v7703_v43 = vmax.f32 %v7671_v2, 0.0  ;;  %v7670_v23 = vadd.f32 %v18424_v16, %v7631_v14  ;;  %v7634_v47 = vmul.f32 %v18408_v35, %v7595_v50  ;;  %7733 = vst.msk [vmem:[#allocation2 + $0x31] sm:$0xff] %vm7730_vm3, %v7700_v6  ;;  %v7594_v46 = vadd.f32 %v7459_v60, %v7206_v51  ;;  %11223 = vrot.lane.b32.xlu1 %v7593_v56, %s15132_s29  ;;  %v20853_v56 = vld [vmem:[#allocation54_spill] sm:$0xff]  ;;  %v20856_v2 = vld [vmem:[#allocation119_spill] sm:$0xff] }
 0x3d0   : > { %v14453_v12 = vpop.f32.mrf.mxu1  ;;  %v6436_v17 = vadd.f32 %v20853_v56, %v6048_v25  ;;  %v6050_v8 = vadd.f32 %v20854_v37, %v18383_v9  ;;  %v20855_v6 = vld [vmem:[#allocation130_spill] sm:$0xff]  ;;  %v6825_v14 = vadd.f32 %v20856_v2, %v6437_v4 }
 0x3d1   : > { %v7702_v29 = vmax.f32 %v7670_v23, 0.0  ;;  %v7673_v55 = vadd.f32 %v18424_v16, %v7634_v47  ;;  %7736 = vst.msk [vmem:[#allocation2 + $0x51] sm:$0xff] %vm7730_vm3, %v7703_v43  ;;  %v7633_v11 = vmul.f32 %v18408_v35, %v7594_v46  ;;  %v7597_v51 = vadd.f32 %v14453_v12, %v7209_v0  ;;  %11225 = vrot.lane.b32.xlu0 %v7594_v46, %s15132_s29  ;;  %v20857_v43 = vld [vmem:[#allocation59_spill] sm:$0xff]  ;;  %v20858_v23 = vld [vmem:[#allocation56_spill] sm:$0xff]  ;;  %v20859_v46 = vld [vmem:[#allocation133_spill] sm:$0xff] }
 0x3d2   : > { %v7211_v52 = vadd.f32 %v20855_v6, %v6823_v15  ;;  %v7469_v57 = vpop.f32.mrf.mxu1  ;;  %v18515_v40 = vld [vmem:[#allocation2 + $0x19] sm:$0xff]  ;;  %v18530_v15 = vld [vmem:[#allocation2 + $0x21] sm:$0xff]  ;;  %v6439_v47 = vadd.f32 %v20858_v23, %v20857_v43  ;;  %v7210_v34 = vadd.f32 %v20859_v46, %v6822_v54  ;;  %v6824_v59 = vadd.f32 %v20860_v42, %v6436_v17  ;;  %v20861_v54 = vld [vmem:[#allocation32_spill] sm:$0xff] }
 0x3d3   : > { %v18517_v62 = vld [vmem:[#allocation2 + $0x18] sm:$0xff]  ;;  %v18519_v21 = vld [vmem:[#allocation2 + $0x20] sm:$0xff]  ;;  %v7705_v0 = vmax.f32 %v7673_v55, 0.0  ;;  %7735 = vst.msk [vmem:[#allocation2 + $0x49] sm:$0xff] %vm7730_vm3, %v7702_v29  ;;  %v7672_v25 = vadd.f32 %v18424_v16, %v7633_v11  ;;  %v7636_v9 = vmul.f32 %v18408_v35, %v7597_v51  ;;  %v7596_v60 = vadd.f32 %v7469_v57, %v7208_v18  ;;  %14492 = vmatprep.mubr.msk.f32.mxu0 %vm7730_vm3, %v18515_v40  ;;  %v18556_v57 = vpop.f32.mrf.mxu0  ;;  %v20866_v23 = vld [vmem:[#allocation123_spill] sm:$0xff] }
 0x3d4   : > { %14542 = vmatprep.mubr.msk.f32.mxu1 %vm7730_vm3, %v18517_v62  ;;  %11227 = vrot.lane.b32.xlu1 %v7595_v50, %s15132_s29  ;;  %v14456_v4 = vpop.f32.mrf.mxu1  ;;  %v6438_v29 = vadd.f32 %v20861_v54, %v6050_v8  ;;  %v20862_v50 = vld [vmem:[#allocation24_spill] sm:$0xff]  ;;  %v7213_v11 = vadd.f32 %v18314_v49, %v6825_v14  ;;  %v20863_v56 = vld [vmem:[#allocation122_spill] sm:$0xff]  ;;  %v7212_v43 = vadd.f32 %v18321_v26, %v6824_v59  ;;  %v20867_v26 = vld [vmem:[#allocation69_spill] sm:$0xff] }
 0x3d5   : > { %14493 = vmatmul.mubr.msk.f32.gmra.mxu0 %vm7730_vm3, %v18530_v15  ;;  %7738 = vst.msk [vmem:[#allocation2 + $0x69] sm:$0xff] %vm7730_vm3, %v7705_v0  ;;  %v7704_v41 = vmax.f32 %v7672_v25, 0.0  ;;  %v7675_v18 = vadd.f32 %v18424_v16, %v7636_v9  ;;  %v7635_v30 = vmul.f32 %v18408_v35, %v7596_v60  ;;  %v7599_v12 = vadd.f32 %v14456_v4, %v7211_v52  ;;  %v18565_v49 = vld [vmem:[#allocation2 + $0x39] sm:$0xff]  ;;  %v20864_v14 = vld [vmem:[#allocation60_spill] sm:$0xff] }
 0x3d6   : > { %14543 = vmatmul.mubr.msk.f32.gmra.mxu1 %vm7730_vm3, %v18519_v21  ;;  %11229 = vrot.lane.b32.xlu0 %v7596_v60, %s15132_s29  ;;  %v6052_v55 = vadd.f32 %v20862_v50, %v18397_v13  ;;  %v6827_v17 = vadd.f32 %v20863_v56, %v6439_v47  ;;  %v7479_v37 = vpop.f32.mrf.mxu1  ;;  %v18550_v6 = vld [vmem:[#allocation2 + $0x31] sm:$0xff]  ;;  %v20865_v9 = vld [vmem:[#allocation62_spill] sm:$0xff]  ;;  %v6826_v47 = vadd.f32 %v20866_v23, %v6438_v29 }
 0x3d7   : > { %v18552_v2 = vld [vmem:[#allocation2 + $0x30] sm:$0xff]  ;;  %v18554_v52 = vld [vmem:[#allocation2 + $0x38] sm:$0xff]  ;;  %7737 = vst.msk [vmem:[#allocation2 + $0x61] sm:$0xff] %vm7730_vm3, %v7704_v41  ;;  %v7707_v0 = vmax.f32 %v7675_v18, 0.0  ;;  %v7674_v8 = vadd.f32 %v18424_v16, %v7635_v30  ;;  %v7638_v13 = vmul.f32 %v18408_v35, %v7599_v12  ;;  %v7598_v25 = vadd.f32 %v7479_v37, %v7210_v34  ;;  %14495 = vmatprep.mubr.msk.f32.mxu0 %vm7730_vm3, %v18550_v6 }
 0x3d8   : > { %14545 = vmatprep.mubr.msk.f32.mxu1 %vm7730_vm3, %v18552_v2  ;;  %v6441_v60 = vadd.f32 %v20865_v9, %v20864_v14  ;;  %11231 = vrot.lane.b32.xlu1 %v7597_v51, %s15132_s29  ;;  %v14459_v46 = vpop.f32.mrf.mxu1  ;;  %v6440_v59 = vadd.f32 %v20867_v26, %v6052_v55  ;;  %v20868_v51 = vld [vmem:[#allocation66_spill] sm:$0xff]  ;;  %v7215_v30 = vadd.f32 %v18329_v20, %v6827_v17  ;;  %v20869_v54 = vld [vmem:[#allocation125_spill] sm:$0xff]  ;;  %v20870_v17 = vld [vmem:[#allocation71_spill] sm:$0xff] }
 0x3d9   : > { %14496 = vmatmul.mubr.msk.f32.gmra.mxu0 %vm7730_vm3, %v18565_v49  ;;  %7740 = vst.msk [vmem:[#allocation2 + $0x81] sm:$0xff] %vm7730_vm3, %v7707_v0  ;;  %v7706_v34 = vmax.f32 %v7674_v8, 0.0  ;;  %v7677_v42 = vadd.f32 %v18424_v16, %v7638_v13  ;;  %v7637_v4 = vmul.f32 %v18408_v35, %v7598_v25  ;;  %v7601_v41 = vadd.f32 %v14459_v46, %v7213_v11  ;;  %v18591_v0 = vpop.f32.mrf.mxu0  ;;  %v18600_v20 = vld [vmem:[#allocation2 + $0x51] sm:$0xff] }
 0x3da   : > { %14546 = vmatmul.mubr.msk.f32.gmra.mxu1 %vm7730_vm3, %v18554_v52  ;;  %11233 = vrot.lane.b32.xlu0 %v7598_v25, %s15132_s29  ;;  %v6054_v18 = vadd.f32 %v20868_v51, %v18400_v10  ;;  %v6829_v29 = vadd.f32 %v20869_v54, %v6441_v60  ;;  %v7489_v50 = vpop.f32.mrf.mxu1  ;;  %v18585_v56 = vld [vmem:[#allocation2 + $0x49] sm:$0xff]  ;;  %v7214_v9 = vadd.f32 %v18358_v19, %v6826_v47  ;;  %v20872_v60 = vld [vmem:[#allocation126_spill] sm:$0xff] }
 0x3db   : > { %v18587_v37 = vld [vmem:[#allocation2 + $0x48] sm:$0xff]  ;;  %v18589_v11 = vld [vmem:[#allocation2 + $0x50] sm:$0xff]  ;;  %7739 = vst.msk [vmem:[#allocation2 + $0x79] sm:$0xff] %vm7730_vm3, %v7706_v34  ;;  %v7709_v8 = vmax.f32 %v7677_v42, 0.0  ;;  %v7676_v55 = vadd.f32 %v18424_v16, %v7637_v4  ;;  %v7640_v10 = vmul.f32 %v18408_v35, %v7601_v41  ;;  %v7600_v13 = vadd.f32 %v7489_v50, %v7212_v43  ;;  %14498 = vmatprep.mubr.msk.f32.mxu0 %vm7730_vm3, %v18585_v56 }
 0x3dc   : > { %14548 = vmatprep.mubr.msk.f32.mxu1 %vm7730_vm3, %v18587_v37  ;;  %v20871_v25 = vld [vmem:[#allocation28_spill] sm:$0xff]  ;;  %v6828_v23 = vadd.f32 %v20872_v60, %v6440_v59  ;;  %11235 = vrot.lane.b32.xlu1 %v7599_v12, %s15132_s29  ;;  %v14462_v46 = vpop.f32.mrf.mxu1  ;;  %v20873_v19 = vld [vmem:[#allocation31_spill] sm:$0xff]  ;;  %v20874_v12 = vld [vmem:[#allocation38_spill] sm:$0xff]  ;;  %v7217_v59 = vadd.f32 %v18393_v7, %v6829_v29 }
 0x3dd   : > { %v6443_v14 = vadd.f32 %v20871_v25, %v20870_v17  ;;  %14499 = vmatmul.mubr.msk.f32.gmra.mxu0 %vm7730_vm3, %v18600_v20  ;;  %7742 = vst.msk [vmem:[#allocation2 + $0x99] sm:$0xff] %vm7730_vm3, %v7709_v8  ;;  %v7708_v43 = vmax.f32 %v7676_v55, 0.0  ;;  %v7679_v34 = vadd.f32 %v18424_v16, %v7640_v10  ;;  %v7639_v42 = vmul.f32 %v18408_v35, %v7600_v13  ;;  %v20875_v51 = vld [vmem:[#allocation128_spill] sm:$0xff]  ;;  %v18626_v10 = vpop.f32.mrf.mxu0  ;;  %v20877_v25 = vld [vmem:[#allocation30_spill] sm:$0xff] }
 0x3de   : > { %v7603_v4 = vadd.f32 %v14462_v46, %v7215_v30  ;;  %14549 = vmatmul.mubr.msk.f32.gmra.mxu1 %vm7730_vm3, %v18589_v11  ;;  %11237 = vrot.lane.b32.xlu0 %v7600_v13, %s15132_s29  ;;  %v6442_v47 = vadd.f32 %v20873_v19, %v6054_v18  ;;  %v6056_v26 = vadd.f32 %v20874_v12, %v18411_v39  ;;  %v7499_v50 = vpop.f32.mrf.mxu1  ;;  %v18620_v8 = vld [vmem:[#allocation2 + $0x61] sm:$0xff]  ;;  %v18635_v7 = vld [vmem:[#allocation2 + $0x69] sm:$0xff]  ;;  %v20878_v46 = vld [vmem:[#allocation129_spill] sm:$0xff] }
 0x3df   : > { %v6831_v54 = vadd.f32 %v20875_v51, %v6443_v14  ;;  %v18622_v55 = vld [vmem:[#allocation2 + $0x60] sm:$0xff]  ;;  %v18624_v30 = vld [vmem:[#allocation2 + $0x68] sm:$0xff]  ;;  %7741 = vst.msk [vmem:[#allocation2 + $0x91] sm:$0xff] %vm7730_vm3, %v7708_v43  ;;  %v7711_v13 = vmax.f32 %v7679_v34, 0.0  ;;  %v7678_v18 = vadd.f32 %v18424_v16, %v7639_v42  ;;  %v7602_v17 = vadd.f32 %v7499_v50, %v7214_v9  ;;  %14501 = vmatprep.mubr.msk.f32.mxu0 %vm7730_vm3, %v18620_v8  ;;  %v20876_v29 = vld [vmem:[#allocation68_spill] sm:$0xff] }
 0x3e0   : > { %v7642_v39 = vmul.f32 %v18408_v35, %v7603_v4  ;;  %14551 = vmatprep.mubr.msk.f32.mxu1 %vm7730_vm3, %v18622_v55  ;;  %v6445_v14 = vadd.f32 %v20877_v25, %v20876_v29  ;;  %v7216_v60 = vadd.f32 %v18430_v32, %v6828_v23  ;;  %v6830_v43 = vadd.f32 %v20878_v46, %v6442_v47  ;;  %v14465_v34 = vpop.f32.mrf.mxu1  ;;  %v20879_v32 = vld [vmem:[#allocation77_spill] sm:$0xff]  ;;  %v20881_v50 = vld [vmem:[#allocation131_spill] sm:$0xff]  ;;  %v18661_v25 = vpop.f32.mrf.mxu0 }
 0x3e1   : > { %11239 = vrot.lane.b32.xlu1 %v7601_v41, %s15132_s29  ;;  %14502 = vmatmul.mubr.msk.f32.gmra.mxu0 %vm7730_vm3, %v18635_v7  ;;  %7744 = vst.msk [vmem:[#allocation2 + $0xb1] sm:$0xff] %vm7730_vm3, %v7711_v13  ;;  %v7710_v9 = vmax.f32 %v7678_v18, 0.0  ;;  %v7641_v19 = vmul.f32 %v18408_v35, %v7602_v17  ;;  %v7605_v12 = vadd.f32 %v14465_v34, %v7217_v59  ;;  %v20880_v41 = vld [vmem:[#allocation93_spill] sm:$0xff] }
 0x3e2   : > { %v7681_v42 = vadd.f32 %v18424_v16, %v7642_v39  ;;  %14552 = vmatmul.mubr.msk.f32.gmra.mxu1 %vm7730_vm3, %v18624_v30  ;;  %11241 = vrot.lane.b32.xlu0 %v7602_v17, %s15132_s29  ;;  %v6444_v23 = vadd.f32 %v20879_v32, %v6056_v26  ;;  %v6058_v47 = vadd.f32 %v20880_v41, %v18416_v1  ;;  %v7509_v18 = vpop.f32.mrf.mxu1  ;;  %v18655_v29 = vld [vmem:[#allocation2 + $0x79] sm:$0xff] }
 0x3e3   : > { %v7219_v51 = vadd.f32 %v18448_v5, %v6831_v54  ;;  %v6833_v13 = vadd.f32 %v20881_v50, %v6445_v14  ;;  %v18657_v39 = vld [vmem:[#allocation2 + $0x78] sm:$0xff]  ;;  %v18659_v59 = vld [vmem:[#allocation2 + $0x80] sm:$0xff]  ;;  %7743 = vst.msk [vmem:[#allocation2 + $0xa9] sm:$0xff] %vm7730_vm3, %v7710_v9  ;;  %v7680_v26 = vadd.f32 %v18424_v16, %v7641_v19  ;;  %v7644_v1 = vmul.f32 %v18408_v35, %v7605_v12  ;;  %v20883_v54 = vld [vmem:[#allocation35_spill] sm:$0xff] }
 0x3e4   : > { %v7713_v17 = vmax.f32 %v7681_v42, 0.0  ;;  %v7604_v46 = vadd.f32 %v7509_v18, %v7216_v60  ;;  %14504 = vmatprep.mubr.msk.f32.mxu0 %vm7730_vm3, %v18655_v29  ;;  %14554 = vmatprep.mubr.msk.f32.mxu1 %vm7730_vm3, %v18657_v39  ;;  %v18670_v5 = vld [vmem:[#allocation2 + $0x81] sm:$0xff]  ;;  %v20884_v14 = vld [vmem:[#allocation92_spill] sm:$0xff]  ;;  %v7218_v32 = vadd.f32 %v18469_v22, %v6830_v43  ;;  %v14468_v19 = vpop.f32.mrf.mxu1 }
 0x3e5   : > { %20882 = vst [vmem:[#allocation72_spill] sm:$0xff] %v18670_v5  ;;  %v6447_v34 = vadd.f32 %v20884_v14, %v20883_v54  ;;  %v20885_v9 = vld [vmem:[#allocation132_spill] sm:$0xff]  ;;  %11243 = vrot.lane.b32.xlu1 %v7603_v4, %s15132_s29  ;;  %14505 = vmatmul.mubr.msk.f32.gmra.mxu0 %vm7730_vm3, %v18670_v5  ;;  %v7712_v60 = vmax.f32 %v7680_v26, 0.0  ;;  %v7683_v41 = vadd.f32 %v18424_v16, %v7644_v1  ;;  %v20886_v22 = vld [vmem:[#allocation94_spill] sm:$0xff]  ;;  %v20887_v4 = vld [vmem:[#allocation97_spill] sm:$0xff] }
 0x3e6   : > { %v6832_v42 = vadd.f32 %v20885_v9, %v6444_v23  ;;  %7746 = vst.msk [vmem:[#allocation2 + $0xc9] sm:$0xff] %vm7730_vm3, %v7713_v17  ;;  %v7643_v50 = vmul.f32 %v18408_v35, %v7604_v46  ;;  %v7607_v18 = vadd.f32 %v14468_v19, %v7219_v51  ;;  %14555 = vmatmul.mubr.msk.f32.gmra.mxu1 %vm7730_vm3, %v18659_v59  ;;  %v20888_v14 = vld [vmem:[#allocation134_spill] sm:$0xff]  ;;  %v7519_v26 = vpop.f32.mrf.mxu1  ;;  %v18690_v9 = vld [vmem:[#allocation2 + $0x91] sm:$0xff]  ;;  %v18696_v19 = vpop.f32.mrf.mxu0 }
 0x3e7   : > { %11245 = vrot.lane.b32.xlu0 %v7604_v46, %s15132_s29  ;;  %v6446_v43 = vadd.f32 %v20886_v22, %v6058_v47  ;;  %v6060_v23 = vadd.f32 %v20887_v4, %v18427_v63  ;;  %v7221_v54 = vadd.f32 %v18493_v38, %v6833_v13  ;;  %v6835_v17 = vadd.f32 %v20888_v14, %v6447_v34  ;;  %v18692_v1 = vld [vmem:[#allocation2 + $0x90] sm:$0xff]  ;;  %v18694_v51 = vld [vmem:[#allocation2 + $0x98] sm:$0xff]  ;;  %v20890_v13 = vld [vmem:[#allocation95_spill] sm:$0xff] }
 0x3e8   : > { %20889 = vst [vmem:[#allocation74_spill] sm:$0xff] %v18690_v9  ;;  %7745 = vst.msk [vmem:[#allocation2 + $0xc1] sm:$0xff] %vm7730_vm3, %v7712_v60  ;;  %v7715_v46 = vmax.f32 %v7683_v41, 0.0  ;;  %v7682_v47 = vadd.f32 %v18424_v16, %v7643_v50  ;;  %v7646_v63 = vmul.f32 %v18408_v35, %v7607_v18  ;;  %v7606_v22 = vadd.f32 %v7519_v26, %v7218_v32  ;;  %v18705_v38 = vld [vmem:[#allocation2 + $0x99] sm:$0xff]  ;;  %v20891_v34 = vld [vmem:[#allocation96_spill] sm:$0xff]  ;;  %v14471_v50 = vpop.f32.mrf.mxu1 }
 0x3e9   : > { %14507 = vmatprep.mubr.msk.f32.mxu0 %vm7730_vm3, %v18690_v9  ;;  %14557 = vmatprep.mubr.msk.f32.mxu1 %vm7730_vm3, %v18692_v1  ;;  %v6449_v4 = vadd.f32 %v20891_v34, %v20890_v13  ;;  %v7220_v14 = vadd.f32 %v18521_v31, %v6832_v42  ;;  %v20892_v60 = vld [vmem:[#allocation135_spill] sm:$0xff]  ;;  %v7609_v5 = vadd.f32 %v14471_v50, %v7221_v54  ;;  %v20893_v31 = vld [vmem:[#allocation98_spill] sm:$0xff] }
 0x3ea   : > { %v6834_v41 = vadd.f32 %v20892_v60, %v6446_v43  ;;  %11247 = vrot.lane.b32.xlu1 %v7605_v12, %s15132_s29  ;;  %14508 = vmatmul.mubr.msk.f32.gmra.mxu0 %vm7730_vm3, %v18705_v38  ;;  %7748 = vst.msk [vmem:[#allocation2 + $0xe1] sm:$0xff] %vm7730_vm3, %v7715_v46  ;;  %v7714_v32 = vmax.f32 %v7682_v47, 0.0  ;;  %v7685_v26 = vadd.f32 %v18424_v16, %v7646_v63  ;;  %v20894_v12 = vld [vmem:[#allocation101_spill] sm:$0xff]  ;;  %v7529_v47 = vpop.f32.mrf.mxu1  ;;  %v18725_v34 = vld [vmem:[#allocation2 + $0xa9] sm:$0xff]  ;;  %v18731_v60 = vpop.f32.mrf.mxu0 }
 0x3eb   : > { %v7645_v9 = vmul.f32 %v18408_v35, %v7606_v22  ;;  %14558 = vmatmul.mubr.msk.f32.gmra.mxu1 %vm7730_vm3, %v18694_v51  ;;  %11249 = vrot.lane.b32.xlu0 %v7606_v22, %s15132_s29  ;;  %v6448_v42 = vadd.f32 %v20893_v31, %v6060_v23  ;;  %v6062_v43 = vadd.f32 %v20894_v12, %v18435_v53  ;;  %v18727_v63 = vld [vmem:[#allocation2 + $0xa8] sm:$0xff]  ;;  %v18729_v54 = vld [vmem:[#allocation2 + $0xb0] sm:$0xff] }
 0x3ec   : > { %v7223_v13 = vadd.f32 %v18556_v57, %v6835_v17  ;;  %v6837_v46 = vadd.f32 %v18316_v61, %v6449_v4  ;;  %7747 = vst.msk [vmem:[#allocation2 + $0xd9] sm:$0xff] %vm7730_vm3, %v7714_v32  ;;  %v7717_v22 = vmax.f32 %v7685_v26, 0.0  ;;  %v7648_v53 = vmul.f32 %v18408_v35, %v7609_v5  ;;  %14510 = vmatprep.mubr.msk.f32.mxu0 %vm7730_vm3, %v18725_v34  ;;  %v18740_v61 = vld [vmem:[#allocation2 + $0xb1] sm:$0xff]  ;;  %v20895_v57 = vld [vmem:[#allocation99_spill] sm:$0xff] }
 0x3ed   : > { %v7684_v23 = vadd.f32 %v18424_v16, %v7645_v9  ;;  %v7608_v50 = vadd.f32 %v7529_v47, %v7220_v14  ;;  %14560 = vmatprep.mubr.msk.f32.mxu1 %vm7730_vm3, %v18727_v63  ;;  %v20896_v17 = vld [vmem:[#allocation100_spill] sm:$0xff]  ;;  %v7222_v31 = vadd.f32 %v18591_v0, %v6834_v41  ;;  %v6836_v32 = vadd.f32 %v18319_v58, %v6448_v42  ;;  %v14474_v9 = vpop.f32.mrf.mxu1  ;;  %v20897_v58 = vld [vmem:[#allocation102_spill] sm:$0xff] }
 0x3ee   : > { %v6451_v4 = vadd.f32 %v20896_v17, %v20895_v57  ;;  %11251 = vrot.lane.b32.xlu1 %v7607_v18, %s15132_s29  ;;  %14511 = vmatmul.mubr.msk.f32.gmra.mxu0 %vm7730_vm3, %v18740_v61  ;;  %7750 = vst.msk [vmem:[#allocation2 + $0xf9] sm:$0xff] %vm7730_vm3, %v7717_v22  ;;  %v7687_v26 = vadd.f32 %v18424_v16, %v7648_v53  ;;  %v20898_v18 = vld [vmem:[#allocation105_spill] sm:$0xff]  ;;  %v14431_v17 = vpop.f32.mrf.mxu0 }
 0x3ef   : > { %v7716_v14 = vmax.f32 %v7684_v23, 0.0  ;;  %v7647_v12 = vmul.f32 %v18408_v35, %v7608_v50  ;;  %v7611_v47 = vadd.f32 %v14474_v9, %v7223_v13  ;;  %14561 = vmatmul.mubr.msk.f32.gmra.mxu1 %vm7730_vm3, %v18729_v54  ;;  %11253 = vrot.lane.b32.xlu0 %v7608_v50, %s15132_s29  ;;  %v6450_v0 = vadd.f32 %v20897_v58, %v6062_v43  ;;  %v7539_v23 = vpop.f32.mrf.mxu1  ;;  %v18760_v57 = vld [vmem:[#allocation2 + $0xc1] sm:$0xff] }
 0x3f0   : > { %v6064_v41 = vadd.f32 %v20898_v18, %v18455_v27  ;;  %v7225_v42 = vadd.f32 %v18626_v10, %v6837_v46  ;;  %v6839_v22 = vadd.f32 %v18323_v3, %v6451_v4  ;;  %v18762_v53 = vld [vmem:[#allocation2 + $0xc0] sm:$0xff]  ;;  %v18764_v13 = vld [vmem:[#allocation2 + $0xc8] sm:$0xff]  ;;  %v7719_v50 = vmax.f32 %v7687_v26, 0.0  ;;  %14513 = vmatprep.mubr.msk.f32.mxu0 %vm7730_vm3, %v18760_v57  ;;  %v20900_v46 = vld [vmem:[#allocation104_spill] sm:$0xff] }
 0x3f1   : > { %7749 = vst.msk [vmem:[#allocation2 + $0xf1] sm:$0xff] %vm7730_vm3, %v7716_v14  ;;  %v7686_v43 = vadd.f32 %v18424_v16, %v7647_v12  ;;  %v7650_v9 = vmul.f32 %v18408_v35, %v7611_v47  ;;  %v7610_v27 = vadd.f32 %v7539_v23, %v7222_v31  ;;  %14563 = vmatprep.mubr.msk.f32.mxu1 %vm7730_vm3, %v18762_v53  ;;  %v18773_v3 = vld [vmem:[#allocation2 + $0xc9] sm:$0xff]  ;;  %v14477_v26 = vpop.f32.mrf.mxu1 }
 0x3f2   : > { %v20899_v10 = vld [vmem:[#allocation103_spill] sm:$0xff]  ;;  %v7224_v58 = vadd.f32 %v18661_v25, %v6836_v32  ;;  %v6838_v14 = vadd.f32 %v18326_v44, %v6450_v0  ;;  %11255 = vrot.lane.b32.xlu1 %v7609_v5, %s15132_s29  ;;  %14514 = vmatmul.mubr.msk.f32.gmra.mxu0 %vm7730_vm3, %v18773_v3  ;;  %7752 = vst.msk [vmem:[#allocation2 + $0x111] sm:$0xff] %vm7730_vm3, %v7719_v50  ;;  %v20901_v44 = vld [vmem:[#allocation106_spill] sm:$0xff]  ;;  %v20902_v5 = vld [vmem:[#allocation109_spill] sm:$0xff] }
 0x3f3   : > { %v6453_v4 = vadd.f32 %v20900_v46, %v20899_v10  ;;  %v7718_v31 = vmax.f32 %v7686_v43, 0.0  ;;  %v7689_v12 = vadd.f32 %v18424_v16, %v7650_v9  ;;  %v7649_v18 = vmul.f32 %v18408_v35, %v7610_v27  ;;  %14564 = vmatmul.mubr.msk.f32.gmra.mxu1 %vm7730_vm3, %v18764_v13  ;;  %11257 = vrot.lane.b32.xlu0 %v7610_v27, %s15132_s29  ;;  %v7549_v43 = vpop.f32.mrf.mxu1  ;;  %v18793_v10 = vld [vmem:[#allocation2 + $0xd9] sm:$0xff]  ;;  %v7181_v46 = vpop.f32.mrf.mxu0 }
 0x3f4   : > { %v7613_v23 = vadd.f32 %v14477_v26, %v7225_v42  ;;  %v6452_v25 = vadd.f32 %v20901_v44, %v6064_v41  ;;  %v6066_v32 = vadd.f32 %v20902_v5, %v18500_v48  ;;  %v7227_v0 = vadd.f32 %v18696_v19, %v6839_v22  ;;  %20903 = vst [vmem:[#allocation34_spill] sm:$0xff] %v18793_v10  ;;  %v18795_v9 = vld [vmem:[#allocation2 + $0xd8] sm:$0xff]  ;;  %v18797_v42 = vld [vmem:[#allocation2 + $0xe0] sm:$0xff]  ;;  %v20904_v19 = vld [vmem:[#allocation107_spill] sm:$0xff] }
 0x3f5   : > { %v6841_v50 = vadd.f32 %v18331_v33, %v6453_v4  ;;  %7751 = vst.msk [vmem:[#allocation2 + $0x109] sm:$0xff] %vm7730_vm3, %v7718_v31  ;;  %v7721_v27 = vmax.f32 %v7689_v12, 0.0  ;;  %v7688_v41 = vadd.f32 %v18424_v16, %v7649_v18  ;;  %v7612_v48 = vadd.f32 %v7549_v43, %v7224_v58  ;;  %14516 = vmatprep.mubr.msk.f32.mxu0 %vm7730_vm3, %v18793_v10  ;;  %v18806_v33 = vld [vmem:[#allocation2 + $0xe1] sm:$0xff]  ;;  %v20905_v22 = vld [vmem:[#allocation108_spill] sm:$0xff]  ;;  %v14480_v12 = vpop.f32.mrf.mxu1  ;;  %v14434_v58 = vpop.f32.mrf.mxu0 }
 0x3f6   : > { %v7652_v26 = vmul.f32 %v18408_v35, %v7613_v23  ;;  %14566 = vmatprep.mubr.msk.f32.mxu1 %vm7730_vm3, %v18795_v9  ;;  %v6455_v4 = vadd.f32 %v20905_v22, %v20904_v19  ;;  %v7226_v44 = vadd.f32 %v18731_v60, %v6838_v14  ;;  %v6840_v31 = vadd.f32 %v18349_v28, %v6452_v25  ;;  %v20906_v28 = vld [vmem:[#allocation110_spill] sm:$0xff] }
 0x3f7   : > { %11259 = vrot.lane.b32.xlu1 %v7611_v47, %s15132_s29  ;;  %14517 = vmatmul.mubr.msk.f32.gmra.mxu0 %vm7730_vm3, %v18806_v33  ;;  %7754 = vst.msk [vmem:[#allocation2 + $0x129] sm:$0xff] %vm7730_vm3, %v7721_v27  ;;  %v7720_v18 = vmax.f32 %v7688_v41, 0.0  ;;  %v7651_v43 = vmul.f32 %v18408_v35, %v7612_v48  ;;  %v7615_v10 = vadd.f32 %v14480_v12, %v7227_v0  ;;  %v7559_v25 = vpop.f32.mrf.mxu1 }
 0x3f8   : > { %v7691_v5 = vadd.f32 %v18424_v16, %v7652_v26  ;;  %14567 = vmatmul.mubr.msk.f32.gmra.mxu1 %vm7730_vm3, %v18797_v42  ;;  %11261 = vrot.lane.b32.xlu0 %v7612_v48, %s15132_s29  ;;  %v6454_v60 = vadd.f32 %v20906_v28, %v6066_v32  ;;  %v7229_v47 = vadd.f32 %v14431_v17, %v6841_v50  ;;  %v18823_v19 = vld [vmem:[#allocation2 + $0xf1] sm:$0xff] }
 0x3f9   : > { %v6843_v14 = vadd.f32 %v18367_v24, %v6455_v4  ;;  %v18825_v27 = vld [vmem:[#allocation2 + $0xf0] sm:$0xff]  ;;  %v18827_v41 = vld [vmem:[#allocation2 + $0xf8] sm:$0xff]  ;;  %7753 = vst.msk [vmem:[#allocation2 + $0x121] sm:$0xff] %vm7730_vm3, %v7720_v18  ;;  %v7690_v26 = vadd.f32 %v18424_v16, %v7651_v43  ;;  %v7654_v22 = vmul.f32 %v18408_v35, %v7615_v10  ;;  %v7614_v48 = vadd.f32 %v7559_v25, %v7226_v44  ;;  %v14483_v50 = vpop.f32.mrf.mxu1  ;;  %v7191_v4 = vpop.f32.mrf.mxu0 }
 0x3fa   : > { %v7723_v0 = vmax.f32 %v7691_v5, 0.0  ;;  %14519 = vmatprep.mubr.msk.f32.mxu0 %vm7730_vm3, %v18823_v19  ;;  %14569 = vmatprep.mubr.msk.f32.mxu1 %vm7730_vm3, %v18825_v27  ;;  %v18836_v24 = vld [vmem:[#allocation2 + $0xf9] sm:$0xff]  ;;  %v7228_v17 = vadd.f32 %v7181_v46, %v6840_v31  ;;  %v6842_v32 = vadd.f32 %v18387_v45, %v6454_v60  ;;  %v7617_v5 = vadd.f32 %v14483_v50, %v7229_v47 }
 0x3fb   : > { %11263 = vrot.lane.b32.xlu1 %v7613_v23, %s15132_s29  ;;  %14520 = vmatmul.mubr.msk.f32.gmra.mxu0 %vm7730_vm3, %v18836_v24  ;;  %v7722_v44 = vmax.f32 %v7690_v26, 0.0  ;;  %v7693_v12 = vadd.f32 %v18424_v16, %v7654_v22  ;;  %v7653_v18 = vmul.f32 %v18408_v35, %v7614_v48  ;;  %v7231_v45 = vadd.f32 %v14434_v58, %v6843_v14  ;;  %v7569_v23 = vpop.f32.mrf.mxu1  ;;  %v18861_v58 = vld [vmem:[#allocation2 + $0x111] sm:$0xff] }
 0x3fc   : > { %7756 = vst.msk [vmem:[#allocation2 + $0x141] sm:$0xff] %vm7730_vm3, %v7723_v0  ;;  %14570 = vmatmul.mubr.msk.f32.gmra.mxu1 %vm7730_vm3, %v18827_v41  ;;  %11265 = vrot.lane.b32.xlu0 %v7614_v48, %s15132_s29  ;;  %v18848_v46 = vld [vmem:[#allocation2 + $0x109] sm:$0xff]  ;;  %v7656_v47 = vmul.f32 %v18408_v35, %v7617_v5  ;;  %v7616_v25 = vadd.f32 %v7569_v23, %v7228_v17 }
 0x3fd   : > { %v18850_v31 = vld [vmem:[#allocation2 + $0x108] sm:$0xff]  ;;  %v18852_v43 = vld [vmem:[#allocation2 + $0x110] sm:$0xff]  ;;  %7755 = vst.msk [vmem:[#allocation2 + $0x139] sm:$0xff] %vm7730_vm3, %v7722_v44  ;;  %v7725_v28 = vmax.f32 %v7693_v12, 0.0  ;;  %v7692_v60 = vadd.f32 %v18424_v16, %v7653_v18  ;;  %14522 = vmatprep.mubr.msk.f32.mxu0 %vm7730_vm3, %v18848_v46  ;;  %v7230_v14 = vadd.f32 %v7191_v4, %v6842_v32  ;;  %v14486_v0 = vpop.f32.mrf.mxu1 }
 0x3fe   : > { %14572 = vmatprep.mubr.msk.f32.mxu1 %vm7730_vm3, %v18850_v31  ;;  %v7695_v22 = vadd.f32 %v18424_v16, %v7656_v47  ;;  %v7655_v48 = vmul.f32 %v18408_v35, %v7616_v25  ;;  %v7619_v17 = vadd.f32 %v14486_v0, %v7231_v45  ;;  %v18885_v23 = vld [vmem:[#allocation2 + $0x129] sm:$0xff] }
 0x3ff   : > { %11267 = vrot.lane.b32.xlu1 %v7615_v10, %s15132_s29  ;;  %14523 = vmatmul.mubr.msk.f32.gmra.mxu0 %vm7730_vm3, %v18861_v58  ;;  %7758 = vst.msk [vmem:[#allocation2 + $0x159] sm:$0xff] %vm7730_vm3, %v7725_v28  ;;  %v7724_v26 = vmax.f32 %v7692_v60, 0.0  ;;  %v7579_v32 = vpop.f32.mrf.mxu1 }
 0x400   : > { %14573 = vmatmul.mubr.msk.f32.gmra.mxu1 %vm7730_vm3, %v18852_v43  ;;  %11269 = vrot.lane.b32.xlu0 %v7616_v25, %s15132_s29  ;;  %v18872_v50 = vld [vmem:[#allocation2 + $0x121] sm:$0xff]  ;;  %v7727_v44 = vmax.f32 %v7695_v22, 0.0  ;;  %v7694_v12 = vadd.f32 %v18424_v16, %v7655_v48  ;;  %v7658_v18 = vmul.f32 %v18408_v35, %v7619_v17  ;;  %v7618_v45 = vadd.f32 %v7579_v32, %v7230_v14 }
 0x401   : > { %v18874_v10 = vld [vmem:[#allocation2 + $0x120] sm:$0xff]  ;;  %v18876_v4 = vld [vmem:[#allocation2 + $0x128] sm:$0xff]  ;;  %7757 = vst.msk [vmem:[#allocation2 + $0x151] sm:$0xff] %vm7730_vm3, %v7724_v26  ;;  %14525 = vmatprep.mubr.msk.f32.mxu0 %vm7730_vm3, %v18872_v50 }
 0x402   : > { %14575 = vmatprep.mubr.msk.f32.mxu1 %vm7730_vm3, %v18874_v10  ;;  %7760 = vst.msk [vmem:[#allocation2 + $0x171] sm:$0xff] %vm7730_vm3, %v7727_v44  ;;  %v7726_v28 = vmax.f32 %v7694_v12, 0.0  ;;  %v7697_v60 = vadd.f32 %v18424_v16, %v7658_v18  ;;  %v7657_v47 = vmul.f32 %v18408_v35, %v7618_v45  ;;  %v8472_v44 = vld [vmem:[#allocation2 + $0x2] sm:$0xff] }
 0x403   : > { %11271 = vrot.lane.b32.xlu1 %v7617_v5, %s15132_s29  ;;  %14526 = vmatmul.mubr.msk.f32.gmra.mxu0 %vm7730_vm3, %v18885_v23  ;;  %v18908_v35 = vld [vmem:[#allocation2 + $0x141] sm:$0xff] }
 0x404   : > { %14576 = vmatmul.mubr.msk.f32.gmra.mxu1 %vm7730_vm3, %v18876_v4  ;;  %11273 = vrot.lane.b32.xlu0 %v7618_v45, %s15132_s29  ;;  %v18896_v25 = vld [vmem:[#allocation2 + $0x139] sm:$0xff]  ;;  %7759 = vst.msk [vmem:[#allocation2 + $0x169] sm:$0xff] %vm7730_vm3, %v7726_v28  ;;  %v7729_v0 = vmax.f32 %v7697_v60, 0.0  ;;  %v7696_v26 = vadd.f32 %v18424_v16, %v7657_v47  ;;  %v8473_v60 = vld [vmem:[#allocation2 + $0xa] sm:$0xff] }
 0x405   : > { %v18898_v14 = vld [vmem:[#allocation2 + $0x138] sm:$0xff]  ;;  %v18900_v5 = vld [vmem:[#allocation2 + $0x140] sm:$0xff]  ;;  %14528 = vmatprep.mubr.msk.f32.mxu0 %vm7730_vm3, %v18896_v25 }
 0x406   : > { %14578 = vmatprep.mubr.msk.f32.mxu1 %vm7730_vm3, %v18898_v14  ;;  %7762 = vst.msk [vmem:[#allocation2 + $0x189] sm:$0xff] %vm7730_vm3, %v7729_v0  ;;  %v7728_v22 = vmax.f32 %v7696_v26, 0.0  ;;  %v18953_v47 = vld [vmem:[#allocation3 + $0x30] sm:$0xff]  ;;  %v15003_v0 = vld [vmem:[#allocation3 + $0x20] sm:$0xff] }
 0x407   : > { %11275 = vrot.lane.b32.xlu1 %v7619_v17, %s15132_s29  ;;  %14529 = vmatmul.mubr.msk.f32.gmra.mxu0 %vm7730_vm3, %v18908_v35  ;;  %v18927_v17 = vld [vmem:[#allocation2 + $0x159] sm:$0xff]  ;;  %s15062_s29 = scalar_lea.vmem %s20248_s21, 4096 }
 0x408   : > { %14579 = vmatmul.mubr.msk.f32.gmra.mxu1 %vm7730_vm3, %v18900_v5  ;;  %v18916_v16 = vld [vmem:[#allocation2 + $0x151] sm:$0xff]  ;;  %7761 = vst.msk [vmem:[#allocation2 + $0x181] sm:$0xff] %vm7730_vm3, %v7728_v22  ;;  %v18957_v26 = vld [vmem:[#allocation2 + $0x1a] sm:$0xff]  ;;  %v18959_v22 = vld [vmem:[#allocation3 + $0x38] sm:$0xff]  ;;  %p15063_p6 = scmp.ne.s32.totalorder %s20248_s21, %s15062_s29 }
 0x409   : > { %v18918_v48 = vld [vmem:[#allocation2 + $0x150] sm:$0xff]  ;;  %v18920_v32 = vld [vmem:[#allocation2 + $0x158] sm:$0xff]  ;;  %14531 = vmatprep.mubr.msk.f32.mxu0 %vm7730_vm3, %v18916_v16 }
 0x40a   : > { %14581 = vmatprep.mubr.msk.f32.mxu1 %vm7730_vm3, %v18918_v48  ;;  %v18943_v28 = vld [vmem:[#allocation2 + $0x171] sm:$0xff]  ;;  %p15064_p9 = pnand %p15063_p6, %p15230_p5 }
 0x40b   : > { %14532 = vmatmul.mubr.msk.f32.gmra.mxu0 %vm7730_vm3, %v18927_v17  ;;  %v18933_v12 = vld [vmem:[#allocation2 + $0x169] sm:$0xff]  ;;  %20908 = vst [vmem:[#allocation81_spill] sm:$0xff] %v18943_v28 }
 0x40c   : > { %14582 = vmatmul.mubr.msk.f32.gmra.mxu1 %vm7730_vm3, %v18920_v32  ;;  %20907 = vst [vmem:[#allocation78_spill] sm:$0xff] %v18933_v12  ;;  %v18935_v18 = vld [vmem:[#allocation2 + $0x168] sm:$0xff]  ;;  %v18937_v45 = vld [vmem:[#allocation2 + $0x170] sm:$0xff]  ;;  %14534 = vmatprep.mubr.msk.f32.mxu0 %vm7730_vm3, %v18933_v12  ;;  %p15065_p10 = pneg %p15064_p9 }
 0x40d   : > { %14584 = vmatprep.mubr.msk.f32.mxu1 %vm7730_vm3, %v18935_v18  ;;  %v14541_v12 = vpop.f32.mrf.mxu1 }
 0x40f   : > { %14535 = vmatmul.mubr.msk.f32.gmra.mxu0 %vm7730_vm3, %v18943_v28  ;;  %v14491_v28 = vpop.f32.mrf.mxu0 }
 0x410   : > { %14585 = vmatmul.mubr.msk.f32.gmra.mxu1 %vm7730_vm3, %v18937_v45  ;;  %14589 = vmatprep.mubr.msk.f32.mxu0 %vm7730_vm3, %v8472_v44  ;;  %v18967_v44 = vld [vmem:[#allocation2 + $0x22] sm:$0xff] }
 0x411   : > { %14639 = vmatprep.mubr.msk.f32.mxu1 %vm7730_vm3, %v18517_v62  ;;  %v18965_v62 = vadd.f32 %v14541_v12, %v14491_v28  ;;  %v19106_v12 = vld [vmem:[#allocation2 + $0x13a] sm:$0xff]  ;;  %v19118_v28 = vld [vmem:[#allocation2 + $0x152] sm:$0xff] }
 0x413   : > { %14590 = vmatmul.mubr.msk.f32.vlgmr.msra.gmra.mxu0 %vm7730_vm3, %v8473_v60  ;;  %v19140_v60 = vld [vmem:[#allocation2 + $0x172] sm:$0xff] }
 0x414   : > { %14640 = vmatmul.mubr.msk.f32.vlgmr.msra.gmra.mxu1 %vm7730_vm3, %v18519_v21  ;;  %14688 = vmatpush3.msra.mxu0 %v15003_v0  ;;  %v18973_v21 = vld [vmem:[#allocation2 + $0x32] sm:$0xff] }
 0x415   : > { %14592 = vmatprep.mubr.msk.f32.mxu0 %vm7730_vm3, %v18957_v26  ;;  %14642 = vmatprep.mubr.msk.f32.mxu1 %vm7730_vm3, %v18552_v2  ;;  %v18982_v2 = vld [vmem:[#allocation2 + $0x3a] sm:$0xff] }
 0x416   : > { %14738 = vmatpush3.msra.mxu1 %v18485_v36  ;;  %14787 = vmatprep.subr.mxu0 %v18953_v47  ;;  %v18986_v36 = vld [vmem:[#allocation2 + $0x4a] sm:$0xff] }
 0x417   : > { %14593 = vmatmul.mubr.msk.f32.gmra.mxu0 %vm7730_vm3, %v18967_v44  ;;  %14837 = vmatprep.subr.mxu1 %v18959_v22 }
 0x418   : > { %14643 = vmatmul.mubr.msk.f32.gmra.mxu1 %vm7730_vm3, %v18554_v52  ;;  %14595 = vmatprep.mubr.msk.f32.mxu0 %vm7730_vm3, %v18973_v21  ;;  %v18994_v52 = vld [vmem:[#allocation2 + $0x52] sm:$0xff] }
 0x419   : > { %14645 = vmatprep.mubr.msk.f32.mxu1 %vm7730_vm3, %v18587_v37  ;;  %v18998_v37 = vld [vmem:[#allocation2 + $0x62] sm:$0xff] }
 0x41b   : > { %14596 = vmatmul.mubr.msk.f32.gmra.mxu0 %vm7730_vm3, %v18982_v2 }
 0x41c   : > { %14646 = vmatmul.mubr.msk.f32.gmra.mxu1 %vm7730_vm3, %v18589_v11  ;;  %14598 = vmatprep.mubr.msk.f32.mxu0 %vm7730_vm3, %v18986_v36  ;;  %v19006_v11 = vld [vmem:[#allocation2 + $0x6a] sm:$0xff] }
 0x41d   : > { %14648 = vmatprep.mubr.msk.f32.mxu1 %vm7730_vm3, %v18622_v55  ;;  %v19010_v55 = vld [vmem:[#allocation2 + $0x7a] sm:$0xff] }
 0x41f   : > { %14599 = vmatmul.mubr.msk.f32.gmra.mxu0 %vm7730_vm3, %v18994_v52 }
 0x420   : > { %14649 = vmatmul.mubr.msk.f32.gmra.mxu1 %vm7730_vm3, %v18624_v30  ;;  %14601 = vmatprep.mubr.msk.f32.mxu0 %vm7730_vm3, %v18998_v37  ;;  %v19018_v30 = vld [vmem:[#allocation2 + $0x82] sm:$0xff] }
 0x421   : > { %14651 = vmatprep.mubr.msk.f32.mxu1 %vm7730_vm3, %v18657_v39  ;;  %v19022_v39 = vld [vmem:[#allocation2 + $0x92] sm:$0xff] }
 0x423   : > { %14602 = vmatmul.mubr.msk.f32.gmra.mxu0 %vm7730_vm3, %v19006_v11 }
 0x424   : > { %14652 = vmatmul.mubr.msk.f32.gmra.mxu1 %vm7730_vm3, %v18659_v59  ;;  %14604 = vmatprep.mubr.msk.f32.mxu0 %vm7730_vm3, %v19010_v55  ;;  %v19030_v59 = vld [vmem:[#allocation2 + $0x9a] sm:$0xff] }
 0x425   : > { %14654 = vmatprep.mubr.msk.f32.mxu1 %vm7730_vm3, %v18692_v1  ;;  %v19034_v1 = vld [vmem:[#allocation2 + $0xaa] sm:$0xff] }
 0x427   : > { %14605 = vmatmul.mubr.msk.f32.gmra.mxu0 %vm7730_vm3, %v19018_v30 }
 0x428   : > { %14655 = vmatmul.mubr.msk.f32.gmra.mxu1 %vm7730_vm3, %v18694_v51  ;;  %14607 = vmatprep.mubr.msk.f32.mxu0 %vm7730_vm3, %v19022_v39  ;;  %v19042_v51 = vld [vmem:[#allocation2 + $0xb2] sm:$0xff] }
 0x429   : > { %14657 = vmatprep.mubr.msk.f32.mxu1 %vm7730_vm3, %v18727_v63  ;;  %v19046_v63 = vld [vmem:[#allocation2 + $0xc2] sm:$0xff] }
 0x42b   : > { %14608 = vmatmul.mubr.msk.f32.gmra.mxu0 %vm7730_vm3, %v19030_v59 }
 0x42c   : > { %14658 = vmatmul.mubr.msk.f32.gmra.mxu1 %vm7730_vm3, %v18729_v54  ;;  %14610 = vmatprep.mubr.msk.f32.mxu0 %vm7730_vm3, %v19034_v1  ;;  %v19054_v54 = vld [vmem:[#allocation2 + $0xca] sm:$0xff] }
 0x42d   : > { %14660 = vmatprep.mubr.msk.f32.mxu1 %vm7730_vm3, %v18762_v53  ;;  %v19058_v53 = vld [vmem:[#allocation2 + $0xda] sm:$0xff] }
 0x42f   : > { %14611 = vmatmul.mubr.msk.f32.gmra.mxu0 %vm7730_vm3, %v19042_v51 }
 0x430   : > { %14661 = vmatmul.mubr.msk.f32.gmra.mxu1 %vm7730_vm3, %v18764_v13  ;;  %14613 = vmatprep.mubr.msk.f32.mxu0 %vm7730_vm3, %v19046_v63  ;;  %v19066_v13 = vld [vmem:[#allocation2 + $0xe2] sm:$0xff] }
 0x431   : > { %14663 = vmatprep.mubr.msk.f32.mxu1 %vm7730_vm3, %v18795_v9  ;;  %v19070_v9 = vld [vmem:[#allocation2 + $0xf2] sm:$0xff] }
 0x433   : > { %14614 = vmatmul.mubr.msk.f32.gmra.mxu0 %vm7730_vm3, %v19054_v54 }
 0x434   : > { %14664 = vmatmul.mubr.msk.f32.gmra.mxu1 %vm7730_vm3, %v18797_v42  ;;  %14616 = vmatprep.mubr.msk.f32.mxu0 %vm7730_vm3, %v19058_v53  ;;  %v19078_v42 = vld [vmem:[#allocation2 + $0xfa] sm:$0xff] }
 0x435   : > { %14666 = vmatprep.mubr.msk.f32.mxu1 %vm7730_vm3, %v18825_v27  ;;  %v19082_v27 = vld [vmem:[#allocation2 + $0x10a] sm:$0xff] }
 0x437   : > { %14617 = vmatmul.mubr.msk.f32.gmra.mxu0 %vm7730_vm3, %v19066_v13 }
 0x438   : > { %14667 = vmatmul.mubr.msk.f32.gmra.mxu1 %vm7730_vm3, %v18827_v41  ;;  %14619 = vmatprep.mubr.msk.f32.mxu0 %vm7730_vm3, %v19070_v9  ;;  %v19090_v41 = vld [vmem:[#allocation2 + $0x112] sm:$0xff] }
 0x439   : > { %14669 = vmatprep.mubr.msk.f32.mxu1 %vm7730_vm3, %v18850_v31  ;;  %v19094_v31 = vld [vmem:[#allocation2 + $0x122] sm:$0xff] }
 0x43b   : > { %14620 = vmatmul.mubr.msk.f32.gmra.mxu0 %vm7730_vm3, %v19078_v42 }
 0x43c   : > { %14670 = vmatmul.mubr.msk.f32.gmra.mxu1 %vm7730_vm3, %v18852_v43  ;;  %14622 = vmatprep.mubr.msk.f32.mxu0 %vm7730_vm3, %v19082_v27  ;;  %v19102_v43 = vld [vmem:[#allocation2 + $0x12a] sm:$0xff] }
 0x43d   : > { %14672 = vmatprep.mubr.msk.f32.mxu1 %vm7730_vm3, %v18874_v10 }
 0x43f   : > { %14623 = vmatmul.mubr.msk.f32.gmra.mxu0 %vm7730_vm3, %v19090_v41 }
 0x440   : > { %14673 = vmatmul.mubr.msk.f32.gmra.mxu1 %vm7730_vm3, %v18876_v4  ;;  %14625 = vmatprep.mubr.msk.f32.mxu0 %vm7730_vm3, %v19094_v31  ;;  %v19114_v4 = vld [vmem:[#allocation2 + $0x142] sm:$0xff] }
 0x441   : > { %14675 = vmatprep.mubr.msk.f32.mxu1 %vm7730_vm3, %v18898_v14 }
 0x443   : > { %14626 = vmatmul.mubr.msk.f32.gmra.mxu0 %vm7730_vm3, %v19102_v43 }
 0x444   : > { %14676 = vmatmul.mubr.msk.f32.gmra.mxu1 %vm7730_vm3, %v18900_v5  ;;  %14628 = vmatprep.mubr.msk.f32.mxu0 %vm7730_vm3, %v19106_v12  ;;  %v19126_v5 = vld [vmem:[#allocation2 + $0x15a] sm:$0xff] }
 0x445   : > { %14678 = vmatprep.mubr.msk.f32.mxu1 %vm7730_vm3, %v18918_v48  ;;  %v19130_v48 = vld [vmem:[#allocation2 + $0x16a] sm:$0xff] }
 0x447   : > { %14629 = vmatmul.mubr.msk.f32.gmra.mxu0 %vm7730_vm3, %v19114_v4 }
 0x448   : > { %14679 = vmatmul.mubr.msk.f32.gmra.mxu1 %vm7730_vm3, %v18920_v32  ;;  %14631 = vmatprep.mubr.msk.f32.mxu0 %vm7730_vm3, %v19118_v28  ;;  %v19136_v32 = vld [vmem:[#allocation2 + $0x180] sm:$0xff] }
 0x449   : > { %14681 = vmatprep.mubr.msk.f32.mxu1 %vm7730_vm3, %v18935_v18  ;;  %v19144_v18 = vld [vmem:[#allocation2 + $0x188] sm:$0xff] }
 0x44b   : > { %14632 = vmatmul.mubr.msk.f32.gmra.mxu0 %vm7730_vm3, %v19126_v5 }
 0x44c   : > { %14682 = vmatmul.mubr.msk.f32.gmra.mxu1 %vm7730_vm3, %v18937_v45  ;;  %14634 = vmatprep.mubr.msk.f32.mxu0 %vm7730_vm3, %v19130_v48  ;;  %v19154_v45 = vld [vmem:[#allocation3 + $0x40] sm:$0xff] }
 0x44d   : > { %14684 = vmatprep.mubr.msk.f32.mxu1 %vm7730_vm3, %v19136_v32 }
 0x44f   : > { %14635 = vmatmul.mubr.msk.f32.gmra.mxu0 %vm7730_vm3, %v19140_v60 }
 0x450   : > { %14685 = vmatmul.mubr.msk.f32.gmra.mxu1 %vm7730_vm3, %v19144_v18  ;;  %14689 = vmatprep.mubr.msk.f32.mxu0 %vm7730_vm3, %v18515_v40  ;;  %v20909_v40 = vld [vmem:[#allocation72_spill] sm:$0xff] }
 0x451   : > { %14739 = vmatprep.mubr.msk.f32.mxu1 %vm7730_vm3, %v18957_v26  ;;  %v10025_v26 = vld [vmem:[#allocation2 + $0x68] sm:$0xff] }
 0x453   : > { %14690 = vmatmul.mubr.msk.f32.vlgmr.msra.gmra.mxu0 %vm7730_vm3, %v18530_v15  ;;  %v20910_v15 = vld [vmem:[#allocation74_spill] sm:$0xff] }
 0x454   : > { %14740 = vmatmul.mubr.msk.f32.vlgmr.msra.gmra.mxu1 %vm7730_vm3, %v18967_v44  ;;  %14788 = vmatpush3.msra.mxu0 %v18953_v47 }
 0x455   : > { %14692 = vmatprep.mubr.msk.f32.mxu0 %vm7730_vm3, %v18550_v6  ;;  %14742 = vmatprep.mubr.msk.f32.mxu1 %vm7730_vm3, %v18973_v21  ;;  %v20911_v6 = vld [vmem:[#allocation34_spill] sm:$0xff]  ;;  %v10412_v21 = vld [vmem:[#allocation2 + $0x69] sm:$0xff] }
 0x456   : > { %14838 = vmatpush3.msra.mxu1 %v18959_v22  ;;  %14887 = vmatprep.subr.mxu0 %v19154_v45 }
 0x457   : > { %14693 = vmatmul.mubr.msk.f32.gmra.mxu0 %vm7730_vm3, %v18565_v49  ;;  %v20912_v49 = vld [vmem:[#allocation78_spill] sm:$0xff] }
 0x458   : > { %14743 = vmatmul.mubr.msk.f32.gmra.mxu1 %vm7730_vm3, %v18982_v2  ;;  %14695 = vmatprep.mubr.msk.f32.mxu0 %vm7730_vm3, %v18585_v56  ;;  %v20913_v56 = vld [vmem:[#allocation81_spill] sm:$0xff] }
 0x459   : > { %14745 = vmatprep.mubr.msk.f32.mxu1 %vm7730_vm3, %v18986_v36  ;;  %v10026_v2 = vld [vmem:[#allocation2 + $0x78] sm:$0xff] }
 0x45b   : > { %14696 = vmatmul.mubr.msk.f32.gmra.mxu0 %vm7730_vm3, %v18600_v20  ;;  %v19271_v20 = vld [vmem:[#allocation2 + $0x181] sm:$0xff] }
 0x45c   : > { %14746 = vmatmul.mubr.msk.f32.gmra.mxu1 %vm7730_vm3, %v18994_v52  ;;  %14698 = vmatprep.mubr.msk.f32.mxu0 %vm7730_vm3, %v18620_v8  ;;  %v19277_v8 = vld [vmem:[#allocation2 + $0x182] sm:$0xff]  ;;  %v10413_v52 = vld [vmem:[#allocation2 + $0x79] sm:$0xff] }
 0x45d   : > { %14748 = vmatprep.mubr.msk.f32.mxu1 %vm7730_vm3, %v18998_v37 }
 0x45f   : > { %14699 = vmatmul.mubr.msk.f32.gmra.mxu0 %vm7730_vm3, %v18635_v7  ;;  %v19281_v7 = vld [vmem:[#allocation2 + $0x189] sm:$0xff] }
 0x460   : > { %14749 = vmatmul.mubr.msk.f32.gmra.mxu1 %vm7730_vm3, %v19006_v11  ;;  %14701 = vmatprep.mubr.msk.f32.mxu0 %vm7730_vm3, %v18655_v29  ;;  %v19285_v29 = vld [vmem:[#allocation2 + $0x18a] sm:$0xff] }
 0x461   : > { %14751 = vmatprep.mubr.msk.f32.mxu1 %vm7730_vm3, %v19010_v55 }
 0x463   : > { %14702 = vmatmul.mubr.msk.f32.gmra.mxu0 %vm7730_vm3, %v20909_v40 }
 0x464   : > { %14752 = vmatmul.mubr.msk.f32.gmra.mxu1 %vm7730_vm3, %v19018_v30  ;;  %14704 = vmatprep.mubr.msk.f32.mxu0 %vm7730_vm3, %v20910_v15  ;;  %v10027_v30 = vld [vmem:[#allocation2 + $0x80] sm:$0xff]  ;;  %v10418_v15 = vld [vmem:[#allocation2 + $0xb1] sm:$0xff] }
 0x465   : > { %14754 = vmatprep.mubr.msk.f32.mxu1 %vm7730_vm3, %v19022_v39 }
 0x467   : > { %14705 = vmatmul.mubr.msk.f32.gmra.mxu0 %vm7730_vm3, %v18705_v38  ;;  %v10020_v38 = vld [vmem:[#allocation2 + $0x30] sm:$0xff] }
 0x468   : > { %14755 = vmatmul.mubr.msk.f32.gmra.mxu1 %vm7730_vm3, %v19030_v59  ;;  %14707 = vmatprep.mubr.msk.f32.mxu0 %vm7730_vm3, %v18725_v34  ;;  %v10407_v34 = vld [vmem:[#allocation2 + $0x31] sm:$0xff] }
 0x469   : > { %14757 = vmatprep.mubr.msk.f32.mxu1 %vm7730_vm3, %v19034_v1  ;;  %v10414_v1 = vld [vmem:[#allocation2 + $0x81] sm:$0xff] }
 0x46b   : > { %14708 = vmatmul.mubr.msk.f32.gmra.mxu0 %vm7730_vm3, %v18740_v61  ;;  %v10021_v61 = vld [vmem:[#allocation2 + $0x38] sm:$0xff] }
 0x46c   : > { %14758 = vmatmul.mubr.msk.f32.gmra.mxu1 %vm7730_vm3, %v19042_v51  ;;  %14710 = vmatprep.mubr.msk.f32.mxu0 %vm7730_vm3, %v18760_v57  ;;  %v10408_v57 = vld [vmem:[#allocation2 + $0x39] sm:$0xff]  ;;  %v10028_v51 = vld [vmem:[#allocation2 + $0x90] sm:$0xff] }
 0x46d   : > { %14760 = vmatprep.mubr.msk.f32.mxu1 %vm7730_vm3, %v19046_v63 }
 0x46f   : > { %14711 = vmatmul.mubr.msk.f32.gmra.mxu0 %vm7730_vm3, %v18773_v3  ;;  %v10022_v3 = vld [vmem:[#allocation2 + $0x48] sm:$0xff] }
 0x470   : > { %14761 = vmatmul.mubr.msk.f32.gmra.mxu1 %vm7730_vm3, %v19054_v54  ;;  %14713 = vmatprep.mubr.msk.f32.mxu0 %vm7730_vm3, %v20911_v6  ;;  %v10415_v54 = vld [vmem:[#allocation2 + $0x91] sm:$0xff]  ;;  %v10032_v6 = vld [vmem:[#allocation2 + $0xc0] sm:$0xff] }
 0x471   : > { %14763 = vmatprep.mubr.msk.f32.mxu1 %vm7730_vm3, %v19058_v53 }
 0x473   : > { %14714 = vmatmul.mubr.msk.f32.gmra.mxu0 %vm7730_vm3, %v18806_v33  ;;  %v10409_v33 = vld [vmem:[#allocation2 + $0x49] sm:$0xff] }
 0x474   : > { %14764 = vmatmul.mubr.msk.f32.gmra.mxu1 %vm7730_vm3, %v19066_v13  ;;  %14716 = vmatprep.mubr.msk.f32.mxu0 %vm7730_vm3, %v18823_v19  ;;  %v19294_v19 = vpop.f32.mrf.mxu0 }
 0x475   : > { %14766 = vmatprep.mubr.msk.f32.mxu1 %vm7730_vm3, %v19070_v9 }
 0x477   : > { %14717 = vmatmul.mubr.msk.f32.gmra.mxu0 %vm7730_vm3, %v18836_v24  ;;  %v19298_v24 = vpop.f32.mrf.mxu1 }
 0x478   : > { %14767 = vmatmul.mubr.msk.f32.gmra.mxu1 %vm7730_vm3, %v19078_v42  ;;  %14719 = vmatprep.mubr.msk.f32.mxu0 %vm7730_vm3, %v18848_v46  ;;  %v10023_v46 = vld [vmem:[#allocation2 + $0x50] sm:$0xff]  ;;  %v10029_v42 = vld [vmem:[#allocation2 + $0x98] sm:$0xff] }
 0x479   : > { %14769 = vmatprep.mubr.msk.f32.mxu1 %vm7730_vm3, %v19082_v27 }
 0x47b   : > { %14720 = vmatmul.mubr.msk.f32.gmra.mxu0 %vm7730_vm3, %v18861_v58 }
 0x47c   : > { %14770 = vmatmul.mubr.msk.f32.gmra.mxu1 %vm7730_vm3, %v19090_v41  ;;  %14722 = vmatprep.mubr.msk.f32.mxu0 %vm7730_vm3, %v18872_v50 }
 0x47d   : > { %14772 = vmatprep.mubr.msk.f32.mxu1 %vm7730_vm3, %v19094_v31  ;;  %v10416_v31 = vld [vmem:[#allocation2 + $0x99] sm:$0xff] }
 0x47f   : > { %14723 = vmatmul.mubr.msk.f32.gmra.mxu0 %vm7730_vm3, %v18885_v23  ;;  %v10410_v23 = vld [vmem:[#allocation2 + $0x51] sm:$0xff] }
 0x480   : > { %14773 = vmatmul.mubr.msk.f32.gmra.mxu1 %vm7730_vm3, %v19102_v43  ;;  %14725 = vmatprep.mubr.msk.f32.mxu0 %vm7730_vm3, %v18896_v25  ;;  %v10024_v25 = vld [vmem:[#allocation2 + $0x60] sm:$0xff]  ;;  %v10030_v43 = vld [vmem:[#allocation2 + $0xa8] sm:$0xff] }
 0x481   : > { %14775 = vmatprep.mubr.msk.f32.mxu1 %vm7730_vm3, %v19106_v12 }
 0x483   : > { %14726 = vmatmul.mubr.msk.f32.gmra.mxu0 %vm7730_vm3, %v18908_v35 }
 0x484   : > { %14776 = vmatmul.mubr.msk.f32.gmra.mxu1 %vm7730_vm3, %v19114_v4  ;;  %14728 = vmatprep.mubr.msk.f32.mxu0 %vm7730_vm3, %v18916_v16  ;;  %v10411_v16 = vld [vmem:[#allocation2 + $0x61] sm:$0xff]  ;;  %v10417_v4 = vld [vmem:[#allocation2 + $0xa9] sm:$0xff] }
 0x485   : > { %14778 = vmatprep.mubr.msk.f32.mxu1 %vm7730_vm3, %v19118_v28 }
 0x487   : > { %14729 = vmatmul.mubr.msk.f32.gmra.mxu0 %vm7730_vm3, %v18927_v17 }
 0x488   : > { %14779 = vmatmul.mubr.msk.f32.gmra.mxu1 %vm7730_vm3, %v19126_v5  ;;  %14731 = vmatprep.mubr.msk.f32.mxu0 %vm7730_vm3, %v20912_v49 }
 0x489   : > { %14781 = vmatprep.mubr.msk.f32.mxu1 %vm7730_vm3, %v19130_v48 }
 0x48b   : > { %14732 = vmatmul.mubr.msk.f32.gmra.mxu0 %vm7730_vm3, %v20913_v56  ;;  %v10419_v56 = vld [vmem:[#allocation2 + $0xc1] sm:$0xff] }
 0x48c   : > { %14782 = vmatmul.mubr.msk.f32.gmra.mxu1 %vm7730_vm3, %v19140_v60  ;;  %14734 = vmatprep.mubr.msk.f32.mxu0 %vm7730_vm3, %v19271_v20  ;;  %v10031_v60 = vld [vmem:[#allocation2 + $0xb0] sm:$0xff] }
 0x48d   : > { %14784 = vmatprep.mubr.msk.f32.mxu1 %vm7730_vm3, %v19277_v8 }
 0x48f   : > { %14735 = vmatmul.mubr.msk.f32.gmra.mxu0 %vm7730_vm3, %v19281_v7 }
 0x490   : > { %14785 = vmatmul.mubr.msk.f32.gmra.mxu1 %vm7730_vm3, %v19285_v29  ;;  %14789 = vmatprep.mubr.msk.f32.mxu0 %vm7730_vm3, %v10020_v38 }
 0x491   : > { %14839 = vmatprep.mubr.msk.f32.mxu1 %vm7730_vm3, %v10407_v34 }
 0x493   : > { %14790 = vmatmul.mubr.msk.f32.vlgmr.msra.gmra.mxu0 %vm7730_vm3, %v10021_v61 }
 0x494   : > { %14840 = vmatmul.mubr.msk.f32.vlgmr.msra.gmra.mxu1 %vm7730_vm3, %v10408_v57  ;;  %14888 = vmatpush3.msra.mxu0 %v19154_v45  ;;  %v10033_v57 = vld [vmem:[#allocation2 + $0xc8] sm:$0xff] }
 0x495   : > { %14792 = vmatprep.mubr.msk.f32.mxu0 %vm7730_vm3, %v10022_v3  ;;  %14842 = vmatprep.mubr.msk.f32.mxu1 %vm7730_vm3, %v10409_v33  ;;  %v14494_v58 = vpop.f32.mrf.mxu0 }
 0x496   : > { %v14544_v35 = vpop.f32.mrf.mxu1 }
 0x497   : > { %14793 = vmatmul.mubr.msk.f32.gmra.mxu0 %vm7730_vm3, %v10023_v46  ;;  %v19303_v17 = vadd.f32 %v14544_v35, %v14494_v58  ;;  %v8002_v47 = vpop.f32.mrf.mxu0  ;;  %v10420_v46 = vld [vmem:[#allocation2 + $0xc9] sm:$0xff]  ;;  %v10034_v58 = vld [vmem:[#allocation2 + $0xd8] sm:$0xff] }
 0x498   : > { %14843 = vmatmul.mubr.msk.f32.gmra.mxu1 %vm7730_vm3, %v10410_v23  ;;  %14795 = vmatprep.mubr.msk.f32.mxu0 %vm7730_vm3, %v10024_v25  ;;  %v8323_v0 = vpop.f32.mrf.mxu1  ;;  %v10421_v25 = vld [vmem:[#allocation2 + $0xd9] sm:$0xff] }
 0x499   : > { %14845 = vmatprep.mubr.msk.f32.mxu1 %vm7730_vm3, %v10411_v16  ;;  %v19306_v22 = vadd.f32 %v8323_v0, %v8002_v47  ;;  %v14497_v44 = vpop.f32.mrf.mxu0  ;;  %v10035_v0 = vld [vmem:[#allocation2 + $0xe0] sm:$0xff] }
 0x49a   : > { %v14547_v36 = vpop.f32.mrf.mxu1 }
 0x49b   : > { %14796 = vmatmul.mubr.msk.f32.gmra.mxu0 %vm7730_vm3, %v10025_v26  ;;  %v19311_v37 = vadd.f32 %v14547_v36, %v14497_v44  ;;  %v8012_v11 = vpop.f32.mrf.mxu0 }
 0x49c   : > { %14846 = vmatmul.mubr.msk.f32.gmra.mxu1 %vm7730_vm3, %v10412_v21  ;;  %14798 = vmatprep.mubr.msk.f32.mxu0 %vm7730_vm3, %v10026_v2  ;;  %v8333_v55 = vpop.f32.mrf.mxu1  ;;  %v10422_v21 = vld [vmem:[#allocation2 + $0xe1] sm:$0xff]  ;;  %v10036_v2 = vld [vmem:[#allocation2 + $0xf0] sm:$0xff] }
 0x49d   : > { %14848 = vmatprep.mubr.msk.f32.mxu1 %vm7730_vm3, %v10413_v52  ;;  %v19314_v39 = vadd.f32 %v8333_v55, %v8012_v11  ;;  %v14500_v59 = vpop.f32.mrf.mxu0  ;;  %v10423_v52 = vld [vmem:[#allocation2 + $0xf1] sm:$0xff] }
 0x49e   : > { %v14550_v63 = vpop.f32.mrf.mxu1 }
 0x49f   : > { %14799 = vmatmul.mubr.msk.f32.gmra.mxu0 %vm7730_vm3, %v10027_v30  ;;  %v19319_v53 = vadd.f32 %v14550_v63, %v14500_v59  ;;  %v8022_v13 = vpop.f32.mrf.mxu0  ;;  %v10037_v59 = vld [vmem:[#allocation2 + $0xf8] sm:$0xff] }
 0x4a0   : > { %14849 = vmatmul.mubr.msk.f32.gmra.mxu1 %vm7730_vm3, %v10414_v1  ;;  %14801 = vmatprep.mubr.msk.f32.mxu0 %vm7730_vm3, %v10028_v51  ;;  %v8343_v9 = vpop.f32.mrf.mxu1  ;;  %v10424_v63 = vld [vmem:[#allocation2 + $0xf9] sm:$0xff] }
 0x4a1   : > { %14851 = vmatprep.mubr.msk.f32.mxu1 %vm7730_vm3, %v10415_v54  ;;  %v19322_v27 = vadd.f32 %v8343_v9, %v8022_v13  ;;  %v14503_v41 = vpop.f32.mrf.mxu0  ;;  %v10038_v54 = vld [vmem:[#allocation2 + $0x108] sm:$0xff] }
 0x4a2   : > { %v14553_v12 = vpop.f32.mrf.mxu1  ;;  %v10425_v9 = vld [vmem:[#allocation2 + $0x109] sm:$0xff] }
 0x4a3   : > { %14802 = vmatmul.mubr.msk.f32.gmra.mxu0 %vm7730_vm3, %v10029_v42  ;;  %v19327_v28 = vadd.f32 %v14553_v12, %v14503_v41  ;;  %v8032_v5 = vpop.f32.mrf.mxu0 }
 0x4a4   : > { %14852 = vmatmul.mubr.msk.f32.gmra.mxu1 %vm7730_vm3, %v10416_v31  ;;  %14804 = vmatprep.mubr.msk.f32.mxu0 %vm7730_vm3, %v10030_v43  ;;  %v8353_v48 = vpop.f32.mrf.mxu1  ;;  %v10039_v43 = vld [vmem:[#allocation2 + $0x110] sm:$0xff] }
 0x4a5   : > { %14854 = vmatprep.mubr.msk.f32.mxu1 %vm7730_vm3, %v10417_v4  ;;  %v19330_v45 = vadd.f32 %v8353_v48, %v8032_v5  ;;  %v14506_v40 = vpop.f32.mrf.mxu0  ;;  %v10426_v5 = vld [vmem:[#allocation2 + $0x111] sm:$0xff] }
 0x4a6   : > { %v14556_v49 = vpop.f32.mrf.mxu1 }
 0x4a7   : > { %14805 = vmatmul.mubr.msk.f32.gmra.mxu0 %vm7730_vm3, %v10031_v60  ;;  %v19335_v38 = vadd.f32 %v14556_v49, %v14506_v40  ;;  %v8042_v34 = vpop.f32.mrf.mxu0 }
 0x4a8   : > { %14855 = vmatmul.mubr.msk.f32.gmra.mxu1 %vm7730_vm3, %v10418_v15  ;;  %14807 = vmatprep.mubr.msk.f32.mxu0 %vm7730_vm3, %v10032_v6  ;;  %v8363_v61 = vpop.f32.mrf.mxu1  ;;  %v10041_v6 = vld [vmem:[#allocation2 + $0x128] sm:$0xff] }
 0x4a9   : > { %14857 = vmatprep.mubr.msk.f32.mxu1 %vm7730_vm3, %v10419_v56  ;;  %v19338_v3 = vadd.f32 %v8363_v61, %v8042_v34  ;;  %v10428_v34 = vld [vmem:[#allocation2 + $0x129] sm:$0xff] }
 0x4aa   : > { %v14509_v33 = vpop.f32.mrf.mxu0 }
 0x4ab   : > { %14808 = vmatmul.mubr.msk.f32.gmra.mxu0 %vm7730_vm3, %v10033_v57  ;;  %v14559_v23 = vpop.f32.mrf.mxu1 }
 0x4ac   : > { %14858 = vmatmul.mubr.msk.f32.gmra.mxu1 %vm7730_vm3, %v10420_v46  ;;  %14810 = vmatprep.mubr.msk.f32.mxu0 %vm7730_vm3, %v10034_v58  ;;  %v19343_v35 = vadd.f32 %v14559_v23, %v14509_v33  ;;  %v8052_v16 = vpop.f32.mrf.mxu0  ;;  %v10043_v46 = vld [vmem:[#allocation2 + $0x140] sm:$0xff] }
 0x4ad   : > { %14860 = vmatprep.mubr.msk.f32.mxu1 %vm7730_vm3, %v10421_v25  ;;  %v8373_v47 = vpop.f32.mrf.mxu1  ;;  %v10430_v25 = vld [vmem:[#allocation2 + $0x141] sm:$0xff] }
 0x4ae   : > { %v19346_v26 = vadd.f32 %v8373_v47, %v8052_v16  ;;  %v14512_v44 = vpop.f32.mrf.mxu0  ;;  %v10044_v16 = vld [vmem:[#allocation2 + $0x150] sm:$0xff] }
 0x4af   : > { %14811 = vmatmul.mubr.msk.f32.gmra.mxu0 %vm7730_vm3, %v10035_v0  ;;  %v14562_v36 = vpop.f32.mrf.mxu1 }
 0x4b0   : > { %14861 = vmatmul.mubr.msk.f32.gmra.mxu1 %vm7730_vm3, %v10422_v21  ;;  %14813 = vmatprep.mubr.msk.f32.mxu0 %vm7730_vm3, %v10036_v2  ;;  %v19351_v11 = vadd.f32 %v14562_v36, %v14512_v44  ;;  %v8062_v55 = vpop.f32.mrf.mxu0  ;;  %v10045_v2 = vld [vmem:[#allocation2 + $0x158] sm:$0xff] }
 0x4b1   : > { %14863 = vmatprep.mubr.msk.f32.mxu1 %vm7730_vm3, %v10423_v52  ;;  %v8383_v30 = vpop.f32.mrf.mxu1 }
 0x4b2   : > { %v19354_v1 = vadd.f32 %v8383_v30, %v8062_v55  ;;  %v14515_v51 = vpop.f32.mrf.mxu0  ;;  %v10432_v55 = vld [vmem:[#allocation2 + $0x159] sm:$0xff]  ;;  %v10046_v30 = vld [vmem:[#allocation2 + $0x168] sm:$0xff] }
 0x4b3   : > { %14814 = vmatmul.mubr.msk.f32.gmra.mxu0 %vm7730_vm3, %v10037_v59  ;;  %v14565_v13 = vpop.f32.mrf.mxu1 }
 0x4b4   : > { %14864 = vmatmul.mubr.msk.f32.gmra.mxu1 %vm7730_vm3, %v10424_v63  ;;  %14816 = vmatprep.mubr.msk.f32.mxu0 %vm7730_vm3, %v10038_v54  ;;  %v19359_v42 = vadd.f32 %v14565_v13, %v14515_v51  ;;  %v8072_v41 = vpop.f32.mrf.mxu0  ;;  %v10433_v51 = vld [vmem:[#allocation2 + $0x169] sm:$0xff] }
 0x4b5   : > { %14866 = vmatprep.mubr.msk.f32.mxu1 %vm7730_vm3, %v10425_v9  ;;  %v8393_v31 = vpop.f32.mrf.mxu1  ;;  %v10047_v9 = vld [vmem:[#allocation2 + $0x170] sm:$0xff] }
 0x4b6   : > { %v19362_v12 = vadd.f32 %v8393_v31, %v8072_v41 }
 0x4b7   : > { %v14518_v4 = vpop.f32.mrf.mxu0  ;;  %14817 = vmatmul.mubr.msk.f32.gmra.mxu0 %vm7730_vm3, %v10039_v43  ;;  %v10434_v43 = vld [vmem:[#allocation2 + $0x171] sm:$0xff] }
 0x4b8   : > { %v14568_v48 = vpop.f32.mrf.mxu1  ;;  %14867 = vmatmul.mubr.msk.f32.gmra.mxu1 %vm7730_vm3, %v10426_v5  ;;  %14819 = vmatprep.mubr.msk.f32.mxu0 %vm7730_vm3, %v18874_v10  ;;  %v10429_v10 = vld [vmem:[#allocation2 + $0x139] sm:$0xff] }
 0x4b9   : > { %v19368_v60 = vadd.f32 %v14568_v48, %v14518_v4  ;;  %14869 = vmatprep.mubr.msk.f32.mxu1 %vm7730_vm3, %v18872_v50  ;;  %v8082_v40 = vpop.f32.mrf.mxu0 }
 0x4ba   : > { %v8403_v15 = vpop.f32.mrf.mxu1 }
 0x4bb   : > { %v19372_v49 = vadd.f32 %v8403_v15, %v8082_v40  ;;  %v14521_v56 = vpop.f32.mrf.mxu0  ;;  %14820 = vmatmul.mubr.msk.f32.gmra.mxu0 %vm7730_vm3, %v10041_v6  ;;  %v10050_v40 = vld [vmem:[#allocation2 + $0x198] sm:$0xff] }
 0x4bc   : > { %v14571_v61 = vpop.f32.mrf.mxu1  ;;  %14870 = vmatmul.mubr.msk.f32.gmra.mxu1 %vm7730_vm3, %v10428_v34  ;;  %14822 = vmatprep.mubr.msk.f32.mxu0 %vm7730_vm3, %v18898_v14  ;;  %v10431_v14 = vld [vmem:[#allocation2 + $0x151] sm:$0xff]  ;;  %v10437_v6 = vld [vmem:[#allocation2 + $0x199] sm:$0xff] }
 0x4bd   : > { %v19378_v57 = vadd.f32 %v14571_v61, %v14521_v56  ;;  %14872 = vmatprep.mubr.msk.f32.mxu1 %vm7730_vm3, %v10429_v10  ;;  %v8092_v50 = vpop.f32.mrf.mxu0 }
 0x4be   : > { %v8413_v33 = vpop.f32.mrf.mxu1 }
 0x4bf   : > { %v19381_v58 = vadd.f32 %v8413_v33, %v8092_v50  ;;  %v14524_v23 = vpop.f32.mrf.mxu0  ;;  %14823 = vmatmul.mubr.msk.f32.gmra.mxu0 %vm7730_vm3, %v10043_v46  ;;  %v10438_v50 = vld [vmem:[#allocation2 + $0x1a1] sm:$0xff] }
 0x4c0   : > { %v14574_v47 = vpop.f32.mrf.mxu1  ;;  %14873 = vmatmul.mubr.msk.f32.gmra.mxu1 %vm7730_vm3, %v10430_v25  ;;  %14825 = vmatprep.mubr.msk.f32.mxu0 %vm7730_vm3, %v10044_v16 }
 0x4c1   : > { %v19386_v0 = vadd.f32 %v14574_v47, %v14524_v23  ;;  %14875 = vmatprep.mubr.msk.f32.mxu1 %vm7730_vm3, %v10431_v14  ;;  %v8102_v44 = vpop.f32.mrf.mxu0  ;;  %v10795_v14 = vld [vmem:[#allocation2 + $0x3a] sm:$0xff] }
 0x4c2   : > { %v8423_v21 = vpop.f32.mrf.mxu1 }
 0x4c3   : > { %v19389_v36 = vadd.f32 %v8423_v21, %v8102_v44  ;;  %v14527_v52 = vpop.f32.mrf.mxu0  ;;  %14826 = vmatmul.mubr.msk.f32.gmra.mxu0 %vm7730_vm3, %v10045_v2  ;;  %v10796_v2 = vld [vmem:[#allocation2 + $0x4a] sm:$0xff] }
 0x4c4   : > { %v14577_v59 = vpop.f32.mrf.mxu1  ;;  %14876 = vmatmul.mubr.msk.f32.gmra.mxu1 %vm7730_vm3, %v10432_v55  ;;  %14828 = vmatprep.mubr.msk.f32.mxu0 %vm7730_vm3, %v10046_v30 }
 0x4c5   : > { %v19394_v63 = vadd.f32 %v14577_v59, %v14527_v52  ;;  %14878 = vmatprep.mubr.msk.f32.mxu1 %vm7730_vm3, %v10433_v51  ;;  %v8112_v54 = vpop.f32.mrf.mxu0  ;;  %v8314_v52 = vadd.f32 %v19298_v24, %v19294_v19 }
 0x4c6   : > { %v8433_v13 = vpop.f32.mrf.mxu1 }
 0x4c7   : > { %v19397_v41 = vadd.f32 %v8433_v13, %v8112_v54  ;;  %v14530_v31 = vpop.f32.mrf.mxu0  ;;  %14829 = vmatmul.mubr.msk.f32.gmra.mxu0 %vm7730_vm3, %v10047_v9  ;;  %v10797_v9 = vld [vmem:[#allocation2 + $0x52] sm:$0xff] }
 0x4c8   : > { %v14580_v4 = vpop.f32.mrf.mxu1  ;;  %14879 = vmatmul.mubr.msk.f32.gmra.mxu1 %vm7730_vm3, %v10434_v43  ;;  %14831 = vmatprep.mubr.msk.f32.mxu0 %vm7730_vm3, %v19136_v32  ;;  %v10051_v32 = vld [vmem:[#allocation2 + $0x1a0] sm:$0xff] }
 0x4c9   : > { %v19403_v5 = vadd.f32 %v14580_v4, %v14530_v31  ;;  %14881 = vmatprep.mubr.msk.f32.mxu1 %vm7730_vm3, %v19271_v20  ;;  %v8122_v48 = vpop.f32.mrf.mxu0  ;;  %v10798_v43 = vld [vmem:[#allocation2 + $0x62] sm:$0xff] }
 0x4ca   : > { %v8443_v15 = vpop.f32.mrf.mxu1 }
 0x4cb   : > { %v19407_v56 = vadd.f32 %v8443_v15, %v8122_v48  ;;  %v14533_v34 = vpop.f32.mrf.mxu0  ;;  %14832 = vmatmul.mubr.msk.f32.gmra.mxu0 %vm7730_vm3, %v19144_v18  ;;  %v10794_v18 = vld [vmem:[#allocation2 + $0x32] sm:$0xff] }
 0x4cc   : > { %v14583_v61 = vpop.f32.mrf.mxu1  ;;  %14882 = vmatmul.mubr.msk.f32.gmra.mxu1 %vm7730_vm3, %v19281_v7  ;;  %14834 = vmatprep.mubr.msk.f32.mxu0 %vm7730_vm3, %v10050_v40 }
 0x4cd   : > { %v19414_v10 = vadd.f32 %v14583_v61, %v14533_v34  ;;  %v8132_v20 = vpop.f32.mrf.mxu0  ;;  %14884 = vmatprep.mubr.msk.f32.mxu1 %vm7730_vm3, %v10437_v6  ;;  %v10799_v6 = vld [vmem:[#allocation2 + $0x6a] sm:$0xff]  ;;  %v10800_v61 = vld [vmem:[#allocation2 + $0x7a] sm:$0xff] }
 0x4ce   : > { %v8453_v33 = vpop.f32.mrf.mxu1 }
 0x4cf   : > { %v19417_v46 = vadd.f32 %v8453_v33, %v8132_v20  ;;  %v14536_v23 = vpop.f32.mrf.mxu0  ;;  %14835 = vmatmul.mubr.msk.f32.gmra.mxu0 %vm7730_vm3, %v10051_v32 }
 0x4d0   : > { %v14586_v25 = vpop.f32.mrf.mxu1  ;;  %14889 = vmatprep.mubr.msk.f32.mxu0 %vm7730_vm3, %v10794_v18  ;;  %14885 = vmatmul.mubr.msk.f32.gmra.mxu1 %vm7730_vm3, %v10438_v50 }
 0x4d1   : > { %v19422_v7 = vadd.f32 %v14586_v25, %v14536_v23  ;;  %v8142_v16 = vpop.f32.mrf.mxu0 }
 0x4d2   : > { %v8463_v47 = vpop.f32.mrf.mxu1 }
 0x4d3   : > { %v19424_v44 = vadd.f32 %v8463_v47, %v8142_v16  ;;  %v14591_v21 = vpop.f32.mrf.mxu0  ;;  %14890 = vmatmul.mubr.msk.f32.vlgmr.msra.gmra.mxu0 %vm7730_vm3, %v10795_v14  ;;  %v10802_v16 = vld [vmem:[#allocation2 + $0x92] sm:$0xff] }
 0x4d4   : > { %v8828_v55 = vadd.f32 %v14591_v21, %v18965_v62  ;;  %v14641_v30 = vpop.f32.mrf.mxu1  ;;  %14892 = vmatprep.mubr.msk.f32.mxu0 %vm7730_vm3, %v10796_v2 }
 0x4d5   : > { %v8668_v59 = vpop.f32.mrf.mxu0 }
 0x4d6   : > { %v19431_v51 = vadd.f32 %v14641_v30, %v8828_v55  ;;  %v8827_v54 = vadd.f32 %v8668_v59, %v8314_v52  ;;  %v9055_v13 = vpop.f32.mrf.mxu1  ;;  %v10804_v59 = vld [vmem:[#allocation2 + $0xaa] sm:$0xff] }
 0x4d7   : > { %v14594_v31 = vpop.f32.mrf.mxu0  ;;  %14893 = vmatmul.mubr.msk.f32.gmra.mxu0 %vm7730_vm3, %v10797_v9 }
 0x4d8   : > { %v19434_v4 = vadd.f32 %v9055_v13, %v8827_v54  ;;  %v8830_v48 = vadd.f32 %v14594_v31, %v19303_v17  ;;  %v14644_v19 = vpop.f32.mrf.mxu1  ;;  %14895 = vmatprep.mubr.msk.f32.mxu0 %vm7730_vm3, %v10798_v43 }
 0x4d9   : > { %v8678_v62 = vpop.f32.mrf.mxu0 }
 0x4da   : > { %v19438_v24 = vadd.f32 %v14644_v19, %v8830_v48  ;;  %v8829_v40 = vadd.f32 %v8678_v62, %v19306_v22  ;;  %v9065_v15 = vpop.f32.mrf.mxu1  ;;  %v10801_v22 = vld [vmem:[#allocation2 + $0x82] sm:$0xff] }
 0x4db   : > { %v14597_v34 = vpop.f32.mrf.mxu0  ;;  %14896 = vmatmul.mubr.msk.f32.gmra.mxu0 %vm7730_vm3, %v10799_v6  ;;  %v10806_v62 = vld [vmem:[#allocation2 + $0xc2] sm:$0xff] }
 0x4dc   : > { %v19442_v32 = vadd.f32 %v9065_v15, %v8829_v40  ;;  %v8832_v20 = vadd.f32 %v14597_v34, %v19311_v37  ;;  %v14647_v50 = vpop.f32.mrf.mxu1  ;;  %14898 = vmatprep.mubr.msk.f32.mxu0 %vm7730_vm3, %v10800_v61 }
 0x4dd   : > { %v8688_v17 = vpop.f32.mrf.mxu0 }
 0x4de   : > { %v19446_v33 = vadd.f32 %v14647_v50, %v8832_v20  ;;  %v8831_v23 = vadd.f32 %v8688_v17, %v19314_v39  ;;  %v9075_v18 = vpop.f32.mrf.mxu1  ;;  %v10803_v39 = vld [vmem:[#allocation2 + $0x9a] sm:$0xff] }
 0x4df   : > { %v14600_v25 = vpop.f32.mrf.mxu0  ;;  %14899 = vmatmul.mubr.msk.f32.gmra.mxu0 %vm7730_vm3, %v10801_v22  ;;  %v10808_v17 = vld [vmem:[#allocation2 + $0xda] sm:$0xff] }
 0x4e0   : > { %v19450_v47 = vadd.f32 %v9075_v18, %v8831_v23  ;;  %v8834_v14 = vadd.f32 %v14600_v25, %v19319_v53  ;;  %v14650_v21 = vpop.f32.mrf.mxu1  ;;  %14901 = vmatprep.mubr.msk.f32.mxu0 %vm7730_vm3, %v10802_v16 }
 0x4e1   : > { %v8698_v37 = vpop.f32.mrf.mxu0 }
 0x4e2   : > { %v19454_v2 = vadd.f32 %v14650_v21, %v8834_v14  ;;  %v8833_v52 = vadd.f32 %v8698_v37, %v19322_v27  ;;  %v9085_v55 = vpop.f32.mrf.mxu1  ;;  %v10805_v27 = vld [vmem:[#allocation2 + $0xb2] sm:$0xff] }
 0x4e3   : > { %v14603_v30 = vpop.f32.mrf.mxu0  ;;  %14902 = vmatmul.mubr.msk.f32.gmra.mxu0 %vm7730_vm3, %v10803_v39  ;;  %v10810_v37 = vld [vmem:[#allocation2 + $0xf2] sm:$0xff] }
 0x4e4   : > { %v19458_v54 = vadd.f32 %v9085_v55, %v8833_v52  ;;  %v8836_v13 = vadd.f32 %v14603_v30, %v19327_v28  ;;  %v14653_v9 = vpop.f32.mrf.mxu1  ;;  %14904 = vmatprep.mubr.msk.f32.mxu0 %vm7730_vm3, %v10804_v59 }
 0x4e5   : > { %v8708_v53 = vpop.f32.mrf.mxu0 }
 0x4e6   : > { %v19462_v31 = vadd.f32 %v14653_v9, %v8836_v13  ;;  %v8835_v43 = vadd.f32 %v8708_v53, %v19330_v45  ;;  %v9095_v48 = vpop.f32.mrf.mxu1  ;;  %v10807_v45 = vld [vmem:[#allocation2 + $0xca] sm:$0xff] }
 0x4e7   : > { %v14606_v19 = vpop.f32.mrf.mxu0  ;;  %14905 = vmatmul.mubr.msk.f32.gmra.mxu0 %vm7730_vm3, %v10805_v27  ;;  %v10812_v53 = vld [vmem:[#allocation2 + $0x10a] sm:$0xff] }
 0x4e8   : > { %v19466_v40 = vadd.f32 %v9095_v48, %v8835_v43  ;;  %v8838_v15 = vadd.f32 %v14606_v19, %v19335_v38  ;;  %v14656_v6 = vpop.f32.mrf.mxu1  ;;  %14907 = vmatprep.mubr.msk.f32.mxu0 %vm7730_vm3, %v10806_v62 }
 0x4e9   : > { %v8718_v28 = vpop.f32.mrf.mxu0 }
 0x4ea   : > { %v19470_v34 = vadd.f32 %v14656_v6, %v8838_v15  ;;  %v8837_v61 = vadd.f32 %v8718_v28, %v19338_v3  ;;  %v9105_v20 = vpop.f32.mrf.mxu1  ;;  %v10809_v3 = vld [vmem:[#allocation2 + $0xe2] sm:$0xff] }
 0x4eb   : > { %v14609_v50 = vpop.f32.mrf.mxu0  ;;  %14908 = vmatmul.mubr.msk.f32.gmra.mxu0 %vm7730_vm3, %v10807_v45  ;;  %v10814_v28 = vld [vmem:[#allocation2 + $0x122] sm:$0xff] }
 0x4ec   : > { %v19474_v23 = vadd.f32 %v9105_v20, %v8837_v61  ;;  %v8840_v18 = vadd.f32 %v14609_v50, %v19343_v35  ;;  %v14659_v22 = vpop.f32.mrf.mxu1  ;;  %14910 = vmatprep.mubr.msk.f32.mxu0 %vm7730_vm3, %v10808_v17 }
 0x4ed   : > { %v8728_v38 = vpop.f32.mrf.mxu0 }
 0x4ee   : > { %v19478_v25 = vadd.f32 %v14659_v22, %v8840_v18  ;;  %v8839_v16 = vadd.f32 %v8728_v38, %v19346_v26  ;;  %v9115_v14 = vpop.f32.mrf.mxu1  ;;  %v10811_v26 = vld [vmem:[#allocation2 + $0xfa] sm:$0xff] }
 0x4ef   : > { %v14612_v21 = vpop.f32.mrf.mxu0  ;;  %14911 = vmatmul.mubr.msk.f32.gmra.mxu0 %vm7730_vm3, %v10809_v3  ;;  %v10816_v38 = vld [vmem:[#allocation2 + $0x13a] sm:$0xff] }
 0x4f0   : > { %v19482_v52 = vadd.f32 %v9115_v14, %v8839_v16  ;;  %v8842_v55 = vadd.f32 %v14612_v21, %v19351_v11  ;;  %v14662_v39 = vpop.f32.mrf.mxu1  ;;  %14913 = vmatprep.mubr.msk.f32.mxu0 %vm7730_vm3, %v10810_v37 }
 0x4f1   : > { %v8738_v35 = vpop.f32.mrf.mxu0 }
 0x4f2   : > { %v19486_v30 = vadd.f32 %v14662_v39, %v8842_v55  ;;  %v8841_v59 = vadd.f32 %v8738_v35, %v19354_v1  ;;  %v9125_v13 = vpop.f32.mrf.mxu1  ;;  %v10813_v1 = vld [vmem:[#allocation2 + $0x112] sm:$0xff] }
 0x4f3   : > { %v14615_v9 = vpop.f32.mrf.mxu0  ;;  %14914 = vmatmul.mubr.msk.f32.gmra.mxu0 %vm7730_vm3, %v10811_v26  ;;  %v10818_v35 = vld [vmem:[#allocation2 + $0x152] sm:$0xff] }
 0x4f4   : > { %v19490_v43 = vadd.f32 %v9125_v13, %v8841_v59  ;;  %v8844_v48 = vadd.f32 %v14615_v9, %v19359_v42  ;;  %v14665_v27 = vpop.f32.mrf.mxu1  ;;  %14916 = vmatprep.mubr.msk.f32.mxu0 %vm7730_vm3, %v10812_v53 }
 0x4f5   : > { %v8748_v11 = vpop.f32.mrf.mxu0 }
 0x4f6   : > { %v19494_v19 = vadd.f32 %v14665_v27, %v8844_v48  ;;  %v8843_v62 = vadd.f32 %v8748_v11, %v19362_v12  ;;  %v9135_v15 = vpop.f32.mrf.mxu1  ;;  %v10815_v12 = vld [vmem:[#allocation2 + $0x12a] sm:$0xff] }
 0x4f7   : > { %v14618_v6 = vpop.f32.mrf.mxu0  ;;  %14917 = vmatmul.mubr.msk.f32.gmra.mxu0 %vm7730_vm3, %v10813_v1  ;;  %v10820_v11 = vld [vmem:[#allocation2 + $0x16a] sm:$0xff] }
 0x4f8   : > { %v19498_v61 = vadd.f32 %v9135_v15, %v8843_v62  ;;  %v8846_v20 = vadd.f32 %v14618_v6, %v19368_v60  ;;  %v14668_v45 = vpop.f32.mrf.mxu1  ;;  %14919 = vmatprep.mubr.msk.f32.mxu0 %vm7730_vm3, %v10814_v28 }
 0x4f9   : > { %v8758_v42 = vpop.f32.mrf.mxu0 }
 0x4fa   : > { %v19502_v50 = vadd.f32 %v14668_v45, %v8846_v20  ;;  %v8845_v17 = vadd.f32 %v8758_v42, %v19372_v49  ;;  %v9145_v18 = vpop.f32.mrf.mxu1  ;;  %v10817_v49 = vld [vmem:[#allocation2 + $0x142] sm:$0xff] }
 0x4fb   : > { %v14621_v22 = vpop.f32.mrf.mxu0  ;;  %14920 = vmatmul.mubr.msk.f32.gmra.mxu0 %vm7730_vm3, %v10815_v12  ;;  %v10824_v12 = vld [vmem:[#allocation2 + $0x19a] sm:$0xff] }
 0x4fc   : > { %v19506_v16 = vadd.f32 %v9145_v18, %v8845_v17  ;;  %v8848_v14 = vadd.f32 %v14621_v22, %v19378_v57  ;;  %v14671_v3 = vpop.f32.mrf.mxu1  ;;  %14922 = vmatprep.mubr.msk.f32.mxu0 %vm7730_vm3, %v10816_v38 }
 0x4fd   : > { %v8768_v60 = vpop.f32.mrf.mxu0 }
 0x4fe   : > { %v19510_v21 = vadd.f32 %v14671_v3, %v8848_v14  ;;  %v8847_v37 = vadd.f32 %v8768_v60, %v19381_v58  ;;  %v9155_v55 = vpop.f32.mrf.mxu1  ;;  %v10819_v58 = vld [vmem:[#allocation2 + $0x15a] sm:$0xff] }
 0x4ff   : > { %v14624_v39 = vpop.f32.mrf.mxu0  ;;  %14923 = vmatmul.mubr.msk.f32.gmra.mxu0 %vm7730_vm3, %v10817_v49 }
 0x500   : > { %v19514_v59 = vadd.f32 %v9155_v55, %v8847_v37  ;;  %v8850_v13 = vadd.f32 %v14624_v39, %v19386_v0  ;;  %v14674_v26 = vpop.f32.mrf.mxu1  ;;  %14925 = vmatprep.mubr.msk.f32.mxu0 %vm7730_vm3, %v10818_v35  ;;  %v10825_v37 = vld [vmem:[#allocation2 + $0x1a2] sm:$0xff] }
 0x501   : > { %v8778_v57 = vpop.f32.mrf.mxu0 }
 0x502   : > { %v19518_v9 = vadd.f32 %v14674_v26, %v8850_v13  ;;  %v8849_v53 = vadd.f32 %v8778_v57, %v19389_v36  ;;  %v9165_v48 = vpop.f32.mrf.mxu1  ;;  %v10821_v36 = vld [vmem:[#allocation2 + $0x172] sm:$0xff] }
 0x503   : > { %v14627_v27 = vpop.f32.mrf.mxu0  ;;  %14926 = vmatmul.mubr.msk.f32.gmra.mxu0 %vm7730_vm3, %v10819_v58 }
 0x504   : > { %v19522_v62 = vadd.f32 %v9165_v48, %v8849_v53  ;;  %v8852_v15 = vadd.f32 %v14627_v27, %v19394_v63  ;;  %v14677_v1 = vpop.f32.mrf.mxu1  ;;  %14928 = vmatprep.mubr.msk.f32.mxu0 %vm7730_vm3, %v10820_v11 }
 0x505   : > { %v8788_v0 = vpop.f32.mrf.mxu0 }
 0x506   : > { %v19526_v6 = vadd.f32 %v14677_v1, %v8852_v15  ;;  %v8851_v28 = vadd.f32 %v8788_v0, %v19397_v41  ;;  %v9175_v20 = vpop.f32.mrf.mxu1 }
 0x507   : > { %v14630_v45 = vpop.f32.mrf.mxu0  ;;  %14929 = vmatmul.mubr.msk.f32.gmra.mxu0 %vm7730_vm3, %v10821_v36 }
 0x508   : > { %v19530_v42 = vadd.f32 %v9175_v20, %v8851_v28  ;;  %v8854_v17 = vadd.f32 %v14630_v45, %v19403_v5  ;;  %v14680_v18 = vpop.f32.mrf.mxu1  ;;  %14931 = vmatprep.mubr.msk.f32.mxu0 %vm7730_vm3, %v19277_v8 }
 0x509   : > { %v8798_v63 = vpop.f32.mrf.mxu0 }
 0x50a   : > { %v19535_v22 = vadd.f32 %v14680_v18, %v8854_v17  ;;  %v8853_v38 = vadd.f32 %v8798_v63, %v19407_v56  ;;  %v9185_v41 = vpop.f32.mrf.mxu1 }
 0x50b   : > { %v14633_v14 = vpop.f32.mrf.mxu0  ;;  %14932 = vmatmul.mubr.msk.f32.gmra.mxu0 %vm7730_vm3, %v19285_v29 }
 0x50c   : > { %v19540_v3 = vadd.f32 %v9185_v41, %v8853_v38  ;;  %v8856_v60 = vadd.f32 %v14633_v14, %v19414_v10  ;;  %v14683_v5 = vpop.f32.mrf.mxu1  ;;  %14934 = vmatprep.mubr.msk.f32.mxu0 %vm7730_vm3, %v10824_v12 }
 0x50d   : > { %v8808_v8 = vpop.f32.mrf.mxu0 }
 0x50e   : > { %v19544_v55 = vadd.f32 %v14683_v5, %v8856_v60  ;;  %v8855_v49 = vadd.f32 %v8808_v8, %v19417_v46  ;;  %v9195_v39 = vpop.f32.mrf.mxu1 }
 0x50f   : > { %v14636_v56 = vpop.f32.mrf.mxu0  ;;  %14935 = vmatmul.mubr.msk.f32.gmra.mxu0 %vm7730_vm3, %v10825_v37 }
 0x510   : > { %v19548_v35 = vadd.f32 %v9195_v39, %v8855_v49  ;;  %v8858_v29 = vadd.f32 %v14636_v56, %v19422_v7  ;;  %v14686_v13 = vpop.f32.mrf.mxu1 }
 0x511   : > { %v8818_v26 = vpop.f32.mrf.mxu0 }
 0x512   : > { %v19551_v10 = vadd.f32 %v14686_v13, %v8858_v29  ;;  %v8857_v57 = vadd.f32 %v8818_v26, %v19424_v44  ;;  %v9205_v53 = vpop.f32.mrf.mxu1 }
 0x513   : > { %v14691_v48 = vpop.f32.mrf.mxu0 }
 0x514   : > { %v19554_v58 = vadd.f32 %v9205_v53, %v8857_v57  ;;  %v19557_v46 = vadd.f32 %v14691_v48, %v19431_v51  ;;  %v19559_v27 = vpop.f32.mrf.mxu1 }
 0x515   : > { %v9442_v11 = vpop.f32.mrf.mxu0 }
 0x516   : > { %v19562_v15 = vadd.f32 %v9442_v11, %v19434_v4  ;;  %v19564_v7 = vpop.f32.mrf.mxu1 }
 0x517   : > { %v14694_v1 = vpop.f32.mrf.mxu0 }
 0x518   : > { %v19567_v0 = vadd.f32 %v14694_v1, %v19438_v24  ;;  %v19569_v44 = vpop.f32.mrf.mxu1 }
 0x519   : > { %v9452_v28 = vpop.f32.mrf.mxu0 }
 0x51a   : > { %v19572_v20 = vadd.f32 %v9452_v28, %v19442_v32  ;;  %v19574_v51 = vpop.f32.mrf.mxu1 }
 0x51b   : > { %v14697_v36 = vpop.f32.mrf.mxu0 }
 0x51c   : > { %v19577_v45 = vadd.f32 %v14697_v36, %v19446_v33  ;;  %v19579_v4 = vpop.f32.mrf.mxu1 }
 0x51d   : > { %v9462_v17 = vpop.f32.mrf.mxu0 }
 0x51e   : > { %v19582_v18 = vadd.f32 %v9462_v17, %v19450_v47  ;;  %v19584_v24 = vpop.f32.mrf.mxu1 }
 0x51f   : > { %v14700_v63 = vpop.f32.mrf.mxu0 }
 0x520   : > { %v19587_v12 = vadd.f32 %v14700_v63, %v19454_v2  ;;  %v19589_v32 = vpop.f32.mrf.mxu1 }
 0x521   : > { %v9472_v38 = vpop.f32.mrf.mxu0 }
 0x522   : > { %v19592_v41 = vadd.f32 %v9472_v38, %v19458_v54  ;;  %v19594_v33 = vpop.f32.mrf.mxu1 }
 0x523   : > { %v14703_v14 = vpop.f32.mrf.mxu0 }
 0x524   : > { %v19597_v60 = vadd.f32 %v14703_v14, %v19462_v31  ;;  %v19599_v47 = vpop.f32.mrf.mxu1 }
 0x525   : > { %v9482_v5 = vpop.f32.mrf.mxu0 }
 0x526   : > { %v19602_v37 = vadd.f32 %v9482_v5, %v19466_v40  ;;  %v19604_v2 = vpop.f32.mrf.mxu1 }
 0x527   : > { %v14706_v8 = vpop.f32.mrf.mxu0 }
 0x528   : > { %v19607_v49 = vadd.f32 %v14706_v8, %v19470_v34  ;;  %v19609_v54 = vpop.f32.mrf.mxu1 }
 0x529   : > { %v9492_v39 = vpop.f32.mrf.mxu0 }
 0x52a   : > { %v19612_v56 = vadd.f32 %v9492_v39, %v19474_v23  ;;  %v19614_v31 = vpop.f32.mrf.mxu1 }
 0x52b   : > { %v14709_v29 = vpop.f32.mrf.mxu0 }
 0x52c   : > { %v19617_v13 = vadd.f32 %v14709_v29, %v19478_v25  ;;  %v19619_v40 = vpop.f32.mrf.mxu1 }
 0x52d   : > { %v9502_v26 = vpop.f32.mrf.mxu0 }
 0x52e   : > { %v19622_v57 = vadd.f32 %v9502_v26, %v19482_v52  ;;  %v19624_v34 = vpop.f32.mrf.mxu1 }
 0x52f   : > { %v14712_v53 = vpop.f32.mrf.mxu0 }
 0x530   : > { %v19627_v48 = vadd.f32 %v14712_v53, %v19486_v30  ;;  %v19629_v23 = vpop.f32.mrf.mxu1 }
 0x531   : > { %20914 = vst [vmem:[#allocation33_spill] sm:$0xff] %v19629_v23  ;;  %v9512_v11 = vpop.f32.mrf.mxu0 }
 0x532   : > { %v19632_v1 = vadd.f32 %v9512_v11, %v19490_v43  ;;  %v19634_v25 = vpop.f32.mrf.mxu1 }
 0x533   : > { %20916 = vst [vmem:[#allocation11_spill] sm:$0xff] %v19634_v25  ;;  %v14715_v28 = vpop.f32.mrf.mxu0 }
 0x534   : > { %20915 = vst [vmem:[#allocation79_spill] sm:$0xff] %v19632_v1  ;;  %v19637_v36 = vadd.f32 %v14715_v28, %v19494_v19  ;;  %v19639_v52 = vpop.f32.mrf.mxu1 }
 0x535   : > { %20918 = vst [vmem:[#allocation83_spill] sm:$0xff] %v19639_v52  ;;  %v9522_v17 = vpop.f32.mrf.mxu0 }
 0x536   : > { %20917 = vst [vmem:[#allocation36_spill] sm:$0xff] %v19637_v36  ;;  %v19642_v63 = vadd.f32 %v9522_v17, %v19498_v61  ;;  %v19644_v30 = vpop.f32.mrf.mxu1 }
 0x537   : > { %20920 = vst [vmem:[#allocation76_spill] sm:$0xff] %v19644_v30  ;;  %v14718_v38 = vpop.f32.mrf.mxu0 }
 0x538   : > { %20919 = vst [vmem:[#allocation87_spill] sm:$0xff] %v19642_v63  ;;  %v19647_v14 = vadd.f32 %v14718_v38, %v19502_v50  ;;  %v19649_v43 = vpop.f32.mrf.mxu1 }
 0x539   : > { %20922 = vst [vmem:[#allocation85_spill] sm:$0xff] %v19649_v43  ;;  %v9532_v5 = vpop.f32.mrf.mxu0 }
 0x53a   : > { %20921 = vst [vmem:[#allocation37_spill] sm:$0xff] %v19647_v14  ;;  %v19652_v8 = vadd.f32 %v9532_v5, %v19506_v16  ;;  %v19654_v19 = vpop.f32.mrf.mxu1 }
 0x53b   : > { %20924 = vst [vmem:[#allocation82_spill] sm:$0xff] %v19654_v19  ;;  %v14721_v39 = vpop.f32.mrf.mxu0 }
 0x53c   : > { %20923 = vst [vmem:[#allocation80_spill] sm:$0xff] %v19652_v8  ;;  %v19657_v29 = vadd.f32 %v14721_v39, %v19510_v21  ;;  %v19659_v61 = vpop.f32.mrf.mxu1 }
 0x53d   : > { %20926 = vst [vmem:[#allocation42_spill] sm:$0xff] %v19659_v61  ;;  %v9542_v26 = vpop.f32.mrf.mxu0 }
 0x53e   : > { %20925 = vst [vmem:[#allocation84_spill] sm:$0xff] %v19657_v29  ;;  %v19662_v53 = vadd.f32 %v9542_v26, %v19514_v59  ;;  %v19664_v50 = vpop.f32.mrf.mxu1 }
 0x53f   : > { %20928 = vst [vmem:[#allocation43_spill] sm:$0xff] %v19664_v50  ;;  %v14724_v11 = vpop.f32.mrf.mxu0 }
 0x540   : > { %20927 = vst [vmem:[#allocation40_spill] sm:$0xff] %v19662_v53  ;;  %v19667_v28 = vadd.f32 %v14724_v11, %v19518_v9  ;;  %v19669_v16 = vpop.f32.mrf.mxu1 }
 0x541   : > { %20930 = vst [vmem:[#allocation41_spill] sm:$0xff] %v19669_v16  ;;  %v9552_v17 = vpop.f32.mrf.mxu0 }
 0x542   : > { %20929 = vst [vmem:[#allocation111_spill] sm:$0xff] %v19667_v28  ;;  %v19672_v38 = vadd.f32 %v9552_v17, %v19522_v62  ;;  %v19674_v21 = vpop.f32.mrf.mxu1 }
 0x543   : > { %20932 = vst [vmem:[#allocation88_spill] sm:$0xff] %v19674_v21  ;;  %v14727_v5 = vpop.f32.mrf.mxu0 }
 0x544   : > { %20931 = vst [vmem:[#allocation86_spill] sm:$0xff] %v19672_v38  ;;  %v19677_v39 = vadd.f32 %v14727_v5, %v19526_v6  ;;  %v19679_v59 = vpop.f32.mrf.mxu1 }
 0x545   : > { %20934 = vst [vmem:[#allocation112_spill] sm:$0xff] %v19679_v59  ;;  %v9562_v26 = vpop.f32.mrf.mxu0 }
 0x546   : > { %20933 = vst [vmem:[#allocation115_spill] sm:$0xff] %v19677_v39  ;;  %v19682_v50 = vadd.f32 %v9562_v26, %v19530_v42  ;;  %v19684_v9 = vpop.f32.mrf.mxu1 }
 0x547   : > { %20936 = vst [vmem:[#allocation52_spill] sm:$0xff] %v19684_v9  ;;  %v14730_v11 = vpop.f32.mrf.mxu0 }
 0x548   : > { %20935 = vst [vmem:[#allocation45_spill] sm:$0xff] %v19682_v50  ;;  %v19687_v16 = vadd.f32 %v14730_v11, %v19535_v22  ;;  %v19689_v62 = vpop.f32.mrf.mxu1 }
 0x549   : > { %20938 = vst [vmem:[#allocation113_spill] sm:$0xff] %v19689_v62  ;;  %v9572_v17 = vpop.f32.mrf.mxu0 }
 0x54a   : > { %20937 = vst [vmem:[#allocation118_spill] sm:$0xff] %v19687_v16  ;;  %v19692_v21 = vadd.f32 %v9572_v17, %v19540_v3  ;;  %v19694_v6 = vpop.f32.mrf.mxu1 }
 0x54b   : > { %20940 = vst [vmem:[#allocation89_spill] sm:$0xff] %v19694_v6  ;;  %v14733_v5 = vpop.f32.mrf.mxu0 }
 0x54c   : > { %20939 = vst [vmem:[#allocation44_spill] sm:$0xff] %v19692_v21  ;;  %v19697_v59 = vadd.f32 %v14733_v5, %v19544_v55  ;;  %v19699_v42 = vpop.f32.mrf.mxu1 }
 0x54d   : > { %20942 = vst [vmem:[#allocation121_spill] sm:$0xff] %v19699_v42  ;;  %v9582_v26 = vpop.f32.mrf.mxu0 }
 0x54e   : > { %20941 = vst [vmem:[#allocation90_spill] sm:$0xff] %v19697_v59  ;;  %v19702_v9 = vadd.f32 %v9582_v26, %v19548_v35  ;;  %v19704_v22 = vpop.f32.mrf.mxu1 }
 0x54f   : > { %20944 = vst [vmem:[#allocation70_spill] sm:$0xff] %v19704_v22  ;;  %v14736_v11 = vpop.f32.mrf.mxu0 }
 0x550   : > { %20943 = vst [vmem:[#allocation114_spill] sm:$0xff] %v19702_v9  ;;  %v19707_v62 = vadd.f32 %v14736_v11, %v19551_v10  ;;  %v19709_v3 = vpop.f32.mrf.mxu1 }
 0x551   : > { %20946 = vst [vmem:[#allocation124_spill] sm:$0xff] %v19709_v3  ;;  %v9592_v17 = vpop.f32.mrf.mxu0 }
 0x552   : > { %20945 = vst [vmem:[#allocation25_spill] sm:$0xff] %v19707_v62  ;;  %v19712_v6 = vadd.f32 %v9592_v17, %v19554_v58  ;;  %v19714_v55 = vpop.f32.mrf.mxu1 }
 0x553   : > { %20948 = vst [vmem:[#allocation39_spill] sm:$0xff] %v19714_v55  ;;  %v14791_v5 = vpop.f32.mrf.mxu0 }
 0x554   : > { %20947 = vst [vmem:[#allocation116_spill] sm:$0xff] %v19712_v6  ;;  %v14841_v42 = vpop.f32.mrf.mxu1 }
 0x555   : > { %v10216_v59 = vpop.f32.mrf.mxu0 }
 0x556   : > { %v10603_v21 = vpop.f32.mrf.mxu1 }
 0x557   : > { %v14794_v35 = vpop.f32.mrf.mxu0 }
 0x558   : > { %v14844_v9 = vpop.f32.mrf.mxu1 }
 0x559   : > { %v10226_v26 = vpop.f32.mrf.mxu0 }
 0x55a   : > { %v19718_v10 = vpop.f32.mrf.mxu1 }
 0x55b   : > { %v14797_v22 = vpop.f32.mrf.mxu0 }
 0x55c   : > { %v19724_v58 = vpop.f32.mrf.mxu1 }
 0x55d   : > { %v19716_v16 = vpop.f32.mrf.mxu0 }
 0x55e   : > { %v19730_v6 = vpop.f32.mrf.mxu1 }
 0x55f   : > { %v19720_v11 = vpop.f32.mrf.mxu0 }
 0x560   : > { %v19736_v39 = vpop.f32.mrf.mxu1 }
 0x561   : > { %v19722_v3 = vpop.f32.mrf.mxu0 }
 0x562   : > { %v19742_v53 = vpop.f32.mrf.mxu1 }
 0x563   : > { %v19726_v17 = vpop.f32.mrf.mxu0 }
 0x564   : > { %v19748_v19 = vpop.f32.mrf.mxu1 }
 0x565   : > { %v19728_v55 = vpop.f32.mrf.mxu0 }
 0x566   : > { %v19754_v14 = vpop.f32.mrf.mxu1 }
 0x567   : > { %v19732_v62 = vpop.f32.mrf.mxu0 }
 0x568   : > { %v19760_v52 = vpop.f32.mrf.mxu1 }
 0x569   : > { %v19734_v50 = vpop.f32.mrf.mxu0 }
 0x56b   : > { %v19738_v38 = vpop.f32.mrf.mxu0 }
 0x56d   : > { %v19740_v28 = vpop.f32.mrf.mxu0 }
 0x56e   : > { %20949 = vst [vmem:[#allocation73_spill] sm:$0xff] %v19740_v28 }
 0x56f   : > { %v19744_v61 = vpop.f32.mrf.mxu0 }
 0x570   : > { %20950 = vst [vmem:[#allocation75_spill] sm:$0xff] %v19744_v61  ;;  %v19766_v61 = vpop.f32.mrf.mxu1 }
 0x571   : > { %v19746_v29 = vpop.f32.mrf.mxu0  ;;  %20958 = vst [vmem:[#allocation56_spill] sm:$0xff] %v19766_v61 }
 0x572   : > { %20951 = vst [vmem:[#allocation127_spill] sm:$0xff] %v19746_v29 }
 0x573   : > { %v19750_v8 = vpop.f32.mrf.mxu0 }
 0x574   : > { %20952 = vst [vmem:[#allocation117_spill] sm:$0xff] %v19750_v8  ;;  %v19772_v8 = vpop.f32.mrf.mxu1 }
 0x575   : > { %v19752_v43 = vpop.f32.mrf.mxu0  ;;  %20961 = vst [vmem:[#allocation32_spill] sm:$0xff] %v19772_v8 }
 0x576   : > { %20953 = vst [vmem:[#allocation54_spill] sm:$0xff] %v19752_v43 }
 0x577   : > { %v19756_v30 = vpop.f32.mrf.mxu0 }
 0x578   : > { %20954 = vst [vmem:[#allocation58_spill] sm:$0xff] %v19756_v30  ;;  %v19778_v30 = vpop.f32.mrf.mxu1 }
 0x579   : > { %v19758_v63 = vpop.f32.mrf.mxu0  ;;  %20964 = vst [vmem:[#allocation60_spill] sm:$0xff] %v19778_v30 }
 0x57a   : > { %20955 = vst [vmem:[#allocation130_spill] sm:$0xff] %v19758_v63 }
 0x57b   : > { %v19762_v36 = vpop.f32.mrf.mxu0 }
 0x57c   : > { %20956 = vst [vmem:[#allocation119_spill] sm:$0xff] %v19762_v36  ;;  %v19784_v36 = vpop.f32.mrf.mxu1 }
 0x57d   : > { %v19764_v25 = vpop.f32.mrf.mxu0  ;;  %20967 = vst [vmem:[#allocation69_spill] sm:$0xff] %v19784_v36 }
 0x57e   : > { %20957 = vst [vmem:[#allocation59_spill] sm:$0xff] %v19764_v25 }
 0x57f   : > { %v19768_v29 = vpop.f32.mrf.mxu0 }
 0x580   : > { %20959 = vst [vmem:[#allocation133_spill] sm:$0xff] %v19768_v29  ;;  %v9989_v29 = vadd.f32 %v19559_v27, %v19557_v46 }
 0x581   : > { %v19770_v1 = vpop.f32.mrf.mxu0 }
 0x582   : > { %20960 = vst [vmem:[#allocation120_spill] sm:$0xff] %v19770_v1  ;;  %v10376_v8 = vadd.f32 %v14791_v5, %v9989_v29 }
 0x583   : > { %v19774_v43 = vpop.f32.mrf.mxu0 }
 0x584   : > { %20962 = vst [vmem:[#allocation24_spill] sm:$0xff] %v19774_v43  ;;  %v9988_v43 = vadd.f32 %v19564_v7, %v19562_v15  ;;  %v10763_v46 = vadd.f32 %v14841_v42, %v10376_v8  ;;  %v9993_v15 = vadd.f32 %v19579_v4, %v19577_v45 }
 0x585   : > { %v19776_v28 = vpop.f32.mrf.mxu0 }
 0x586   : > { %20963 = vst [vmem:[#allocation122_spill] sm:$0xff] %v19776_v28  ;;  %v19794_v28 = vpop.f32.mrf.mxu1 }
 0x587   : > { %v19780_v63 = vpop.f32.mrf.mxu0 }
 0x588   : > { %20965 = vst [vmem:[#allocation62_spill] sm:$0xff] %v19780_v63  ;;  %v10375_v63 = vadd.f32 %v10216_v59, %v9988_v43  ;;  %v10380_v43 = vadd.f32 %v14797_v22, %v9993_v15 }
 0x589   : > { %v19782_v23 = vpop.f32.mrf.mxu0 }
 0x58a   : > { %20966 = vst [vmem:[#allocation123_spill] sm:$0xff] %v19782_v23  ;;  %v9991_v23 = vadd.f32 %v19569_v44, %v19567_v0  ;;  %v10762_v7 = vadd.f32 %v10603_v21, %v10375_v63  ;;  %v9992_v0 = vadd.f32 %v19584_v24, %v19582_v18  ;;  %v9994_v24 = vadd.f32 %v19594_v33, %v19592_v41 }
 0x58b   : > { %v19786_v25 = vpop.f32.mrf.mxu0  ;;  %v10767_v63 = vadd.f32 %v19724_v58, %v10380_v43  ;;  %v9996_v33 = vadd.f32 %v19604_v2, %v19602_v37  ;;  %v9998_v2 = vadd.f32 %v19614_v31, %v19612_v56  ;;  %v10000_v31 = vadd.f32 %v19624_v34, %v19622_v57  ;;  %v19866_v34 = vpop.permute.xlu1 %11219  ;;  %v20976_v43 = vld [vmem:[#allocation32_spill] sm:$0xff] }
 0x58c   : > { %20968 = vst [vmem:[#allocation66_spill] sm:$0xff] %v19786_v25  ;;  %v9990_v25 = vadd.f32 %v19574_v51, %v19572_v20  ;;  %v10378_v27 = vadd.f32 %v14794_v35, %v9991_v23  ;;  %v9995_v23 = vadd.f32 %v19589_v32, %v19587_v12  ;;  %v10379_v4 = vadd.f32 %v19716_v16, %v9992_v0 }
 0x58d   : > { %v19790_v1 = vpop.f32.mrf.mxu0  ;;  %v9997_v32 = vadd.f32 %v19599_v47, %v19597_v60  ;;  %v10381_v21 = vadd.f32 %v19722_v3, %v9994_v24  ;;  %v9999_v47 = vadd.f32 %v19609_v54, %v19607_v49  ;;  %v10383_v3 = vadd.f32 %v19728_v55, %v9996_v33 }
 0x58e   : > { %20969 = vst [vmem:[#allocation125_spill] sm:$0xff] %v19790_v1  ;;  %v19804_v1 = vpop.f32.mrf.mxu1  ;;  %v10377_v29 = vadd.f32 %v10226_v26, %v9990_v25  ;;  %v10765_v44 = vadd.f32 %v14844_v9, %v10378_v27  ;;  %v10766_v16 = vadd.f32 %v19730_v6, %v10379_v4  ;;  %v10001_v54 = vadd.f32 %v19619_v40, %v19617_v13  ;;  %v20971_v40 = vld [vmem:[#allocation33_spill] sm:$0xff] }
 0x58f   : > { %v19796_v30 = vpop.f32.mrf.mxu0  ;;  %v10384_v22 = vadd.f32 %v19726_v17, %v9997_v32  ;;  %v10768_v6 = vadd.f32 %v19742_v53, %v10381_v21  ;;  %v10770_v53 = vadd.f32 %v19754_v14, %v10383_v3  ;;  %v10385_v55 = vadd.f32 %v19734_v50, %v9998_v2  ;;  %v20972_v50 = vld [vmem:[#allocation56_spill] sm:$0xff]  ;;  %v19880_v21 = vpop.permute.xlu0 %11215  ;;  %v20987_v2 = vld [vmem:[#allocation85_spill] sm:$0xff] }
 0x590   : > { %20970 = vst [vmem:[#allocation71_spill] sm:$0xff] %v19796_v30  ;;  %v19811_v20 = vpop.f32.mrf.mxu1  ;;  %v10764_v45 = vadd.f32 %v19718_v10, %v10377_v29  ;;  %v10003_v14 = vadd.f32 %v20971_v40, %v19627_v48  ;;  %v20973_v29 = vld [vmem:[#allocation73_spill] sm:$0xff] }
 0x591   : > { %v19800_v36 = vpop.f32.mrf.mxu0 }
 0x593   : > { %v14891_v61 = vpop.f32.mrf.mxu0 }
 0x594   : > { %v11150_v5 = vadd.f32 %v14891_v61, %v10763_v46  ;;  %v19823_v61 = vpop.f32.mrf.mxu1 }
 0x595   : > { %v10990_v30 = vpop.f32.mrf.mxu0 }
 0x596   : > { %v11149_v59 = vadd.f32 %v10990_v30, %v10762_v7  ;;  %11343 = vrot.lane.b32.xlu1 %v11150_v5, %s15133_s30  ;;  %v10382_v30 = vadd.f32 %v19720_v11, %v9995_v23  ;;  %v19835_v26 = vpop.f32.mrf.mxu1  ;;  %v10386_v11 = vadd.f32 %v19732_v62, %v9999_v47  ;;  %v10388_v62 = vadd.f32 %v19738_v38, %v10001_v54  ;;  %v20975_v38 = vld [vmem:[#allocation11_spill] sm:$0xff] }
 0x597   : > { %v14894_v51 = vpop.f32.mrf.mxu0  ;;  %v10772_v7 = vadd.f32 %v20972_v50, %v10385_v55  ;;  %v10387_v5 = vadd.f32 %v20973_v29, %v10000_v31  ;;  %v20989_v55 = vld [vmem:[#allocation80_spill] sm:$0xff]  ;;  %v20993_v50 = vld [vmem:[#allocation42_spill] sm:$0xff] }
 0x598   : > { %v11152_v25 = vadd.f32 %v14894_v51, %v10765_v44  ;;  %11341 = vrot.lane.b32.xlu0 %v11149_v59, %s15133_s30  ;;  %v10769_v42 = vadd.f32 %v19736_v39, %v10382_v30  ;;  %v10771_v39 = vadd.f32 %v19748_v19, %v10384_v22  ;;  %v19847_v17 = vpop.f32.mrf.mxu1  ;;  %v10773_v19 = vadd.f32 %v19760_v52, %v10386_v11  ;;  %v20974_v52 = vld [vmem:[#allocation79_spill] sm:$0xff] }
 0x599   : > { %v11000_v18 = vpop.f32.mrf.mxu0  ;;  %v10002_v44 = vadd.f32 %v20975_v38, %v20974_v52  ;;  %v10775_v59 = vadd.f32 %v20976_v43, %v10388_v62  ;;  %v20977_v51 = vld [vmem:[#allocation75_spill] sm:$0xff]  ;;  %v20995_v38 = vld [vmem:[#allocation40_spill] sm:$0xff] }
 0x59a   : > { %v11151_v8 = vadd.f32 %v11000_v18, %v10764_v45  ;;  %11347 = vrot.lane.b32.xlu1 %v11152_v25, %s15133_s30  ;;  %v19859_v15 = vpop.f32.mrf.mxu1  ;;  %v10390_v23 = vadd.f32 %v20977_v51, %v10003_v14  ;;  %v20978_v25 = vld [vmem:[#allocation36_spill] sm:$0xff]  ;;  %v20979_v18 = vld [vmem:[#allocation83_spill] sm:$0xff]  ;;  %v19899_v14 = vpop.permute.xlu0 %11213 }
 0x59b   : > { %v14897_v12 = vpop.f32.mrf.mxu0  ;;  %v10005_v24 = vadd.f32 %v20979_v18, %v20978_v25  ;;  %v20997_v51 = vld [vmem:[#allocation119_spill] sm:$0xff] }
 0x59c   : > { %v11154_v9 = vadd.f32 %v14897_v12, %v10767_v63  ;;  %11345 = vrot.lane.b32.xlu0 %v11151_v8, %s15133_s30  ;;  %v19873_v48 = vpop.f32.mrf.mxu1  ;;  %v20980_v63 = vld [vmem:[#allocation60_spill] sm:$0xff]  ;;  %v20981_v8 = vld [vmem:[#allocation127_spill] sm:$0xff] }
 0x59d   : > { %v11010_v41 = vpop.f32.mrf.mxu0  ;;  %v10774_v30 = vadd.f32 %v20980_v63, %v10387_v5  ;;  %v10389_v12 = vadd.f32 %v20981_v8, %v10002_v44  ;;  %v20994_v5 = vld [vmem:[#allocation130_spill] sm:$0xff]  ;;  %v20996_v44 = vld [vmem:[#allocation43_spill] sm:$0xff] }
 0x59e   : > { %v11153_v35 = vadd.f32 %v11010_v41, %v10766_v16  ;;  %11351 = vrot.lane.b32.xlu1 %v11154_v9, %s15133_s30  ;;  %v20982_v9 = vld [vmem:[#allocation87_spill] sm:$0xff]  ;;  %v20983_v41 = vld [vmem:[#allocation76_spill] sm:$0xff]  ;;  %v10008_v43 = vadd.f32 %v20996_v44, %v20995_v38  ;;  %v19913_v25 = vpop.permute.xlu0 %11221  ;;  %v21014_v38 = vld [vmem:[#allocation89_spill] sm:$0xff] }
 0x59f   : > { %v14900_v60 = vpop.f32.mrf.mxu0  ;;  %v10004_v33 = vadd.f32 %v20983_v41, %v20982_v9  ;;  %v10776_v11 = vadd.f32 %v19794_v28, %v10389_v12  ;;  %v20992_v28 = vld [vmem:[#allocation84_spill] sm:$0xff]  ;;  %v20998_v18 = vld [vmem:[#allocation111_spill] sm:$0xff] }
 0x5a0   : > { %v11156_v10 = vadd.f32 %v14900_v60, %v10769_v42  ;;  %11349 = vrot.lane.b32.xlu0 %v11153_v35, %s15133_s30  ;;  %v20984_v42 = vld [vmem:[#allocation69_spill] sm:$0xff]  ;;  %v21000_v8 = vld [vmem:[#allocation59_spill] sm:$0xff]  ;;  %v21002_v9 = vld [vmem:[#allocation88_spill] sm:$0xff] }
 0x5a1   : > { %v11020_v37 = vpop.f32.mrf.mxu0  ;;  %v10777_v22 = vadd.f32 %v20984_v42, %v10390_v23  ;;  %v20985_v35 = vld [vmem:[#allocation117_spill] sm:$0xff]  ;;  %v10395_v12 = vadd.f32 %v21000_v8, %v10008_v43  ;;  %v21018_v8 = vld [vmem:[#allocation123_spill] sm:$0xff] }
 0x5a2   : > { %v11155_v58 = vadd.f32 %v11020_v37, %v10768_v6  ;;  %11355 = vrot.lane.b32.xlu1 %v11156_v10, %s15133_s30  ;;  %v10392_v60 = vadd.f32 %v20985_v35, %v10005_v24  ;;  %v10713_v6 = vpop.f32.mrf.mxu1  ;;  %v19887_v10 = vpop.permute.xlu1 %11217  ;;  %v20986_v37 = vld [vmem:[#allocation37_spill] sm:$0xff] }
 0x5a3   : > { %v14903_v49 = vpop.f32.mrf.mxu0  ;;  %v20999_v24 = vld [vmem:[#allocation41_spill] sm:$0xff] }
 0x5a4   : > { %v11158_v46 = vadd.f32 %v14903_v49, %v10771_v39  ;;  %11353 = vrot.lane.b32.xlu0 %v11155_v58, %s15133_s30  ;;  %v10007_v39 = vadd.f32 %v20987_v2, %v20986_v37  ;;  %v20988_v58 = vld [vmem:[#allocation54_spill] sm:$0xff]  ;;  %v10779_v31 = vadd.f32 %v19804_v1, %v10392_v60  ;;  %v10011_v63 = vadd.f32 %v20999_v24, %v20998_v18  ;;  %v21003_v42 = vld [vmem:[#allocation133_spill] sm:$0xff]  ;;  %v21005_v37 = vld [vmem:[#allocation112_spill] sm:$0xff] }
 0x5a5   : > { %v11030_v56 = vpop.f32.mrf.mxu0  ;;  %v10391_v49 = vadd.f32 %v20988_v58, %v10004_v33  ;;  %v21016_v18 = vld [vmem:[#allocation90_spill] sm:$0xff]  ;;  %v21017_v24 = vld [vmem:[#allocation121_spill] sm:$0xff] }
 0x5a6   : > { %v11157_v27 = vadd.f32 %v11030_v56, %v10770_v53  ;;  %11359 = vrot.lane.b32.xlu1 %v11158_v46, %s15133_s30  ;;  %v20990_v46 = vld [vmem:[#allocation82_spill] sm:$0xff]  ;;  %v19906_v52 = vpop.permute.xlu1 %11223 }
 0x5a7   : > { %v14906_v13 = vpop.f32.mrf.mxu0  ;;  %v10006_v56 = vadd.f32 %v20990_v46, %v20989_v55  ;;  %v10778_v29 = vadd.f32 %v19811_v20, %v10391_v49  ;;  %v21008_v55 = vld [vmem:[#allocation52_spill] sm:$0xff] }
 0x5a8   : > { %v11160_v0 = vadd.f32 %v14906_v13, %v10773_v19  ;;  %11357 = vrot.lane.b32.xlu0 %v11157_v27, %s15133_s30  ;;  %v20991_v19 = vld [vmem:[#allocation58_spill] sm:$0xff]  ;;  %v14877_v13 = vpop.f32.mrf.mxu1 }
 0x5a9   : > { %v11040_v57 = vpop.f32.mrf.mxu0  ;;  %v10394_v62 = vadd.f32 %v20991_v19, %v10007_v39  ;;  %v10782_v39 = vadd.f32 %v19859_v15, %v10395_v12 }
 0x5aa   : > { %v11159_v45 = vadd.f32 %v11040_v57, %v10772_v7  ;;  %11363 = vrot.lane.b32.xlu1 %v11160_v0, %s15133_s30  ;;  %v10009_v7 = vadd.f32 %v20993_v50, %v20992_v28  ;;  %v10393_v0 = vadd.f32 %v20994_v5, %v10006_v56  ;;  %v21011_v28 = vld [vmem:[#allocation113_spill] sm:$0xff] }
 0x5ab   : > { %v14909_v4 = vpop.f32.mrf.mxu0 }
 0x5ac   : > { %v11162_v32 = vadd.f32 %v14909_v4, %v10775_v59  ;;  %11361 = vrot.lane.b32.xlu0 %v11159_v45, %s15133_s30  ;;  %v10781_v59 = vadd.f32 %v19823_v61, %v10394_v62  ;;  %v10396_v23 = vadd.f32 %v20997_v51, %v10009_v7  ;;  %v10723_v4 = vpop.f32.mrf.mxu1 }
 0x5ad   : > { %v11050_v16 = vpop.f32.mrf.mxu0 }
 0x5ae   : > { %v11161_v47 = vadd.f32 %v11050_v16, %v10774_v30  ;;  %11367 = vrot.lane.b32.xlu1 %v11162_v32, %s15133_s30  ;;  %v10780_v30 = vadd.f32 %v19835_v26, %v10393_v0  ;;  %v21001_v16 = vld [vmem:[#allocation86_spill] sm:$0xff]  ;;  %v10783_v33 = vadd.f32 %v19847_v17, %v10396_v23  ;;  %v14880_v60 = vpop.f32.mrf.mxu1  ;;  %v21004_v26 = vld [vmem:[#allocation115_spill] sm:$0xff] }
 0x5af   : > { %v14912_v3 = vpop.f32.mrf.mxu0  ;;  %v10010_v41 = vadd.f32 %v21002_v9, %v21001_v16  ;;  %v10013_v2 = vadd.f32 %v21005_v37, %v21004_v26  ;;  %v21020_v16 = vld [vmem:[#allocation70_spill] sm:$0xff]  ;;  %v21023_v37 = vld [vmem:[#allocation124_spill] sm:$0xff] }
 0x5b0   : > { %v11164_v54 = vadd.f32 %v14912_v3, %v10777_v22  ;;  %11365 = vrot.lane.b32.xlu0 %v11161_v47, %s15133_s30  ;;  %v10398_v22 = vadd.f32 %v21003_v42, %v10011_v63  ;;  %v19925_v3 = vpop.permute.xlu1 %11227  ;;  %v10017_v63 = vadd.f32 %v21017_v24, %v21016_v18 }
 0x5b1   : > { %v11060_v53 = vpop.f32.mrf.mxu0 }
 0x5b2   : > { %v11163_v27 = vadd.f32 %v11060_v53, %v10776_v11  ;;  %11371 = vrot.lane.b32.xlu1 %v11164_v54, %s15133_s30  ;;  %v21006_v11 = vld [vmem:[#allocation120_spill] sm:$0xff]  ;;  %v19932_v54 = vpop.permute.xlu0 %11225  ;;  %v21007_v53 = vld [vmem:[#allocation45_spill] sm:$0xff]  ;;  %v10785_v56 = vadd.f32 %v19873_v48, %v10398_v22 }
 0x5b3   : > { %v14915_v40 = vpop.f32.mrf.mxu0  ;;  %v10397_v58 = vadd.f32 %v21006_v11, %v10010_v41  ;;  %v10012_v46 = vadd.f32 %v21008_v55, %v21007_v53  ;;  %v21013_v48 = vld [vmem:[#allocation44_spill] sm:$0xff]  ;;  %v21024_v11 = vld [vmem:[#allocation125_spill] sm:$0xff] }
 0x5b4   : > { %v11166_v57 = vadd.f32 %v14915_v40, %v10779_v31  ;;  %11369 = vrot.lane.b32.xlu0 %v11163_v27, %s15133_s30  ;;  %v21009_v31 = vld [vmem:[#allocation24_spill] sm:$0xff]  ;;  %v10733_v27 = vpop.f32.mrf.mxu1  ;;  %v21010_v40 = vld [vmem:[#allocation118_spill] sm:$0xff]  ;;  %v10014_v44 = vadd.f32 %v21014_v38, %v21013_v48 }
 0x5b5   : > { %v11070_v1 = vpop.f32.mrf.mxu0  ;;  %v10400_v19 = vadd.f32 %v21009_v31, %v10013_v2  ;;  %v10015_v50 = vadd.f32 %v21011_v28, %v21010_v40  ;;  %v10784_v7 = vadd.f32 %v10713_v6, %v10397_v58  ;;  %v21025_v55 = vld [vmem:[#allocation116_spill] sm:$0xff] }
 0x5b6   : > { %v11165_v45 = vadd.f32 %v11070_v1, %v10778_v29  ;;  %11375 = vrot.lane.b32.xlu1 %v11166_v57, %s15133_s30  ;;  %v21012_v29 = vld [vmem:[#allocation122_spill] sm:$0xff]  ;;  %v19943_v1 = vpop.permute.xlu1 %11231  ;;  %v19949_v6 = vpop.permute.xlu0 %11229  ;;  %v10401_v12 = vadd.f32 %v21018_v8, %v10014_v44 }
 0x5b7   : > { %v14918_v20 = vpop.f32.mrf.mxu0  ;;  %v10399_v5 = vadd.f32 %v21012_v29, %v10012_v46  ;;  %v10787_v43 = vadd.f32 %v14877_v13, %v10400_v19  ;;  %v21019_v13 = vld [vmem:[#allocation114_spill] sm:$0xff]  ;;  %v21026_v46 = vld [vmem:[#allocation39_spill] sm:$0xff] }
 0x5b8   : > { %v11168_v32 = vadd.f32 %v14918_v20, %v10781_v59  ;;  %11373 = vrot.lane.b32.xlu0 %v11165_v45, %s15133_s30  ;;  %v21015_v59 = vld [vmem:[#allocation62_spill] sm:$0xff]  ;;  %v14883_v45 = vpop.f32.mrf.mxu1  ;;  %v10016_v9 = vadd.f32 %v21020_v16, %v21019_v13  ;;  %v21027_v19 = vld [vmem:[#allocation71_spill] sm:$0xff] }
 0x5b9   : > { %v11080_v61 = vpop.f32.mrf.mxu0  ;;  %v10402_v51 = vadd.f32 %v21015_v59, %v10015_v50 }
 0x5ba   : > { %v11167_v35 = vadd.f32 %v11080_v61, %v10780_v30  ;;  %11379 = vrot.lane.b32.xlu1 %v11168_v32, %s15133_s30  ;;  %v10786_v30 = vadd.f32 %v10723_v4, %v10399_v5  ;;  %v19959_v26 = vpop.permute.xlu1 %11235  ;;  %v21022_v4 = vld [vmem:[#allocation25_spill] sm:$0xff]  ;;  %v10403_v58 = vadd.f32 %v21024_v11, %v10016_v9  ;;  %v19965_v53 = vpop.permute.xlu0 %11233 }
 0x5bb   : > { %v14921_v47 = vpop.f32.mrf.mxu0  ;;  %v10789_v41 = vadd.f32 %v14880_v60, %v10402_v51  ;;  %v10019_v2 = vadd.f32 %v21023_v37, %v21022_v4  ;;  %v21029_v37 = vld [vmem:[#allocation12_spill] sm:$0xff] }
 0x5bc   : > { %v11170_v49 = vadd.f32 %v14921_v47, %v10783_v33  ;;  %11377 = vrot.lane.b32.xlu0 %v11167_v35, %s15133_s30  ;;  %v21021_v33 = vld [vmem:[#allocation66_spill] sm:$0xff]  ;;  %v10743_v35 = vpop.f32.mrf.mxu1 }
 0x5bd   : > { %v11090_v17 = vpop.f32.mrf.mxu0  ;;  %v10404_v42 = vadd.f32 %v21021_v33, %v10017_v63 }
 0x5be   : > { %v11169_v62 = vadd.f32 %v11090_v17, %v10782_v39  ;;  %11383 = vrot.lane.b32.xlu1 %v11170_v49, %s15133_s30  ;;  %v10788_v39 = vadd.f32 %v10733_v27, %v10401_v12  ;;  %v14886_v17 = vpop.f32.mrf.mxu1  ;;  %v10790_v27 = vadd.f32 %v10743_v35, %v10403_v58  ;;  %v19973_v5 = vpop.permute.xlu1 %11239 }
 0x5bf   : > { %v14924_v15 = vpop.f32.mrf.mxu0  ;;  %v10791_v31 = vadd.f32 %v14883_v45, %v10404_v42  ;;  %v19976_v38 = vpop.permute.xlu0 %11237 }
 0x5c0   : > { %v11172_v0 = vadd.f32 %v14924_v15, %v10785_v56  ;;  %11381 = vrot.lane.b32.xlu0 %v11169_v62, %s15133_s30  ;;  %v10018_v56 = vadd.f32 %v21026_v46, %v21025_v55  ;;  %v10406_v62 = vadd.f32 %v21027_v19, %v10019_v2  ;;  %v11437_v2 = vsel %vm4160_vm2, %v21029_v37, %v19899_v14  ;;  %v15010_v37 = vld [vmem:[%s15319_s26 + $0x38] sm:$0xff] }
 0x5c1   : > { %v11100_v57 = vpop.f32.mrf.mxu0 }
 0x5c2   : > { %v11171_v23 = vadd.f32 %v11100_v57, %v10784_v7  ;;  %11387 = vrot.lane.b32.xlu1 %v11172_v0, %s15133_s30  ;;  %v10405_v28 = vadd.f32 %v19800_v36, %v10018_v56  ;;  %v10753_v7 = vpop.f32.mrf.mxu1  ;;  %v10793_v0 = vadd.f32 %v14886_v17, %v10406_v62  ;;  %v19980_v51 = vpop.permute.xlu1 %11243  ;;  %v21030_v17 = vld [vmem:[#allocation14_spill] sm:$0xff]  ;;  %v21031_v56 = vld [vmem:[#allocation16_spill] sm:$0xff] }
 0x5c3   : > { %v14927_v20 = vpop.f32.mrf.mxu0 }
 0x5c4   : > { %v11174_v32 = vadd.f32 %v14927_v20, %v10787_v43  ;;  %11385 = vrot.lane.b32.xlu0 %v11171_v23, %s15133_s30  ;;  %v10792_v44 = vadd.f32 %v10753_v7, %v10405_v28  ;;  %v19983_v23 = vpop.permute.xlu0 %11241  ;;  %v15007_v28 = vld [vmem:[%s15319_s26 + $0x10] sm:$0xff] }
 0x5c5   : > { %v11110_v61 = vpop.f32.mrf.mxu0 }
 0x5c6   : > { %v11173_v22 = vadd.f32 %v11110_v61, %v10786_v30  ;;  %11391 = vrot.lane.b32.xlu1 %v11174_v32, %s15133_s30  ;;  %v19985_v45 = vpop.permute.xlu1 %11247 }
 0x5c7   : > { %v14930_v47 = vpop.f32.mrf.mxu0 }
 0x5c8   : > { %v11176_v49 = vadd.f32 %v14930_v47, %v10789_v41  ;;  %11389 = vrot.lane.b32.xlu0 %v11173_v22, %s15133_s30  ;;  %v19987_v20 = vpop.permute.xlu0 %11245  ;;  %v21028_v22 = vld [vmem:[#allocation91_spill] sm:$0xff] }
 0x5c9   : > { %v11120_v60 = vpop.f32.mrf.mxu0  ;;  %v11438_v35 = vsel %vm4160_vm2, %v21028_v22, %v19880_v21  ;;  %v15005_v21 = vld [vmem:[%s15319_s26] sm:$0xff] }
 0x5ca   : > { %v11175_v15 = vadd.f32 %v11120_v60, %v10788_v39  ;;  %11395 = vrot.lane.b32.xlu1 %v11176_v49, %s15133_s30  ;;  %v19989_v18 = vpop.permute.xlu1 %11251  ;;  %v15004_v39 = vld [vmem:[%s15319_s26 + $0x8] sm:$0xff]  ;;  %v11440_v60 = vsel %vm4160_vm2, %v21030_v17, %v19866_v34  ;;  %v15006_v34 = vld [vmem:[%s15319_s26 + $0x18] sm:$0xff] }
 0x5cb   : > { %v14933_v40 = vpop.f32.mrf.mxu0 }
 0x5cc   : > { %v11178_v50 = vadd.f32 %v14933_v40, %v10791_v31  ;;  %11393 = vrot.lane.b32.xlu0 %v11175_v15, %s15133_s30  ;;  %v19991_v24 = vpop.permute.xlu0 %11249  ;;  %v11439_v31 = vsel %vm4160_vm2, %v21031_v56, %v19887_v10  ;;  %v21032_v40 = vld [vmem:[#allocation9_spill] sm:$0xff] }
 0x5cd   : > { %v11130_v29 = vpop.f32.mrf.mxu0 }
 0x5ce   : > { %v11177_v57 = vadd.f32 %v11130_v29, %v10790_v27  ;;  %11399 = vrot.lane.b32.xlu1 %v11178_v50, %s15133_s30  ;;  %v19993_v63 = vpop.permute.xlu1 %11255  ;;  %v11442_v27 = vsel %vm4160_vm2, %v21032_v40, %v19906_v52  ;;  %v21033_v29 = vld [vmem:[#allocation13_spill] sm:$0xff]  ;;  %v21039_v40 = vld [vmem:[#allocation15_spill] sm:$0xff] }
 0x5cf   : > { %v14936_v48 = vpop.f32.mrf.mxu0 }
 0x5d0   : > { %v11180_v43 = vadd.f32 %v14936_v48, %v10793_v0  ;;  %11397 = vrot.lane.b32.xlu0 %v11177_v57, %s15133_s30  ;;  %v19995_v30 = vpop.permute.xlu0 %11253  ;;  %v11441_v0 = vsel %vm4160_vm2, %v21033_v29, %v19913_v25  ;;  %v15008_v57 = vld [vmem:[%s15319_s26 + $0x28] sm:$0xff] }
 0x5d1   : > { %v11140_v59 = vpop.f32.mrf.mxu0 }
 0x5d2   : > { %v11179_v36 = vadd.f32 %v11140_v59, %v10792_v44  ;;  %11403 = vrot.lane.b32.xlu1 %v11180_v43, %s15133_s30  ;;  %v19997_v8 = vpop.permute.xlu1 %11259  ;;  %v21034_v43 = vld [vmem:[#allocation18_spill] sm:$0xff] }
 0x5d3   : > { %v11444_v59 = vsel %vm4160_vm2, %v21034_v43, %v19925_v3  ;;  %v15016_v43 = vld [vmem:[%s15319_s26 + $0x68] sm:$0xff] }
 0x5d4   : > { %11401 = vrot.lane.b32.xlu0 %v11179_v36, %s15133_s30  ;;  %v19999_v12 = vpop.permute.xlu0 %11257  ;;  %v15009_v36 = vld [vmem:[%s15319_s26 + $0x20] sm:$0xff]  ;;  %s15134_s30 = smov [#allocation6]  }
 0x5d5   : > { %s15066_s12 = sshll.u32 %s15134_s30, 4  ;;  %s15067_s12 = int_to_ptr.vmem [resolvable:$false] %s15066_s12 }
 0x5d6   : > { %v20001_v32 = vpop.permute.xlu1 %11263  ;;  %s15068_s20 = scalar_lea.vmem %s15067_s12, 8192  ;;  %p15069_p11 = scmp.lt.s32.totalorder %s20248_s21, %s15067_s12 }
 0x5d7   : > { %p15070_p12 = scmp.lt.s32.totalorder %s15068_s20, %s15062_s29 }
 0x5d8   : > { %v20003_v61 = vpop.permute.xlu0 %11261 }
 0x5d9   : > { %p15071_p13 = por %p15070_p12, %p15069_p11 }
 0x5da   : > { %v20005_v13 = vpop.permute.xlu1 %11267 }
 0x5db   : > { %p15072_p0 = pnand %p15071_p13, %p15065_p10 }
 0x5dc   : > { %v20007_v16 = vpop.permute.xlu0 %11265 }
 0x5de   : > { %v20009_v9 = vpop.permute.xlu1 %11271 }
 0x5e0   : > { %v20011_v41 = vpop.permute.xlu0 %11269 }
 0x5e2   : > { %v20014_v33 = vpop.permute.xlu1 %11275 }
 0x5e4   : > { %v20016_v42 = vpop.permute.xlu0 %11273 }
 0x608   : > { %v11344_v47 = vpop.permute.xlu1 %11343 }
 0x609   : > { %v11471_v4 = vsel %vm11469_vm4, %v11438_v35, %v11344_v47  ;;  %v21035_v47 = vld [vmem:[#allocation46_spill] sm:$0xff] }
 0x60a   : > { %v11503_v11 = vadd.f32 %v15004_v39, %v11471_v4  ;;  %v11342_v58 = vpop.permute.xlu0 %11341  ;;  %v11443_v4 = vsel %vm4160_vm2, %v21035_v47, %v19932_v54 }
 0x60b   : > { %v11470_v49 = vsel %vm11469_vm4, %v11437_v2, %v11342_v58 }
 0x60c   : > { %11535 = vst.msk [vmem:[%s20032_s18 + $0x8] sm:$0xff] %vm405_vm0, %v11503_v11  ;;  %v11502_v55 = vadd.f32 %v15005_v21, %v11470_v49  ;;  %v11348_v14 = vpop.permute.xlu1 %11347  ;;  %v21036_v11 = vld [vmem:[#allocation49_spill] sm:$0xff]  ;;  %v15011_v49 = vld [vmem:[%s15319_s26 + $0x30] sm:$0xff] }
 0x60d   : > { %v11473_v46 = vsel %vm11469_vm4, %v11440_v60, %v11348_v14  ;;  %v11446_v58 = vsel %vm4160_vm2, %v21036_v11, %v19943_v1  ;;  %v21037_v21 = vld [vmem:[#allocation20_spill] sm:$0xff]  ;;  %v15012_v14 = vld [vmem:[%s15319_s26 + $0x48] sm:$0xff] }
 0x60e   : > { %11534 = vst.msk [vmem:[%s20032_s18] sm:$0xff] %vm405_vm0, %v11502_v55  ;;  %v11505_v19 = vadd.f32 %v15006_v34, %v11473_v46  ;;  %v11346_v62 = vpop.permute.xlu0 %11345  ;;  %v11445_v55 = vsel %vm4160_vm2, %v21037_v21, %v19949_v6  ;;  %v21045_v21 = vld [vmem:[#allocation50_spill] sm:$0xff] }
 0x60f   : > { %v11472_v15 = vsel %vm11469_vm4, %v11439_v31, %v11346_v62  ;;  %v21038_v31 = vld [vmem:[#allocation47_spill] sm:$0xff] }
 0x610   : > { %11537 = vst.msk [vmem:[%s20032_s18 + $0x18] sm:$0xff] %vm405_vm0, %v11505_v19  ;;  %v11504_v50 = vadd.f32 %v15007_v28, %v11472_v15  ;;  %v11352_v7 = vpop.permute.xlu1 %11351  ;;  %v11448_v34 = vsel %vm4160_vm2, %v21038_v31, %v19959_v26  ;;  %v15013_v19 = vld [vmem:[%s15319_s26 + $0x40] sm:$0xff]  ;;  %v15014_v28 = vld [vmem:[%s15319_s26 + $0x58] sm:$0xff] }
 0x611   : > { %v11475_v10 = vsel %vm11469_vm4, %v11442_v27, %v11352_v7  ;;  %v11447_v27 = vsel %vm4160_vm2, %v21039_v40, %v19965_v53  ;;  %v15022_v40 = vld [vmem:[%s15319_s26 + $0x98] sm:$0xff] }
 0x612   : > { %11536 = vst.msk [vmem:[%s20032_s18 + $0x10] sm:$0xff] %vm405_vm0, %v11504_v50  ;;  %v11507_v48 = vadd.f32 %v15008_v57, %v11475_v10  ;;  %v11350_v44 = vpop.permute.xlu0 %11349  ;;  %v21040_v10 = vld [vmem:[#allocation51_spill] sm:$0xff] }
 0x613   : > { %v11474_v52 = vsel %vm11469_vm4, %v11441_v0, %v11350_v44  ;;  %v11450_v29 = vsel %vm4160_vm2, %v21040_v10, %v19973_v5  ;;  %v15015_v0 = vld [vmem:[%s15319_s26 + $0x50] sm:$0xff]  ;;  %v21041_v44 = vld [vmem:[#allocation10_spill] sm:$0xff] }
 0x614   : > { %11539 = vst.msk [vmem:[%s20032_s18 + $0x28] sm:$0xff] %vm405_vm0, %v11507_v48  ;;  %v11506_v22 = vadd.f32 %v15009_v36, %v11474_v52  ;;  %v11356_v35 = vpop.permute.xlu1 %11355  ;;  %v11449_v52 = vsel %vm4160_vm2, %v21041_v44, %v19976_v38 }
 0x615   : > { %v11477_v25 = vsel %vm11469_vm4, %v11444_v59, %v11356_v35 }
 0x616   : > { %11538 = vst.msk [vmem:[%s20032_s18 + $0x20] sm:$0xff] %vm405_vm0, %v11506_v22  ;;  %v11509_v2 = vadd.f32 %v15010_v37, %v11477_v25  ;;  %v11354_v39 = vpop.permute.xlu0 %11353  ;;  %v21042_v22 = vld [vmem:[#allocation23_spill] sm:$0xff]  ;;  %v15017_v25 = vld [vmem:[%s15319_s26 + $0x60] sm:$0xff] }
 0x617   : > { %v11476_v3 = vsel %vm11469_vm4, %v11443_v4, %v11354_v39  ;;  %v11452_v35 = vsel %vm4160_vm2, %v21042_v22, %v19980_v51  ;;  %v21043_v37 = vld [vmem:[#allocation26_spill] sm:$0xff]  ;;  %v15018_v39 = vld [vmem:[%s15319_s26 + $0x78] sm:$0xff]  ;;  %v21051_v22 = vld [vmem:[#allocation19_spill] sm:$0xff] }
 0x618   : > { %11541 = vst.msk [vmem:[%s20032_s18 + $0x38] sm:$0xff] %vm405_vm0, %v11509_v2  ;;  %v11508_v17 = vadd.f32 %v15011_v49, %v11476_v3  ;;  %v11360_v60 = vpop.permute.xlu1 %11359  ;;  %v11451_v2 = vsel %vm4160_vm2, %v21043_v37, %v19983_v23 }
 0x619   : > { %v11479_v54 = vsel %vm11469_vm4, %v11446_v58, %v11360_v60  ;;  %v21044_v58 = vld [vmem:[#allocation48_spill] sm:$0xff] }
 0x61a   : > { %11540 = vst.msk [vmem:[%s20032_s18 + $0x30] sm:$0xff] %vm405_vm0, %v11508_v17  ;;  %v11511_v46 = vadd.f32 %v15012_v14, %v11479_v54  ;;  %v11358_v56 = vpop.permute.xlu0 %11357  ;;  %v11454_v49 = vsel %vm4160_vm2, %v21044_v58, %v19985_v45  ;;  %v15019_v17 = vld [vmem:[%s15319_s26 + $0x70] sm:$0xff]  ;;  %v15020_v14 = vld [vmem:[%s15319_s26 + $0x88] sm:$0xff] }
 0x61b   : > { %v11478_v1 = vsel %vm11469_vm4, %v11445_v55, %v11358_v56  ;;  %v11453_v55 = vsel %vm4160_vm2, %v21045_v21, %v19987_v20  ;;  %v15028_v58 = vld [vmem:[%s15319_s26 + $0xc8] sm:$0xff] }
 0x61c   : > { %11543 = vst.msk [vmem:[%s20032_s18 + $0x48] sm:$0xff] %vm405_vm0, %v11511_v46  ;;  %v11510_v62 = vadd.f32 %v15013_v19, %v11478_v1  ;;  %v11364_v15 = vpop.permute.xlu1 %11363  ;;  %v21046_v1 = vld [vmem:[#allocation53_spill] sm:$0xff] }
 0x61d   : > { %v11481_v6 = vsel %vm11469_vm4, %v11448_v34, %v11364_v15  ;;  %v11456_v31 = vsel %vm4160_vm2, %v21046_v1, %v19989_v18  ;;  %v15021_v34 = vld [vmem:[%s15319_s26 + $0x80] sm:$0xff]  ;;  %v21047_v15 = vld [vmem:[#allocation17_spill] sm:$0xff] }
 0x61e   : > { %11542 = vst.msk [vmem:[%s20032_s18 + $0x40] sm:$0xff] %vm405_vm0, %v11510_v62  ;;  %v11513_v50 = vadd.f32 %v15014_v28, %v11481_v6  ;;  %v11362_v7 = vpop.permute.xlu0 %11361  ;;  %v11455_v6 = vsel %vm4160_vm2, %v21047_v15, %v19991_v24  ;;  %v21057_v15 = vld [vmem:[#allocation67_spill] sm:$0xff] }
 0x61f   : > { %v11480_v26 = vsel %vm11469_vm4, %v11447_v27, %v11362_v7 }
 0x620   : > { %11545 = vst.msk [vmem:[%s20032_s18 + $0x58] sm:$0xff] %vm405_vm0, %v11513_v50  ;;  %v11512_v57 = vadd.f32 %v15015_v0, %v11480_v26  ;;  %v11368_v48 = vpop.permute.xlu1 %11367  ;;  %v21048_v50 = vld [vmem:[#allocation55_spill] sm:$0xff]  ;;  %v15023_v26 = vld [vmem:[%s15319_s26 + $0x90] sm:$0xff]  ;;  %v21049_v0 = vld [vmem:[#allocation22_spill] sm:$0xff] }
 0x621   : > { %v11483_v53 = vsel %vm11469_vm4, %v11450_v29, %v11368_v48  ;;  %v11458_v7 = vsel %vm4160_vm2, %v21048_v50, %v19993_v63  ;;  %v15024_v48 = vld [vmem:[%s15319_s26 + $0xa8] sm:$0xff] }
 0x622   : > { %11544 = vst.msk [vmem:[%s20032_s18 + $0x50] sm:$0xff] %vm405_vm0, %v11512_v57  ;;  %v11515_v59 = vadd.f32 %v15016_v43, %v11483_v53  ;;  %v11366_v36 = vpop.permute.xlu0 %11365  ;;  %v11457_v57 = vsel %vm4160_vm2, %v21049_v0, %v19995_v30 }
 0x623   : > { %v11482_v5 = vsel %vm11469_vm4, %v11449_v52, %v11366_v36  ;;  %v21050_v52 = vld [vmem:[#allocation57_spill] sm:$0xff] }
 0x624   : > { %11547 = vst.msk [vmem:[%s20032_s18 + $0x68] sm:$0xff] %vm405_vm0, %v11515_v59  ;;  %v11514_v47 = vadd.f32 %v15017_v25, %v11482_v5  ;;  %v11372_v4 = vpop.permute.xlu1 %11371  ;;  %v11460_v43 = vsel %vm4160_vm2, %v21050_v52, %v19997_v8  ;;  %v15025_v59 = vld [vmem:[%s15319_s26 + $0xa0] sm:$0xff]  ;;  %v15026_v25 = vld [vmem:[%s15319_s26 + $0xb8] sm:$0xff] }
 0x625   : > { %v11485_v38 = vsel %vm11469_vm4, %v11452_v35, %v11372_v4  ;;  %v11459_v35 = vsel %vm4160_vm2, %v21051_v22, %v19999_v12 }
 0x626   : > { %11546 = vst.msk [vmem:[%s20032_s18 + $0x60] sm:$0xff] %vm405_vm0, %v11514_v47  ;;  %v11517_v3 = vadd.f32 %v15018_v39, %v11485_v38  ;;  %v11370_v11 = vpop.permute.xlu0 %11369  ;;  %v21052_v38 = vld [vmem:[#allocation29_spill] sm:$0xff] }
 0x627   : > { %v11484_v51 = vsel %vm11469_vm4, %v11451_v2, %v11370_v11  ;;  %v11462_v37 = vsel %vm4160_vm2, %v21052_v38, %v20001_v32  ;;  %v15027_v2 = vld [vmem:[%s15319_s26 + $0xb0] sm:$0xff]  ;;  %v21053_v11 = vld [vmem:[#allocation61_spill] sm:$0xff] }
 0x628   : > { %11549 = vst.msk [vmem:[%s20032_s18 + $0x78] sm:$0xff] %vm405_vm0, %v11517_v3  ;;  %v11516_v60 = vadd.f32 %v15019_v17, %v11484_v51  ;;  %v11376_v54 = vpop.permute.xlu1 %11375  ;;  %v11461_v51 = vsel %vm4160_vm2, %v21053_v11, %v20003_v61 }
 0x629   : > { %v11487_v23 = vsel %vm11469_vm4, %v11454_v49, %v11376_v54 }
 0x62a   : > { %11548 = vst.msk [vmem:[%s20032_s18 + $0x70] sm:$0xff] %vm405_vm0, %v11516_v60  ;;  %v11519_v46 = vadd.f32 %v15020_v14, %v11487_v23  ;;  %v11374_v56 = vpop.permute.xlu0 %11373  ;;  %v21054_v60 = vld [vmem:[#allocation21_spill] sm:$0xff]  ;;  %v15029_v23 = vld [vmem:[%s15319_s26 + $0xc0] sm:$0xff]  ;;  %v21055_v14 = vld [vmem:[#allocation63_spill] sm:$0xff] }
 0x62b   : > { %v11486_v45 = vsel %vm11469_vm4, %v11453_v55, %v11374_v56  ;;  %v11464_v54 = vsel %vm4160_vm2, %v21054_v60, %v20005_v13  ;;  %v15030_v56 = vld [vmem:[%s15319_s26 + $0xd8] sm:$0xff] }
 0x62c   : > { %11551 = vst.msk [vmem:[%s20032_s18 + $0x88] sm:$0xff] %vm405_vm0, %v11519_v46  ;;  %v11518_v19 = vadd.f32 %v15021_v34, %v11486_v45  ;;  %v11380_v62 = vpop.permute.xlu1 %11379  ;;  %v11463_v46 = vsel %vm4160_vm2, %v21055_v14, %v20007_v16 }
 0x62d   : > { %v11489_v20 = vsel %vm11469_vm4, %v11456_v31, %v11380_v62  ;;  %v21056_v31 = vld [vmem:[#allocation65_spill] sm:$0xff] }
 0x62e   : > { %11550 = vst.msk [vmem:[%s20032_s18 + $0x80] sm:$0xff] %vm405_vm0, %v11518_v19  ;;  %v11521_v27 = vadd.f32 %v15022_v40, %v11489_v20  ;;  %v11378_v28 = vpop.permute.xlu0 %11377  ;;  %v11466_v34 = vsel %vm4160_vm2, %v21056_v31, %v20009_v9  ;;  %v15031_v19 = vld [vmem:[%s15319_s26 + $0xd0] sm:$0xff]  ;;  %v15032_v40 = vld [vmem:[%s15319_s26 + $0xe8] sm:$0xff] }
 0x62f   : > { %v11488_v18 = vsel %vm11469_vm4, %v11455_v6, %v11378_v28  ;;  %v11465_v6 = vsel %vm4160_vm2, %v21057_v15, %v20011_v41 }
 0x630   : > { %11553 = vst.msk [vmem:[%s20032_s18 + $0x98] sm:$0xff] %vm405_vm0, %v11521_v27  ;;  %v11520_v10 = vadd.f32 %v15023_v26, %v11488_v18  ;;  %v11384_v29 = vpop.permute.xlu1 %11383  ;;  %v21058_v18 = vld [vmem:[#allocation64_spill] sm:$0xff] }
 0x631   : > { %v11491_v24 = vsel %vm11469_vm4, %v11458_v7, %v11384_v29  ;;  %v11468_v50 = vsel %vm4160_vm2, %v21058_v18, %v20014_v33  ;;  %v15033_v7 = vld [vmem:[%s15319_s26 + $0xe0] sm:$0xff]  ;;  %v21059_v29 = vld [vmem:[#allocation27_spill] sm:$0xff]  ;;  %v15034_v33 = vld [vmem:[%s15319_s26 + $0xf8] sm:$0xff] }
 0x632   : > { %11552 = vst.msk [vmem:[%s20032_s18 + $0x90] sm:$0xff] %vm405_vm0, %v11520_v10  ;;  %v11523_v53 = vadd.f32 %v15024_v48, %v11491_v24  ;;  %v11382_v44 = vpop.permute.xlu0 %11381  ;;  %v11467_v24 = vsel %vm4160_vm2, %v21059_v29, %v20016_v42  ;;  %v15035_v42 = vld [vmem:[%s15319_s26 + $0xf0] sm:$0xff] }
 0x633   : > { %v11490_v63 = vsel %vm11469_vm4, %v11457_v57, %v11382_v44 }
 0x634   : > { %11555 = vst.msk [vmem:[%s20032_s18 + $0xa8] sm:$0xff] %vm405_vm0, %v11523_v53  ;;  %v11522_v36 = vadd.f32 %v15025_v59, %v11490_v63  ;;  %v11388_v5 = vpop.permute.xlu1 %11387 }
 0x635   : > { %v11493_v30 = vsel %vm11469_vm4, %v11460_v43, %v11388_v5 }
 0x636   : > { %11554 = vst.msk [vmem:[%s20032_s18 + $0xa0] sm:$0xff] %vm405_vm0, %v11522_v36  ;;  %v11525_v47 = vadd.f32 %v15026_v25, %v11493_v30  ;;  %v11386_v4 = vpop.permute.xlu0 %11385 }
 0x637   : > { %v11492_v8 = vsel %vm11469_vm4, %v11459_v35, %v11386_v4 }
 0x638   : > { %11557 = vst.msk [vmem:[%s20032_s18 + $0xb8] sm:$0xff] %vm405_vm0, %v11525_v47  ;;  %v11524_v39 = vadd.f32 %v15027_v2, %v11492_v8  ;;  %v11392_v3 = vpop.permute.xlu1 %11391 }
 0x639   : > { %v11495_v12 = vsel %vm11469_vm4, %v11462_v37, %v11392_v3 }
 0x63a   : > { %11556 = vst.msk [vmem:[%s20032_s18 + $0xb0] sm:$0xff] %vm405_vm0, %v11524_v39  ;;  %v11527_v49 = vadd.f32 %v15028_v58, %v11495_v12  ;;  %v11390_v17 = vpop.permute.xlu0 %11389 }
 0x63b   : > { %v11494_v32 = vsel %vm11469_vm4, %v11461_v51, %v11390_v17 }
 0x63c   : > { %11559 = vst.msk [vmem:[%s20032_s18 + $0xc8] sm:$0xff] %vm405_vm0, %v11527_v49  ;;  %v11526_v21 = vadd.f32 %v15029_v23, %v11494_v32  ;;  %v11396_v55 = vpop.permute.xlu1 %11395 }
 0x63d   : > { %v11497_v61 = vsel %vm11469_vm4, %v11464_v54, %v11396_v55 }
 0x63e   : > { %11558 = vst.msk [vmem:[%s20032_s18 + $0xc0] sm:$0xff] %vm405_vm0, %v11526_v21  ;;  %v11529_v45 = vadd.f32 %v15030_v56, %v11497_v61  ;;  %v11394_v1 = vpop.permute.xlu0 %11393 }
 0x63f   : > { %v11496_v13 = vsel %vm11469_vm4, %v11463_v46, %v11394_v1 }
 0x640   : > { %11561 = vst.msk [vmem:[%s20032_s18 + $0xd8] sm:$0xff] %vm405_vm0, %v11529_v45  ;;  %v11528_v62 = vadd.f32 %v15031_v19, %v11496_v13  ;;  %v11400_v16 = vpop.permute.xlu1 %11399 }
 0x641   : > { %v11499_v20 = vsel %vm11469_vm4, %v11466_v34, %v11400_v16 }
 0x642   : > { %11560 = vst.msk [vmem:[%s20032_s18 + $0xd0] sm:$0xff] %vm405_vm0, %v11528_v62  ;;  %v11531_v27 = vadd.f32 %v15032_v40, %v11499_v20  ;;  %v11398_v9 = vpop.permute.xlu0 %11397 }
 0x643   : > { %v11498_v28 = vsel %vm11469_vm4, %v11465_v6, %v11398_v9 }
 0x644   : > { %11563 = vst.msk [vmem:[%s20032_s18 + $0xe8] sm:$0xff] %vm405_vm0, %v11531_v27  ;;  %v11530_v26 = vadd.f32 %v15033_v7, %v11498_v28  ;;  %v11404_v41 = vpop.permute.xlu1 %11403 }
 0x645   : > { %v11501_v10 = vsel %vm11469_vm4, %v11468_v50, %v11404_v41 }
 0x646   : > { %11562 = vst.msk [vmem:[%s20032_s18 + $0xe0] sm:$0xff] %vm405_vm0, %v11530_v26  ;;  %v11533_v0 = vadd.f32 %v15034_v33, %v11501_v10  ;;  %v11402_v57 = vpop.permute.xlu0 %11401 }
 0x647   : > { %v11500_v48 = vsel %vm11469_vm4, %v11467_v24, %v11402_v57 }
 0x648   : > { %11565 = vst.msk [vmem:[%s20032_s18 + $0xf8] sm:$0xff] %vm405_vm0, %v11533_v0  ;;  %v11532_v53 = vadd.f32 %v15035_v42, %v11500_v48 }
 0x64a   : > { %11564 = vst.msk [vmem:[%s20032_s18 + $0xf0] sm:$0xff] %vm405_vm0, %v11532_v53 }
 0x64b   : > { %15075 = shalt.err (!%p15072_p0)
}
 0x64c   : > { %s15076_s26 = scalar_lea.hbm %s20246_s28, 4096  ;;  %s15080_s25 = scalar_lea.hbm %s20307_s10, 8192 }
 0x64d   : > { %p15077_p1 = scmp.ne.s32.totalorder %s20246_s28, %s15076_s26  ;;  %p15081_p4 = scmp.lt.s32.totalorder %s20246_s28, %s20307_s10 }
 0x64e   : > { %p15082_p7 = scmp.lt.s32.totalorder %s15080_s25, %s15076_s26 }
 0x64f   : > { %p15078_p2 = pnand %p15077_p1, %p15230_p5 }
 0x650   : > { %p15083_p8 = por %p15082_p7, %p15081_p4 }
 0x651   : > { %p15079_p3 = pneg %p15078_p2 }
 0x653   : > { %p15084_p6 = pnand %p15083_p8, %p15079_p3 }
 0x655   : > { %15087 = shalt.err (!%p15084_p6)
}
 0x656   : > { %s15135_s29 = smov 128   ;;  %s15136_s12 = smov 8  }
 0x657   : > { %14949 = dma.vmem_to_hbm [thread:$0]  (%p15230_p5), %s20248_s21, 4096, %s20246_s28, %s20257_s17, %s15135_s29, %s15135_s29, %s15136_s12  }
 0x658 PF: > { %p14961_p9 = scmp.ge.s32.totalorder %s15126_s16, 2  ;;  %s11595_s20 = sand.u32 1, %s15114_s13  }
 0x659   : > { %p21060_p10 = scmp.ne.s32.totalorder %s20412_s24, 0  ;;  %s11596_s26 = scalar_lea.sflag [#allocation5], %s11595_s20 }
 0x65b   : > { %p14956_p11 = pnand %p14961_p9, %p21060_p10 }
 0x65d   : > { %p14957_p12 = pneg %p14956_p11 }
 0x65f   : > { %15109 = dma.done.wait (%p14957_p12), %s11596_s26, 4096  }
 0x660   : > { %15111 = vsyncadd (%p14957_p12), %s11596_s26, 4294963200  ;;  %p21_p13 = scmp.ge.s32.totalorder %s15217_s19, 4   ;;  %s21061_s13 = smov %s15118_s14 }
 0x661   : > { %s21062_s14 = smov %s15122_s15  ;;  %s21063_s15 = smov %s15228_s22 }
 0x662   : > { %s21064_s16 = smov %s15217_s19  ;;  %23 = sbr.rel (!%p21_p13) target bundleno = 4 (0x4), region = 126 }
 0x667   :  { %11601 = vsyncpa [#allocation4], 1 }
 0x668   :  { %11603 = vsyncpa [#allocation4 + $0x1], 1 }
 0x669   :  { %11604 = vsyncpa [#allocation5], 1 }
 0x66a   :  { %11606 = vsyncpa [#allocation5 + $0x1], 1 }

</bundles_post_ra>
